<compile_context>
chip_gen: v7x
topology: tpu7x:2x2x1
jax: 0.10.0
libtpu: 0.0.40
codegen_flags: <defaults>
</compile_context>

<pallas_src>
import jax
import jax.numpy as jnp
import numpy as np
from jax import lax
from jax.experimental import pallas as pl
from jax.experimental.pallas import tpu as pltpu

_SMEM = pl.BlockSpec(memory_space=pltpu.MemorySpace.SMEM)


# ----------------------------- fused conv kernel -----------------------------

def _conv_stack_kernel(x_ref, w1_ref, b1_ref, w2b_ref, b2b_ref,
                       rss_ref, csr_ref, rs2_ref, cs2_ref,
                       out_ref, xrep_ref):
    """Per-sample: conv1+ReLU+pool -> conv2+ReLU+pool -> lane-dense (16,128).

    x_ref   : (1, 1, 66, 128) f32 zero-padded input block (image at [1:65,1:65])
    w1_ref  : (36,) f32 conv1 weights, row-major (4,1,3,3)              (SMEM)
    b1_ref  : (4,)  f32                                                 (SMEM)
    w2b_ref : (36, 256) f32 lane-banded conv2 weights
              w2b[(ci*3+dh)*3+dw, 32*co + c] = w2[co,ci,dh,dw]
    b2b_ref : (1, 256) f32, b2b[0, 32*co + c] = b2[co]
    rss_ref : (2, 136, 256) stage-1 row-pool selectors (4 channels stacked,
              rows 0/33 of each 34-block are zero => row padding)
    csr_ref : (2, 64, 768) stage-1 col-pool selectors: zero-pad + dw-shift +
              replicate into 8 lane bands of 32
    rs2_ref : (2, 16, 32)  stage-2 row-pool selectors
    cs2_ref : (2, 256, 128) stage-2 col-pool + lane-dense channel placement
    out_ref : (1, 16, 128) f32  -- out[0, r, 16*co + w] = pooled2[co, r, w]
    xrep_ref: (136, 768) f32 VMEM scratch
              xrep[34*ci + h, 256*dw + 32*r + c] = padded_pool1[ci, h, dw + c]
    """
    f32 = jnp.float32

    # -------- stage 1: conv1 (1->4) taps, each slice shared across cout ------
    acc1 = [jnp.zeros((64, 64), f32) for _ in range(4)]
    for dh in range(3):
        for dw in range(3):
            sl = x_ref[0, 0, dh:dh + 64, dw:dw + 64]           # loaded once
            for co in range(4):
                acc1[co] = acc1[co] + w1_ref[co * 9 + dh * 3 + dw] * sl
    # bias + ReLU, channels stacked on sublanes -> (256, 64)
    y1 = jnp.concatenate(
        [jnp.maximum(acc1[co] + b1_ref[co], 0.0) for co in range(4)], axis=0)

    # -------- stage-1 maxpool + zero-pad + dw-shift + 8-band replication -----
    rp = jnp.maximum(
        jnp.dot(rss_ref[0], y1, preferred_element_type=f32),
        jnp.dot(rss_ref[1], y1, preferred_element_type=f32))   # (136, 64)
    for dw in range(3):                                        # chunked store
        cs0 = csr_ref[0, :, 256 * dw:256 * (dw + 1)]
        cs1 = csr_ref[1, :, 256 * dw:256 * (dw + 1)]
        xrep_ref[:, 256 * dw:256 * (dw + 1)] = jnp.maximum(
            jnp.dot(rp, cs0, preferred_element_type=f32),
            jnp.dot(rp, cs1, preferred_element_type=f32))

    # -------- stage 2: conv2 (4->8), all 8 channels lane-banded --------------
    acc2 = jnp.zeros((32, 256), f32)
    for ci in range(4):
        for dh in range(3):
            for dw in range(3):
                t = (ci * 3 + dh) * 3 + dw
                sl8 = xrep_ref[34 * ci + dh:34 * ci + dh + 32,
                               256 * dw:256 * dw + 256]        # (32, 256)
                acc2 = acc2 + w2b_ref[t:t + 1, :] * sl8        # one vector FMA
    a2 = jnp.maximum(acc2 + b2b_ref[...], 0.0)                 # (32, 256)

    # -------- stage-2 maxpool + lane-dense channel placement -----------------
    rp2 = jnp.maximum(
        jnp.dot(rs2_ref[0], a2, preferred_element_type=f32),
        jnp.dot(rs2_ref[1], a2, preferred_element_type=f32))   # (16, 256)
    out_ref[0] = jnp.maximum(
        jnp.dot(rp2, cs2_ref[0], preferred_element_type=f32),
        jnp.dot(rp2, cs2_ref[1], preferred_element_type=f32))  # (16, 128)


def conv_stack(xp, w1_flat, b1, w2b, b2b, rss, csr, rs2, cs2):
    B = xp.shape[0]
    assert xp.shape[1:] == (1, 66, 128)

    def const(shape):
        return pl.BlockSpec(shape, lambda b, _s=shape: (0,) * len(_s))

    return pl.pallas_call(
        _conv_stack_kernel,
        out_shape=jax.ShapeDtypeStruct((B, 16, 128), jnp.float32),
        grid=(B,),
        in_specs=[
            pl.BlockSpec((1, 1, 66, 128), lambda b: (b, 0, 0, 0)),
            _SMEM, _SMEM,
            const((36, 256)), const((1, 256)),
            const((2, 136, 256)), const((2, 64, 768)),
            const((2, 16, 32)), const((2, 256, 128)),
        ],
        out_specs=pl.BlockSpec((1, 16, 128), lambda b: (b, 0, 0)),
        scratch_shapes=[pltpu.VMEM((136, 768), jnp.float32)],
        compiler_params=pltpu.CompilerParams(
            dimension_semantics=("parallel",)),
    )(xp, w1_flat, b1, w2b, b2b, rss, csr, rs2, cs2)


# --------------------------------- MLP kernel --------------------------------

def _mlp_kernel(x_ref, w1_ref, b1_ref, w2_ref, out_ref):
    """One grid step per 256-wide fc1 column tile: full-K fc1 + ReLU + fc2."""
    h = jnp.dot(x_ref[...], w1_ref[...], preferred_element_type=jnp.float32)
    h = jnp.maximum(h + b1_ref[...], 0.0)
    out_ref[0] = jnp.dot(h, w2_ref[...], preferred_element_type=jnp.float32)


def mlp(feat, w1, b1, w2, *, tn=256):
    B, K = feat.shape
    N = w1.shape[1]
    out_dim = w2.shape[1]
    assert w1.shape[0] == K and b1.shape == (1, N) and w2.shape[0] == N
    assert N % tn == 0
    n_tiles = N // tn
    return pl.pallas_call(
        _mlp_kernel,
        out_shape=jax.ShapeDtypeStruct((n_tiles, B, out_dim), jnp.float32),
        grid=(n_tiles,),
        in_specs=[
            pl.BlockSpec((B, K), lambda n: (0, 0)),        # DMA'd once
            pl.BlockSpec((K, tn), lambda n: (0, n)),       # 2 MiB weight stream
            pl.BlockSpec((1, tn), lambda n: (0, n)),
            pl.BlockSpec((tn, out_dim), lambda n: (n, 0)),
        ],
        out_specs=pl.BlockSpec((1, B, out_dim), lambda n: (n, 0, 0)),
        compiler_params=pltpu.CompilerParams(
            dimension_semantics=("parallel",)),
    )(feat, w1, b1, w2)


# ------------------------------- parameters -----------------------------------

def init_params(key, output_dim=64):
    ks = jax.random.split(key, 8)

    def u(k, shape, fan_in):
        bound = 1.0 / np.sqrt(fan_in)
        return jax.random.uniform(k, shape, jnp.float32, -bound, bound)

    return dict(
        w1=u(ks[0], (4, 1, 3, 3), 9),       b1=u(ks[1], (4,), 9),
        w2=u(ks[2], (8, 4, 3, 3), 36),      b2=u(ks[3], (8,), 36),
        fc1_w=u(ks[4], (512, 2048), 2048),  fc1_b=u(ks[5], (512,), 2048),
        fc2_w=u(ks[6], (output_dim, 512), 512),
        fc2_b=u(ks[7], (output_dim,), 512),
    )


def prepare_params(p):
    """One-time layout prep: banded conv2 weights, selector tables, fc layouts."""
    # conv1 (scalar taps from SMEM)
    conv1_w = p["w1"].reshape(-1)                                   # (36,)
    conv1_b = p["b1"]                                               # (4,)

    # conv2 lane-banded weights / bias: column 32*co + c carries channel co.
    w2b = jnp.repeat(jnp.transpose(p["w2"], (1, 2, 3, 0)).reshape(36, 8),
                     32, axis=1).astype(jnp.float32)                # (36, 256)
    b2b = jnp.repeat(p["b2"], 32)[None, :].astype(jnp.float32)      # (1, 256)

    # ---- pooling / padding / replication selectors (0/1 constants) ----------
    # Stage-1 row pool, 4 channels stacked on sublanes; rows 0/33 of each block
    # stay zero -> the row padding needed by conv2.
    rss = np.zeros((2, 136, 256), np.float32)
    for par in range(2):
        for ci in range(4):
            for h in range(1, 33):
                rss[par, 34 * ci + h, 64 * ci + 2 * (h - 1) + par] = 1.0
    # Stage-1 col pool: zero-pad + dw-shift + replicate into 8 lane bands of 32.
    csr = np.zeros((2, 64, 768), np.float32)
    for par in range(2):
        for dw in range(3):
            for c in range(32):
                w = dw + c
                if 1 <= w <= 32:
                    for r in range(8):
                        csr[par, 2 * (w - 1) + par, 256 * dw + 32 * r + c] = 1.0
    # Stage-2 row pool.
    rs2 = np.zeros((2, 16, 32), np.float32)
    for par in range(2):
        for i in range(16):
            rs2[par, i, 2 * i + par] = 1.0
    # Stage-2 col pool + placement of channel co into lanes [16co, 16co+16).
    cs2 = np.zeros((2, 256, 128), np.float32)
    for par in range(2):
        for co in range(8):
            for j in range(16):
                cs2[par, 32 * co + 2 * j + par, 16 * co + j] = 1.0

    # fc1 pre-transposed AND row-permuted so the lane-dense conv output
    # (B,16,128) -> reshape(B,2048) feeds it directly:
    #   new feature index r*128 + 16*co + w  <->  torch index co*256 + r*16 + w
    w4 = p["fc1_w"].reshape(512, 8, 16, 16)                         # (j,co,r,w)
    fc1_w = jnp.transpose(w4, (2, 1, 3, 0)).reshape(2048, 512)

    return dict(
        conv1_w=conv1_w, conv1_b=conv1_b, w2b=w2b, b2b=b2b,
        rss=jnp.asarray(rss), csr=jnp.asarray(csr),
        rs2=jnp.asarray(rs2), cs2=jnp.asarray(cs2),
        fc1_w=fc1_w, fc1_b=p["fc1_b"].reshape(1, 512),
        fc2_w=p["fc2_w"].T, fc2_b=p["fc2_b"],
    )


# --------------------------------- forward ------------------------------------

@jax.jit
def encoder_forward(x, pp):
    # x: (B, 1, 64, 64) NCHW float32
    B = x.shape[0]
    xp = jnp.pad(x, ((0, 0), (0, 0), (1, 1), (1, 63)))     # (B,1,66,128), lane-dense
    feat = conv_stack(xp, pp["conv1_w"], pp["conv1_b"], pp["w2b"], pp["b2b"],
                      pp["rss"], pp["csr"], pp["rs2"], pp["cs2"])   # (B,16,128)
    feat = feat.reshape(B, 2048)                            # free reshape
    partials = mlp(feat, pp["fc1_w"], pp["fc1_b"], pp["fc2_w"])     # (2,B,out)
    return partials.sum(axis=0) + pp["fc2_b"][None, :]


# ----------------------------- pure-JAX reference ------------------------------

def reference_forward(x, p):
    dn = ("NCHW", "OIHW", "NCHW")
    y = lax.conv_general_dilated(x, p["w1"], (1, 1), "SAME",
                                 dimension_numbers=dn)
    y = jnp.maximum(y + p["b1"][None, :, None, None], 0.0)
    y = lax.reduce_window(y, -jnp.inf, lax.max, (1, 1, 2, 2), (1, 1, 2, 2),
                          "VALID")
    y = lax.conv_general_dilated(y, p["w2"], (1, 1), "SAME",
                                 dimension_numbers=dn)
    y = jnp.maximum(y + p["b2"][None, :, None, None], 0.0)
    y = lax.reduce_window(y, -jnp.inf, lax.max, (1, 1, 2, 2), (1, 1, 2, 2),
                          "VALID")
    f = y.reshape(x.shape[0], -1)
    h = jnp.maximum(f @ p["fc1_w"].T + p["fc1_b"], 0.0)
    return h @ p["fc2_w"].T + p["fc2_b"]


# ----------------------------------- main --------------------------------------

if __name__ == "__main__":
    key = jax.random.PRNGKey(0)
    pkey, xkey = jax.random.split(key)

    B, OUT_DIM = 2, 64
    params = init_params(pkey, output_dim=OUT_DIM)
    prepped = prepare_params(params)
    x = jax.random.normal(xkey, (B, 1, 64, 64), jnp.float32)

    out = encoder_forward(x, prepped)
    out = jax.block_until_ready(out)

    ref = reference_forward(x, params)
    assert out.shape == (B, OUT_DIM)
    np.testing.assert_allclose(np.asarray(out), np.asarray(ref),
                               rtol=1e-3, atol=1e-3)
    print("KERNEL_OK")
</pallas_src>

<mosaic_0001>
module attributes {stable_mosaic.version = 11 : i64} {
  func.func @_conv_stack_kernel(%arg0: i32, %arg1: memref<1x1x66x128xf32, #tpu.memory_space<vmem>>, %arg2: memref<36xf32, #tpu.memory_space<smem>>, %arg3: memref<4xf32, #tpu.memory_space<smem>>, %arg4: memref<36x256xf32, #tpu.memory_space<vmem>>, %arg5: memref<1x256xf32, #tpu.memory_space<vmem>>, %arg6: memref<2x136x256xf32, #tpu.memory_space<vmem>>, %arg7: memref<2x64x768xf32, #tpu.memory_space<vmem>>, %arg8: memref<2x16x32xf32, #tpu.memory_space<vmem>>, %arg9: memref<2x256x128xf32, #tpu.memory_space<vmem>>, %arg10: memref<1x16x128xf32, #tpu.memory_space<vmem>>, %arg11: memref<136x768xf32, #tpu.memory_space<vmem>>) attributes {dimension_semantics = [#tpu.dimension_semantics<parallel>], iteration_bounds = array<i64: 2>, scalar_prefetch = 0 : i64, scratch_operands = 1 : i64, tpu.core_type = #tpu.core_type<tc>, window_params = [{transform_indices = @transform_0, window_bounds = array<i64: 1, 1, 66, 128>}, {transform_indices = @transform_1, window_bounds = array<i64: 36>}, {transform_indices = @transform_2, window_bounds = array<i64: 4>}, {pipeline_mode = #tpu.pipeline_mode<synchronous>, transform_indices = @transform_3, window_bounds = array<i64: 36, 256>}, {pipeline_mode = #tpu.pipeline_mode<synchronous>, transform_indices = @transform_4, window_bounds = array<i64: 1, 256>}, {pipeline_mode = #tpu.pipeline_mode<synchronous>, transform_indices = @transform_5, window_bounds = array<i64: 2, 136, 256>}, {pipeline_mode = #tpu.pipeline_mode<synchronous>, transform_indices = @transform_6, window_bounds = array<i64: 2, 64, 768>}, {pipeline_mode = #tpu.pipeline_mode<synchronous>, transform_indices = @transform_7, window_bounds = array<i64: 2, 16, 32>}, {pipeline_mode = #tpu.pipeline_mode<synchronous>, transform_indices = @transform_8, window_bounds = array<i64: 2, 256, 128>}, {transform_indices = @transform_9, window_bounds = array<i64: 1, 16, 128>}]} {
    %cst = arith.constant 0.000000e+00 : f32
    %0 = vector.broadcast %cst : f32 to vector<64x64xf32>
    %cst_0 = arith.constant 0.000000e+00 : f32
    %1 = vector.broadcast %cst_0 : f32 to vector<64x64xf32>
    %cst_1 = arith.constant 0.000000e+00 : f32
    %2 = vector.broadcast %cst_1 : f32 to vector<64x64xf32>
    %cst_2 = arith.constant 0.000000e+00 : f32
    %3 = vector.broadcast %cst_2 : f32 to vector<64x64xf32>
    %c0 = arith.constant 0 : index
    %c0_3 = arith.constant 0 : index
    %c0_4 = arith.constant 0 : index
    %c0_5 = arith.constant 0 : index
    %4 = vector.load %arg1[%c0, %c0_3, %c0_4, %c0_5] : memref<1x1x66x128xf32, #tpu.memory_space<vmem>>, vector<1x1x64x64xf32>
    %5 = vector.shape_cast %4 : vector<1x1x64x64xf32> to vector<64x64xf32>
    %c0_6 = arith.constant 0 : index
    %6 = memref.load %arg2[%c0_6] : memref<36xf32, #tpu.memory_space<smem>>
    %7 = vector.broadcast %6 : f32 to vector<64x64xf32>
    %8 = arith.mulf %7, %5 : vector<64x64xf32>
    %9 = arith.addf %0, %8 : vector<64x64xf32>
    %c9 = arith.constant 9 : index
    %10 = memref.load %arg2[%c9] : memref<36xf32, #tpu.memory_space<smem>>
    %11 = vector.broadcast %10 : f32 to vector<64x64xf32>
    %12 = arith.mulf %11, %5 : vector<64x64xf32>
    %13 = arith.addf %1, %12 : vector<64x64xf32>
    %c18 = arith.constant 18 : index
    %14 = memref.load %arg2[%c18] : memref<36xf32, #tpu.memory_space<smem>>
    %15 = vector.broadcast %14 : f32 to vector<64x64xf32>
    %16 = arith.mulf %15, %5 : vector<64x64xf32>
    %17 = arith.addf %2, %16 : vector<64x64xf32>
    %c27 = arith.constant 27 : index
    %18 = memref.load %arg2[%c27] : memref<36xf32, #tpu.memory_space<smem>>
    %19 = vector.broadcast %18 : f32 to vector<64x64xf32>
    %20 = arith.mulf %19, %5 : vector<64x64xf32>
    %21 = arith.addf %3, %20 : vector<64x64xf32>
    %c0_7 = arith.constant 0 : index
    %c0_8 = arith.constant 0 : index
    %c0_9 = arith.constant 0 : index
    %c1 = arith.constant 1 : index
    %22 = vector.load %arg1[%c0_7, %c0_8, %c0_9, %c1] : memref<1x1x66x128xf32, #tpu.memory_space<vmem>>, vector<1x1x64x64xf32>
    %23 = vector.shape_cast %22 : vector<1x1x64x64xf32> to vector<64x64xf32>
    %c1_10 = arith.constant 1 : index
    %24 = memref.load %arg2[%c1_10] : memref<36xf32, #tpu.memory_space<smem>>
    %25 = vector.broadcast %24 : f32 to vector<64x64xf32>
    %26 = arith.mulf %25, %23 : vector<64x64xf32>
    %27 = arith.addf %9, %26 : vector<64x64xf32>
    %c10 = arith.constant 10 : index
    %28 = memref.load %arg2[%c10] : memref<36xf32, #tpu.memory_space<smem>>
    %29 = vector.broadcast %28 : f32 to vector<64x64xf32>
    %30 = arith.mulf %29, %23 : vector<64x64xf32>
    %31 = arith.addf %13, %30 : vector<64x64xf32>
    %c19 = arith.constant 19 : index
    %32 = memref.load %arg2[%c19] : memref<36xf32, #tpu.memory_space<smem>>
    %33 = vector.broadcast %32 : f32 to vector<64x64xf32>
    %34 = arith.mulf %33, %23 : vector<64x64xf32>
    %35 = arith.addf %17, %34 : vector<64x64xf32>
    %c28 = arith.constant 28 : index
    %36 = memref.load %arg2[%c28] : memref<36xf32, #tpu.memory_space<smem>>
    %37 = vector.broadcast %36 : f32 to vector<64x64xf32>
    %38 = arith.mulf %37, %23 : vector<64x64xf32>
    %39 = arith.addf %21, %38 : vector<64x64xf32>
    %c0_11 = arith.constant 0 : index
    %c0_12 = arith.constant 0 : index
    %c0_13 = arith.constant 0 : index
    %c2 = arith.constant 2 : index
    %40 = vector.load %arg1[%c0_11, %c0_12, %c0_13, %c2] : memref<1x1x66x128xf32, #tpu.memory_space<vmem>>, vector<1x1x64x64xf32>
    %41 = vector.shape_cast %40 : vector<1x1x64x64xf32> to vector<64x64xf32>
    %c2_14 = arith.constant 2 : index
    %42 = memref.load %arg2[%c2_14] : memref<36xf32, #tpu.memory_space<smem>>
    %43 = vector.broadcast %42 : f32 to vector<64x64xf32>
    %44 = arith.mulf %43, %41 : vector<64x64xf32>
    %45 = arith.addf %27, %44 : vector<64x64xf32>
    %c11 = arith.constant 11 : index
    %46 = memref.load %arg2[%c11] : memref<36xf32, #tpu.memory_space<smem>>
    %47 = vector.broadcast %46 : f32 to vector<64x64xf32>
    %48 = arith.mulf %47, %41 : vector<64x64xf32>
    %49 = arith.addf %31, %48 : vector<64x64xf32>
    %c20 = arith.constant 20 : index
    %50 = memref.load %arg2[%c20] : memref<36xf32, #tpu.memory_space<smem>>
    %51 = vector.broadcast %50 : f32 to vector<64x64xf32>
    %52 = arith.mulf %51, %41 : vector<64x64xf32>
    %53 = arith.addf %35, %52 : vector<64x64xf32>
    %c29 = arith.constant 29 : index
    %54 = memref.load %arg2[%c29] : memref<36xf32, #tpu.memory_space<smem>>
    %55 = vector.broadcast %54 : f32 to vector<64x64xf32>
    %56 = arith.mulf %55, %41 : vector<64x64xf32>
    %57 = arith.addf %39, %56 : vector<64x64xf32>
    %c0_15 = arith.constant 0 : index
    %c0_16 = arith.constant 0 : index
    %c1_17 = arith.constant 1 : index
    %c0_18 = arith.constant 0 : index
    %58 = vector.load %arg1[%c0_15, %c0_16, %c1_17, %c0_18] : memref<1x1x66x128xf32, #tpu.memory_space<vmem>>, vector<1x1x64x64xf32>
    %59 = vector.shape_cast %58 : vector<1x1x64x64xf32> to vector<64x64xf32>
    %c3 = arith.constant 3 : index
    %60 = memref.load %arg2[%c3] : memref<36xf32, #tpu.memory_space<smem>>
    %61 = vector.broadcast %60 : f32 to vector<64x64xf32>
    %62 = arith.mulf %61, %59 : vector<64x64xf32>
    %63 = arith.addf %45, %62 : vector<64x64xf32>
    %c12 = arith.constant 12 : index
    %64 = memref.load %arg2[%c12] : memref<36xf32, #tpu.memory_space<smem>>
    %65 = vector.broadcast %64 : f32 to vector<64x64xf32>
    %66 = arith.mulf %65, %59 : vector<64x64xf32>
    %67 = arith.addf %49, %66 : vector<64x64xf32>
    %c21 = arith.constant 21 : index
    %68 = memref.load %arg2[%c21] : memref<36xf32, #tpu.memory_space<smem>>
    %69 = vector.broadcast %68 : f32 to vector<64x64xf32>
    %70 = arith.mulf %69, %59 : vector<64x64xf32>
    %71 = arith.addf %53, %70 : vector<64x64xf32>
    %c30 = arith.constant 30 : index
    %72 = memref.load %arg2[%c30] : memref<36xf32, #tpu.memory_space<smem>>
    %73 = vector.broadcast %72 : f32 to vector<64x64xf32>
    %74 = arith.mulf %73, %59 : vector<64x64xf32>
    %75 = arith.addf %57, %74 : vector<64x64xf32>
    %c0_19 = arith.constant 0 : index
    %c0_20 = arith.constant 0 : index
    %c1_21 = arith.constant 1 : index
    %c1_22 = arith.constant 1 : index
    %76 = vector.load %arg1[%c0_19, %c0_20, %c1_21, %c1_22] : memref<1x1x66x128xf32, #tpu.memory_space<vmem>>, vector<1x1x64x64xf32>
    %77 = vector.shape_cast %76 : vector<1x1x64x64xf32> to vector<64x64xf32>
    %c4 = arith.constant 4 : index
    %78 = memref.load %arg2[%c4] : memref<36xf32, #tpu.memory_space<smem>>
    %79 = vector.broadcast %78 : f32 to vector<64x64xf32>
    %80 = arith.mulf %79, %77 : vector<64x64xf32>
    %81 = arith.addf %63, %80 : vector<64x64xf32>
    %c13 = arith.constant 13 : index
    %82 = memref.load %arg2[%c13] : memref<36xf32, #tpu.memory_space<smem>>
    %83 = vector.broadcast %82 : f32 to vector<64x64xf32>
    %84 = arith.mulf %83, %77 : vector<64x64xf32>
    %85 = arith.addf %67, %84 : vector<64x64xf32>
    %c22 = arith.constant 22 : index
    %86 = memref.load %arg2[%c22] : memref<36xf32, #tpu.memory_space<smem>>
    %87 = vector.broadcast %86 : f32 to vector<64x64xf32>
    %88 = arith.mulf %87, %77 : vector<64x64xf32>
    %89 = arith.addf %71, %88 : vector<64x64xf32>
    %c31 = arith.constant 31 : index
    %90 = memref.load %arg2[%c31] : memref<36xf32, #tpu.memory_space<smem>>
    %91 = vector.broadcast %90 : f32 to vector<64x64xf32>
    %92 = arith.mulf %91, %77 : vector<64x64xf32>
    %93 = arith.addf %75, %92 : vector<64x64xf32>
    %c0_23 = arith.constant 0 : index
    %c0_24 = arith.constant 0 : index
    %c1_25 = arith.constant 1 : index
    %c2_26 = arith.constant 2 : index
    %94 = vector.load %arg1[%c0_23, %c0_24, %c1_25, %c2_26] : memref<1x1x66x128xf32, #tpu.memory_space<vmem>>, vector<1x1x64x64xf32>
    %95 = vector.shape_cast %94 : vector<1x1x64x64xf32> to vector<64x64xf32>
    %c5 = arith.constant 5 : index
    %96 = memref.load %arg2[%c5] : memref<36xf32, #tpu.memory_space<smem>>
    %97 = vector.broadcast %96 : f32 to vector<64x64xf32>
    %98 = arith.mulf %97, %95 : vector<64x64xf32>
    %99 = arith.addf %81, %98 : vector<64x64xf32>
    %c14 = arith.constant 14 : index
    %100 = memref.load %arg2[%c14] : memref<36xf32, #tpu.memory_space<smem>>
    %101 = vector.broadcast %100 : f32 to vector<64x64xf32>
    %102 = arith.mulf %101, %95 : vector<64x64xf32>
    %103 = arith.addf %85, %102 : vector<64x64xf32>
    %c23 = arith.constant 23 : index
    %104 = memref.load %arg2[%c23] : memref<36xf32, #tpu.memory_space<smem>>
    %105 = vector.broadcast %104 : f32 to vector<64x64xf32>
    %106 = arith.mulf %105, %95 : vector<64x64xf32>
    %107 = arith.addf %89, %106 : vector<64x64xf32>
    %c32 = arith.constant 32 : index
    %108 = memref.load %arg2[%c32] : memref<36xf32, #tpu.memory_space<smem>>
    %109 = vector.broadcast %108 : f32 to vector<64x64xf32>
    %110 = arith.mulf %109, %95 : vector<64x64xf32>
    %111 = arith.addf %93, %110 : vector<64x64xf32>
    %c0_27 = arith.constant 0 : index
    %c0_28 = arith.constant 0 : index
    %c2_29 = arith.constant 2 : index
    %c0_30 = arith.constant 0 : index
    %112 = vector.load %arg1[%c0_27, %c0_28, %c2_29, %c0_30] : memref<1x1x66x128xf32, #tpu.memory_space<vmem>>, vector<1x1x64x64xf32>
    %113 = vector.shape_cast %112 : vector<1x1x64x64xf32> to vector<64x64xf32>
    %c6 = arith.constant 6 : index
    %114 = memref.load %arg2[%c6] : memref<36xf32, #tpu.memory_space<smem>>
    %115 = vector.broadcast %114 : f32 to vector<64x64xf32>
    %116 = arith.mulf %115, %113 : vector<64x64xf32>
    %117 = arith.addf %99, %116 : vector<64x64xf32>
    %c15 = arith.constant 15 : index
    %118 = memref.load %arg2[%c15] : memref<36xf32, #tpu.memory_space<smem>>
    %119 = vector.broadcast %118 : f32 to vector<64x64xf32>
    %120 = arith.mulf %119, %113 : vector<64x64xf32>
    %121 = arith.addf %103, %120 : vector<64x64xf32>
    %c24 = arith.constant 24 : index
    %122 = memref.load %arg2[%c24] : memref<36xf32, #tpu.memory_space<smem>>
    %123 = vector.broadcast %122 : f32 to vector<64x64xf32>
    %124 = arith.mulf %123, %113 : vector<64x64xf32>
    %125 = arith.addf %107, %124 : vector<64x64xf32>
    %c33 = arith.constant 33 : index
    %126 = memref.load %arg2[%c33] : memref<36xf32, #tpu.memory_space<smem>>
    %127 = vector.broadcast %126 : f32 to vector<64x64xf32>
    %128 = arith.mulf %127, %113 : vector<64x64xf32>
    %129 = arith.addf %111, %128 : vector<64x64xf32>
    %c0_31 = arith.constant 0 : index
    %c0_32 = arith.constant 0 : index
    %c2_33 = arith.constant 2 : index
    %c1_34 = arith.constant 1 : index
    %130 = vector.load %arg1[%c0_31, %c0_32, %c2_33, %c1_34] : memref<1x1x66x128xf32, #tpu.memory_space<vmem>>, vector<1x1x64x64xf32>
    %131 = vector.shape_cast %130 : vector<1x1x64x64xf32> to vector<64x64xf32>
    %c7 = arith.constant 7 : index
    %132 = memref.load %arg2[%c7] : memref<36xf32, #tpu.memory_space<smem>>
    %133 = vector.broadcast %132 : f32 to vector<64x64xf32>
    %134 = arith.mulf %133, %131 : vector<64x64xf32>
    %135 = arith.addf %117, %134 : vector<64x64xf32>
    %c16 = arith.constant 16 : index
    %136 = memref.load %arg2[%c16] : memref<36xf32, #tpu.memory_space<smem>>
    %137 = vector.broadcast %136 : f32 to vector<64x64xf32>
    %138 = arith.mulf %137, %131 : vector<64x64xf32>
    %139 = arith.addf %121, %138 : vector<64x64xf32>
    %c25 = arith.constant 25 : index
    %140 = memref.load %arg2[%c25] : memref<36xf32, #tpu.memory_space<smem>>
    %141 = vector.broadcast %140 : f32 to vector<64x64xf32>
    %142 = arith.mulf %141, %131 : vector<64x64xf32>
    %143 = arith.addf %125, %142 : vector<64x64xf32>
    %c34 = arith.constant 34 : index
    %144 = memref.load %arg2[%c34] : memref<36xf32, #tpu.memory_space<smem>>
    %145 = vector.broadcast %144 : f32 to vector<64x64xf32>
    %146 = arith.mulf %145, %131 : vector<64x64xf32>
    %147 = arith.addf %129, %146 : vector<64x64xf32>
    %c0_35 = arith.constant 0 : index
    %c0_36 = arith.constant 0 : index
    %c2_37 = arith.constant 2 : index
    %c2_38 = arith.constant 2 : index
    %148 = vector.load %arg1[%c0_35, %c0_36, %c2_37, %c2_38] : memref<1x1x66x128xf32, #tpu.memory_space<vmem>>, vector<1x1x64x64xf32>
    %149 = vector.shape_cast %148 : vector<1x1x64x64xf32> to vector<64x64xf32>
    %c8 = arith.constant 8 : index
    %150 = memref.load %arg2[%c8] : memref<36xf32, #tpu.memory_space<smem>>
    %151 = vector.broadcast %150 : f32 to vector<64x64xf32>
    %152 = arith.mulf %151, %149 : vector<64x64xf32>
    %153 = arith.addf %135, %152 : vector<64x64xf32>
    %c17 = arith.constant 17 : index
    %154 = memref.load %arg2[%c17] : memref<36xf32, #tpu.memory_space<smem>>
    %155 = vector.broadcast %154 : f32 to vector<64x64xf32>
    %156 = arith.mulf %155, %149 : vector<64x64xf32>
    %157 = arith.addf %139, %156 : vector<64x64xf32>
    %c26 = arith.constant 26 : index
    %158 = memref.load %arg2[%c26] : memref<36xf32, #tpu.memory_space<smem>>
    %159 = vector.broadcast %158 : f32 to vector<64x64xf32>
    %160 = arith.mulf %159, %149 : vector<64x64xf32>
    %161 = arith.addf %143, %160 : vector<64x64xf32>
    %c35 = arith.constant 35 : index
    %162 = memref.load %arg2[%c35] : memref<36xf32, #tpu.memory_space<smem>>
    %163 = vector.broadcast %162 : f32 to vector<64x64xf32>
    %164 = arith.mulf %163, %149 : vector<64x64xf32>
    %165 = arith.addf %147, %164 : vector<64x64xf32>
    %c0_39 = arith.constant 0 : index
    %166 = memref.load %arg3[%c0_39] : memref<4xf32, #tpu.memory_space<smem>>
    %167 = vector.broadcast %166 : f32 to vector<64x64xf32>
    %168 = arith.addf %153, %167 : vector<64x64xf32>
    %cst_40 = arith.constant 0.000000e+00 : f32
    %169 = vector.broadcast %cst_40 : f32 to vector<64x64xf32>
    %170 = arith.maximumf %168, %169 : vector<64x64xf32>
    %c1_41 = arith.constant 1 : index
    %171 = memref.load %arg3[%c1_41] : memref<4xf32, #tpu.memory_space<smem>>
    %172 = vector.broadcast %171 : f32 to vector<64x64xf32>
    %173 = arith.addf %157, %172 : vector<64x64xf32>
    %cst_42 = arith.constant 0.000000e+00 : f32
    %174 = vector.broadcast %cst_42 : f32 to vector<64x64xf32>
    %175 = arith.maximumf %173, %174 : vector<64x64xf32>
    %c2_43 = arith.constant 2 : index
    %176 = memref.load %arg3[%c2_43] : memref<4xf32, #tpu.memory_space<smem>>
    %177 = vector.broadcast %176 : f32 to vector<64x64xf32>
    %178 = arith.addf %161, %177 : vector<64x64xf32>
    %cst_44 = arith.constant 0.000000e+00 : f32
    %179 = vector.broadcast %cst_44 : f32 to vector<64x64xf32>
    %180 = arith.maximumf %178, %179 : vector<64x64xf32>
    %c3_45 = arith.constant 3 : index
    %181 = memref.load %arg3[%c3_45] : memref<4xf32, #tpu.memory_space<smem>>
    %182 = vector.broadcast %181 : f32 to vector<64x64xf32>
    %183 = arith.addf %165, %182 : vector<64x64xf32>
    %cst_46 = arith.constant 0.000000e+00 : f32
    %184 = vector.broadcast %cst_46 : f32 to vector<64x64xf32>
    %185 = arith.maximumf %183, %184 : vector<64x64xf32>
    %186 = tpu.concatenate %170, %175, %180, %185 in 0 : vector<64x64xf32>, vector<64x64xf32>, vector<64x64xf32>, vector<64x64xf32> -> vector<256x64xf32>
    %c0_47 = arith.constant 0 : index
    %c0_48 = arith.constant 0 : index
    %c0_49 = arith.constant 0 : index
    %187 = vector.load %arg6[%c0_47, %c0_48, %c0_49] : memref<2x136x256xf32, #tpu.memory_space<vmem>>, vector<1x136x256xf32>
    %188 = vector.shape_cast %187 : vector<1x136x256xf32> to vector<136x256xf32>
    %cst_50 = arith.constant dense<0.000000e+00> : vector<136x64xf32>
    %189 = tpu.matmul %188, %186, %cst_50 {dimension_numbers = #tpu.dot_dimension_numbers<[1], [0], [0], [1], [0, 0, 1, 1], [], []>} : vector<136x256xf32>, vector<256x64xf32>, vector<136x64xf32> -> vector<136x64xf32>
    %c1_51 = arith.constant 1 : index
    %c0_52 = arith.constant 0 : index
    %c0_53 = arith.constant 0 : index
    %190 = vector.load %arg6[%c1_51, %c0_52, %c0_53] : memref<2x136x256xf32, #tpu.memory_space<vmem>>, vector<1x136x256xf32>
    %191 = vector.shape_cast %190 : vector<1x136x256xf32> to vector<136x256xf32>
    %cst_54 = arith.constant dense<0.000000e+00> : vector<136x64xf32>
    %192 = tpu.matmul %191, %186, %cst_54 {dimension_numbers = #tpu.dot_dimension_numbers<[1], [0], [0], [1], [0, 0, 1, 1], [], []>} : vector<136x256xf32>, vector<256x64xf32>, vector<136x64xf32> -> vector<136x64xf32>
    %193 = arith.maximumf %189, %192 : vector<136x64xf32>
    %c0_55 = arith.constant 0 : index
    %c0_56 = arith.constant 0 : index
    %c0_57 = arith.constant 0 : index
    %194 = vector.load %arg7[%c0_55, %c0_56, %c0_57] : memref<2x64x768xf32, #tpu.memory_space<vmem>>, vector<1x64x256xf32>
    %195 = vector.shape_cast %194 : vector<1x64x256xf32> to vector<64x256xf32>
    %c1_58 = arith.constant 1 : index
    %c0_59 = arith.constant 0 : index
    %c0_60 = arith.constant 0 : index
    %196 = vector.load %arg7[%c1_58, %c0_59, %c0_60] : memref<2x64x768xf32, #tpu.memory_space<vmem>>, vector<1x64x256xf32>
    %197 = vector.shape_cast %196 : vector<1x64x256xf32> to vector<64x256xf32>
    %cst_61 = arith.constant dense<0.000000e+00> : vector<136x256xf32>
    %198 = tpu.matmul %193, %195, %cst_61 {dimension_numbers = #tpu.dot_dimension_numbers<[1], [0], [0], [1], [0, 0, 1, 1], [], []>} : vector<136x64xf32>, vector<64x256xf32>, vector<136x256xf32> -> vector<136x256xf32>
    %cst_62 = arith.constant dense<0.000000e+00> : vector<136x256xf32>
    %199 = tpu.matmul %193, %197, %cst_62 {dimension_numbers = #tpu.dot_dimension_numbers<[1], [0], [0], [1], [0, 0, 1, 1], [], []>} : vector<136x64xf32>, vector<64x256xf32>, vector<136x256xf32> -> vector<136x256xf32>
    %200 = arith.maximumf %198, %199 : vector<136x256xf32>
    %c0_63 = arith.constant 0 : index
    %c0_64 = arith.constant 0 : index
    %201 = vector.load %arg11[%c0_63, %c0_64] : memref<136x768xf32, #tpu.memory_space<vmem>>, vector<136x256xf32>
    tpu.vector_store %arg11[%c0_63, %c0_64], %200 {strides = array<i32>} : memref<136x768xf32, #tpu.memory_space<vmem>>, vector<136x256xf32>,
    %c0_65 = arith.constant 0 : index
    %c0_66 = arith.constant 0 : index
    %c256 = arith.constant 256 : index
    %202 = vector.load %arg7[%c0_65, %c0_66, %c256] : memref<2x64x768xf32, #tpu.memory_space<vmem>>, vector<1x64x256xf32>
    %203 = vector.shape_cast %202 : vector<1x64x256xf32> to vector<64x256xf32>
    %c1_67 = arith.constant 1 : index
    %c0_68 = arith.constant 0 : index
    %c256_69 = arith.constant 256 : index
    %204 = vector.load %arg7[%c1_67, %c0_68, %c256_69] : memref<2x64x768xf32, #tpu.memory_space<vmem>>, vector<1x64x256xf32>
    %205 = vector.shape_cast %204 : vector<1x64x256xf32> to vector<64x256xf32>
    %cst_70 = arith.constant dense<0.000000e+00> : vector<136x256xf32>
    %206 = tpu.matmul %193, %203, %cst_70 {dimension_numbers = #tpu.dot_dimension_numbers<[1], [0], [0], [1], [0, 0, 1, 1], [], []>} : vector<136x64xf32>, vector<64x256xf32>, vector<136x256xf32> -> vector<136x256xf32>
    %cst_71 = arith.constant dense<0.000000e+00> : vector<136x256xf32>
    %207 = tpu.matmul %193, %205, %cst_71 {dimension_numbers = #tpu.dot_dimension_numbers<[1], [0], [0], [1], [0, 0, 1, 1], [], []>} : vector<136x64xf32>, vector<64x256xf32>, vector<136x256xf32> -> vector<136x256xf32>
    %208 = arith.maximumf %206, %207 : vector<136x256xf32>
    %c0_72 = arith.constant 0 : index
    %c256_73 = arith.constant 256 : index
    %209 = vector.load %arg11[%c0_72, %c256_73] : memref<136x768xf32, #tpu.memory_space<vmem>>, vector<136x256xf32>
    tpu.vector_store %arg11[%c0_72, %c256_73], %208 {strides = array<i32>} : memref<136x768xf32, #tpu.memory_space<vmem>>, vector<136x256xf32>,
    %c0_74 = arith.constant 0 : index
    %c0_75 = arith.constant 0 : index
    %c512 = arith.constant 512 : index
    %210 = vector.load %arg7[%c0_74, %c0_75, %c512] : memref<2x64x768xf32, #tpu.memory_space<vmem>>, vector<1x64x256xf32>
    %211 = vector.shape_cast %210 : vector<1x64x256xf32> to vector<64x256xf32>
    %c1_76 = arith.constant 1 : index
    %c0_77 = arith.constant 0 : index
    %c512_78 = arith.constant 512 : index
    %212 = vector.load %arg7[%c1_76, %c0_77, %c512_78] : memref<2x64x768xf32, #tpu.memory_space<vmem>>, vector<1x64x256xf32>
    %213 = vector.shape_cast %212 : vector<1x64x256xf32> to vector<64x256xf32>
    %cst_79 = arith.constant dense<0.000000e+00> : vector<136x256xf32>
    %214 = tpu.matmul %193, %211, %cst_79 {dimension_numbers = #tpu.dot_dimension_numbers<[1], [0], [0], [1], [0, 0, 1, 1], [], []>} : vector<136x64xf32>, vector<64x256xf32>, vector<136x256xf32> -> vector<136x256xf32>
    %cst_80 = arith.constant dense<0.000000e+00> : vector<136x256xf32>
    %215 = tpu.matmul %193, %213, %cst_80 {dimension_numbers = #tpu.dot_dimension_numbers<[1], [0], [0], [1], [0, 0, 1, 1], [], []>} : vector<136x64xf32>, vector<64x256xf32>, vector<136x256xf32> -> vector<136x256xf32>
    %216 = arith.maximumf %214, %215 : vector<136x256xf32>
    %c0_81 = arith.constant 0 : index
    %c512_82 = arith.constant 512 : index
    %217 = vector.load %arg11[%c0_81, %c512_82] : memref<136x768xf32, #tpu.memory_space<vmem>>, vector<136x256xf32>
    tpu.vector_store %arg11[%c0_81, %c512_82], %216 {strides = array<i32>} : memref<136x768xf32, #tpu.memory_space<vmem>>, vector<136x256xf32>,
    %cst_83 = arith.constant 0.000000e+00 : f32
    %218 = vector.broadcast %cst_83 : f32 to vector<32x256xf32>
    %c0_84 = arith.constant 0 : index
    %c0_85 = arith.constant 0 : index
    %219 = vector.load %arg11[%c0_84, %c0_85] : memref<136x768xf32, #tpu.memory_space<vmem>>, vector<32x256xf32>
    %c0_86 = arith.constant 0 : index
    %c0_87 = arith.constant 0 : index
    %220 = vector.load %arg4[%c0_86, %c0_87] : memref<36x256xf32, #tpu.memory_space<vmem>>, vector<1x256xf32>
    %221 = vector.broadcast %220 : vector<1x256xf32> to vector<32x256xf32>
    %222 = arith.mulf %221, %219 : vector<32x256xf32>
    %223 = arith.addf %218, %222 : vector<32x256xf32>
    %c0_88 = arith.constant 0 : index
    %c256_89 = arith.constant 256 : index
    %224 = vector.load %arg11[%c0_88, %c256_89] : memref<136x768xf32, #tpu.memory_space<vmem>>, vector<32x256xf32>
    %c1_90 = arith.constant 1 : index
    %c0_91 = arith.constant 0 : index
    %225 = vector.load %arg4[%c1_90, %c0_91] : memref<36x256xf32, #tpu.memory_space<vmem>>, vector<1x256xf32>
    %226 = vector.broadcast %225 : vector<1x256xf32> to vector<32x256xf32>
    %227 = arith.mulf %226, %224 : vector<32x256xf32>
    %228 = arith.addf %223, %227 : vector<32x256xf32>
    %c0_92 = arith.constant 0 : index
    %c512_93 = arith.constant 512 : index
    %229 = vector.load %arg11[%c0_92, %c512_93] : memref<136x768xf32, #tpu.memory_space<vmem>>, vector<32x256xf32>
    %c2_94 = arith.constant 2 : index
    %c0_95 = arith.constant 0 : index
    %230 = vector.load %arg4[%c2_94, %c0_95] : memref<36x256xf32, #tpu.memory_space<vmem>>, vector<1x256xf32>
    %231 = vector.broadcast %230 : vector<1x256xf32> to vector<32x256xf32>
    %232 = arith.mulf %231, %229 : vector<32x256xf32>
    %233 = arith.addf %228, %232 : vector<32x256xf32>
    %c1_96 = arith.constant 1 : index
    %c0_97 = arith.constant 0 : index
    %234 = vector.load %arg11[%c1_96, %c0_97] : memref<136x768xf32, #tpu.memory_space<vmem>>, vector<32x256xf32>
    %c3_98 = arith.constant 3 : index
    %c0_99 = arith.constant 0 : index
    %235 = vector.load %arg4[%c3_98, %c0_99] : memref<36x256xf32, #tpu.memory_space<vmem>>, vector<1x256xf32>
    %236 = vector.broadcast %235 : vector<1x256xf32> to vector<32x256xf32>
    %237 = arith.mulf %236, %234 : vector<32x256xf32>
    %238 = arith.addf %233, %237 : vector<32x256xf32>
    %c1_100 = arith.constant 1 : index
    %c256_101 = arith.constant 256 : index
    %239 = vector.load %arg11[%c1_100, %c256_101] : memref<136x768xf32, #tpu.memory_space<vmem>>, vector<32x256xf32>
    %c4_102 = arith.constant 4 : index
    %c0_103 = arith.constant 0 : index
    %240 = vector.load %arg4[%c4_102, %c0_103] : memref<36x256xf32, #tpu.memory_space<vmem>>, vector<1x256xf32>
    %241 = vector.broadcast %240 : vector<1x256xf32> to vector<32x256xf32>
    %242 = arith.mulf %241, %239 : vector<32x256xf32>
    %243 = arith.addf %238, %242 : vector<32x256xf32>
    %c1_104 = arith.constant 1 : index
    %c512_105 = arith.constant 512 : index
    %244 = vector.load %arg11[%c1_104, %c512_105] : memref<136x768xf32, #tpu.memory_space<vmem>>, vector<32x256xf32>
    %c5_106 = arith.constant 5 : index
    %c0_107 = arith.constant 0 : index
    %245 = vector.load %arg4[%c5_106, %c0_107] : memref<36x256xf32, #tpu.memory_space<vmem>>, vector<1x256xf32>
    %246 = vector.broadcast %245 : vector<1x256xf32> to vector<32x256xf32>
    %247 = arith.mulf %246, %244 : vector<32x256xf32>
    %248 = arith.addf %243, %247 : vector<32x256xf32>
    %c2_108 = arith.constant 2 : index
    %c0_109 = arith.constant 0 : index
    %249 = vector.load %arg11[%c2_108, %c0_109] : memref<136x768xf32, #tpu.memory_space<vmem>>, vector<32x256xf32>
    %c6_110 = arith.constant 6 : index
    %c0_111 = arith.constant 0 : index
    %250 = vector.load %arg4[%c6_110, %c0_111] : memref<36x256xf32, #tpu.memory_space<vmem>>, vector<1x256xf32>
    %251 = vector.broadcast %250 : vector<1x256xf32> to vector<32x256xf32>
    %252 = arith.mulf %251, %249 : vector<32x256xf32>
    %253 = arith.addf %248, %252 : vector<32x256xf32>
    %c2_112 = arith.constant 2 : index
    %c256_113 = arith.constant 256 : index
    %254 = vector.load %arg11[%c2_112, %c256_113] : memref<136x768xf32, #tpu.memory_space<vmem>>, vector<32x256xf32>
    %c7_114 = arith.constant 7 : index
    %c0_115 = arith.constant 0 : index
    %255 = vector.load %arg4[%c7_114, %c0_115] : memref<36x256xf32, #tpu.memory_space<vmem>>, vector<1x256xf32>
    %256 = vector.broadcast %255 : vector<1x256xf32> to vector<32x256xf32>
    %257 = arith.mulf %256, %254 : vector<32x256xf32>
    %258 = arith.addf %253, %257 : vector<32x256xf32>
    %c2_116 = arith.constant 2 : index
    %c512_117 = arith.constant 512 : index
    %259 = vector.load %arg11[%c2_116, %c512_117] : memref<136x768xf32, #tpu.memory_space<vmem>>, vector<32x256xf32>
    %c8_118 = arith.constant 8 : index
    %c0_119 = arith.constant 0 : index
    %260 = vector.load %arg4[%c8_118, %c0_119] : memref<36x256xf32, #tpu.memory_space<vmem>>, vector<1x256xf32>
    %261 = vector.broadcast %260 : vector<1x256xf32> to vector<32x256xf32>
    %262 = arith.mulf %261, %259 : vector<32x256xf32>
    %263 = arith.addf %258, %262 : vector<32x256xf32>
    %c34_120 = arith.constant 34 : index
    %c0_121 = arith.constant 0 : index
    %264 = vector.load %arg11[%c34_120, %c0_121] : memref<136x768xf32, #tpu.memory_space<vmem>>, vector<32x256xf32>
    %c9_122 = arith.constant 9 : index
    %c0_123 = arith.constant 0 : index
    %265 = vector.load %arg4[%c9_122, %c0_123] : memref<36x256xf32, #tpu.memory_space<vmem>>, vector<1x256xf32>
    %266 = vector.broadcast %265 : vector<1x256xf32> to vector<32x256xf32>
    %267 = arith.mulf %266, %264 : vector<32x256xf32>
    %268 = arith.addf %263, %267 : vector<32x256xf32>
    %c34_124 = arith.constant 34 : index
    %c256_125 = arith.constant 256 : index
    %269 = vector.load %arg11[%c34_124, %c256_125] : memref<136x768xf32, #tpu.memory_space<vmem>>, vector<32x256xf32>
    %c10_126 = arith.constant 10 : index
    %c0_127 = arith.constant 0 : index
    %270 = vector.load %arg4[%c10_126, %c0_127] : memref<36x256xf32, #tpu.memory_space<vmem>>, vector<1x256xf32>
    %271 = vector.broadcast %270 : vector<1x256xf32> to vector<32x256xf32>
    %272 = arith.mulf %271, %269 : vector<32x256xf32>
    %273 = arith.addf %268, %272 : vector<32x256xf32>
    %c34_128 = arith.constant 34 : index
    %c512_129 = arith.constant 512 : index
    %274 = vector.load %arg11[%c34_128, %c512_129] : memref<136x768xf32, #tpu.memory_space<vmem>>, vector<32x256xf32>
    %c11_130 = arith.constant 11 : index
    %c0_131 = arith.constant 0 : index
    %275 = vector.load %arg4[%c11_130, %c0_131] : memref<36x256xf32, #tpu.memory_space<vmem>>, vector<1x256xf32>
    %276 = vector.broadcast %275 : vector<1x256xf32> to vector<32x256xf32>
    %277 = arith.mulf %276, %274 : vector<32x256xf32>
    %278 = arith.addf %273, %277 : vector<32x256xf32>
    %c35_132 = arith.constant 35 : index
    %c0_133 = arith.constant 0 : index
    %279 = vector.load %arg11[%c35_132, %c0_133] : memref<136x768xf32, #tpu.memory_space<vmem>>, vector<32x256xf32>
    %c12_134 = arith.constant 12 : index
    %c0_135 = arith.constant 0 : index
    %280 = vector.load %arg4[%c12_134, %c0_135] : memref<36x256xf32, #tpu.memory_space<vmem>>, vector<1x256xf32>
    %281 = vector.broadcast %280 : vector<1x256xf32> to vector<32x256xf32>
    %282 = arith.mulf %281, %279 : vector<32x256xf32>
    %283 = arith.addf %278, %282 : vector<32x256xf32>
    %c35_136 = arith.constant 35 : index
    %c256_137 = arith.constant 256 : index
    %284 = vector.load %arg11[%c35_136, %c256_137] : memref<136x768xf32, #tpu.memory_space<vmem>>, vector<32x256xf32>
    %c13_138 = arith.constant 13 : index
    %c0_139 = arith.constant 0 : index
    %285 = vector.load %arg4[%c13_138, %c0_139] : memref<36x256xf32, #tpu.memory_space<vmem>>, vector<1x256xf32>
    %286 = vector.broadcast %285 : vector<1x256xf32> to vector<32x256xf32>
    %287 = arith.mulf %286, %284 : vector<32x256xf32>
    %288 = arith.addf %283, %287 : vector<32x256xf32>
    %c35_140 = arith.constant 35 : index
    %c512_141 = arith.constant 512 : index
    %289 = vector.load %arg11[%c35_140, %c512_141] : memref<136x768xf32, #tpu.memory_space<vmem>>, vector<32x256xf32>
    %c14_142 = arith.constant 14 : index
    %c0_143 = arith.constant 0 : index
    %290 = vector.load %arg4[%c14_142, %c0_143] : memref<36x256xf32, #tpu.memory_space<vmem>>, vector<1x256xf32>
    %291 = vector.broadcast %290 : vector<1x256xf32> to vector<32x256xf32>
    %292 = arith.mulf %291, %289 : vector<32x256xf32>
    %293 = arith.addf %288, %292 : vector<32x256xf32>
    %c36 = arith.constant 36 : index
    %c0_144 = arith.constant 0 : index
    %294 = vector.load %arg11[%c36, %c0_144] : memref<136x768xf32, #tpu.memory_space<vmem>>, vector<32x256xf32>
    %c15_145 = arith.constant 15 : index
    %c0_146 = arith.constant 0 : index
    %295 = vector.load %arg4[%c15_145, %c0_146] : memref<36x256xf32, #tpu.memory_space<vmem>>, vector<1x256xf32>
    %296 = vector.broadcast %295 : vector<1x256xf32> to vector<32x256xf32>
    %297 = arith.mulf %296, %294 : vector<32x256xf32>
    %298 = arith.addf %293, %297 : vector<32x256xf32>
    %c36_147 = arith.constant 36 : index
    %c256_148 = arith.constant 256 : index
    %299 = vector.load %arg11[%c36_147, %c256_148] : memref<136x768xf32, #tpu.memory_space<vmem>>, vector<32x256xf32>
    %c16_149 = arith.constant 16 : index
    %c0_150 = arith.constant 0 : index
    %300 = vector.load %arg4[%c16_149, %c0_150] : memref<36x256xf32, #tpu.memory_space<vmem>>, vector<1x256xf32>
    %301 = vector.broadcast %300 : vector<1x256xf32> to vector<32x256xf32>
    %302 = arith.mulf %301, %299 : vector<32x256xf32>
    %303 = arith.addf %298, %302 : vector<32x256xf32>
    %c36_151 = arith.constant 36 : index
    %c512_152 = arith.constant 512 : index
    %304 = vector.load %arg11[%c36_151, %c512_152] : memref<136x768xf32, #tpu.memory_space<vmem>>, vector<32x256xf32>
    %c17_153 = arith.constant 17 : index
    %c0_154 = arith.constant 0 : index
    %305 = vector.load %arg4[%c17_153, %c0_154] : memref<36x256xf32, #tpu.memory_space<vmem>>, vector<1x256xf32>
    %306 = vector.broadcast %305 : vector<1x256xf32> to vector<32x256xf32>
    %307 = arith.mulf %306, %304 : vector<32x256xf32>
    %308 = arith.addf %303, %307 : vector<32x256xf32>
    %c68 = arith.constant 68 : index
    %c0_155 = arith.constant 0 : index
    %309 = vector.load %arg11[%c68, %c0_155] : memref<136x768xf32, #tpu.memory_space<vmem>>, vector<32x256xf32>
    %c18_156 = arith.constant 18 : index
    %c0_157 = arith.constant 0 : index
    %310 = vector.load %arg4[%c18_156, %c0_157] : memref<36x256xf32, #tpu.memory_space<vmem>>, vector<1x256xf32>
    %311 = vector.broadcast %310 : vector<1x256xf32> to vector<32x256xf32>
    %312 = arith.mulf %311, %309 : vector<32x256xf32>
    %313 = arith.addf %308, %312 : vector<32x256xf32>
    %c68_158 = arith.constant 68 : index
    %c256_159 = arith.constant 256 : index
    %314 = vector.load %arg11[%c68_158, %c256_159] : memref<136x768xf32, #tpu.memory_space<vmem>>, vector<32x256xf32>
    %c19_160 = arith.constant 19 : index
    %c0_161 = arith.constant 0 : index
    %315 = vector.load %arg4[%c19_160, %c0_161] : memref<36x256xf32, #tpu.memory_space<vmem>>, vector<1x256xf32>
    %316 = vector.broadcast %315 : vector<1x256xf32> to vector<32x256xf32>
    %317 = arith.mulf %316, %314 : vector<32x256xf32>
    %318 = arith.addf %313, %317 : vector<32x256xf32>
    %c68_162 = arith.constant 68 : index
    %c512_163 = arith.constant 512 : index
    %319 = vector.load %arg11[%c68_162, %c512_163] : memref<136x768xf32, #tpu.memory_space<vmem>>, vector<32x256xf32>
    %c20_164 = arith.constant 20 : index
    %c0_165 = arith.constant 0 : index
    %320 = vector.load %arg4[%c20_164, %c0_165] : memref<36x256xf32, #tpu.memory_space<vmem>>, vector<1x256xf32>
    %321 = vector.broadcast %320 : vector<1x256xf32> to vector<32x256xf32>
    %322 = arith.mulf %321, %319 : vector<32x256xf32>
    %323 = arith.addf %318, %322 : vector<32x256xf32>
    %c69 = arith.constant 69 : index
    %c0_166 = arith.constant 0 : index
    %324 = vector.load %arg11[%c69, %c0_166] : memref<136x768xf32, #tpu.memory_space<vmem>>, vector<32x256xf32>
    %c21_167 = arith.constant 21 : index
    %c0_168 = arith.constant 0 : index
    %325 = vector.load %arg4[%c21_167, %c0_168] : memref<36x256xf32, #tpu.memory_space<vmem>>, vector<1x256xf32>
    %326 = vector.broadcast %325 : vector<1x256xf32> to vector<32x256xf32>
    %327 = arith.mulf %326, %324 : vector<32x256xf32>
    %328 = arith.addf %323, %327 : vector<32x256xf32>
    %c69_169 = arith.constant 69 : index
    %c256_170 = arith.constant 256 : index
    %329 = vector.load %arg11[%c69_169, %c256_170] : memref<136x768xf32, #tpu.memory_space<vmem>>, vector<32x256xf32>
    %c22_171 = arith.constant 22 : index
    %c0_172 = arith.constant 0 : index
    %330 = vector.load %arg4[%c22_171, %c0_172] : memref<36x256xf32, #tpu.memory_space<vmem>>, vector<1x256xf32>
    %331 = vector.broadcast %330 : vector<1x256xf32> to vector<32x256xf32>
    %332 = arith.mulf %331, %329 : vector<32x256xf32>
    %333 = arith.addf %328, %332 : vector<32x256xf32>
    %c69_173 = arith.constant 69 : index
    %c512_174 = arith.constant 512 : index
    %334 = vector.load %arg11[%c69_173, %c512_174] : memref<136x768xf32, #tpu.memory_space<vmem>>, vector<32x256xf32>
    %c23_175 = arith.constant 23 : index
    %c0_176 = arith.constant 0 : index
    %335 = vector.load %arg4[%c23_175, %c0_176] : memref<36x256xf32, #tpu.memory_space<vmem>>, vector<1x256xf32>
    %336 = vector.broadcast %335 : vector<1x256xf32> to vector<32x256xf32>
    %337 = arith.mulf %336, %334 : vector<32x256xf32>
    %338 = arith.addf %333, %337 : vector<32x256xf32>
    %c70 = arith.constant 70 : index
    %c0_177 = arith.constant 0 : index
    %339 = vector.load %arg11[%c70, %c0_177] : memref<136x768xf32, #tpu.memory_space<vmem>>, vector<32x256xf32>
    %c24_178 = arith.constant 24 : index
    %c0_179 = arith.constant 0 : index
    %340 = vector.load %arg4[%c24_178, %c0_179] : memref<36x256xf32, #tpu.memory_space<vmem>>, vector<1x256xf32>
    %341 = vector.broadcast %340 : vector<1x256xf32> to vector<32x256xf32>
    %342 = arith.mulf %341, %339 : vector<32x256xf32>
    %343 = arith.addf %338, %342 : vector<32x256xf32>
    %c70_180 = arith.constant 70 : index
    %c256_181 = arith.constant 256 : index
    %344 = vector.load %arg11[%c70_180, %c256_181] : memref<136x768xf32, #tpu.memory_space<vmem>>, vector<32x256xf32>
    %c25_182 = arith.constant 25 : index
    %c0_183 = arith.constant 0 : index
    %345 = vector.load %arg4[%c25_182, %c0_183] : memref<36x256xf32, #tpu.memory_space<vmem>>, vector<1x256xf32>
    %346 = vector.broadcast %345 : vector<1x256xf32> to vector<32x256xf32>
    %347 = arith.mulf %346, %344 : vector<32x256xf32>
    %348 = arith.addf %343, %347 : vector<32x256xf32>
    %c70_184 = arith.constant 70 : index
    %c512_185 = arith.constant 512 : index
    %349 = vector.load %arg11[%c70_184, %c512_185] : memref<136x768xf32, #tpu.memory_space<vmem>>, vector<32x256xf32>
    %c26_186 = arith.constant 26 : index
    %c0_187 = arith.constant 0 : index
    %350 = vector.load %arg4[%c26_186, %c0_187] : memref<36x256xf32, #tpu.memory_space<vmem>>, vector<1x256xf32>
    %351 = vector.broadcast %350 : vector<1x256xf32> to vector<32x256xf32>
    %352 = arith.mulf %351, %349 : vector<32x256xf32>
    %353 = arith.addf %348, %352 : vector<32x256xf32>
    %c102 = arith.constant 102 : index
    %c0_188 = arith.constant 0 : index
    %354 = vector.load %arg11[%c102, %c0_188] : memref<136x768xf32, #tpu.memory_space<vmem>>, vector<32x256xf32>
    %c27_189 = arith.constant 27 : index
    %c0_190 = arith.constant 0 : index
    %355 = vector.load %arg4[%c27_189, %c0_190] : memref<36x256xf32, #tpu.memory_space<vmem>>, vector<1x256xf32>
    %356 = vector.broadcast %355 : vector<1x256xf32> to vector<32x256xf32>
    %357 = arith.mulf %356, %354 : vector<32x256xf32>
    %358 = arith.addf %353, %357 : vector<32x256xf32>
    %c102_191 = arith.constant 102 : index
    %c256_192 = arith.constant 256 : index
    %359 = vector.load %arg11[%c102_191, %c256_192] : memref<136x768xf32, #tpu.memory_space<vmem>>, vector<32x256xf32>
    %c28_193 = arith.constant 28 : index
    %c0_194 = arith.constant 0 : index
    %360 = vector.load %arg4[%c28_193, %c0_194] : memref<36x256xf32, #tpu.memory_space<vmem>>, vector<1x256xf32>
    %361 = vector.broadcast %360 : vector<1x256xf32> to vector<32x256xf32>
    %362 = arith.mulf %361, %359 : vector<32x256xf32>
    %363 = arith.addf %358, %362 : vector<32x256xf32>
    %c102_195 = arith.constant 102 : index
    %c512_196 = arith.constant 512 : index
    %364 = vector.load %arg11[%c102_195, %c512_196] : memref<136x768xf32, #tpu.memory_space<vmem>>, vector<32x256xf32>
    %c29_197 = arith.constant 29 : index
    %c0_198 = arith.constant 0 : index
    %365 = vector.load %arg4[%c29_197, %c0_198] : memref<36x256xf32, #tpu.memory_space<vmem>>, vector<1x256xf32>
    %366 = vector.broadcast %365 : vector<1x256xf32> to vector<32x256xf32>
    %367 = arith.mulf %366, %364 : vector<32x256xf32>
    %368 = arith.addf %363, %367 : vector<32x256xf32>
    %c103 = arith.constant 103 : index
    %c0_199 = arith.constant 0 : index
    %369 = vector.load %arg11[%c103, %c0_199] : memref<136x768xf32, #tpu.memory_space<vmem>>, vector<32x256xf32>
    %c30_200 = arith.constant 30 : index
    %c0_201 = arith.constant 0 : index
    %370 = vector.load %arg4[%c30_200, %c0_201] : memref<36x256xf32, #tpu.memory_space<vmem>>, vector<1x256xf32>
    %371 = vector.broadcast %370 : vector<1x256xf32> to vector<32x256xf32>
    %372 = arith.mulf %371, %369 : vector<32x256xf32>
    %373 = arith.addf %368, %372 : vector<32x256xf32>
    %c103_202 = arith.constant 103 : index
    %c256_203 = arith.constant 256 : index
    %374 = vector.load %arg11[%c103_202, %c256_203] : memref<136x768xf32, #tpu.memory_space<vmem>>, vector<32x256xf32>
    %c31_204 = arith.constant 31 : index
    %c0_205 = arith.constant 0 : index
    %375 = vector.load %arg4[%c31_204, %c0_205] : memref<36x256xf32, #tpu.memory_space<vmem>>, vector<1x256xf32>
    %376 = vector.broadcast %375 : vector<1x256xf32> to vector<32x256xf32>
    %377 = arith.mulf %376, %374 : vector<32x256xf32>
    %378 = arith.addf %373, %377 : vector<32x256xf32>
    %c103_206 = arith.constant 103 : index
    %c512_207 = arith.constant 512 : index
    %379 = vector.load %arg11[%c103_206, %c512_207] : memref<136x768xf32, #tpu.memory_space<vmem>>, vector<32x256xf32>
    %c32_208 = arith.constant 32 : index
    %c0_209 = arith.constant 0 : index
    %380 = vector.load %arg4[%c32_208, %c0_209] : memref<36x256xf32, #tpu.memory_space<vmem>>, vector<1x256xf32>
    %381 = vector.broadcast %380 : vector<1x256xf32> to vector<32x256xf32>
    %382 = arith.mulf %381, %379 : vector<32x256xf32>
    %383 = arith.addf %378, %382 : vector<32x256xf32>
    %c104 = arith.constant 104 : index
    %c0_210 = arith.constant 0 : index
    %384 = vector.load %arg11[%c104, %c0_210] : memref<136x768xf32, #tpu.memory_space<vmem>>, vector<32x256xf32>
    %c33_211 = arith.constant 33 : index
    %c0_212 = arith.constant 0 : index
    %385 = vector.load %arg4[%c33_211, %c0_212] : memref<36x256xf32, #tpu.memory_space<vmem>>, vector<1x256xf32>
    %386 = vector.broadcast %385 : vector<1x256xf32> to vector<32x256xf32>
    %387 = arith.mulf %386, %384 : vector<32x256xf32>
    %388 = arith.addf %383, %387 : vector<32x256xf32>
    %c104_213 = arith.constant 104 : index
    %c256_214 = arith.constant 256 : index
    %389 = vector.load %arg11[%c104_213, %c256_214] : memref<136x768xf32, #tpu.memory_space<vmem>>, vector<32x256xf32>
    %c34_215 = arith.constant 34 : index
    %c0_216 = arith.constant 0 : index
    %390 = vector.load %arg4[%c34_215, %c0_216] : memref<36x256xf32, #tpu.memory_space<vmem>>, vector<1x256xf32>
    %391 = vector.broadcast %390 : vector<1x256xf32> to vector<32x256xf32>
    %392 = arith.mulf %391, %389 : vector<32x256xf32>
    %393 = arith.addf %388, %392 : vector<32x256xf32>
    %c104_217 = arith.constant 104 : index
    %c512_218 = arith.constant 512 : index
    %394 = vector.load %arg11[%c104_217, %c512_218] : memref<136x768xf32, #tpu.memory_space<vmem>>, vector<32x256xf32>
    %c35_219 = arith.constant 35 : index
    %c0_220 = arith.constant 0 : index
    %395 = vector.load %arg4[%c35_219, %c0_220] : memref<36x256xf32, #tpu.memory_space<vmem>>, vector<1x256xf32>
    %396 = vector.broadcast %395 : vector<1x256xf32> to vector<32x256xf32>
    %397 = arith.mulf %396, %394 : vector<32x256xf32>
    %398 = arith.addf %393, %397 : vector<32x256xf32>
    %c0_221 = arith.constant 0 : index
    %c0_222 = arith.constant 0 : index
    %399 = vector.load %arg5[%c0_221, %c0_222] : memref<1x256xf32, #tpu.memory_space<vmem>>, vector<1x256xf32>
    %400 = vector.broadcast %399 : vector<1x256xf32> to vector<32x256xf32>
    %401 = arith.addf %398, %400 : vector<32x256xf32>
    %cst_223 = arith.constant 0.000000e+00 : f32
    %402 = vector.broadcast %cst_223 : f32 to vector<32x256xf32>
    %403 = arith.maximumf %401, %402 : vector<32x256xf32>
    %c0_224 = arith.constant 0 : index
    %c0_225 = arith.constant 0 : index
    %c0_226 = arith.constant 0 : index
    %404 = vector.load %arg8[%c0_224, %c0_225, %c0_226] : memref<2x16x32xf32, #tpu.memory_space<vmem>>, vector<1x16x32xf32>
    %405 = vector.shape_cast %404 : vector<1x16x32xf32> to vector<16x32xf32>
    %cst_227 = arith.constant dense<0.000000e+00> : vector<16x256xf32>
    %406 = tpu.matmul %405, %403, %cst_227 {dimension_numbers = #tpu.dot_dimension_numbers<[1], [0], [0], [1], [0, 0, 1, 1], [], []>} : vector<16x32xf32>, vector<32x256xf32>, vector<16x256xf32> -> vector<16x256xf32>
    %c1_228 = arith.constant 1 : index
    %c0_229 = arith.constant 0 : index
    %c0_230 = arith.constant 0 : index
    %407 = vector.load %arg8[%c1_228, %c0_229, %c0_230] : memref<2x16x32xf32, #tpu.memory_space<vmem>>, vector<1x16x32xf32>
    %408 = vector.shape_cast %407 : vector<1x16x32xf32> to vector<16x32xf32>
    %cst_231 = arith.constant dense<0.000000e+00> : vector<16x256xf32>
    %409 = tpu.matmul %408, %403, %cst_231 {dimension_numbers = #tpu.dot_dimension_numbers<[1], [0], [0], [1], [0, 0, 1, 1], [], []>} : vector<16x32xf32>, vector<32x256xf32>, vector<16x256xf32> -> vector<16x256xf32>
    %410 = arith.maximumf %406, %409 : vector<16x256xf32>
    %c0_232 = arith.constant 0 : index
    %c0_233 = arith.constant 0 : index
    %c0_234 = arith.constant 0 : index
    %411 = vector.load %arg9[%c0_232, %c0_233, %c0_234] : memref<2x256x128xf32, #tpu.memory_space<vmem>>, vector<1x256x128xf32>
    %412 = vector.shape_cast %411 : vector<1x256x128xf32> to vector<256x128xf32>
    %cst_235 = arith.constant dense<0.000000e+00> : vector<16x128xf32>
    %413 = tpu.matmul %410, %412, %cst_235 {dimension_numbers = #tpu.dot_dimension_numbers<[1], [0], [0], [1], [0, 0, 1, 1], [], []>} : vector<16x256xf32>, vector<256x128xf32>, vector<16x128xf32> -> vector<16x128xf32>
    %c1_236 = arith.constant 1 : index
    %c0_237 = arith.constant 0 : index
    %c0_238 = arith.constant 0 : index
    %414 = vector.load %arg9[%c1_236, %c0_237, %c0_238] : memref<2x256x128xf32, #tpu.memory_space<vmem>>, vector<1x256x128xf32>
    %415 = vector.shape_cast %414 : vector<1x256x128xf32> to vector<256x128xf32>
    %cst_239 = arith.constant dense<0.000000e+00> : vector<16x128xf32>
    %416 = tpu.matmul %410, %415, %cst_239 {dimension_numbers = #tpu.dot_dimension_numbers<[1], [0], [0], [1], [0, 0, 1, 1], [], []>} : vector<16x256xf32>, vector<256x128xf32>, vector<16x128xf32> -> vector<16x128xf32>
    %417 = arith.maximumf %413, %416 : vector<16x128xf32>
    %c0_240 = arith.constant 0 : index
    %c0_241 = arith.constant 0 : index
    %c0_242 = arith.constant 0 : index
    %418 = vector.load %arg10[%c0_240, %c0_241, %c0_242] : memref<1x16x128xf32, #tpu.memory_space<vmem>>, vector<1x16x128xf32>
    %419 = vector.shape_cast %418 : vector<1x16x128xf32> to vector<16x128xf32>
    %420 = vector.shape_cast %417 : vector<16x128xf32> to vector<1x16x128xf32>
    tpu.vector_store %arg10[%c0_240, %c0_241, %c0_242], %420 {strides = array<i32>} : memref<1x16x128xf32, #tpu.memory_space<vmem>>, vector<1x16x128xf32>,
    return
  }
  func.func @transform_0(%arg0: i32) -> (i32, i32, i32, i32) {
    %c0_i32 = arith.constant 0 : i32
    %c0_i32_0 = arith.constant 0 : i32
    %c0_i32_1 = arith.constant 0 : i32
    %c0_i32_2 = arith.constant 0 : i32
    return %arg0, %c0_i32, %c0_i32_0, %c0_i32_1 : i32, i32, i32, i32
  }
  func.func @transform_1(%arg0: i32) -> i32 {
    %c0_i32 = arith.constant 0 : i32
    %c0_i32_0 = arith.constant 0 : i32
    return %c0_i32 : i32
  }
  func.func @transform_2(%arg0: i32) -> i32 {
    %c0_i32 = arith.constant 0 : i32
    %c0_i32_0 = arith.constant 0 : i32
    return %c0_i32 : i32
  }
  func.func @transform_3(%arg0: i32) -> (i32, i32) {
    %c0_i32 = arith.constant 0 : i32
    %c0_i32_0 = arith.constant 0 : i32
    %c0_i32_1 = arith.constant 0 : i32
    return %c0_i32, %c0_i32_0 : i32, i32
  }
  func.func @transform_4(%arg0: i32) -> (i32, i32) {
    %c0_i32 = arith.constant 0 : i32
    %c0_i32_0 = arith.constant 0 : i32
    %c0_i32_1 = arith.constant 0 : i32
    return %c0_i32, %c0_i32_0 : i32, i32
  }
  func.func @transform_5(%arg0: i32) -> (i32, i32, i32) {
    %c0_i32 = arith.constant 0 : i32
    %c0_i32_0 = arith.constant 0 : i32
    %c0_i32_1 = arith.constant 0 : i32
    %c0_i32_2 = arith.constant 0 : i32
    return %c0_i32, %c0_i32_0, %c0_i32_1 : i32, i32, i32
  }
  func.func @transform_6(%arg0: i32) -> (i32, i32, i32) {
    %c0_i32 = arith.constant 0 : i32
    %c0_i32_0 = arith.constant 0 : i32
    %c0_i32_1 = arith.constant 0 : i32
    %c0_i32_2 = arith.constant 0 : i32
    return %c0_i32, %c0_i32_0, %c0_i32_1 : i32, i32, i32
  }
  func.func @transform_7(%arg0: i32) -> (i32, i32, i32) {
    %c0_i32 = arith.constant 0 : i32
    %c0_i32_0 = arith.constant 0 : i32
    %c0_i32_1 = arith.constant 0 : i32
    %c0_i32_2 = arith.constant 0 : i32
    return %c0_i32, %c0_i32_0, %c0_i32_1 : i32, i32, i32
  }
  func.func @transform_8(%arg0: i32) -> (i32, i32, i32) {
    %c0_i32 = arith.constant 0 : i32
    %c0_i32_0 = arith.constant 0 : i32
    %c0_i32_1 = arith.constant 0 : i32
    %c0_i32_2 = arith.constant 0 : i32
    return %c0_i32, %c0_i32_0, %c0_i32_1 : i32, i32, i32
  }
  func.func @transform_9(%arg0: i32) -> (i32, i32, i32) {
    %c0_i32 = arith.constant 0 : i32
    %c0_i32_0 = arith.constant 0 : i32
    %c0_i32_1 = arith.constant 0 : i32
    return %arg0, %c0_i32, %c0_i32_0 : i32, i32, i32
  }
}

module attributes {stable_mosaic.version = 11 : i64} {
  func.func @_mlp_kernel(%arg0: i32, %arg1: memref<2x2048xf32, #tpu.memory_space<vmem>>, %arg2: memref<2048x256xf32, #tpu.memory_space<vmem>>, %arg3: memref<1x256xf32, #tpu.memory_space<vmem>>, %arg4: memref<256x64xf32, #tpu.memory_space<vmem>>, %arg5: memref<1x2x64xf32, #tpu.memory_space<vmem>>) attributes {dimension_semantics = [#tpu.dimension_semantics<parallel>], iteration_bounds = array<i64: 2>, scalar_prefetch = 0 : i64, scratch_operands = 0 : i64, tpu.core_type = #tpu.core_type<tc>, window_params = [{pipeline_mode = #tpu.pipeline_mode<synchronous>, transform_indices = @transform_0, window_bounds = array<i64: 2, 2048>}, {transform_indices = @transform_1, window_bounds = array<i64: 2048, 256>}, {transform_indices = @transform_2, window_bounds = array<i64: 1, 256>}, {transform_indices = @transform_3, window_bounds = array<i64: 256, 64>}, {transform_indices = @transform_4, window_bounds = array<i64: 1, 2, 64>}]} {
    %c0 = arith.constant 0 : index
    %c0_0 = arith.constant 0 : index
    %0 = vector.load %arg1[%c0, %c0_0] : memref<2x2048xf32, #tpu.memory_space<vmem>>, vector<2x2048xf32>
    %c0_1 = arith.constant 0 : index
    %c0_2 = arith.constant 0 : index
    %1 = vector.load %arg2[%c0_1, %c0_2] : memref<2048x256xf32, #tpu.memory_space<vmem>>, vector<2048x256xf32>
    %cst = arith.constant dense<0.000000e+00> : vector<2x256xf32>
    %2 = tpu.matmul %0, %1, %cst {dimension_numbers = #tpu.dot_dimension_numbers<[1], [0], [0], [1], [0, 0, 1, 1], [], []>} : vector<2x2048xf32>, vector<2048x256xf32>, vector<2x256xf32> -> vector<2x256xf32>
    %c0_3 = arith.constant 0 : index
    %c0_4 = arith.constant 0 : index
    %3 = vector.load %arg3[%c0_3, %c0_4] : memref<1x256xf32, #tpu.memory_space<vmem>>, vector<1x256xf32>
    %4 = vector.broadcast %3 : vector<1x256xf32> to vector<2x256xf32>
    %5 = arith.addf %2, %4 : vector<2x256xf32>
    %cst_5 = arith.constant 0.000000e+00 : f32
    %6 = vector.broadcast %cst_5 : f32 to vector<2x256xf32>
    %7 = arith.maximumf %5, %6 : vector<2x256xf32>
    %c0_6 = arith.constant 0 : index
    %c0_7 = arith.constant 0 : index
    %8 = vector.load %arg4[%c0_6, %c0_7] : memref<256x64xf32, #tpu.memory_space<vmem>>, vector<256x64xf32>
    %cst_8 = arith.constant dense<0.000000e+00> : vector<2x64xf32>
    %9 = tpu.matmul %7, %8, %cst_8 {dimension_numbers = #tpu.dot_dimension_numbers<[1], [0], [0], [1], [0, 0, 1, 1], [], []>} : vector<2x256xf32>, vector<256x64xf32>, vector<2x64xf32> -> vector<2x64xf32>
    %c0_9 = arith.constant 0 : index
    %c0_10 = arith.constant 0 : index
    %c0_11 = arith.constant 0 : index
    %10 = vector.load %arg5[%c0_9, %c0_10, %c0_11] : memref<1x2x64xf32, #tpu.memory_space<vmem>>, vector<1x2x64xf32>
    %11 = vector.shape_cast %10 : vector<1x2x64xf32> to vector<2x64xf32>
    %12 = vector.shape_cast %9 : vector<2x64xf32> to vector<1x2x64xf32>
    tpu.vector_store %arg5[%c0_9, %c0_10, %c0_11], %12 {strides = array<i32>} : memref<1x2x64xf32, #tpu.memory_space<vmem>>, vector<1x2x64xf32>,
    return
  }
  func.func @transform_0(%arg0: i32) -> (i32, i32) {
    %c0_i32 = arith.constant 0 : i32
    %c0_i32_0 = arith.constant 0 : i32
    %c0_i32_1 = arith.constant 0 : i32
    return %c0_i32, %c0_i32_0 : i32, i32
  }
  func.func @transform_1(%arg0: i32) -> (i32, i32) {
    %c0_i32 = arith.constant 0 : i32
    %c0_i32_0 = arith.constant 0 : i32
    return %c0_i32, %arg0 : i32, i32
  }
  func.func @transform_2(%arg0: i32) -> (i32, i32) {
    %c0_i32 = arith.constant 0 : i32
    %c0_i32_0 = arith.constant 0 : i32
    return %c0_i32, %arg0 : i32, i32
  }
  func.func @transform_3(%arg0: i32) -> (i32, i32) {
    %c0_i32 = arith.constant 0 : i32
    %c0_i32_0 = arith.constant 0 : i32
    return %arg0, %c0_i32 : i32, i32
  }
  func.func @transform_4(%arg0: i32) -> (i32, i32, i32) {
    %c0_i32 = arith.constant 0 : i32
    %c0_i32_0 = arith.constant 0 : i32
    %c0_i32_1 = arith.constant 0 : i32
    return %arg0, %c0_i32, %c0_i32_0 : i32, i32, i32
  }
}

</mosaic_0001>

<bundles_post_ra>
// kernel: encoder_forward.3
= control target key start
LH: loop header
LB: loop body
LE: loop exit
PB: predicated region body
PF: predicated region fallthrough
CT: control target
= control target key end

     0   :  { %9 = vsyncpa [#allocation3], 0  ;;  %s3262_s0 = inlined_call_operand.vmem [shape: f32[2,2048], index: 0, kind: input, shape index: {}]   ;;  %s3263_s1 = inlined_call_operand.hbm [shape: f32[2048,512], index: 1, kind: input, shape index: {}]   ;;  %s3264_s2 = inlined_call_operand.hbm [shape: f32[1,512], index: 2, kind: input, shape index: {}]   ;;  %s3265_s3 = inlined_call_operand.vmem [shape: f32[512,64], index: 3, kind: input, shape index: {}]   ;;  %s3266_s4 = inlined_call_operand.vmem [shape: f32[2,2,64], index: 4, kind: output, shape index: {}]  }
   0x1   :  { %11 = vsyncpa [#allocation3 + $0x1], 0 }
   0x2   :  { %12 = vsyncpa [#allocation5], 0 }
   0x3   :  { %14 = vsyncpa [#allocation5 + $0x1], 0  ;;  %s2465_s15 = smov 0   ;;  %s2467_s16 = smov 0  }
   0x4   :  { %s2469_s17 = smov 0   ;;  %s2471_s18 = smov 0  }
   0x5 LB: > { %s2484_s19 = sadd.s32 4294967295, %s2432_s18   ;;  %s2487_s20 = sadd.s32 1, %s2432_s18   ;;  %s2432_s18 = sphi %s2471_s18, %s3277_s18   ;;  %s2428_s17 = sphi %s2469_s17, %s3276_s17   ;;  %s2424_s16 = sphi %s2467_s16, %s3275_s16   ;;  %s2420_s15 = sphi %s2465_s15, %s3274_s15  }
   0x6   : > { %s45_s21 = ssub.s32 %s2432_s18, %s2487_s20  ;;  %s48_s22 = sadd.s32 1, %s2428_s17 }
   0x7   : > { %p46_p0 = scmp.eq.s32.totalorder %s45_s21, 0  ;;  %p55_p1 = scmp.ne.s32.totalorder %s2428_s17, %s2424_s16 }
   0x8   : > { %p56_p2 = scmp.eq.s32.totalorder %s2432_s18, 0  ;;  %p61_p3 = scmp.ne.s32.totalorder %s2424_s16, %s2420_s15 }
   0x9   : > { %s2497_s23 = scalar_select %p46_p0, %s2428_s17, %s48_s22  }
   0xa   : > { %p57_p4 = por %p56_p2, %p55_p1  ;;  %p62_p5 = scmp.eq.s32.totalorder %s2484_s19, 0 }
   0xb   : > { %p2293_p6 = scmp.lt.s32.totalorder %s2432_s18, 2  ;;  %s2506_s25 = sand.u32 1, %s2428_s17  }
   0xc   : > { %p2501_p7 = por %p62_p5, %p61_p3  ;;  %s1671_s26 = sshll.u32 %s2506_s25, 12 }
   0xd   : > { %s1685_s27 = sshll.u32 %s2432_s18, 8  ;;  %s170_s5 = scalar_lea.vmem [#allocation2], %s1671_s26 }
   0xe   : > { %s3268_s24 = scalar_select %p2501_p7, 1, 0 }
   0xf   : > { %s2513_s30 = scalar_lea.hbm %s3263_s1, %s1685_s27  ;;  %s177_s6 = sshll.u32 %s170_s5, 4  ;;  %s2515_s6 = int_to_ptr.vmem [resolvable:$true] %s177_s6 }
  0x10   : > { %p2517_p8 = pnand %p2293_p6, %p57_p4  ;;  %s167_s8 = scalar_lea.sflag [#allocation3], %s2506_s25 }
  0x11   : > { %s2334_s9 = scalar_lea.hbm %s2513_s30, 65536  ;;  %s2339_s12 = scalar_lea.hbm %s3263_s1, 131072 }
  0x12   : > { %p2335_p9 = scmp.ne.s32.totalorder %s2513_s30, %s2334_s9  ;;  %p2336_p10 = pneg %p2517_p8 }
  0x13   : > { %p2340_p13 = scmp.lt.u32.totalorder %s2513_s30, %s3263_s1  ;;  %p2341_p0 = scmp.lt.u32.totalorder %s2339_s12, %s2334_s9 }
  0x14   : > { %p2337_p11 = pnand %p2336_p10, %p2335_p9  ;;  %p2343_p2 = scmp.lt.u32.totalorder %s2334_s9, %s2513_s30 }
  0x15   : > { %p2342_p1 = por %p2341_p0, %p2340_p13 }
  0x16   : > { %p2338_p12 = pneg %p2337_p11 }
  0x17   : > { %p2344_p3 = por %p2343_p2, %p2342_p1 }
  0x19   : > { %p2345_p4 = pnand %p2344_p3, %p2338_p12 }
  0x1b   : > { %2348 = shalt.err (!%p2345_p4)
}
  0x1c   : > { %s2349_s15 = scalar_lea.vmem %s2515_s6, 65536  ;;  %s2434_s21 = smov [#allocation2]  }
  0x1d   : > { %p2350_p5 = scmp.ne.s32.totalorder %s2515_s6, %s2349_s15  ;;  %s2354_s22 = sshll.u32 %s2434_s21, 4  ;;  %s2355_s22 = int_to_ptr.vmem [resolvable:$false] %s2354_s22 }
  0x1e   : > { %s2356_s26 = scalar_lea.vmem %s2355_s22, 131072  ;;  %p2357_p11 = scmp.lt.s32.totalorder %s2515_s6, %s2355_s22 }
  0x1f   : > { %p2352_p6 = pnand %p2350_p5, %p2336_p10  ;;  %p2358_p13 = scmp.lt.s32.totalorder %s2356_s26, %s2349_s15 }
  0x21   : > { %p2353_p9 = pneg %p2352_p6  ;;  %p2359_p0 = por %p2358_p13, %p2357_p11 }
  0x23   : > { %p2360_p1 = pnand %p2359_p0, %p2353_p9 }
  0x25   : > { %2363 = shalt.err (!%p2360_p1)
}
  0x26   : > { %s2435_s27 = smov 512   ;;  %s2436_s28 = smov 256  }
  0x27   : > { %s2437_s29 = smov 16   ;;  %p1677_p12 = scmp.ge.s32.totalorder %s2432_s18, 1 }
  0x28   : > { %2289 = dma.hbm_to_vmem [thread:$0]  (!%p2517_p8), %s2513_s30, 65536, %s2515_s6, %s167_s8, %s2435_s27, %s2436_s28, %s2437_s29  }
  0x29   : > { %p213_p2 = scmp.lt.s32.totalorder %s2432_s18, 3  ;;  %s1674_s5 = sshll.u32 %s2506_s25, 1 }
  0x2a   : > { %s1686_s10 = sshll.u32 %s2432_s18, 5  ;;  %s191_s11 = scalar_lea.vmem [#allocation4], %s1674_s5 }
  0x2b   : > { %p2552_p3 = pnand %p1677_p12, %p213_p2  ;;  %s199_s12 = sshll.u32 %s191_s11, 4  ;;  %s200_s12 = int_to_ptr.vmem [resolvable:$true] %s199_s12 }
  0x2c   : > { %s2560_s15 = scalar_lea.hbm %s3264_s2, %s1686_s10  ;;  %s188_s30 = scalar_lea.sflag [#allocation5], %s2506_s25 }
  0x2d   : > { %s3270_s9 = scalar_select %p2552_p3, 1, 0 }
  0x2e   : > { %s2364_s6 = scalar_lea.hbm %s2560_s15, 32  ;;  %s2369_s21 = scalar_lea.hbm %s3264_s2, 64 }
  0x2f   : > { %p2365_p4 = scmp.ne.s32.totalorder %s2560_s15, %s2364_s6  ;;  %p2370_p9 = scmp.lt.u32.totalorder %s2560_s15, %s3264_s2 }
  0x30   : > { %p2371_p11 = scmp.lt.u32.totalorder %s2369_s21, %s2364_s6  ;;  %p2373_p0 = scmp.lt.u32.totalorder %s2364_s6, %s2560_s15 }
  0x31   : > { %p2367_p5 = pnand %p2365_p4, %p2336_p10 }
  0x32   : > { %p2372_p13 = por %p2371_p11, %p2370_p9 }
  0x33   : > { %p2368_p6 = pneg %p2367_p5 }
  0x34   : > { %p2374_p1 = por %p2373_p0, %p2372_p13 }
  0x36   : > { %p2375_p12 = pnand %p2374_p1, %p2368_p6 }
  0x38   : > { %2378 = shalt.err (!%p2375_p12)
}
  0x39   : > { %s2379_s25 = scalar_lea.vmem %s200_s12, 32  ;;  %s2438_s27 = smov [#allocation4]  }
  0x3a   : > { %p2380_p2 = scmp.ne.s32.totalorder %s200_s12, %s2379_s25  ;;  %s2384_s28 = sshll.u32 %s2438_s27, 4  ;;  %s2385_s28 = int_to_ptr.vmem [resolvable:$false] %s2384_s28 }
  0x3b   : > { %s2386_s29 = scalar_lea.vmem %s2385_s28, 64  ;;  %p2387_p7 = scmp.lt.s32.totalorder %s200_s12, %s2385_s28 }
  0x3c   : > { %p2382_p4 = pnand %p2380_p2, %p2336_p10  ;;  %p2388_p3 = scmp.lt.s32.totalorder %s2386_s29, %s2379_s25 }
  0x3e   : > { %p2383_p5 = pneg %p2382_p4  ;;  %p2389_p9 = por %p2388_p3, %p2387_p7 }
  0x40   : > { %p2390_p11 = pnand %p2389_p9, %p2383_p5 }
  0x42   : > { %2393 = shalt.err (!%p2390_p11)
}
  0x43   : > { %2292 = dma.hbm_to_vmem [thread:$0]  (!%p2517_p8), %s2560_s15, 32, %s200_s12, %s188_s30  }
  0x44   : > { %p3271_p6 = scmp.ne.s32.totalorder %s3270_s9, 0 }
  0x45   : > { %s219_s5 = sand.u32 (!%p3271_p6), 1, %s2424_s16   ;;  %p3272_p10 = scmp.ne.s32.totalorder (!%p3271_p6), %s3268_s24, 0 }
  0x46   : > { %217 = sbr.rel (%p3271_p6) target bundleno = 777 (0x309), region = 36  ;;  %s1678_s10 = sshll.u32 (!%p3271_p6), %s219_s5, 12 }
  0x47   : > { %s220_s11 = scalar_lea.sflag (!%p3271_p6), [#allocation3], %s219_s5  ;;  %s2585_s13 = scalar_lea.vmem (!%p3271_p6), [#allocation2], %s1678_s10 }
  0x4d   : > { %2411 = dma.done.wait (%p3272_p10), %s220_s11, 65536  }
  0x4e   : > { %2413 = vsyncadd (%p3272_p10), %s220_s11, 4294901760  ;;  %s1679_s14 = sshll.u32 %s219_s5, 1  ;;  %s229_s7 = scalar_lea.sflag [#allocation5], %s219_s5 }
  0x4f   : > { %s2591_s6 = scalar_lea.vmem [#allocation4], %s1679_s14 }
  0x50   : > { %2415 = dma.done.wait (%p3272_p10), %s229_s7, 32  }
  0x51   : > { %2417 = vsyncadd (%p3272_p10), %s229_s7, 4294967264  ;;  %v283_v0 = vld [vmem:[%s2585_s13 + $0x8] sm:$0xff]  ;;  %v285_v1 = vld [vmem:[%s2585_s13 + $0x18] sm:$0xff]  ;;  %s1680_s22 = sshll.u32 %s2484_s19, 5  ;;  %p274_p8 = scmp.lt.s32.totalorder %s2484_s19, 1  ;;  %vm1566_vm0 = vcmask 517120  }
  0x52   : > { %v539_v2 = vld [vmem:[%s2585_s13 + $0x808] sm:$0xff]  ;;  %v1722_v3 = vpack.c.bf16 %v285_v1, %v283_v0  ;;  %v541_v4 = vld [vmem:[%s2585_s13 + $0x818] sm:$0xff]  ;;  %v282_v5 = vld [vmem:[%s2585_s13] sm:$0xff]  ;;  %p3165_p7 = scmp.lt.s32.totalorder %s1680_s22, 63 }
  0x53   : > { %v284_v6 = vld [vmem:[%s2585_s13 + $0x10] sm:$0xff]  ;;  %v1978_v7 = vpack.c.bf16 %v541_v4, %v539_v2  ;;  %v538_v9 = vld [vmem:[%s2585_s13 + $0x800] sm:$0xff]  ;;  %v287_v11 = vld [vmem:[%s2585_s13 + $0x28] sm:$0xff]  ;;  %s3281_s19 = smov (!%p274_p8, %s2484_s19), 1 }
  0x54   : > { %v1724_v8 = vpack.c.bf16 %v284_v6, %v282_v5  ;;  %v540_v10 = vld [vmem:[%s2585_s13 + $0x810] sm:$0xff]  ;;  %1723 = vmatprep.subr.bf16.mxu1 %v1722_v3  ;;  %v289_v13 = vld [vmem:[%s2585_s13 + $0x38] sm:$0xff]  ;;  %v543_v14 = vld [vmem:[%s2585_s13 + $0x828] sm:$0xff]  ;;  %s3279_s22 = smov (!%p3165_p7, %s1680_s22), 63  ;;  %s1682_s5 = sshll.u32 %s3281_s19, 1 }
  0x55   : > { %v1980_v12 = vpack.c.bf16 %v540_v10, %v538_v9  ;;  %v545_v15 = vld [vmem:[%s2585_s13 + $0x838] sm:$0xff]  ;;  %1979 = vmatprep.subr.bf16.mxu0 %v1978_v7  ;;  %v1726_v16 = vpack.c.bf16 %v289_v13, %v287_v11  ;;  %v286_v18 = vld [vmem:[%s2585_s13 + $0x20] sm:$0xff]  ;;  %v288_v19 = vld [vmem:[%s2585_s13 + $0x30] sm:$0xff]  ;;  %s1681_s25 = sshll.u32 %s3279_s22, 3 }
  0x56   : > { %1725 = vmatpush1.bf16.msra.mxu1 %v1724_v8  ;;  %v1982_v17 = vpack.c.bf16 %v545_v15, %v543_v14  ;;  %v542_v20 = vld [vmem:[%s2585_s13 + $0x820] sm:$0xff]  ;;  %v1728_v21 = vpack.c.bf16 %v288_v19, %v286_v18  ;;  %v544_v22 = vld [vmem:[%s2585_s13 + $0x830] sm:$0xff]  ;;  %v291_v23 = vld [vmem:[%s2585_s13 + $0x48] sm:$0xff]  ;;  %s3201_s29 = scalar_lea.vmem %s3265_s3, %s1681_s25 }
  0x57   : > { %1981 = vmatpush1.bf16.msra.mxu0 %v1980_v12  ;;  %v293_v24 = vld [vmem:[%s2585_s13 + $0x58] sm:$0xff]  ;;  %1727 = vmatprep.subr.bf16.mxu1 %v1726_v16  ;;  %v1984_v25 = vpack.c.bf16 %v544_v22, %v542_v20  ;;  %v547_v27 = vld [vmem:[%s2585_s13 + $0x848] sm:$0xff]  ;;  %v290_v29 = vld [vmem:[%s2585_s13 + $0x40] sm:$0xff] }
  0x58   : > { %1983 = vmatprep.subr.bf16.mxu0 %v1982_v17  ;;  %v1730_v26 = vpack.c.bf16 %v293_v24, %v291_v23  ;;  %v549_v28 = vld [vmem:[%s2585_s13 + $0x858] sm:$0xff]  ;;  %v292_v31 = vld [vmem:[%s2585_s13 + $0x50] sm:$0xff]  ;;  %v546_v32 = vld [vmem:[%s2585_s13 + $0x840] sm:$0xff] }
  0x59   : > { %v1986_v30 = vpack.c.bf16 %v549_v28, %v547_v27  ;;  %v548_v33 = vld [vmem:[%s2585_s13 + $0x850] sm:$0xff]  ;;  %v1732_v34 = vpack.c.bf16 %v292_v31, %v290_v29  ;;  %v295_v35 = vld [vmem:[%s2585_s13 + $0x68] sm:$0xff]  ;;  %v297_v36 = vld [vmem:[%s2585_s13 + $0x78] sm:$0xff] }
  0x5a   : > { %1729 = vmatpush1.bf16.msra.mxu1 %v1728_v21  ;;  %v551_v37 = vld [vmem:[%s2585_s13 + $0x868] sm:$0xff]  ;;  %v1988_v38 = vpack.c.bf16 %v548_v33, %v546_v32  ;;  %v1734_v39 = vpack.c.bf16 %v297_v36, %v295_v35  ;;  %v553_v40 = vld [vmem:[%s2585_s13 + $0x878] sm:$0xff]  ;;  %v294_v41 = vld [vmem:[%s2585_s13 + $0x60] sm:$0xff] }
  0x5b   : > { %1985 = vmatpush1.bf16.msra.mxu0 %v1984_v25  ;;  %1731 = vmatprep.subr.bf16.mxu1 %v1730_v26  ;;  %v296_v42 = vld [vmem:[%s2585_s13 + $0x70] sm:$0xff]  ;;  %v1990_v43 = vpack.c.bf16 %v553_v40, %v551_v37  ;;  %v550_v44 = vld [vmem:[%s2585_s13 + $0x860] sm:$0xff]  ;;  %v299_v46 = vld [vmem:[%s2585_s13 + $0x88] sm:$0xff] }
  0x5c   : > { %1987 = vmatprep.subr.bf16.mxu0 %v1986_v30  ;;  %v552_v45 = vld [vmem:[%s2585_s13 + $0x870] sm:$0xff]  ;;  %v301_v47 = vld [vmem:[%s2585_s13 + $0x98] sm:$0xff]  ;;  %v555_v48 = vld [vmem:[%s2585_s13 + $0x888] sm:$0xff]  ;;  %v1736_v50 = vpack.c.bf16 %v296_v42, %v294_v41 }
  0x5d   : > { %v557_v49 = vld [vmem:[%s2585_s13 + $0x898] sm:$0xff]  ;;  %v1992_v51 = vpack.c.bf16 %v552_v45, %v550_v44  ;;  %v1738_v52 = vpack.c.bf16 %v301_v47, %v299_v46  ;;  %v298_v53 = vld [vmem:[%s2585_s13 + $0x80] sm:$0xff]  ;;  %v300_v54 = vld [vmem:[%s2585_s13 + $0x90] sm:$0xff]  ;;  %v796_v46 = vlaneseq  ;;  %v2439_v47 = vmov 1983009808  }
  0x5e   : > { %1733 = vmatpush1.bf16.msra.mxu1 %v1732_v34  ;;  %v554_v55 = vld [vmem:[%s2585_s13 + $0x880] sm:$0xff]  ;;  %v1994_v56 = vpack.c.bf16 %v557_v49, %v555_v48  ;;  %v556_v57 = vld [vmem:[%s2585_s13 + $0x890] sm:$0xff]  ;;  %v303_v58 = vld [vmem:[%s2585_s13 + $0xa8] sm:$0xff]  ;;  %v1740_v62 = vpack.c.bf16 %v300_v54, %v298_v53  ;;  %v812_v48 = vunpack.c.l.s4 %v2439_v47 }
  0x5f   : > { %1989 = vmatpush1.bf16.msra.mxu0 %v1988_v38  ;;  %1735 = vmatprep.subr.bf16.mxu1 %v1734_v39  ;;  %v305_v59 = vld [vmem:[%s2585_s13 + $0xb8] sm:$0xff]  ;;  %v559_v60 = vld [vmem:[%s2585_s13 + $0x8a8] sm:$0xff]  ;;  %v1996_v63 = vpack.c.bf16 %v556_v57, %v554_v55  ;;  %v302_v1 = vld [vmem:[%s2585_s13 + $0xa0] sm:$0xff] }
  0x60   : > { %1991 = vmatprep.subr.bf16.mxu0 %v1990_v43  ;;  %v561_v61 = vld [vmem:[%s2585_s13 + $0x8b8] sm:$0xff]  ;;  %v1742_v0 = vpack.c.bf16 %v305_v59, %v303_v58  ;;  %v304_v2 = vld [vmem:[%s2585_s13 + $0xb0] sm:$0xff]  ;;  %v558_v3 = vld [vmem:[%s2585_s13 + $0x8a0] sm:$0xff] }
  0x61   : > { %v1998_v4 = vpack.c.bf16 %v561_v61, %v559_v60  ;;  %v560_v5 = vld [vmem:[%s2585_s13 + $0x8b0] sm:$0xff]  ;;  %v307_v6 = vld [vmem:[%s2585_s13 + $0xc8] sm:$0xff]  ;;  %v309_v7 = vld [vmem:[%s2585_s13 + $0xd8] sm:$0xff]  ;;  %v1744_v10 = vpack.c.bf16 %v304_v2, %v302_v1  ;;  %v2681_v61 = vshrl.u32 %v796_v46, 7 }
  0x62   : > { %1737 = vmatpush1.bf16.msra.mxu1 %v1736_v50  ;;  %v563_v8 = vld [vmem:[%s2585_s13 + $0x8c8] sm:$0xff]  ;;  %v565_v9 = vld [vmem:[%s2585_s13 + $0x8d8] sm:$0xff]  ;;  %v2000_v11 = vpack.c.bf16 %v560_v5, %v558_v3  ;;  %v1746_v12 = vpack.c.bf16 %v309_v7, %v307_v6  ;;  %v306_v13 = vld [vmem:[%s2585_s13 + $0xc0] sm:$0xff] }
  0x63   : > { %1993 = vmatpush1.bf16.msra.mxu0 %v1992_v51  ;;  %1739 = vmatprep.subr.bf16.mxu1 %v1738_v52  ;;  %v308_v14 = vld [vmem:[%s2585_s13 + $0xd0] sm:$0xff]  ;;  %v562_v15 = vld [vmem:[%s2585_s13 + $0x8c0] sm:$0xff]  ;;  %v2002_v16 = vpack.c.bf16 %v565_v9, %v563_v8  ;;  %v311_v18 = vld [vmem:[%s2585_s13 + $0xe8] sm:$0xff] }
  0x64   : > { %1995 = vmatprep.subr.bf16.mxu0 %v1994_v56  ;;  %v564_v17 = vld [vmem:[%s2585_s13 + $0x8d0] sm:$0xff]  ;;  %v313_v19 = vld [vmem:[%s2585_s13 + $0xf8] sm:$0xff]  ;;  %v567_v20 = vld [vmem:[%s2585_s13 + $0x8e8] sm:$0xff]  ;;  %v1748_v22 = vpack.c.bf16 %v308_v14, %v306_v13 }
  0x65   : > { %v569_v21 = vld [vmem:[%s2585_s13 + $0x8f8] sm:$0xff]  ;;  %v2004_v23 = vpack.c.bf16 %v564_v17, %v562_v15  ;;  %v1750_v24 = vpack.c.bf16 %v313_v19, %v311_v18  ;;  %v310_v25 = vld [vmem:[%s2585_s13 + $0xe0] sm:$0xff]  ;;  %v312_v26 = vld [vmem:[%s2585_s13 + $0xf0] sm:$0xff] }
  0x66   : > { %1741 = vmatpush1.bf16.msra.mxu1 %v1740_v62  ;;  %v566_v27 = vld [vmem:[%s2585_s13 + $0x8e0] sm:$0xff]  ;;  %v2006_v28 = vpack.c.bf16 %v569_v21, %v567_v20  ;;  %v568_v29 = vld [vmem:[%s2585_s13 + $0x8f0] sm:$0xff]  ;;  %v315_v30 = vld [vmem:[%s2585_s13 + $0x108] sm:$0xff]  ;;  %v1752_v34 = vpack.c.bf16 %v312_v26, %v310_v25  ;;  %v813_v62 = vunpack.c.0.s8 %v812_v48 }
  0x67   : > { %1997 = vmatpush1.bf16.msra.mxu0 %v1996_v63  ;;  %1743 = vmatprep.subr.bf16.mxu1 %v1742_v0  ;;  %v317_v31 = vld [vmem:[%s2585_s13 + $0x118] sm:$0xff]  ;;  %v571_v32 = vld [vmem:[%s2585_s13 + $0x908] sm:$0xff]  ;;  %v2008_v35 = vpack.c.bf16 %v568_v29, %v566_v27  ;;  %v314_v37 = vld [vmem:[%s2585_s13 + $0x100] sm:$0xff] }
  0x68   : > { %1999 = vmatprep.subr.bf16.mxu0 %v1998_v4  ;;  %v573_v33 = vld [vmem:[%s2585_s13 + $0x918] sm:$0xff]  ;;  %v1754_v36 = vpack.c.bf16 %v317_v31, %v315_v30  ;;  %v316_v38 = vld [vmem:[%s2585_s13 + $0x110] sm:$0xff]  ;;  %v570_v39 = vld [vmem:[%s2585_s13 + $0x900] sm:$0xff] }
  0x69   : > { %v2010_v40 = vpack.c.bf16 %v573_v33, %v571_v32  ;;  %v572_v41 = vld [vmem:[%s2585_s13 + $0x910] sm:$0xff]  ;;  %v319_v42 = vld [vmem:[%s2585_s13 + $0x128] sm:$0xff]  ;;  %v321_v43 = vld [vmem:[%s2585_s13 + $0x138] sm:$0xff]  ;;  %v1756_v49 = vpack.c.bf16 %v316_v38, %v314_v37 }
  0x6a   : > { %1745 = vmatpush1.bf16.msra.mxu1 %v1744_v10  ;;  %v575_v44 = vld [vmem:[%s2585_s13 + $0x928] sm:$0xff]  ;;  %v577_v45 = vld [vmem:[%s2585_s13 + $0x938] sm:$0xff]  ;;  %v2012_v50 = vpack.c.bf16 %v572_v41, %v570_v39  ;;  %v1758_v51 = vpack.c.bf16 %v321_v43, %v319_v42  ;;  %v318_v52 = vld [vmem:[%s2585_s13 + $0x120] sm:$0xff] }
  0x6b   : > { %2001 = vmatpush1.bf16.msra.mxu0 %v2000_v11  ;;  %1747 = vmatprep.subr.bf16.mxu1 %v1746_v12  ;;  %v320_v53 = vld [vmem:[%s2585_s13 + $0x130] sm:$0xff]  ;;  %v574_v54 = vld [vmem:[%s2585_s13 + $0x920] sm:$0xff]  ;;  %v2014_v55 = vpack.c.bf16 %v577_v45, %v575_v44  ;;  %v323_v57 = vld [vmem:[%s2585_s13 + $0x148] sm:$0xff]  ;;  %v2692_v11 = vsub.s32 %v813_v62, %v2681_v61 }
  0x6c   : > { %2003 = vmatprep.subr.bf16.mxu0 %v2002_v16  ;;  %v576_v56 = vld [vmem:[%s2585_s13 + $0x930] sm:$0xff]  ;;  %v325_v58 = vld [vmem:[%s2585_s13 + $0x158] sm:$0xff]  ;;  %v579_v59 = vld [vmem:[%s2585_s13 + $0x948] sm:$0xff]  ;;  %v1760_v63 = vpack.c.bf16 %v320_v53, %v318_v52 }
  0x6d   : > { %v581_v60 = vld [vmem:[%s2585_s13 + $0x958] sm:$0xff]  ;;  %v2016_v0 = vpack.c.bf16 %v576_v56, %v574_v54  ;;  %v1762_v1 = vpack.c.bf16 %v325_v58, %v323_v57  ;;  %v322_v2 = vld [vmem:[%s2585_s13 + $0x140] sm:$0xff]  ;;  %v324_v3 = vld [vmem:[%s2585_s13 + $0x150] sm:$0xff] }
  0x6e   : > { %1749 = vmatpush1.bf16.msra.mxu1 %v1748_v22  ;;  %v578_v4 = vld [vmem:[%s2585_s13 + $0x940] sm:$0xff]  ;;  %v2018_v5 = vpack.c.bf16 %v581_v60, %v579_v59  ;;  %v580_v6 = vld [vmem:[%s2585_s13 + $0x950] sm:$0xff]  ;;  %v327_v7 = vld [vmem:[%s2585_s13 + $0x168] sm:$0xff]  ;;  %v1764_v12 = vpack.c.bf16 %v324_v3, %v322_v2 }
  0x6f   : > { %2005 = vmatpush1.bf16.msra.mxu0 %v2004_v23  ;;  %1751 = vmatprep.subr.bf16.mxu1 %v1750_v24  ;;  %v329_v8 = vld [vmem:[%s2585_s13 + $0x178] sm:$0xff]  ;;  %v583_v9 = vld [vmem:[%s2585_s13 + $0x968] sm:$0xff]  ;;  %v326_v13 = vld [vmem:[%s2585_s13 + $0x160] sm:$0xff]  ;;  %v2020_v14 = vpack.c.bf16 %v580_v6, %v578_v4 }
  0x70   : > { %2007 = vmatprep.subr.bf16.mxu0 %v2006_v28  ;;  %v585_v10 = vld [vmem:[%s2585_s13 + $0x978] sm:$0xff]  ;;  %v1766_v15 = vpack.c.bf16 %v329_v8, %v327_v7  ;;  %v328_v16 = vld [vmem:[%s2585_s13 + $0x170] sm:$0xff]  ;;  %v582_v17 = vld [vmem:[%s2585_s13 + $0x960] sm:$0xff] }
  0x71   : > { %v584_v18 = vld [vmem:[%s2585_s13 + $0x970] sm:$0xff]  ;;  %v2022_v19 = vpack.c.bf16 %v585_v10, %v583_v9  ;;  %v331_v20 = vld [vmem:[%s2585_s13 + $0x188] sm:$0xff]  ;;  %v333_v21 = vld [vmem:[%s2585_s13 + $0x198] sm:$0xff]  ;;  %v1768_v27 = vpack.c.bf16 %v328_v16, %v326_v13 }
  0x72   : > { %1753 = vmatpush1.bf16.msra.mxu1 %v1752_v34  ;;  %v2703_v22 = vld [vmem:[%s3262_s0] sm:$0xff]  ;;  %v587_v23 = vld [vmem:[%s2585_s13 + $0x988] sm:$0xff]  ;;  %v589_v24 = vld [vmem:[%s2585_s13 + $0x998] sm:$0xff]  ;;  %v2024_v29 = vpack.c.bf16 %v584_v18, %v582_v17  ;;  %v1770_v30 = vpack.c.bf16 %v333_v21, %v331_v20 }
  0x73   : > { %2009 = vmatpush1.bf16.msra.mxu0 %v2008_v35  ;;  %1755 = vmatprep.subr.bf16.mxu1 %v1754_v36  ;;  %v2709_v25 = vrot.slane %v2703_v22, %v2692_v11  ;;  %v2714_v26 = vld [vmem:[%s3262_s0 + $0x10] sm:$0xff]  ;;  %v330_v31 = vld [vmem:[%s2585_s13 + $0x180] sm:$0xff]  ;;  %v2026_v35 = vpack.c.bf16 %v589_v24, %v587_v23  ;;  %v335_v37 = vld [vmem:[%s2585_s13 + $0x1a8] sm:$0xff] }
  0x74   : > { %2011 = vmatprep.subr.bf16.mxu0 %v2010_v40  ;;  %v2718_v28 = vrot.slane %v2714_v26, %v2692_v11  ;;  %v332_v32 = vld [vmem:[%s2585_s13 + $0x190] sm:$0xff]  ;;  %v586_v33 = vld [vmem:[%s2585_s13 + $0x980] sm:$0xff]  ;;  %v337_v38 = vld [vmem:[%s2585_s13 + $0x1b8] sm:$0xff] }
  0x75   : > { %v825_v34 = vcombine.high %v2709_v25, %v2709_v25  ;;  %v588_v36 = vld [vmem:[%s2585_s13 + $0x990] sm:$0xff]  ;;  %v591_v40 = vld [vmem:[%s2585_s13 + $0x9a8] sm:$0xff]  ;;  %v593_v41 = vld [vmem:[%s2585_s13 + $0x9b8] sm:$0xff]  ;;  %v1772_v42 = vpack.c.bf16 %v332_v32, %v330_v31  ;;  %v1774_v44 = vpack.c.bf16 %v337_v38, %v335_v37 }
  0x76   : > { %1757 = vmatpush1.bf16.msra.mxu1 %v1756_v49  ;;  %v859_v39 = vcombine.high %v2718_v28, %v2718_v28  ;;  %v2028_v43 = vpack.c.bf16 %v588_v36, %v586_v33  ;;  %v334_v45 = vld [vmem:[%s2585_s13 + $0x1a0] sm:$0xff]  ;;  %v336_v46 = vld [vmem:[%s2585_s13 + $0x1b0] sm:$0xff]  ;;  %v2030_v48 = vpack.c.bf16 %v593_v41, %v591_v40  ;;  %v595_v52 = vld [vmem:[%s2585_s13 + $0x9c8] sm:$0xff] }
  0x77   : > { %2013 = vmatpush1.bf16.msra.mxu0 %v2012_v50  ;;  %1759 = vmatprep.subr.bf16.mxu1 %v1758_v51  ;;  %v590_v47 = vld [vmem:[%s2585_s13 + $0x9a0] sm:$0xff]  ;;  %v592_v49 = vld [vmem:[%s2585_s13 + $0x9b0] sm:$0xff]  ;;  %v339_v50 = vld [vmem:[%s2585_s13 + $0x1c8] sm:$0xff]  ;;  %v1776_v54 = vpack.c.bf16 %v336_v46, %v334_v45 }
  0x78   : > { %2015 = vmatprep.subr.bf16.mxu0 %v2014_v55  ;;  %958 = vmatprep.mubr.f32.mxu1 %v825_v34  ;;  %v341_v51 = vld [vmem:[%s2585_s13 + $0x1d8] sm:$0xff]  ;;  %v2032_v55 = vpack.c.bf16 %v592_v49, %v590_v47  ;;  %v338_v57 = vld [vmem:[%s2585_s13 + $0x1c0] sm:$0xff]  ;;  %v340_v58 = vld [vmem:[%s2585_s13 + $0x1d0] sm:$0xff] }
  0x79   : > { %1242 = vmatprep.mubr.f32.mxu0 %v859_v39  ;;  %v597_v53 = vld [vmem:[%s2585_s13 + $0x9d8] sm:$0xff]  ;;  %v1778_v56 = vpack.c.bf16 %v341_v51, %v339_v50  ;;  %v594_v59 = vld [vmem:[%s2585_s13 + $0x9c0] sm:$0xff]  ;;  %v596_v62 = vld [vmem:[%s2585_s13 + $0x9d0] sm:$0xff]  ;;  %v1780_v3 = vpack.c.bf16 %v340_v58, %v338_v57 }
  0x7a   : > { %1761 = vmatpush1.bf16.msra.mxu1 %v1760_v63  ;;  %v2034_v60 = vpack.c.bf16 %v597_v53, %v595_v52  ;;  %v343_v63 = vld [vmem:[%s2585_s13 + $0x1e8] sm:$0xff]  ;;  %v601_v2 = vld [vmem:[%s2585_s13 + $0x9f8] sm:$0xff]  ;;  %v2036_v4 = vpack.c.bf16 %v596_v62, %v594_v59  ;;  %v342_v6 = vld [vmem:[%s2585_s13 + $0x1e0] sm:$0xff] }
  0x7b   : > { %2017 = vmatpush1.bf16.msra.mxu0 %v2016_v0  ;;  %1763 = vmatprep.subr.bf16.mxu1 %v1762_v1  ;;  %v345_v0 = vld [vmem:[%s2585_s13 + $0x1f8] sm:$0xff]  ;;  %v599_v1 = vld [vmem:[%s2585_s13 + $0x9e8] sm:$0xff]  ;;  %v344_v7 = vld [vmem:[%s2585_s13 + $0x1f0] sm:$0xff] }
  0x7c   : > { %2019 = vmatprep.subr.bf16.mxu0 %v2018_v5  ;;  %v1782_v5 = vpack.c.bf16 %v345_v0, %v343_v63  ;;  %v598_v8 = vld [vmem:[%s2585_s13 + $0x9e0] sm:$0xff]  ;;  %v2038_v9 = vpack.c.bf16 %v601_v2, %v599_v1  ;;  %v600_v10 = vld [vmem:[%s2585_s13 + $0x9f0] sm:$0xff]  ;;  %v347_v13 = vld [vmem:[%s2585_s13 + $0x208] sm:$0xff]  ;;  %v1784_v18 = vpack.c.bf16 %v344_v7, %v342_v6 }
  0x7d   : > { %v603_v16 = vld [vmem:[%s2585_s13 + $0xa08] sm:$0xff]  ;;  %v605_v17 = vld [vmem:[%s2585_s13 + $0xa18] sm:$0xff]  ;;  %v346_v21 = vld [vmem:[%s2585_s13 + $0x200] sm:$0xff] }
  0x7e   : > { %1765 = vmatpush1.bf16.msra.mxu1 %v1764_v12  ;;  %v810_v12 = vcombine.high %v2703_v22, %v2703_v22  ;;  %v348_v22 = vld [vmem:[%s2585_s13 + $0x210] sm:$0xff]  ;;  %v602_v23 = vld [vmem:[%s2585_s13 + $0xa00] sm:$0xff]  ;;  %v2042_v24 = vpack.c.bf16 %v605_v17, %v603_v16  ;;  %v607_v31 = vld [vmem:[%s2585_s13 + $0xa28] sm:$0xff] }
  0x7f   : > { %2021 = vmatpush1.bf16.msra.mxu0 %v2020_v14  ;;  %1767 = vmatprep.subr.bf16.mxu1 %v1766_v15  ;;  %v349_v14 = vld [vmem:[%s2585_s13 + $0x218] sm:$0xff]  ;;  %v844_v15 = vcombine.high %v2714_v26, %v2714_v26  ;;  %v604_v26 = vld [vmem:[%s2585_s13 + $0xa10] sm:$0xff]  ;;  %v1788_v34 = vpack.c.bf16 %v348_v22, %v346_v21  ;;  %v350_v37 = vld [vmem:[%s2585_s13 + $0x220] sm:$0xff] }
  0x80   : > { %2023 = vmatprep.subr.bf16.mxu0 %v2022_v19  ;;  %v2040_v19 = vpack.c.bf16 %v600_v10, %v598_v8  ;;  %v1786_v20 = vpack.c.bf16 %v349_v14, %v347_v13  ;;  %v609_v32 = vld [vmem:[%s2585_s13 + $0xa38] sm:$0xff]  ;;  %v352_v38 = vld [vmem:[%s2585_s13 + $0x230] sm:$0xff]  ;;  %v606_v39 = vld [vmem:[%s2585_s13 + $0xa20] sm:$0xff] }
  0x81   : > { %v2772_v33 = vrot.slane %v844_v15, %v2692_v11  ;;  %v2046_v40 = vpack.c.bf16 %v609_v32, %v607_v31  ;;  %v608_v41 = vld [vmem:[%s2585_s13 + $0xa30] sm:$0xff]  ;;  %v611_v45 = vld [vmem:[%s2585_s13 + $0xa48] sm:$0xff]  ;;  %v613_v46 = vld [vmem:[%s2585_s13 + $0xa58] sm:$0xff] }
  0x82   : > { %1769 = vmatpush1.bf16.msra.mxu1 %v1768_v27  ;;  %v351_v27 = vld [vmem:[%s2585_s13 + $0x228] sm:$0xff]  ;;  %v2048_v49 = vpack.c.bf16 %v608_v41, %v606_v39  ;;  %v354_v51 = vld [vmem:[%s2585_s13 + $0x240] sm:$0xff]  ;;  %v2050_v53 = vpack.c.bf16 %v613_v46, %v611_v45  ;;  %v617_v57 = vld [vmem:[%s2585_s13 + $0xa78] sm:$0xff] }
  0x83   : > { %2025 = vmatpush1.bf16.msra.mxu0 %v2024_v29  ;;  %1771 = vmatprep.subr.bf16.mxu1 %v1770_v30  ;;  %v353_v29 = vld [vmem:[%s2585_s13 + $0x238] sm:$0xff]  ;;  %v2767_v30 = vrot.slane %v810_v12, %v2692_v11  ;;  %v860_v47 = vcombine.high %v2772_v33, %v2772_v33  ;;  %v610_v52 = vld [vmem:[%s2585_s13 + $0xa40] sm:$0xff]  ;;  %v360_v63 = vld [vmem:[%s2585_s13 + $0x270] sm:$0xff] }
  0x84   : > { %2027 = vmatprep.subr.bf16.mxu0 %v2026_v35  ;;  %v2044_v35 = vpack.c.bf16 %v604_v26, %v602_v23  ;;  %v1790_v36 = vpack.c.bf16 %v353_v29, %v351_v27  ;;  %v358_v62 = vld [vmem:[%s2585_s13 + $0x260] sm:$0xff]  ;;  %v616_v2 = vld [vmem:[%s2585_s13 + $0xa70] sm:$0xff]  ;;  %v621_v6 = vld [vmem:[%s2585_s13 + $0xa98] sm:$0xff] }
  0x85   : > { %v614_v0 = vld [vmem:[%s2585_s13 + $0xa60] sm:$0xff]  ;;  %v1800_v7 = vpack.c.bf16 %v360_v63, %v358_v62  ;;  %v364_v12 = vld [vmem:[%s2585_s13 + $0x290] sm:$0xff]  ;;  %v367_v16 = vld [vmem:[%s2585_s13 + $0x2a8] sm:$0xff] }
  0x86   : > { %1773 = vmatpush1.bf16.msra.mxu1 %v1772_v42  ;;  %v355_v42 = vld [vmem:[%s2585_s13 + $0x248] sm:$0xff]  ;;  %v2056_v8 = vpack.c.bf16 %v616_v2, %v614_v0  ;;  %v362_v10 = vld [vmem:[%s2585_s13 + $0x280] sm:$0xff]  ;;  %v620_v15 = vld [vmem:[%s2585_s13 + $0xa90] sm:$0xff] }
  0x87   : > { %2029 = vmatpush1.bf16.msra.mxu0 %v2028_v43  ;;  %1775 = vmatprep.subr.bf16.mxu1 %v1774_v44  ;;  %v357_v43 = vld [vmem:[%s2585_s13 + $0x258] sm:$0xff]  ;;  %v826_v44 = vcombine.high %v2767_v30, %v2767_v30  ;;  %v618_v13 = vld [vmem:[%s2585_s13 + $0xa80] sm:$0xff]  ;;  %v624_v29 = vld [vmem:[%s2585_s13 + $0xab0] sm:$0xff] }
  0x88   : > { %2031 = vmatprep.subr.bf16.mxu0 %v2030_v48  ;;  %v1792_v48 = vpack.c.bf16 %v352_v38, %v350_v37  ;;  %v1794_v50 = vpack.c.bf16 %v357_v43, %v355_v42  ;;  %v369_v17 = vld [vmem:[%s2585_s13 + $0x2b8] sm:$0xff]  ;;  %v2060_v21 = vpack.c.bf16 %v620_v15, %v618_v13  ;;  %v366_v23 = vld [vmem:[%s2585_s13 + $0x2a0] sm:$0xff]  ;;  %v371_v31 = vld [vmem:[%s2585_s13 + $0x2c8] sm:$0xff] }
  0x89   : > { %v1806_v22 = vpack.c.bf16 %v369_v17, %v367_v16  ;;  %v622_v26 = vld [vmem:[%s2585_s13 + $0xaa0] sm:$0xff]  ;;  %v373_v32 = vld [vmem:[%s2585_s13 + $0x2d8] sm:$0xff]  ;;  %v628_v43 = vld [vmem:[%s2585_s13 + $0xad0] sm:$0xff] }
  0x8a   : > { %1777 = vmatpush1.bf16.msra.mxu1 %v1776_v54  ;;  %v612_v54 = vld [vmem:[%s2585_s13 + $0xa50] sm:$0xff]  ;;  %v2064_v37 = vpack.c.bf16 %v624_v29, %v622_v26  ;;  %v1810_v38 = vpack.c.bf16 %v373_v32, %v371_v31  ;;  %v370_v39 = vld [vmem:[%s2585_s13 + $0x2c0] sm:$0xff]  ;;  %v377_v45 = vld [vmem:[%s2585_s13 + $0x2f8] sm:$0xff] }
  0x8b   : > { %2033 = vmatpush1.bf16.msra.mxu0 %v2032_v55  ;;  %1779 = vmatprep.subr.bf16.mxu1 %v1778_v56  ;;  %v359_v55 = vld [vmem:[%s2585_s13 + $0x268] sm:$0xff]  ;;  %v361_v56 = vld [vmem:[%s2585_s13 + $0x278] sm:$0xff]  ;;  %v2052_v59 = vpack.c.bf16 %v612_v54, %v610_v52  ;;  %v626_v41 = vld [vmem:[%s2585_s13 + $0xac0] sm:$0xff] }
  0x8c   : > { %2035 = vmatprep.subr.bf16.mxu0 %v2034_v60  ;;  %v1798_v60 = vpack.c.bf16 %v361_v56, %v359_v55  ;;  %v631_v46 = vld [vmem:[%s2585_s13 + $0xae8] sm:$0xff]  ;;  %v630_v52 = vld [vmem:[%s2585_s13 + $0xae0] sm:$0xff]  ;;  %v632_v54 = vld [vmem:[%s2585_s13 + $0xaf0] sm:$0xff] }
  0x8d   : > { %v379_v55 = vld [vmem:[%s2585_s13 + $0x308] sm:$0xff]  ;;  %v381_v56 = vld [vmem:[%s2585_s13 + $0x318] sm:$0xff]  ;;  %v378_v62 = vld [vmem:[%s2585_s13 + $0x300] sm:$0xff] }
  0x8e   : > { %1781 = vmatpush1.bf16.msra.mxu1 %v1780_v3  ;;  %v363_v3 = vld [vmem:[%s2585_s13 + $0x288] sm:$0xff]  ;;  %v380_v63 = vld [vmem:[%s2585_s13 + $0x310] sm:$0xff]  ;;  %v634_v0 = vld [vmem:[%s2585_s13 + $0xb00] sm:$0xff] }
  0x8f   : > { %2037 = vmatpush1.bf16.msra.mxu0 %v2036_v4  ;;  %1783 = vmatprep.subr.bf16.mxu1 %v1782_v5  ;;  %v365_v4 = vld [vmem:[%s2585_s13 + $0x298] sm:$0xff]  ;;  %v619_v5 = vld [vmem:[%s2585_s13 + $0xa88] sm:$0xff]  ;;  %v636_v2 = vld [vmem:[%s2585_s13 + $0xb10] sm:$0xff] }
  0x90   : > { %2039 = vmatprep.subr.bf16.mxu0 %v2038_v9  ;;  %v1802_v9 = vpack.c.bf16 %v365_v4, %v363_v3  ;;  %v2058_v14 = vpack.c.bf16 %v621_v6, %v619_v5  ;;  %v383_v3 = vld [vmem:[%s2585_s13 + $0x328] sm:$0xff]  ;;  %v385_v4 = vld [vmem:[%s2585_s13 + $0x338] sm:$0xff]  ;;  %v638_v13 = vld [vmem:[%s2585_s13 + $0xb20] sm:$0xff] }
  0x91   : > { %v639_v5 = vld [vmem:[%s2585_s13 + $0xb28] sm:$0xff]  ;;  %v641_v6 = vld [vmem:[%s2585_s13 + $0xb38] sm:$0xff]  ;;  %v640_v15 = vld [vmem:[%s2585_s13 + $0xb30] sm:$0xff] }
  0x92   : > { %1785 = vmatpush1.bf16.msra.mxu1 %v1784_v18  ;;  %v623_v18 = vld [vmem:[%s2585_s13 + $0xaa8] sm:$0xff]  ;;  %v389_v17 = vld [vmem:[%s2585_s13 + $0x358] sm:$0xff]  ;;  %v642_v26 = vld [vmem:[%s2585_s13 + $0xb40] sm:$0xff] }
  0x93   : > { %2041 = vmatpush1.bf16.msra.mxu0 %v2040_v19  ;;  %1787 = vmatprep.subr.bf16.mxu1 %v1786_v20  ;;  %v625_v19 = vld [vmem:[%s2585_s13 + $0xab8] sm:$0xff]  ;;  %v1804_v20 = vpack.c.bf16 %v364_v12, %v362_v10  ;;  %v382_v10 = vld [vmem:[%s2585_s13 + $0x320] sm:$0xff]  ;;  %v384_v12 = vld [vmem:[%s2585_s13 + $0x330] sm:$0xff] }
  0x94   : > { %2043 = vmatprep.subr.bf16.mxu0 %v2042_v24  ;;  %v368_v24 = vld [vmem:[%s2585_s13 + $0x2b0] sm:$0xff]  ;;  %v2062_v27 = vpack.c.bf16 %v625_v19, %v623_v18  ;;  %v387_v16 = vld [vmem:[%s2585_s13 + $0x348] sm:$0xff]  ;;  %v645_v19 = vld [vmem:[%s2585_s13 + $0xb58] sm:$0xff] }
  0x95   : > { %959 = vmatmul.mubr.f32.vlgmr.msra.gmra.mrb[0].mxu1 %v2709_v25  ;;  %v356_v25 = vld [vmem:[%s2585_s13 + $0x250] sm:$0xff]  ;;  %v643_v18 = vld [vmem:[%s2585_s13 + $0xb48] sm:$0xff]  ;;  %v393_v32 = vld [vmem:[%s2585_s13 + $0x378] sm:$0xff] }
  0x96   : > { %1789 = vmatpush1.bf16.msra.mxu1 %v1788_v34  ;;  %1243 = vmatmul.mubr.f32.vlgmr.msra.gmra.mrb[0].mxu0 %v2718_v28  ;;  %v615_v28 = vld [vmem:[%s2585_s13 + $0xa68] sm:$0xff]  ;;  %v1796_v58 = vpack.c.bf16 %v356_v25, %v354_v51  ;;  %v374_v51 = vld [vmem:[%s2585_s13 + $0x2e0] sm:$0xff]  ;;  %v376_v25 = vld [vmem:[%s2585_s13 + $0x2f0] sm:$0xff] }
  0x97   : > { %2045 = vmatpush1.bf16.msra.mxu0 %v2044_v35  ;;  %1791 = vmatprep.subr.bf16.mxu1 %v1790_v36  ;;  %v2054_v1 = vpack.c.bf16 %v617_v57, %v615_v28  ;;  %v627_v34 = vld [vmem:[%s2585_s13 + $0xac8] sm:$0xff]  ;;  %v629_v35 = vld [vmem:[%s2585_s13 + $0xad8] sm:$0xff]  ;;  %v1808_v36 = vpack.c.bf16 %v368_v24, %v366_v23  ;;  %v386_v23 = vld [vmem:[%s2585_s13 + $0x340] sm:$0xff] }
  0x98   : > { %2047 = vmatprep.subr.bf16.mxu0 %v2046_v40  ;;  %1029 = vmatprep.mubr.f32.mxu1 %v826_v44  ;;  %v372_v40 = vld [vmem:[%s2585_s13 + $0x2d0] sm:$0xff]  ;;  %v2066_v42 = vpack.c.bf16 %v629_v35, %v627_v34  ;;  %v375_v44 = vld [vmem:[%s2585_s13 + $0x2e8] sm:$0xff]  ;;  %v637_v57 = vld [vmem:[%s2585_s13 + $0xb18] sm:$0xff] }
  0x99   : > { %1313 = vmatprep.mubr.f32.mxu0 %v860_v47  ;;  %v633_v47 = vld [vmem:[%s2585_s13 + $0xaf8] sm:$0xff]  ;;  %v635_v28 = vld [vmem:[%s2585_s13 + $0xb08] sm:$0xff]  ;;  %v388_v24 = vld [vmem:[%s2585_s13 + $0x350] sm:$0xff] }
  0x9a   : > { %1793 = vmatpush1.bf16.msra.mxu1 %v1792_v48  ;;  %v1812_v48 = vpack.c.bf16 %v372_v40, %v370_v39  ;;  %v644_v29 = vld [vmem:[%s2585_s13 + $0xb50] sm:$0xff]  ;;  %v391_v31 = vld [vmem:[%s2585_s13 + $0x368] sm:$0xff]  ;;  %v649_v35 = vld [vmem:[%s2585_s13 + $0xb78] sm:$0xff] }
  0x9b   : > { %2049 = vmatpush1.bf16.msra.mxu0 %v2048_v49  ;;  %1795 = vmatprep.subr.bf16.mxu1 %v1794_v50  ;;  %v2068_v49 = vpack.c.bf16 %v628_v43, %v626_v41  ;;  %v1814_v50 = vpack.c.bf16 %v377_v45, %v375_v44  ;;  %v647_v34 = vld [vmem:[%s2585_s13 + $0xb68] sm:$0xff]  ;;  %v390_v39 = vld [vmem:[%s2585_s13 + $0x360] sm:$0xff]  ;;  %v392_v40 = vld [vmem:[%s2585_s13 + $0x370] sm:$0xff] }
  0x9c   : > { %2051 = vmatprep.subr.bf16.mxu0 %v2050_v53  ;;  %v2070_v53 = vpack.c.bf16 %v633_v47, %v631_v46  ;;  %v646_v41 = vld [vmem:[%s2585_s13 + $0xb60] sm:$0xff]  ;;  %v648_v43 = vld [vmem:[%s2585_s13 + $0xb70] sm:$0xff]  ;;  %v395_v44 = vld [vmem:[%s2585_s13 + $0x388] sm:$0xff] }
  0x9d   : > { %v397_v45 = vld [vmem:[%s2585_s13 + $0x398] sm:$0xff]  ;;  %v651_v46 = vld [vmem:[%s2585_s13 + $0xb88] sm:$0xff] }
  0x9e   : > { %1797 = vmatpush1.bf16.msra.mxu1 %v1796_v58  ;;  %v1816_v58 = vpack.c.bf16 %v376_v25, %v374_v51  ;;  %v653_v47 = vld [vmem:[%s2585_s13 + $0xb98] sm:$0xff]  ;;  %v394_v51 = vld [vmem:[%s2585_s13 + $0x380] sm:$0xff]  ;;  %v396_v25 = vld [vmem:[%s2585_s13 + $0x390] sm:$0xff] }
  0x9f   : > { %2053 = vmatpush1.bf16.msra.mxu0 %v2052_v59  ;;  %1799 = vmatprep.subr.bf16.mxu1 %v1798_v60  ;;  %v2072_v59 = vpack.c.bf16 %v632_v54, %v630_v52  ;;  %v1818_v60 = vpack.c.bf16 %v381_v56, %v379_v55  ;;  %v650_v52 = vld [vmem:[%s2585_s13 + $0xb80] sm:$0xff]  ;;  %v652_v54 = vld [vmem:[%s2585_s13 + $0xb90] sm:$0xff]  ;;  %v399_v55 = vld [vmem:[%s2585_s13 + $0x3a8] sm:$0xff] }
  0xa0   : > { %2055 = vmatprep.subr.bf16.mxu0 %v2054_v1  ;;  %v2074_v1 = vpack.c.bf16 %v637_v57, %v635_v28  ;;  %v401_v56 = vld [vmem:[%s2585_s13 + $0x3b8] sm:$0xff]  ;;  %v655_v28 = vld [vmem:[%s2585_s13 + $0xba8] sm:$0xff] }
  0xa1   : > { %v657_v57 = vld [vmem:[%s2585_s13 + $0xbb8] sm:$0xff] }
  0xa2   : > { %1801 = vmatpush1.bf16.msra.mxu1 %v1800_v7  ;;  %v1820_v7 = vpack.c.bf16 %v380_v63, %v378_v62  ;;  %v398_v62 = vld [vmem:[%s2585_s13 + $0x3a0] sm:$0xff]  ;;  %v400_v63 = vld [vmem:[%s2585_s13 + $0x3b0] sm:$0xff] }
  0xa3   : > { %2057 = vmatpush1.bf16.msra.mxu0 %v2056_v8  ;;  %1803 = vmatprep.subr.bf16.mxu1 %v1802_v9  ;;  %v2076_v8 = vpack.c.bf16 %v636_v2, %v634_v0  ;;  %v1822_v9 = vpack.c.bf16 %v385_v4, %v383_v3  ;;  %v654_v0 = vld [vmem:[%s2585_s13 + $0xba0] sm:$0xff]  ;;  %v656_v2 = vld [vmem:[%s2585_s13 + $0xbb0] sm:$0xff]  ;;  %v403_v3 = vld [vmem:[%s2585_s13 + $0x3c8] sm:$0xff] }
  0xa4   : > { %2059 = vmatprep.subr.bf16.mxu0 %v2058_v14  ;;  %v2078_v14 = vpack.c.bf16 %v641_v6, %v639_v5  ;;  %v405_v4 = vld [vmem:[%s2585_s13 + $0x3d8] sm:$0xff]  ;;  %v659_v5 = vld [vmem:[%s2585_s13 + $0xbc8] sm:$0xff] }
  0xa5   : > { %v661_v6 = vld [vmem:[%s2585_s13 + $0xbd8] sm:$0xff] }
  0xa6   : > { %1805 = vmatpush1.bf16.msra.mxu1 %v1804_v20  ;;  %v1824_v20 = vpack.c.bf16 %v384_v12, %v382_v10  ;;  %v402_v10 = vld [vmem:[%s2585_s13 + $0x3c0] sm:$0xff]  ;;  %v404_v12 = vld [vmem:[%s2585_s13 + $0x3d0] sm:$0xff] }
  0xa7   : > { %2061 = vmatpush1.bf16.msra.mxu0 %v2060_v21  ;;  %1807 = vmatprep.subr.bf16.mxu1 %v1806_v22  ;;  %v2080_v21 = vpack.c.bf16 %v640_v15, %v638_v13  ;;  %v1826_v22 = vpack.c.bf16 %v389_v17, %v387_v16  ;;  %v658_v13 = vld [vmem:[%s2585_s13 + $0xbc0] sm:$0xff]  ;;  %v660_v15 = vld [vmem:[%s2585_s13 + $0xbd0] sm:$0xff]  ;;  %v407_v16 = vld [vmem:[%s2585_s13 + $0x3e8] sm:$0xff] }
  0xa8   : > { %2063 = vmatprep.subr.bf16.mxu0 %v2062_v27  ;;  %v2082_v27 = vpack.c.bf16 %v645_v19, %v643_v18  ;;  %v409_v17 = vld [vmem:[%s2585_s13 + $0x3f8] sm:$0xff]  ;;  %v663_v18 = vld [vmem:[%s2585_s13 + $0xbe8] sm:$0xff] }
  0xa9   : > { %v665_v19 = vld [vmem:[%s2585_s13 + $0xbf8] sm:$0xff] }
  0xaa   : > { %1809 = vmatpush1.bf16.msra.mxu1 %v1808_v36  ;;  %v1828_v36 = vpack.c.bf16 %v388_v24, %v386_v23  ;;  %v406_v23 = vld [vmem:[%s2585_s13 + $0x3e0] sm:$0xff]  ;;  %v408_v24 = vld [vmem:[%s2585_s13 + $0x3f0] sm:$0xff] }
  0xab   : > { %2065 = vmatpush1.bf16.msra.mxu0 %v2064_v37  ;;  %1811 = vmatprep.subr.bf16.mxu1 %v1810_v38  ;;  %v2084_v37 = vpack.c.bf16 %v644_v29, %v642_v26  ;;  %v1830_v38 = vpack.c.bf16 %v393_v32, %v391_v31  ;;  %v662_v26 = vld [vmem:[%s2585_s13 + $0xbe0] sm:$0xff]  ;;  %v664_v29 = vld [vmem:[%s2585_s13 + $0xbf0] sm:$0xff]  ;;  %v411_v31 = vld [vmem:[%s2585_s13 + $0x408] sm:$0xff] }
  0xac   : > { %2067 = vmatprep.subr.bf16.mxu0 %v2066_v42  ;;  %v2086_v42 = vpack.c.bf16 %v649_v35, %v647_v34  ;;  %v413_v32 = vld [vmem:[%s2585_s13 + $0x418] sm:$0xff]  ;;  %v667_v34 = vld [vmem:[%s2585_s13 + $0xc08] sm:$0xff] }
  0xad   : > { %v669_v35 = vld [vmem:[%s2585_s13 + $0xc18] sm:$0xff] }
  0xae   : > { %1813 = vmatpush1.bf16.msra.mxu1 %v1812_v48  ;;  %v1832_v48 = vpack.c.bf16 %v392_v40, %v390_v39  ;;  %v410_v39 = vld [vmem:[%s2585_s13 + $0x400] sm:$0xff]  ;;  %v412_v40 = vld [vmem:[%s2585_s13 + $0x410] sm:$0xff] }
  0xaf   : > { %2069 = vmatpush1.bf16.msra.mxu0 %v2068_v49  ;;  %1815 = vmatprep.subr.bf16.mxu1 %v1814_v50  ;;  %v2088_v49 = vpack.c.bf16 %v648_v43, %v646_v41  ;;  %v1834_v50 = vpack.c.bf16 %v397_v45, %v395_v44  ;;  %v666_v41 = vld [vmem:[%s2585_s13 + $0xc00] sm:$0xff]  ;;  %v668_v43 = vld [vmem:[%s2585_s13 + $0xc10] sm:$0xff]  ;;  %v415_v44 = vld [vmem:[%s2585_s13 + $0x428] sm:$0xff] }
  0xb0   : > { %2071 = vmatprep.subr.bf16.mxu0 %v2070_v53  ;;  %v2090_v53 = vpack.c.bf16 %v653_v47, %v651_v46  ;;  %v417_v45 = vld [vmem:[%s2585_s13 + $0x438] sm:$0xff]  ;;  %v671_v46 = vld [vmem:[%s2585_s13 + $0xc28] sm:$0xff] }
  0xb1   : > { %v673_v47 = vld [vmem:[%s2585_s13 + $0xc38] sm:$0xff] }
  0xb2   : > { %1817 = vmatpush1.bf16.msra.mxu1 %v1816_v58  ;;  %v1836_v58 = vpack.c.bf16 %v396_v25, %v394_v51  ;;  %v2108_v51 = vpack.c.bf16 %v668_v43, %v666_v41  ;;  %v1854_v25 = vpack.c.bf16 %v417_v45, %v415_v44  ;;  %v430_v43 = vld [vmem:[%s2585_s13 + $0x4a0] sm:$0xff]  ;;  %v432_v44 = vld [vmem:[%s2585_s13 + $0x4b0] sm:$0xff] }
  0xb3   : > { %2073 = vmatpush1.bf16.msra.mxu0 %v2072_v59  ;;  %1819 = vmatprep.subr.bf16.mxu1 %v1818_v60  ;;  %v2092_v59 = vpack.c.bf16 %v652_v54, %v650_v52  ;;  %v1838_v60 = vpack.c.bf16 %v401_v56, %v399_v55  ;;  %v416_v52 = vld [vmem:[%s2585_s13 + $0x430] sm:$0xff]  ;;  %v2923_v55 = vld [vmem:[%s3262_s0 + $0x18] sm:$0xff]  ;;  %v2110_v56 = vpack.c.bf16 %v673_v47, %v671_v46  ;;  %v686_v45 = vld [vmem:[%s2585_s13 + $0xca0] sm:$0xff] }
  0xb4   : > { %2075 = vmatprep.subr.bf16.mxu0 %v2074_v1  ;;  %v2094_v1 = vpack.c.bf16 %v657_v57, %v655_v28  ;;  %v672_v28 = vld [vmem:[%s2585_s13 + $0xc30] sm:$0xff]  ;;  %v419_v57 = vld [vmem:[%s2585_s13 + $0x448] sm:$0xff] }
  0xb5   : > { %v688_v47 = vld [vmem:[%s2585_s13 + $0xcb0] sm:$0xff] }
  0xb6   : > { %1821 = vmatpush1.bf16.msra.mxu1 %v1820_v7  ;;  %v1840_v7 = vpack.c.bf16 %v400_v63, %v398_v62  ;;  %v677_v62 = vld [vmem:[%s2585_s13 + $0xc58] sm:$0xff] }
  0xb7   : > { %2077 = vmatpush1.bf16.msra.mxu0 %v2076_v8  ;;  %1823 = vmatprep.subr.bf16.mxu1 %v1822_v9  ;;  %v2096_v8 = vpack.c.bf16 %v656_v2, %v654_v0  ;;  %v1842_v9 = vpack.c.bf16 %v405_v4, %v403_v3  ;;  %v418_v3 = vld [vmem:[%s2585_s13 + $0x440] sm:$0xff]  ;;  %v420_v4 = vld [vmem:[%s2585_s13 + $0x450] sm:$0xff] }
  0xb8   : > { %2079 = vmatprep.subr.bf16.mxu0 %v2078_v14  ;;  %v2098_v14 = vpack.c.bf16 %v661_v6, %v659_v5  ;;  %v674_v5 = vld [vmem:[%s2585_s13 + $0xc40] sm:$0xff] }
  0xba   : > { %1825 = vmatpush1.bf16.msra.mxu1 %v1824_v20  ;;  %v1844_v20 = vpack.c.bf16 %v404_v12, %v402_v10  ;;  %v681_v10 = vld [vmem:[%s2585_s13 + $0xc78] sm:$0xff]  ;;  %v1860_v12 = vpack.c.bf16 %v420_v4, %v418_v3 }
  0xbb   : > { %2081 = vmatpush1.bf16.msra.mxu0 %v2080_v21  ;;  %1827 = vmatprep.subr.bf16.mxu1 %v1826_v22  ;;  %v2100_v21 = vpack.c.bf16 %v660_v15, %v658_v13  ;;  %v1846_v22 = vpack.c.bf16 %v409_v17, %v407_v16  ;;  %v422_v15 = vld [vmem:[%s2585_s13 + $0x460] sm:$0xff]  ;;  %v424_v16 = vld [vmem:[%s2585_s13 + $0x470] sm:$0xff] }
  0xbc   : > { %2083 = vmatprep.subr.bf16.mxu0 %v2082_v27  ;;  %v2102_v27 = vpack.c.bf16 %v665_v19, %v663_v18  ;;  %v678_v17 = vld [vmem:[%s2585_s13 + $0xc60] sm:$0xff]  ;;  %v680_v19 = vld [vmem:[%s2585_s13 + $0xc70] sm:$0xff] }
  0xbe   : > { %1829 = vmatpush1.bf16.msra.mxu1 %v1828_v36  ;;  %v1848_v36 = vpack.c.bf16 %v408_v24, %v406_v23  ;;  %v685_v23 = vld [vmem:[%s2585_s13 + $0xc98] sm:$0xff]  ;;  %v1864_v24 = vpack.c.bf16 %v424_v16, %v422_v15 }
  0xbf   : > { %2085 = vmatpush1.bf16.msra.mxu0 %v2084_v37  ;;  %1831 = vmatprep.subr.bf16.mxu1 %v1830_v38  ;;  %v2104_v37 = vpack.c.bf16 %v664_v29, %v662_v26  ;;  %v1850_v38 = vpack.c.bf16 %v413_v32, %v411_v31  ;;  %v2120_v26 = vpack.c.bf16 %v680_v19, %v678_v17  ;;  %v426_v29 = vld [vmem:[%s2585_s13 + $0x480] sm:$0xff]  ;;  %v428_v31 = vld [vmem:[%s2585_s13 + $0x490] sm:$0xff] }
  0xc0   : > { %2087 = vmatprep.subr.bf16.mxu0 %v2086_v42  ;;  %v2106_v42 = vpack.c.bf16 %v669_v35, %v667_v34  ;;  %v682_v32 = vld [vmem:[%s2585_s13 + $0xc80] sm:$0xff]  ;;  %v684_v35 = vld [vmem:[%s2585_s13 + $0xc90] sm:$0xff] }
  0xc1   : > { %v2124_v41 = vpack.c.bf16 %v684_v35, %v682_v32  ;;  %v442_v17 = vld [vmem:[%s2585_s13 + $0x500] sm:$0xff] }
  0xc2   : > { %1833 = vmatpush1.bf16.msra.mxu1 %v1832_v48  ;;  %v1852_v48 = vpack.c.bf16 %v412_v40, %v410_v39  ;;  %v689_v39 = vld [vmem:[%s2585_s13 + $0xcb8] sm:$0xff]  ;;  %v1868_v40 = vpack.c.bf16 %v428_v31, %v426_v29  ;;  %v698_v19 = vld [vmem:[%s2585_s13 + $0xd00] sm:$0xff] }
  0xc3   : > { %2089 = vmatpush1.bf16.msra.mxu0 %v2088_v49  ;;  %1835 = vmatprep.subr.bf16.mxu1 %v1834_v50  ;;  %v414_v49 = vld [vmem:[%s2585_s13 + $0x420] sm:$0xff]  ;;  %v2912_v50 = vld [vmem:[%s3262_s0 + $0x8] sm:$0xff] }
  0xc4   : > { %2091 = vmatprep.subr.bf16.mxu0 %v2090_v53  ;;  %v670_v53 = vld [vmem:[%s2585_s13 + $0xc20] sm:$0xff]  ;;  %v2918_v54 = vrot.slane %v2912_v50, %v2692_v11  ;;  %v1856_v0 = vpack.c.bf16 %v416_v52, %v414_v49  ;;  %v437_v49 = vld [vmem:[%s2585_s13 + $0x4d8] sm:$0xff]  ;;  %v1872_v52 = vpack.c.bf16 %v432_v44, %v430_v43 }
  0xc5   : > { %v446_v32 = vld [vmem:[%s2585_s13 + $0x520] sm:$0xff] }
  0xc6   : > { %1837 = vmatpush1.bf16.msra.mxu1 %v1836_v58  ;;  %v421_v58 = vld [vmem:[%s2585_s13 + $0x458] sm:$0xff]  ;;  %v842_v63 = vcombine.high %v2918_v54, %v2918_v54  ;;  %v702_v35 = vld [vmem:[%s2585_s13 + $0xd20] sm:$0xff] }
  0xc7   : > { %2093 = vmatpush1.bf16.msra.mxu0 %v2092_v59  ;;  %1839 = vmatprep.subr.bf16.mxu1 %v1838_v60  ;;  %v2930_v59 = vrot.slane %v2923_v55, %v2692_v11  ;;  %v675_v60 = vld [vmem:[%s2585_s13 + $0xc48] sm:$0xff]  ;;  %v1858_v2 = vpack.c.bf16 %v421_v58, %v419_v57  ;;  %v436_v57 = vld [vmem:[%s2585_s13 + $0x4d0] sm:$0xff]  ;;  %v690_v58 = vld [vmem:[%s2585_s13 + $0xcc0] sm:$0xff] }
  0xc8   : > { %2095 = vmatprep.subr.bf16.mxu0 %v2094_v1  ;;  %v2114_v6 = vpack.c.bf16 %v677_v62, %v675_v60  ;;  %v692_v62 = vld [vmem:[%s2585_s13 + $0xcd0] sm:$0xff] }
  0xc9   : > { %v876_v1 = vcombine.high %v2930_v59, %v2930_v59  ;;  %v2132_v3 = vpack.c.bf16 %v692_v62, %v690_v58  ;;  %v454_v58 = vld [vmem:[%s2585_s13 + $0x560] sm:$0xff] }
  0xca   : > { %1841 = vmatpush1.bf16.msra.mxu1 %v1840_v7  ;;  %v676_v7 = vld [vmem:[%s2585_s13 + $0xc50] sm:$0xff]  ;;  %v710_v62 = vld [vmem:[%s2585_s13 + $0xd60] sm:$0xff] }
  0xcb   : > { %2097 = vmatpush1.bf16.msra.mxu0 %v2096_v8  ;;  %1843 = vmatprep.subr.bf16.mxu1 %v1842_v9  ;;  %v425_v8 = vld [vmem:[%s2585_s13 + $0x478] sm:$0xff]  ;;  %v679_v9 = vld [vmem:[%s2585_s13 + $0xc68] sm:$0xff]  ;;  %v2116_v13 = vpack.c.bf16 %v676_v7, %v674_v5  ;;  %v438_v5 = vld [vmem:[%s2585_s13 + $0x4e0] sm:$0xff] }
  0xcc   : > { %2099 = vmatprep.subr.bf16.mxu0 %v2098_v14  ;;  %v2118_v18 = vpack.c.bf16 %v681_v10, %v679_v9  ;;  %v694_v7 = vld [vmem:[%s2585_s13 + $0xce0] sm:$0xff]  ;;  %v443_v9 = vld [vmem:[%s2585_s13 + $0x508] sm:$0xff]  ;;  %v445_v10 = vld [vmem:[%s2585_s13 + $0x518] sm:$0xff] }
  0xcd   : > { %v1882_v16 = vpack.c.bf16 %v445_v10, %v443_v9  ;;  %v716_v10 = vld [vmem:[%s2585_s13 + $0xd90] sm:$0xff] }
  0xce   : > { %1845 = vmatpush1.bf16.msra.mxu1 %v1844_v20  ;;  %v427_v20 = vld [vmem:[%s2585_s13 + $0x488] sm:$0xff] }
  0xcf   : > { %2101 = vmatpush1.bf16.msra.mxu0 %v2100_v21  ;;  %1847 = vmatprep.subr.bf16.mxu1 %v1846_v22  ;;  %v429_v21 = vld [vmem:[%s2585_s13 + $0x498] sm:$0xff]  ;;  %v683_v22 = vld [vmem:[%s2585_s13 + $0xc88] sm:$0xff] }
  0xd0   : > { %2103 = vmatprep.subr.bf16.mxu0 %v2102_v27  ;;  %v1866_v27 = vpack.c.bf16 %v429_v21, %v427_v20  ;;  %v2122_v34 = vpack.c.bf16 %v685_v23, %v683_v22  ;;  %v700_v21 = vld [vmem:[%s2585_s13 + $0xd10] sm:$0xff]  ;;  %v447_v22 = vld [vmem:[%s2585_s13 + $0x528] sm:$0xff]  ;;  %v449_v23 = vld [vmem:[%s2585_s13 + $0x538] sm:$0xff] }
  0xd1   : > { %v2140_v29 = vpack.c.bf16 %v700_v21, %v698_v19  ;;  %v1886_v31 = vpack.c.bf16 %v449_v23, %v447_v22  ;;  %v462_v19 = vld [vmem:[%s2585_s13 + $0x5a0] sm:$0xff]  ;;  %v720_v23 = vld [vmem:[%s2585_s13 + $0xdb0] sm:$0xff] }
  0xd2   : > { %1849 = vmatpush1.bf16.msra.mxu1 %v1848_v36  ;;  %v431_v36 = vld [vmem:[%s2585_s13 + $0x4a8] sm:$0xff]  ;;  %v718_v21 = vld [vmem:[%s2585_s13 + $0xda0] sm:$0xff] }
  0xd3   : > { %2105 = vmatpush1.bf16.msra.mxu0 %v2104_v37  ;;  %1851 = vmatprep.subr.bf16.mxu1 %v1850_v38  ;;  %v433_v37 = vld [vmem:[%s2585_s13 + $0x4b8] sm:$0xff]  ;;  %v687_v38 = vld [vmem:[%s2585_s13 + $0xca8] sm:$0xff] }
  0xd4   : > { %2107 = vmatprep.subr.bf16.mxu0 %v2106_v42  ;;  %v1870_v42 = vpack.c.bf16 %v433_v37, %v431_v36  ;;  %v2126_v46 = vpack.c.bf16 %v689_v39, %v687_v38  ;;  %v704_v37 = vld [vmem:[%s2585_s13 + $0xd30] sm:$0xff]  ;;  %v451_v38 = vld [vmem:[%s2585_s13 + $0x548] sm:$0xff]  ;;  %v453_v39 = vld [vmem:[%s2585_s13 + $0x558] sm:$0xff] }
  0xd5   : > { %1030 = vmatmul.mubr.f32.vlgmr.msra.gmra.mrb[0].mxu1 %v2767_v30  ;;  %v2112_v30 = vpack.c.bf16 %v672_v28, %v670_v53  ;;  %v2128_v53 = vpack.c.bf16 %v688_v47, %v686_v45  ;;  %v434_v28 = vld [vmem:[%s2585_s13 + $0x4c0] sm:$0xff]  ;;  %v2144_v43 = vpack.c.bf16 %v704_v37, %v702_v35  ;;  %v1890_v44 = vpack.c.bf16 %v453_v39, %v451_v38  ;;  %v724_v39 = vld [vmem:[%s2585_s13 + $0xdd0] sm:$0xff] }
  0xd6   : > { %1853 = vmatpush1.bf16.msra.mxu1 %v1852_v48  ;;  %1314 = vmatmul.mubr.f32.vlgmr.msra.gmra.mrb[0].mxu0 %v2772_v33  ;;  %v423_v33 = vld [vmem:[%s2585_s13 + $0x468] sm:$0xff]  ;;  %v450_v45 = vld [vmem:[%s2585_s13 + $0x540] sm:$0xff] }
  0xd7   : > { %2109 = vmatpush1.bf16.msra.mxu0 %v2108_v51  ;;  %1855 = vmatprep.subr.bf16.mxu1 %v1854_v25  ;;  %v1862_v14 = vpack.c.bf16 %v425_v8, %v423_v33  ;;  %v435_v48 = vld [vmem:[%s2585_s13 + $0x4c8] sm:$0xff]  ;;  %v693_v25 = vld [vmem:[%s2585_s13 + $0xcd8] sm:$0xff]  ;;  %v696_v8 = vld [vmem:[%s2585_s13 + $0xcf0] sm:$0xff] }
  0xd8   : > { %2111 = vmatprep.subr.bf16.mxu0 %v2110_v56  ;;  %1100 = vmatprep.mubr.f32.mxu1 %v842_v63  ;;  %v691_v51 = vld [vmem:[%s2585_s13 + $0xcc8] sm:$0xff]  ;;  %v1874_v56 = vpack.c.bf16 %v437_v49, %v435_v48  ;;  %v2136_v15 = vpack.c.bf16 %v696_v8, %v694_v7  ;;  %v706_v47 = vld [vmem:[%s2585_s13 + $0xd40] sm:$0xff]  ;;  %v708_v49 = vld [vmem:[%s2585_s13 + $0xd50] sm:$0xff] }
  0xd9   : > { %1384 = vmatprep.mubr.f32.mxu0 %v876_v1  ;;  %v2130_v60 = vpack.c.bf16 %v693_v25, %v691_v51  ;;  %v439_v63 = vld [vmem:[%s2585_s13 + $0x4e8] sm:$0xff]  ;;  %v457_v25 = vld [vmem:[%s2585_s13 + $0x578] sm:$0xff]  ;;  %v458_v7 = vld [vmem:[%s2585_s13 + $0x580] sm:$0xff] }
  0xda   : > { %1857 = vmatpush1.bf16.msra.mxu1 %v1856_v0  ;;  %v441_v0 = vld [vmem:[%s2585_s13 + $0x4f8] sm:$0xff]  ;;  %v695_v1 = vld [vmem:[%s2585_s13 + $0xce8] sm:$0xff]  ;;  %v714_v8 = vld [vmem:[%s2585_s13 + $0xd80] sm:$0xff] }
  0xdb   : > { %2113 = vmatpush1.bf16.msra.mxu0 %v2112_v30  ;;  %1859 = vmatprep.subr.bf16.mxu1 %v1858_v2  ;;  %v697_v30 = vld [vmem:[%s2585_s13 + $0xcf8] sm:$0xff]  ;;  %v1876_v2 = vpack.c.bf16 %v436_v57, %v434_v28  ;;  %v1878_v4 = vpack.c.bf16 %v441_v0, %v439_v63  ;;  %v455_v51 = vld [vmem:[%s2585_s13 + $0x568] sm:$0xff]  ;;  %v2148_v28 = vpack.c.bf16 %v708_v49, %v706_v47  ;;  %v712_v0 = vld [vmem:[%s2585_s13 + $0xd70] sm:$0xff] }
  0xdc   : > { %2115 = vmatprep.subr.bf16.mxu0 %v2114_v6  ;;  %v440_v6 = vld [vmem:[%s2585_s13 + $0x4f0] sm:$0xff]  ;;  %v2134_v33 = vpack.c.bf16 %v697_v30, %v695_v1  ;;  %v1894_v57 = vpack.c.bf16 %v457_v25, %v455_v51  ;;  %v459_v1 = vld [vmem:[%s2585_s13 + $0x588] sm:$0xff]  ;;  %v461_v30 = vld [vmem:[%s2585_s13 + $0x598] sm:$0xff] }
  0xdd   : > { %v466_v35 = vld [vmem:[%s2585_s13 + $0x5c0] sm:$0xff]  ;;  %v728_v25 = vld [vmem:[%s2585_s13 + $0xdf0] sm:$0xff] }
  0xde   : > { %1861 = vmatpush1.bf16.msra.mxu1 %v1860_v12  ;;  %v699_v12 = vld [vmem:[%s2585_s13 + $0xd08] sm:$0xff]  ;;  %v722_v37 = vld [vmem:[%s2585_s13 + $0xdc0] sm:$0xff] }
  0xdf   : > { %2117 = vmatpush1.bf16.msra.mxu0 %v2116_v13  ;;  %1863 = vmatprep.subr.bf16.mxu1 %v1862_v14  ;;  %v701_v13 = vld [vmem:[%s2585_s13 + $0xd18] sm:$0xff]  ;;  %v1880_v14 = vpack.c.bf16 %v440_v6, %v438_v5  ;;  %v2152_v5 = vpack.c.bf16 %v712_v0, %v710_v62  ;;  %v1898_v6 = vpack.c.bf16 %v461_v30, %v459_v1  ;;  %v470_v47 = vld [vmem:[%s2585_s13 + $0x5e0] sm:$0xff]  ;;  %v476_v1 = vld [vmem:[%s2585_s13 + $0x610] sm:$0xff] }
  0xe0   : > { %2119 = vmatprep.subr.bf16.mxu0 %v2118_v18  ;;  %v444_v18 = vld [vmem:[%s2585_s13 + $0x510] sm:$0xff]  ;;  %v2138_v20 = vpack.c.bf16 %v701_v13, %v699_v12  ;;  %v463_v12 = vld [vmem:[%s2585_s13 + $0x5a8] sm:$0xff]  ;;  %v465_v13 = vld [vmem:[%s2585_s13 + $0x5b8] sm:$0xff] }
  0xe1   : > { %v726_v49 = vld [vmem:[%s2585_s13 + $0xde0] sm:$0xff] }
  0xe2   : > { %1865 = vmatpush1.bf16.msra.mxu1 %v1864_v24  ;;  %v703_v24 = vld [vmem:[%s2585_s13 + $0xd28] sm:$0xff]  ;;  %v2168_v62 = vpack.c.bf16 %v728_v25, %v726_v49  ;;  %v474_v0 = vld [vmem:[%s2585_s13 + $0x600] sm:$0xff]  ;;  %v492_v25 = vld [vmem:[%s2585_s13 + $0x690] sm:$0xff] }
  0xe3   : > { %2121 = vmatpush1.bf16.msra.mxu0 %v2120_v26  ;;  %1867 = vmatprep.subr.bf16.mxu1 %v1866_v27  ;;  %v705_v26 = vld [vmem:[%s2585_s13 + $0xd38] sm:$0xff]  ;;  %v1884_v27 = vpack.c.bf16 %v444_v18, %v442_v17  ;;  %v2156_v17 = vpack.c.bf16 %v716_v10, %v714_v8  ;;  %v1902_v18 = vpack.c.bf16 %v465_v13, %v463_v12  ;;  %v730_v30 = vld [vmem:[%s2585_s13 + $0xe00] sm:$0xff]  ;;  %v480_v12 = vld [vmem:[%s2585_s13 + $0x630] sm:$0xff] }
  0xe4   : > { %2123 = vmatprep.subr.bf16.mxu0 %v2122_v34  ;;  %v448_v34 = vld [vmem:[%s2585_s13 + $0x530] sm:$0xff]  ;;  %v2142_v36 = vpack.c.bf16 %v705_v26, %v703_v24  ;;  %v467_v24 = vld [vmem:[%s2585_s13 + $0x5c8] sm:$0xff]  ;;  %v469_v26 = vld [vmem:[%s2585_s13 + $0x5d8] sm:$0xff] }
  0xe5   : > { %v478_v10 = vld [vmem:[%s2585_s13 + $0x620] sm:$0xff] }
  0xe6   : > { %1869 = vmatpush1.bf16.msra.mxu1 %v1868_v40  ;;  %v707_v40 = vld [vmem:[%s2585_s13 + $0xd48] sm:$0xff]  ;;  %v734_v13 = vld [vmem:[%s2585_s13 + $0xe20] sm:$0xff] }
  0xe7   : > { %2125 = vmatpush1.bf16.msra.mxu0 %v2124_v41  ;;  %1871 = vmatprep.subr.bf16.mxu1 %v1870_v42  ;;  %v709_v41 = vld [vmem:[%s2585_s13 + $0xd58] sm:$0xff]  ;;  %v1888_v42 = vpack.c.bf16 %v448_v34, %v446_v32  ;;  %v2160_v32 = vpack.c.bf16 %v720_v23, %v718_v21  ;;  %v1906_v34 = vpack.c.bf16 %v469_v26, %v467_v24  ;;  %v482_v24 = vld [vmem:[%s2585_s13 + $0x640] sm:$0xff] }
  0xe8   : > { %2127 = vmatprep.subr.bf16.mxu0 %v2126_v46  ;;  %v452_v46 = vld [vmem:[%s2585_s13 + $0x550] sm:$0xff]  ;;  %v2146_v48 = vpack.c.bf16 %v709_v41, %v707_v40  ;;  %v471_v40 = vld [vmem:[%s2585_s13 + $0x5e8] sm:$0xff]  ;;  %v473_v41 = vld [vmem:[%s2585_s13 + $0x5f8] sm:$0xff]  ;;  %v1920_v21 = vpack.c.bf16 %v480_v12, %v478_v10 }
  0xe9   : > { %v738_v26 = vld [vmem:[%s2585_s13 + $0xe40] sm:$0xff] }
  0xea   : > { %1873 = vmatpush1.bf16.msra.mxu1 %v1872_v52  ;;  %v711_v52 = vld [vmem:[%s2585_s13 + $0xd68] sm:$0xff]  ;;  %v498_v12 = vld [vmem:[%s2585_s13 + $0x6c0] sm:$0xff] }
  0xeb   : > { %2129 = vmatpush1.bf16.msra.mxu0 %v2128_v53  ;;  %1875 = vmatprep.subr.bf16.mxu1 %v1874_v56  ;;  %v713_v53 = vld [vmem:[%s2585_s13 + $0xd78] sm:$0xff]  ;;  %v1892_v56 = vpack.c.bf16 %v452_v46, %v450_v45  ;;  %v2164_v45 = vpack.c.bf16 %v724_v39, %v722_v37  ;;  %v1910_v46 = vpack.c.bf16 %v473_v41, %v471_v40  ;;  %v488_v39 = vld [vmem:[%s2585_s13 + $0x670] sm:$0xff]  ;;  %v742_v40 = vld [vmem:[%s2585_s13 + $0xe60] sm:$0xff] }
  0xec   : > { %2131 = vmatprep.subr.bf16.mxu0 %v2130_v60  ;;  %v456_v60 = vld [vmem:[%s2585_s13 + $0x570] sm:$0xff]  ;;  %v2150_v63 = vpack.c.bf16 %v713_v53, %v711_v52  ;;  %v475_v52 = vld [vmem:[%s2585_s13 + $0x608] sm:$0xff]  ;;  %v477_v53 = vld [vmem:[%s2585_s13 + $0x618] sm:$0xff] }
  0xee   : > { %1877 = vmatpush1.bf16.msra.mxu1 %v1876_v2  ;;  %v715_v2 = vld [vmem:[%s2585_s13 + $0xd88] sm:$0xff] }
  0xef   : > { %2133 = vmatpush1.bf16.msra.mxu0 %v2132_v3  ;;  %1879 = vmatprep.subr.bf16.mxu1 %v1878_v4  ;;  %v717_v3 = vld [vmem:[%s2585_s13 + $0xd98] sm:$0xff]  ;;  %v1896_v4 = vpack.c.bf16 %v456_v60, %v454_v58  ;;  %v861_v58 = vcombine.high %v2923_v55, %v2923_v55 }
  0xf0   : > { %2135 = vmatprep.subr.bf16.mxu0 %v2134_v33  ;;  %v460_v33 = vld [vmem:[%s2585_s13 + $0x590] sm:$0xff]  ;;  %v2154_v9 = vpack.c.bf16 %v717_v3, %v715_v2  ;;  %v479_v3 = vld [vmem:[%s2585_s13 + $0x628] sm:$0xff] }
  0xf1   : > { %v732_v2 = vld [vmem:[%s2585_s13 + $0xe10] sm:$0xff] }
  0xf2   : > { %1881 = vmatpush1.bf16.msra.mxu1 %v1880_v14  ;;  %v719_v14 = vld [vmem:[%s2585_s13 + $0xda8] sm:$0xff]  ;;  %v2172_v8 = vpack.c.bf16 %v732_v2, %v730_v30  ;;  %v496_v30 = vld [vmem:[%s2585_s13 + $0x6b0] sm:$0xff] }
  0xf3   : > { %2137 = vmatpush1.bf16.msra.mxu0 %v2136_v15  ;;  %1883 = vmatprep.subr.bf16.mxu1 %v1882_v16  ;;  %v721_v15 = vld [vmem:[%s2585_s13 + $0xdb8] sm:$0xff]  ;;  %v1900_v16 = vpack.c.bf16 %v460_v33, %v458_v7  ;;  %v3068_v7 = vrot.slane %v861_v58, %v2692_v11  ;;  %v1916_v33 = vpack.c.bf16 %v476_v1, %v474_v0  ;;  %v751_v58 = vld [vmem:[%s2585_s13 + $0xea8] sm:$0xff]  ;;  %v494_v1 = vld [vmem:[%s2585_s13 + $0x6a0] sm:$0xff] }
  0xf4   : > { %2139 = vmatprep.subr.bf16.mxu0 %v2138_v20  ;;  %v464_v20 = vld [vmem:[%s2585_s13 + $0x5b0] sm:$0xff]  ;;  %v2158_v22 = vpack.c.bf16 %v721_v15, %v719_v14 }
  0xf5   : > { %v736_v15 = vld [vmem:[%s2585_s13 + $0xe30] sm:$0xff] }
  0xf6   : > { %1885 = vmatpush1.bf16.msra.mxu1 %v1884_v27  ;;  %v723_v27 = vld [vmem:[%s2585_s13 + $0xdc8] sm:$0xff] }
  0xf7   : > { %2141 = vmatpush1.bf16.msra.mxu0 %v2140_v29  ;;  %1887 = vmatprep.subr.bf16.mxu1 %v1886_v31  ;;  %v725_v29 = vld [vmem:[%s2585_s13 + $0xdd8] sm:$0xff]  ;;  %v1904_v31 = vpack.c.bf16 %v464_v20, %v462_v19  ;;  %v877_v20 = vcombine.high %v3068_v7, %v3068_v7 }
  0xf8   : > { %2143 = vmatprep.subr.bf16.mxu0 %v2142_v36  ;;  %v468_v36 = vld [vmem:[%s2585_s13 + $0x5d0] sm:$0xff]  ;;  %v2162_v38 = vpack.c.bf16 %v725_v29, %v723_v27  ;;  %v741_v19 = vld [vmem:[%s2585_s13 + $0xe58] sm:$0xff] }
  0xf9   : > { %v740_v29 = vld [vmem:[%s2585_s13 + $0xe50] sm:$0xff] }
  0xfa   : > { %1889 = vmatpush1.bf16.msra.mxu1 %v1888_v42  ;;  %v727_v42 = vld [vmem:[%s2585_s13 + $0xde8] sm:$0xff] }
  0xfb   : > { %2145 = vmatpush1.bf16.msra.mxu0 %v2144_v43  ;;  %1891 = vmatprep.subr.bf16.mxu1 %v1890_v44  ;;  %v729_v43 = vld [vmem:[%s2585_s13 + $0xdf8] sm:$0xff]  ;;  %v1908_v44 = vpack.c.bf16 %v468_v36, %v466_v35  ;;  %v2180_v36 = vpack.c.bf16 %v740_v29, %v738_v26  ;;  %v507_v29 = vld [vmem:[%s2585_s13 + $0x708] sm:$0xff] }
  0xfc   : > { %2147 = vmatprep.subr.bf16.mxu0 %v2146_v48  ;;  %v472_v48 = vld [vmem:[%s2585_s13 + $0x5f0] sm:$0xff]  ;;  %v2166_v51 = vpack.c.bf16 %v729_v43, %v727_v42  ;;  %v491_v43 = vld [vmem:[%s2585_s13 + $0x688] sm:$0xff] }
  0xfd   : > { %v1912_v60 = vpack.c.bf16 %v472_v48, %v470_v47  ;;  %v744_v42 = vld [vmem:[%s2585_s13 + $0xe70] sm:$0xff] }
  0xfe   : > { %1893 = vmatpush1.bf16.msra.mxu1 %v1892_v56  ;;  %v827_v56 = vcombine.high %v2912_v50, %v2912_v50  ;;  %v2184_v48 = vpack.c.bf16 %v744_v42, %v742_v40  ;;  %v511_v42 = vld [vmem:[%s2585_s13 + $0x728] sm:$0xff] }
  0xff   : > { %2149 = vmatpush1.bf16.msra.mxu0 %v2148_v28  ;;  %1895 = vmatprep.subr.bf16.mxu1 %v1894_v57  ;;  %v731_v28 = vld [vmem:[%s2585_s13 + $0xe08] sm:$0xff]  ;;  %v733_v57 = vld [vmem:[%s2585_s13 + $0xe18] sm:$0xff] }
 0x100   : > { %2151 = vmatprep.subr.bf16.mxu0 %v2150_v63  ;;  %v1914_v63 = vpack.c.bf16 %v477_v53, %v475_v52  ;;  %v2170_v50 = vpack.c.bf16 %v733_v57, %v731_v28  ;;  %v3063_v55 = vrot.slane %v827_v56, %v2692_v11  ;;  %v485_v11 = vld [vmem:[%s2585_s13 + $0x658] sm:$0xff]  ;;  %v746_v52 = vld [vmem:[%s2585_s13 + $0xe80] sm:$0xff]  ;;  %v748_v56 = vld [vmem:[%s2585_s13 + $0xe90] sm:$0xff] }
 0x101   : > { %v495_v28 = vld [vmem:[%s2585_s13 + $0x6a8] sm:$0xff]  ;;  %v497_v57 = vld [vmem:[%s2585_s13 + $0x6b8] sm:$0xff] }
 0x102   : > { %1897 = vmatpush1.bf16.msra.mxu1 %v1896_v4  ;;  %v481_v4 = vld [vmem:[%s2585_s13 + $0x638] sm:$0xff]  ;;  %v1934_v0 = vpack.c.bf16 %v497_v57, %v495_v28  ;;  %v771_v57 = vld [vmem:[%s2585_s13 + $0xf48] sm:$0xff] }
 0x103   : > { %2153 = vmatpush1.bf16.msra.mxu0 %v2152_v5  ;;  %1899 = vmatprep.subr.bf16.mxu1 %v1898_v6  ;;  %v735_v5 = vld [vmem:[%s2585_s13 + $0xe28] sm:$0xff]  ;;  %v737_v6 = vld [vmem:[%s2585_s13 + $0xe38] sm:$0xff] }
 0x104   : > { %2155 = vmatprep.subr.bf16.mxu0 %v2154_v9  ;;  %v1918_v9 = vpack.c.bf16 %v481_v4, %v479_v3  ;;  %v2174_v14 = vpack.c.bf16 %v737_v6, %v735_v5  ;;  %v752_v3 = vld [vmem:[%s2585_s13 + $0xeb0] sm:$0xff]  ;;  %v499_v4 = vld [vmem:[%s2585_s13 + $0x6c8] sm:$0xff]  ;;  %v501_v5 = vld [vmem:[%s2585_s13 + $0x6d8] sm:$0xff] }
 0x105   : > { %v755_v6 = vld [vmem:[%s2585_s13 + $0xec8] sm:$0xff]  ;;  %v1938_v10 = vpack.c.bf16 %v501_v5, %v499_v4  ;;  %v517_v28 = vld [vmem:[%s2585_s13 + $0x758] sm:$0xff] }
 0x106   : > { %1901 = vmatpush1.bf16.msra.mxu1 %v1900_v16  ;;  %v483_v16 = vld [vmem:[%s2585_s13 + $0x648] sm:$0xff]  ;;  %v521_v4 = vld [vmem:[%s2585_s13 + $0x778] sm:$0xff] }
 0x107   : > { %2157 = vmatpush1.bf16.msra.mxu0 %v2156_v17  ;;  %1903 = vmatprep.subr.bf16.mxu1 %v1902_v18  ;;  %v843_v17 = vcombine.high %v3063_v55, %v3063_v55  ;;  %v739_v18 = vld [vmem:[%s2585_s13 + $0xe48] sm:$0xff]  ;;  %v1922_v23 = vpack.c.bf16 %v485_v11, %v483_v16  ;;  %v756_v16 = vld [vmem:[%s2585_s13 + $0xed0] sm:$0xff] }
 0x108   : > { %2159 = vmatprep.subr.bf16.mxu0 %v2158_v22  ;;  %v2176_v22 = vpack.c.bf16 %v736_v15, %v734_v13  ;;  %v2178_v27 = vpack.c.bf16 %v741_v19, %v739_v18  ;;  %v500_v13 = vld [vmem:[%s2585_s13 + $0x6d0] sm:$0xff]  ;;  %v503_v11 = vld [vmem:[%s2585_s13 + $0x6e8] sm:$0xff]  ;;  %v761_v19 = vld [vmem:[%s2585_s13 + $0xef8] sm:$0xff] }
 0x109   : > { %v759_v18 = vld [vmem:[%s2585_s13 + $0xee8] sm:$0xff] }
 0x10a   : > { %1905 = vmatpush1.bf16.msra.mxu1 %v1904_v31  ;;  %v487_v31 = vld [vmem:[%s2585_s13 + $0x668] sm:$0xff]  ;;  %v2198_v26 = vpack.c.bf16 %v761_v19, %v759_v18  ;;  %v781_v18 = vld [vmem:[%s2585_s13 + $0xf98] sm:$0xff] }
 0x10b   : > { %2161 = vmatpush1.bf16.msra.mxu0 %v2160_v32  ;;  %1907 = vmatprep.subr.bf16.mxu1 %v1906_v34  ;;  %v489_v32 = vld [vmem:[%s2585_s13 + $0x678] sm:$0xff]  ;;  %v775_v5 = vld [vmem:[%s2585_s13 + $0xf68] sm:$0xff] }
 0x10c   : > { %2163 = vmatprep.subr.bf16.mxu0 %v2162_v38  ;;  %v745_v34 = vld [vmem:[%s2585_s13 + $0xe78] sm:$0xff]  ;;  %v1926_v37 = vpack.c.bf16 %v489_v32, %v487_v31  ;;  %v486_v38 = vld [vmem:[%s2585_s13 + $0x660] sm:$0xff]  ;;  %v763_v32 = vld [vmem:[%s2585_s13 + $0xf08] sm:$0xff] }
 0x10d   : > { %v1928_v47 = vpack.c.bf16 %v488_v39, %v486_v38  ;;  %v509_v31 = vld [vmem:[%s2585_s13 + $0x718] sm:$0xff]  ;;  %v508_v38 = vld [vmem:[%s2585_s13 + $0x710] sm:$0xff]  ;;  %v762_v39 = vld [vmem:[%s2585_s13 + $0xf00] sm:$0xff] }
 0x10e   : > { %1909 = vmatpush1.bf16.msra.mxu1 %v1908_v44  ;;  %v493_v44 = vld [vmem:[%s2585_s13 + $0x698] sm:$0xff] }
 0x10f   : > { %2165 = vmatpush1.bf16.msra.mxu0 %v2164_v45  ;;  %1911 = vmatprep.subr.bf16.mxu1 %v1910_v46  ;;  %v747_v45 = vld [vmem:[%s2585_s13 + $0xe88] sm:$0xff]  ;;  %v749_v46 = vld [vmem:[%s2585_s13 + $0xe98] sm:$0xff]  ;;  %v1930_v49 = vpack.c.bf16 %v493_v44, %v491_v43 }
 0x110   : > { %2167 = vmatprep.subr.bf16.mxu0 %v2166_v51  ;;  %v490_v51 = vld [vmem:[%s2585_s13 + $0x680] sm:$0xff]  ;;  %v2186_v53 = vpack.c.bf16 %v749_v46, %v747_v45  ;;  %v513_v43 = vld [vmem:[%s2585_s13 + $0x738] sm:$0xff]  ;;  %v767_v44 = vld [vmem:[%s2585_s13 + $0xf28] sm:$0xff] }
 0x111   : > { %v769_v45 = vld [vmem:[%s2585_s13 + $0xf38] sm:$0xff] }
 0x112   : > { %1913 = vmatpush1.bf16.msra.mxu1 %v1912_v60  ;;  %v753_v60 = vld [vmem:[%s2585_s13 + $0xeb8] sm:$0xff] }
 0x113   : > { %2169 = vmatpush1.bf16.msra.mxu0 %v2168_v62  ;;  %1915 = vmatprep.subr.bf16.mxu1 %v1914_v63  ;;  %v1932_v62 = vpack.c.bf16 %v492_v25, %v490_v51  ;;  %v2188_v63 = vpack.c.bf16 %v748_v56, %v746_v52  ;;  %v2190_v2 = vpack.c.bf16 %v753_v60, %v751_v58  ;;  %v512_v51 = vld [vmem:[%s2585_s13 + $0x730] sm:$0xff]  ;;  %v766_v25 = vld [vmem:[%s2585_s13 + $0xf20] sm:$0xff]  ;;  %v515_v56 = vld [vmem:[%s2585_s13 + $0x748] sm:$0xff] }
 0x114   : > { %2171 = vmatprep.subr.bf16.mxu0 %v2170_v50  ;;  %v750_v50 = vld [vmem:[%s2585_s13 + $0xea0] sm:$0xff]  ;;  %v2206_v52 = vpack.c.bf16 %v769_v45, %v767_v44  ;;  %v773_v58 = vld [vmem:[%s2585_s13 + $0xf58] sm:$0xff] }
 0x115   : > { %1101 = vmatmul.mubr.f32.vlgmr.msra.gmra.mrb[0].mxu1 %v2918_v54  ;;  %v484_v54 = vld [vmem:[%s2585_s13 + $0x650] sm:$0xff]  ;;  %v789_v44 = vld [vmem:[%s2585_s13 + $0xfd8] sm:$0xff] }
 0x116   : > { %1917 = vmatpush1.bf16.msra.mxu1 %v1916_v33  ;;  %1385 = vmatmul.mubr.f32.vlgmr.msra.gmra.mrb[0].mxu0 %v2930_v59  ;;  %v743_v59 = vld [vmem:[%s2585_s13 + $0xe68] sm:$0xff]  ;;  %v1924_v35 = vpack.c.bf16 %v484_v54, %v482_v24  ;;  %v757_v33 = vld [vmem:[%s2585_s13 + $0xed8] sm:$0xff]  ;;  %v504_v24 = vld [vmem:[%s2585_s13 + $0x6f0] sm:$0xff] }
 0x117   : > { %2173 = vmatpush1.bf16.msra.mxu0 %v2172_v8  ;;  %1919 = vmatprep.subr.bf16.mxu1 %v1918_v9  ;;  %v2182_v41 = vpack.c.bf16 %v745_v34, %v743_v59  ;;  %v1936_v8 = vpack.c.bf16 %v496_v30, %v494_v1  ;;  %v2192_v9 = vpack.c.bf16 %v752_v3, %v750_v50  ;;  %v758_v54 = vld [vmem:[%s2585_s13 + $0xee0] sm:$0xff]  ;;  %v765_v59 = vld [vmem:[%s2585_s13 + $0xf18] sm:$0xff]  ;;  %v516_v1 = vld [vmem:[%s2585_s13 + $0x750] sm:$0xff] }
 0x118   : > { %2175 = vmatprep.subr.bf16.mxu0 %v2174_v14  ;;  %1171 = vmatprep.mubr.f32.mxu1 %v843_v17  ;;  %v754_v14 = vld [vmem:[%s2585_s13 + $0xec0] sm:$0xff]  ;;  %v2194_v15 = vpack.c.bf16 %v757_v33, %v755_v6  ;;  %v505_v17 = vld [vmem:[%s2585_s13 + $0x6f8] sm:$0xff]  ;;  %v2202_v40 = vpack.c.bf16 %v765_v59, %v763_v32  ;;  %v2210_v50 = vpack.c.bf16 %v773_v58, %v771_v57  ;;  %v519_v3 = vld [vmem:[%s2585_s13 + $0x768] sm:$0xff] }
 0x119   : > { %1455 = vmatprep.mubr.f32.mxu0 %v877_v20  ;;  %v1940_v20 = vpack.c.bf16 %v500_v13, %v498_v12  ;;  %v770_v30 = vld [vmem:[%s2585_s13 + $0xf40] sm:$0xff]  ;;  %v777_v6 = vld [vmem:[%s2585_s13 + $0xf78] sm:$0xff]  ;;  %v520_v12 = vld [vmem:[%s2585_s13 + $0x770] sm:$0xff] }
 0x11a   : > { %1921 = vmatpush1.bf16.msra.mxu1 %v1920_v21  ;;  %v2196_v21 = vpack.c.bf16 %v756_v16, %v754_v14  ;;  %v774_v13 = vld [vmem:[%s2585_s13 + $0xf60] sm:$0xff]  ;;  %v2214_v14 = vpack.c.bf16 %v777_v6, %v775_v5  ;;  %v523_v16 = vld [vmem:[%s2585_s13 + $0x788] sm:$0xff]  ;;  %v785_v32 = vld [vmem:[%s2585_s13 + $0xfb8] sm:$0xff] }
 0x11b   : > { %2177 = vmatpush1.bf16.msra.mxu0 %v2176_v22  ;;  %1923 = vmatprep.subr.bf16.mxu1 %v1922_v23  ;;  %v1942_v22 = vpack.c.bf16 %v505_v17, %v503_v11  ;;  %v502_v23 = vld [vmem:[%s2585_s13 + $0x6e0] sm:$0xff]  ;;  %v525_v11 = vld [vmem:[%s2585_s13 + $0x798] sm:$0xff]  ;;  %v779_v17 = vld [vmem:[%s2585_s13 + $0xf88] sm:$0xff] }
 0x11c   : > { %2179 = vmatprep.subr.bf16.mxu0 %v2178_v27  ;;  %v760_v27 = vld [vmem:[%s2585_s13 + $0xef0] sm:$0xff]  ;;  %v1944_v34 = vpack.c.bf16 %v504_v24, %v502_v23  ;;  %v778_v24 = vld [vmem:[%s2585_s13 + $0xf80] sm:$0xff]  ;;  %v793_v57 = vld [vmem:[%s2585_s13 + $0xff8] sm:$0xff] }
 0x11d   : > { %v524_v23 = vld [vmem:[%s2585_s13 + $0x790] sm:$0xff] }
 0x11e   : > { %1925 = vmatpush1.bf16.msra.mxu1 %v1924_v35  ;;  %v2200_v35 = vpack.c.bf16 %v760_v27, %v758_v54  ;;  %v2218_v54 = vpack.c.bf16 %v781_v18, %v779_v17  ;;  %v527_v27 = vld [vmem:[%s2585_s13 + $0x7a8] sm:$0xff] }
 0x11f   : > { %2181 = vmatpush1.bf16.msra.mxu0 %v2180_v36  ;;  %1927 = vmatprep.subr.bf16.mxu1 %v1926_v37  ;;  %v1946_v36 = vpack.c.bf16 %v509_v31, %v507_v29  ;;  %v506_v37 = vld [vmem:[%s2585_s13 + $0x700] sm:$0xff]  ;;  %v529_v29 = vld [vmem:[%s2585_s13 + $0x7b8] sm:$0xff]  ;;  %v783_v31 = vld [vmem:[%s2585_s13 + $0xfa8] sm:$0xff] }
 0x120   : > { %2183 = vmatprep.subr.bf16.mxu0 %v2182_v41  ;;  %v764_v41 = vld [vmem:[%s2585_s13 + $0xf10] sm:$0xff]  ;;  %v1948_v46 = vpack.c.bf16 %v508_v38, %v506_v37  ;;  %v782_v38 = vld [vmem:[%s2585_s13 + $0xfa0] sm:$0xff] }
 0x121   : > { %v528_v37 = vld [vmem:[%s2585_s13 + $0x7b0] sm:$0xff] }
 0x122   : > { %1929 = vmatpush1.bf16.msra.mxu1 %v1928_v47  ;;  %v2204_v47 = vpack.c.bf16 %v764_v41, %v762_v39  ;;  %v2222_v39 = vpack.c.bf16 %v785_v32, %v783_v31  ;;  %v531_v41 = vld [vmem:[%s2585_s13 + $0x7c8] sm:$0xff]  ;;  %v1472_v31 = vld [vmem:[%s3201_s29 + $0x40] sm:$0xff] }
 0x123   : > { %2185 = vmatpush1.bf16.msra.mxu0 %v2184_v48  ;;  %1931 = vmatprep.subr.bf16.mxu1 %v1930_v49  ;;  %v1950_v48 = vpack.c.bf16 %v513_v43, %v511_v42  ;;  %v510_v49 = vld [vmem:[%s2585_s13 + $0x720] sm:$0xff]  ;;  %v533_v42 = vld [vmem:[%s2585_s13 + $0x7d8] sm:$0xff]  ;;  %v787_v43 = vld [vmem:[%s2585_s13 + $0xfc8] sm:$0xff] }
 0x124   : > { %2187 = vmatprep.subr.bf16.mxu0 %v2186_v53  ;;  %v768_v53 = vld [vmem:[%s2585_s13 + $0xf30] sm:$0xff]  ;;  %v1952_v60 = vpack.c.bf16 %v512_v51, %v510_v49  ;;  %v786_v51 = vld [vmem:[%s2585_s13 + $0xfc0] sm:$0xff]  ;;  %v1473_v32 = vld [vmem:[%s3201_s29 + $0x48] sm:$0xff] }
 0x125   : > { %v532_v49 = vld [vmem:[%s2585_s13 + $0x7d0] sm:$0xff] }
 0x126   : > { %1933 = vmatpush1.bf16.msra.mxu1 %v1932_v62  ;;  %v2208_v62 = vpack.c.bf16 %v768_v53, %v766_v25  ;;  %v2226_v25 = vpack.c.bf16 %v789_v44, %v787_v43  ;;  %v535_v53 = vld [vmem:[%s2585_s13 + $0x7e8] sm:$0xff]  ;;  %v1476_v43 = vld [vmem:[%s3201_s29 + $0x60] sm:$0xff] }
 0x127   : > { %2189 = vmatpush1.bf16.msra.mxu0 %v2188_v63  ;;  %1935 = vmatprep.subr.bf16.mxu1 %v1934_v0  ;;  %v1954_v63 = vpack.c.bf16 %v517_v28, %v515_v56  ;;  %v514_v0 = vld [vmem:[%s2585_s13 + $0x740] sm:$0xff]  ;;  %v537_v56 = vld [vmem:[%s2585_s13 + $0x7f8] sm:$0xff]  ;;  %v791_v28 = vld [vmem:[%s2585_s13 + $0xfe8] sm:$0xff] }
 0x128   : > { %2191 = vmatprep.subr.bf16.mxu0 %v2190_v2  ;;  %v772_v2 = vld [vmem:[%s2585_s13 + $0xf50] sm:$0xff]  ;;  %v1956_v33 = vpack.c.bf16 %v516_v1, %v514_v0  ;;  %v790_v1 = vld [vmem:[%s2585_s13 + $0xfe0] sm:$0xff]  ;;  %v1477_v44 = vld [vmem:[%s3201_s29 + $0x68] sm:$0xff] }
 0x129   : > { %v536_v0 = vld [vmem:[%s2585_s13 + $0x7f0] sm:$0xff] }
 0x12a   : > { %1937 = vmatpush1.bf16.msra.mxu1 %v1936_v8  ;;  %v2212_v8 = vpack.c.bf16 %v772_v2, %v770_v30  ;;  %v2230_v30 = vpack.c.bf16 %v793_v57, %v791_v28  ;;  %v1480_v2 = vld [vmem:[%s3201_s29 + $0x80] sm:$0xff] }
 0x12b   : > { %2193 = vmatpush1.bf16.msra.mxu0 %v2192_v9  ;;  %1939 = vmatprep.subr.bf16.mxu1 %v1938_v10  ;;  %v1958_v9 = vpack.c.bf16 %v521_v4, %v519_v3  ;;  %v518_v10 = vld [vmem:[%s2585_s13 + $0x760] sm:$0xff]  ;;  %v1481_v3 = vld [vmem:[%s3201_s29 + $0x88] sm:$0xff] }
 0x12c   : > { %2195 = vmatprep.subr.bf16.mxu0 %v2194_v15  ;;  %v776_v15 = vld [vmem:[%s2585_s13 + $0xf70] sm:$0xff]  ;;  %v1960_v19 = vpack.c.bf16 %v520_v12, %v518_v10  ;;  %v2234_v6 = vpack.c.bf16 %v1481_v3, %v1480_v2  ;;  %v1483_v10 = vld [vmem:[%s3201_s29 + $0x98] sm:$0xff] }
 0x12e   : > { %1941 = vmatpush1.bf16.msra.mxu1 %v1940_v20  ;;  %v2216_v20 = vpack.c.bf16 %v776_v15, %v774_v13  ;;  %v1467_v15 = vld [vmem:[%s3201_s29 + $0x18] sm:$0xff] }
 0x12f   : > { %2197 = vmatpush1.bf16.msra.mxu0 %v2196_v21  ;;  %1943 = vmatprep.subr.bf16.mxu1 %v1942_v22  ;;  %v1962_v21 = vpack.c.bf16 %v525_v11, %v523_v16  ;;  %v522_v22 = vld [vmem:[%s2585_s13 + $0x780] sm:$0xff]  ;;  %v1485_v11 = vld [vmem:[%s3201_s29 + $0xa8] sm:$0xff] }
 0x130   : > { %2199 = vmatprep.subr.bf16.mxu0 %v2198_v26  ;;  %v780_v26 = vld [vmem:[%s2585_s13 + $0xf90] sm:$0xff]  ;;  %v1964_v59 = vpack.c.bf16 %v524_v23, %v522_v22  ;;  %v1484_v16 = vld [vmem:[%s3201_s29 + $0xa0] sm:$0xff]  ;;  %v1487_v22 = vld [vmem:[%s3201_s29 + $0xb8] sm:$0xff] }
 0x131   : > { %v2242_v18 = vpack.c.bf16 %v1485_v11, %v1484_v16 }
 0x132   : > { %1945 = vmatpush1.bf16.msra.mxu1 %v1944_v34  ;;  %v2220_v34 = vpack.c.bf16 %v780_v26, %v778_v24  ;;  %v1470_v24 = vld [vmem:[%s3201_s29 + $0x30] sm:$0xff]  ;;  %v1489_v26 = vld [vmem:[%s3201_s29 + $0xc8] sm:$0xff] }
 0x133   : > { %2201 = vmatpush1.bf16.msra.mxu0 %v2200_v35  ;;  %1947 = vmatprep.subr.bf16.mxu1 %v1946_v36  ;;  %v1966_v35 = vpack.c.bf16 %v529_v29, %v527_v27  ;;  %v526_v36 = vld [vmem:[%s2585_s13 + $0x7a0] sm:$0xff] }
 0x134   : > { %2203 = vmatprep.subr.bf16.mxu0 %v2202_v40  ;;  %v784_v40 = vld [vmem:[%s2585_s13 + $0xfb0] sm:$0xff]  ;;  %v1968_v45 = vpack.c.bf16 %v528_v37, %v526_v36 }
 0x135   : > { %v1474_v37 = vld [vmem:[%s3201_s29 + $0x50] sm:$0xff] }
 0x136   : > { %1949 = vmatpush1.bf16.msra.mxu1 %v1948_v46  ;;  %v2224_v46 = vpack.c.bf16 %v784_v40, %v782_v38  ;;  %v1475_v38 = vld [vmem:[%s3201_s29 + $0x58] sm:$0xff]  ;;  %v1492_v40 = vld [vmem:[%s3201_s29 + $0xe0] sm:$0xff] }
 0x137   : > { %2205 = vmatpush1.bf16.msra.mxu0 %v2204_v47  ;;  %1951 = vmatprep.subr.bf16.mxu1 %v1950_v48  ;;  %v1970_v47 = vpack.c.bf16 %v533_v42, %v531_v41  ;;  %v530_v48 = vld [vmem:[%s2585_s13 + $0x7c0] sm:$0xff]  ;;  %v1493_v41 = vld [vmem:[%s3201_s29 + $0xe8] sm:$0xff] }
 0x138   : > { %2207 = vmatprep.subr.bf16.mxu0 %v2206_v52  ;;  %v788_v52 = vld [vmem:[%s2585_s13 + $0xfd0] sm:$0xff]  ;;  %v1972_v58 = vpack.c.bf16 %v532_v49, %v530_v48  ;;  %v2258_v42 = vpack.c.bf16 %v1493_v41, %v1492_v40 }
 0x139   : > { %v1478_v49 = vld [vmem:[%s3201_s29 + $0x70] sm:$0xff] }
 0x13a   : > { %1953 = vmatpush1.bf16.msra.mxu1 %v1952_v60  ;;  %v2228_v60 = vpack.c.bf16 %v788_v52, %v786_v51  ;;  %v1479_v51 = vld [vmem:[%s3201_s29 + $0x78] sm:$0xff]  ;;  %v798_v52 = vsub.s32 0, %v2681_v61 }
 0x13b   : > { %2209 = vmatpush1.bf16.msra.mxu0 %v2208_v62  ;;  %1955 = vmatprep.subr.bf16.mxu1 %v1954_v63  ;;  %v1974_v62 = vpack.c.bf16 %v537_v56, %v535_v53  ;;  %v534_v63 = vld [vmem:[%s2585_s13 + $0x7e0] sm:$0xff]  ;;  %v802_v56 = vsub.s32 1, %v2681_v61 }
 0x13c   : > { %2211 = vmatprep.subr.bf16.mxu0 %v2210_v50  ;;  %v792_v50 = vld [vmem:[%s2585_s13 + $0xff0] sm:$0xff]  ;;  %v1976_v4 = vpack.c.bf16 %v536_v0, %v534_v63  ;;  %v794_v53 = vld [vmem:[%s2591_s6] sm:$0x3]  ;;  %s277_s13 = scalar_lea.vmem %s3266_s4, %s1682_s5 }
 0x13d   : > { %v2232_v5 = vpack.c.bf16 %v792_v50, %v790_v1  ;;  %v799_v28 = vrot.slane %v794_v53, %v798_v52  ;;  %v803_v57 = vrot.slane %v794_v53, %v802_v56 }
 0x13e   : > { %1957 = vmatpush1.bf16.msra.mxu1 %v1956_v33  ;;  %v1464_v33 = vld [vmem:[%s3201_s29] sm:$0xff] }
 0x13f   : > { %2213 = vmatpush1.bf16.msra.mxu0 %v2212_v8  ;;  %1959 = vmatprep.subr.bf16.mxu1 %v1958_v9  ;;  %v1465_v8 = vld [vmem:[%s3201_s29 + $0x8] sm:$0xff]  ;;  %v1482_v9 = vld [vmem:[%s3201_s29 + $0x90] sm:$0xff] }
 0x140   : > { %2215 = vmatprep.subr.bf16.mxu0 %v2214_v14  ;;  %v2236_v12 = vpack.c.bf16 %v1465_v8, %v1464_v33  ;;  %v2238_v13 = vpack.c.bf16 %v1483_v10, %v1482_v9  ;;  %v1466_v14 = vld [vmem:[%s3201_s29 + $0x10] sm:$0xff] }
 0x141   : > { %v2240_v17 = vpack.c.bf16 %v1467_v15, %v1466_v14 }
 0x142   : > { %1961 = vmatpush1.bf16.msra.mxu1 %v1960_v19  ;;  %v1468_v19 = vld [vmem:[%s3201_s29 + $0x20] sm:$0xff] }
 0x143   : > { %2217 = vmatpush1.bf16.msra.mxu0 %v2216_v20  ;;  %1963 = vmatprep.subr.bf16.mxu1 %v1962_v21  ;;  %v1469_v20 = vld [vmem:[%s3201_s29 + $0x28] sm:$0xff]  ;;  %v1486_v21 = vld [vmem:[%s3201_s29 + $0xb0] sm:$0xff] }
 0x144   : > { %2219 = vmatprep.subr.bf16.mxu0 %v2218_v54  ;;  %v2244_v23 = vpack.c.bf16 %v1469_v20, %v1468_v19  ;;  %v1488_v54 = vld [vmem:[%s3201_s29 + $0xc0] sm:$0xff] }
 0x145   : > { %v2250_v29 = vpack.c.bf16 %v1489_v26, %v1488_v54 }
 0x146   : > { %1965 = vmatpush1.bf16.msra.mxu1 %v1964_v59  ;;  %v1490_v59 = vld [vmem:[%s3201_s29 + $0xd0] sm:$0xff] }
 0x147   : > { %2221 = vmatpush1.bf16.msra.mxu0 %v2220_v34  ;;  %1967 = vmatprep.subr.bf16.mxu1 %v1966_v35  ;;  %v1491_v34 = vld [vmem:[%s3201_s29 + $0xd8] sm:$0xff]  ;;  %v2252_v35 = vpack.c.bf16 %v1473_v32, %v1472_v31 }
 0x148   : > { %2223 = vmatprep.subr.bf16.mxu0 %v2222_v39  ;;  %v2254_v36 = vpack.c.bf16 %v1491_v34, %v1490_v59  ;;  %v2256_v39 = vpack.c.bf16 %v1475_v38, %v1474_v37 }
 0x14a   : > { %1969 = vmatpush1.bf16.msra.mxu1 %v1968_v45  ;;  %v2260_v45 = vpack.c.bf16 %v1477_v44, %v1476_v43 }
 0x14b   : > { %2225 = vmatpush1.bf16.msra.mxu0 %v2224_v46  ;;  %1971 = vmatprep.subr.bf16.mxu1 %v1970_v47  ;;  %v1494_v46 = vld [vmem:[%s3201_s29 + $0xf0] sm:$0xff]  ;;  %v1495_v47 = vld [vmem:[%s3201_s29 + $0xf8] sm:$0xff] }
 0x14c   : > { %2227 = vmatprep.subr.bf16.mxu0 %v2226_v25  ;;  %v2262_v48 = vpack.c.bf16 %v1495_v47, %v1494_v46  ;;  %v2264_v25 = vpack.c.bf16 %v1479_v51, %v1478_v49 }
 0x14e   : > { %1973 = vmatpush1.bf16.msra.mxu1 %v1972_v58 }
 0x14f   : > { %2229 = vmatpush1.bf16.msra.mxu0 %v2228_v60  ;;  %1975 = vmatprep.subr.bf16.mxu1 %v1974_v62 }
 0x150   : > { %2231 = vmatprep.subr.bf16.mxu0 %v2230_v30 }
 0x152   : > { %1977 = vmatpush1.bf16.msra.mxu1 %v1976_v4 }
 0x153   : > { %2233 = vmatpush1.bf16.msra.mxu0 %v2232_v5  ;;  %2235 = vmatprep.subr.bf16.mxu1 %v2234_v6 }
 0x155   : > { %1172 = vmatmul.mubr.f32.vlgmr.msra.gmra.mrb[0].mxu1 %v3063_v55  ;;  %v2246_v55 = vpack.c.bf16 %v1487_v22, %v1486_v21 }
 0x156   : > { %1456 = vmatmul.mubr.f32.vlgmr.msra.gmra.mrb[0].mxu0 %v3068_v7  ;;  %2237 = vmatpush3.bf16.msra.mxu1 %v2236_v12  ;;  %v1471_v7 = vld [vmem:[%s3201_s29 + $0x38] sm:$0xff] }
 0x157   : > { %2239 = vmatprep.subr.bf16.mxu1 %v2238_v13  ;;  %v2248_v27 = vpack.c.bf16 %v1471_v7, %v1470_v24 }
 0x15a   : > { %2241 = vmatpush3.bf16.msra.mxu1 %v2240_v17 }
 0x15b   : > { %2243 = vmatprep.subr.bf16.mxu1 %v2242_v18 }
 0x15e   : > { %2245 = vmatpush3.bf16.msra.mxu1 %v2244_v23 }
 0x15f   : > { %2247 = vmatprep.subr.bf16.mxu1 %v2246_v55 }
 0x162   : > { %2249 = vmatpush3.bf16.msra.mxu1 %v2248_v27 }
 0x163   : > { %2251 = vmatprep.subr.bf16.mxu1 %v2250_v29 }
 0x166   : > { %2253 = vmatpush3.bf16.msra.mxu1 %v2252_v35 }
 0x167   : > { %2255 = vmatprep.subr.bf16.mxu1 %v2254_v36 }
 0x16a   : > { %2257 = vmatpush3.bf16.msra.mxu1 %v2256_v39 }
 0x16b   : > { %2259 = vmatprep.subr.bf16.mxu1 %v2258_v42 }
 0x16e   : > { %2261 = vmatpush3.bf16.msra.mxu1 %v2260_v45 }
 0x16f   : > { %2263 = vmatprep.subr.bf16.mxu1 %v2262_v48 }
 0x172   : > { %2265 = vmatpush3.bf16.msra.mxu1 %v2264_v25 }
 0x228   : > { %v1173_v58 = vpop.f32.mrb[0].mxu1 }
 0x229   : > { %v2266_v60 = vadd.f32 %v1173_v58, %v799_v28  ;;  %v1457_v62 = vpop.f32.mrb[0].mxu0  ;;  %v1175_v63 = vpop.f32.mrb[1].mxu1 }
 0x22a   : > { %v2268_v0 = vadd.f32 %v1175_v63, %v803_v57  ;;  %v1459_v1 = vpop.f32.mrb[1].mxu0 }
 0x22b   : > { %v2267_v30 = vadd.f32 %v2266_v60, %v1457_v62 }
 0x22c   : > { %v2269_v50 = vadd.f32 %v2268_v0, %v1459_v1 }
 0x22d   : > { %v1462_v3 = vmax.f32 %v2267_v30, 0.0 }
 0x22e   : > { %v1463_v2 = vmax.f32 %v2269_v50, 0.0 }
 0x230   : > { %1560 = vmatprep.mubr.f32.mxu1 %v1463_v2 }
 0x231   : > { %1561 = vmatmul.mubr.f32.vlgmr.msra.gmra.mrb[2].mxu1 %v1462_v3 }
 0x304   : > { %v1719_v4 = vpop.f32.mrb[2].mxu1 }
 0x305   : > { %v1720_v61 = vpop.f32.mrb[3].mxu1 }
 0x306   : > { %v1721_v5 = vadd.f32 %v1720_v61, %v1719_v4 }
 0x308   : > { %1567 = vst.msk [vmem:[%s277_s13] sm:$0x3] %vm1566_vm0, %v1721_v5 }
 0x309 PF: > { %p17_p3 = scmp.ge.s32.totalorder %s2487_s20, 4   ;;  %s3274_s15 = smov %s2424_s16 }
 0x30a   : > { %s3275_s16 = smov %s2428_s17  ;;  %s3276_s17 = smov %s2497_s23 }
 0x30b   : > { %s3277_s18 = smov %s2487_s20  ;;  %19 = sbr.rel (!%p17_p3) target bundleno = 5 (0x5), region = 92 }
 0x312   :  { %1587 = vsyncpa [#allocation3], 1 }
 0x313   :  { %1589 = vsyncpa [#allocation3 + $0x1], 1 }
 0x314   :  { %1590 = vsyncpa [#allocation5], 1 }
 0x315   :  { %1592 = vsyncpa [#allocation5 + $0x1], 1 }

// kernel: encoder_forward.2
= control target key start
LH: loop header
LB: loop body
LE: loop exit
PB: predicated region body
PF: predicated region fallthrough
CT: control target
= control target key end

     0   :  { %14 = vsyncpa [#allocation5], 0  ;;  %s12063_s0 = inlined_call_operand.vmem [shape: f32[2,1,66,128], index: 0, kind: input, shape index: {}]   ;;  %s12064_s1 = inlined_call_operand.hbm [shape: f32[36], index: 1, kind: input, shape index: {}]   ;;  %s12065_s2 = inlined_call_operand.hbm [shape: f32[4], index: 2, kind: input, shape index: {}]   ;;  %s12066_s3 = inlined_call_operand.hbm [shape: f32[36,256], index: 3, kind: input, shape index: {}]   ;;  %s12067_s4 = inlined_call_operand.hbm [shape: f32[1,256], index: 4, kind: input, shape index: {}]   ;;  %s12068_s5 = inlined_call_operand.hbm [shape: f32[2,136,256], index: 5, kind: input, shape index: {}]   ;;  %s12069_s6 = inlined_call_operand.hbm [shape: f32[2,64,768], index: 6, kind: input, shape index: {}]   ;;  %s12070_s7 = inlined_call_operand.hbm [shape: f32[2,16,32], index: 7, kind: input, shape index: {}]   ;;  %s12071_s8 = inlined_call_operand.hbm [shape: f32[2,256,128], index: 8, kind: input, shape index: {}]   ;;  %s12072_s9 = inlined_call_operand.vmem [shape: f32[2,16,128], index: 9, kind: output, shape index: {}]  }
   0x1   :  { %15 = vsyncpa [#allocation7], 0 }
   0x2   :  { %16 = vsyncpa [#allocation4], 0 }
   0x3   :  { %17 = vsyncpa [#allocation10], 0 }
   0x4   :  { %18 = vsyncpa [#allocation13], 0 }
   0x5   :  { %19 = vsyncpa [#allocation16], 0  ;;  %s7589_s30 = smov 0  }
   0x6 LB: > { %s7521_s10 = smov [#allocation9]   ;;  %s7595_s12 = sadd.s32 4294967295, %s7519_s30   ;;  %s7519_s30 = sphi %s7589_s30, %s25_s30  }
   0x7   : > { %s294_s11 = sshll.u32 %s7521_s10, 4  ;;  %p6651_p0 = scmp.ge.s32.totalorder %s7519_s30, 1  ;;  %s295_s11 = int_to_ptr.vmem [resolvable:$true] %s294_s11 }
   0x8   : > { %p250_p1 = scmp.lt.s32.totalorder %s7519_s30, 3  ;;  %p12073_p2 = scmp.eq.s32.totalorder %s7595_s12, 0 }
   0x9   : > { %s7522_s14 = smov [#allocation12]   ;;  %s7523_s17 = smov [#allocation8]  }
   0xa   : > { %p7600_p3 = pnand %p6651_p0, %p250_p1  ;;  %s317_s15 = sshll.u32 %s7522_s14, 4  ;;  %s7606_s15 = int_to_ptr.vmem [resolvable:$true] %s317_s15 }
   0xb   : > { %s7614_s18 = sshll.u32 %s7523_s17, 4  ;;  %s7295_s21 = scalar_lea.hbm %s12067_s4, 32  ;;  %s281_s18 = int_to_ptr.vmem [resolvable:$true] %s7614_s18 }
   0xc   : > { %s12241_s13 = scalar_select %p7600_p3, 1, 0 }
   0xd   : > { %p7201_p4 = pneg %p7600_p3  ;;  %p7296_p6 = scmp.ne.s32.totalorder %s12067_s4, %s7295_s21 }
   0xe   : > { %p7302_p10 = scmp.lt.u32.totalorder %s7295_s21, %s12067_s4 }
   0xf   : > { %p7610_p5 = pnand %p12073_p2, %p7201_p4 }
  0x11   : > { %p7624_p7 = pneg %p7610_p5 }
  0x13   : > { %p7298_p8 = pnand %p7624_p7, %p7296_p6 }
  0x15   : > { %p7299_p9 = pneg %p7298_p8 }
  0x17   : > { %p7304_p11 = pnand %p7302_p10, %p7299_p9 }
  0x19   : > { %7307 = shalt.err (!%p7304_p11)
}
  0x1a   : > { %s7308_s27 = scalar_lea.vmem %s295_s11, 32  ;;  %p7316_p1 = scmp.lt.s32.totalorder %s295_s11, %s295_s11 }
  0x1b   : > { %p7309_p12 = scmp.ne.s32.totalorder %s295_s11, %s7308_s27  ;;  %p7317_p4 = scmp.lt.s32.totalorder %s7308_s27, %s7308_s27 }
  0x1d   : > { %p7311_p13 = pnand %p7309_p12, %p7624_p7  ;;  %p7318_p2 = por %p7317_p4, %p7316_p1 }
  0x1f   : > { %p7312_p0 = pneg %p7311_p13 }
  0x21   : > { %p7319_p3 = pnand %p7318_p2, %p7312_p0 }
  0x23   : > { %7322 = shalt.err (!%p7319_p3)
}
  0x24   : > { %7213 = dma.hbm_to_vmem [thread:$0]  (!%p7610_p5), %s12067_s4, 32, %s295_s11, [#allocation10]  }
  0x25   : > { %s7323_s17 = scalar_lea.hbm %s12069_s6, 12288 }
  0x26   : > { %p7324_p6 = scmp.ne.s32.totalorder %s12069_s6, %s7323_s17  ;;  %p7330_p2 = scmp.lt.u32.totalorder %s7323_s17, %s12069_s6 }
  0x28   : > { %p7326_p8 = pnand %p7324_p6, %p7624_p7 }
  0x2a   : > { %p7327_p9 = pneg %p7326_p8 }
  0x2c   : > { %p7332_p3 = pnand %p7330_p2, %p7327_p9 }
  0x2e   : > { %7335 = shalt.err (!%p7332_p3)
}
  0x2f   : > { %s7336_s11 = scalar_lea.vmem %s7606_s15, 12288  ;;  %p7344_p13 = scmp.lt.s32.totalorder %s7606_s15, %s7606_s15 }
  0x30   : > { %p7337_p10 = scmp.ne.s32.totalorder %s7606_s15, %s7336_s11  ;;  %p7345_p0 = scmp.lt.s32.totalorder %s7336_s11, %s7336_s11 }
  0x32   : > { %p7339_p11 = pnand %p7337_p10, %p7624_p7  ;;  %p7346_p1 = por %p7345_p0, %p7344_p13 }
  0x34   : > { %p7340_p12 = pneg %p7339_p11 }
  0x36   : > { %p7347_p4 = pnand %p7346_p1, %p7340_p12 }
  0x38   : > { %7350 = shalt.err (!%p7347_p4)
}
  0x39   : > { %s7524_s23 = smov 768   ;;  %s7525_s25 = smov 48  }
  0x3a   : > { %7219 = dma.hbm_to_vmem [thread:$0]  (!%p7610_p5), %s12069_s6, 12288, %s7606_s15, [#allocation13], %s7524_s23, %s7524_s23, %s7525_s25  }
  0x3b   : > { %s7351_s10 = scalar_lea.hbm %s12064_s1, 16 }
  0x3c   : > { %p7352_p6 = scmp.ne.s32.totalorder %s12064_s1, %s7351_s10  ;;  %p7358_p2 = scmp.lt.u32.totalorder %s7351_s10, %s12064_s1 }
  0x3e   : > { %p7354_p8 = pnand %p7352_p6, %p7624_p7 }
  0x40   : > { %p7355_p9 = pneg %p7354_p8 }
  0x42   : > { %p7360_p3 = pnand %p7358_p2, %p7355_p9 }
  0x44   : > { %7363 = shalt.err (!%p7360_p3)
}
  0x45   : > { %s7526_s21 = smov [#allocation3]   ;;  %s7364_s25 = scalar_lea.hbm %s12065_s2, 16 }
  0x46   : > { %7204 = dma.hbm_to_smem (!%p7610_p5), %s12064_s1, 16, %s7526_s21, [#allocation5]  }
  0x47   : > { %p7365_p10 = scmp.ne.s32.totalorder %s12065_s2, %s7364_s25  ;;  %p7371_p13 = scmp.lt.u32.totalorder %s7364_s25, %s12065_s2 }
  0x49   : > { %p7367_p11 = pnand %p7365_p10, %p7624_p7 }
  0x4b   : > { %p7368_p12 = pneg %p7367_p11 }
  0x4d   : > { %p7373_p0 = pnand %p7371_p13, %p7368_p12 }
  0x4f   : > { %7376 = shalt.err (!%p7373_p0)
}
  0x50   : > { %s7527_s10 = smov [#allocation6]   ;;  %s7377_s21 = scalar_lea.hbm %s12066_s3, 1280 }
  0x51   : > { %7207 = dma.hbm_to_smem (!%p7610_p5), %s12065_s2, 16, %s7527_s10, [#allocation7]  }
  0x52   : > { %p7378_p1 = scmp.ne.s32.totalorder %s12066_s3, %s7377_s21  ;;  %p7384_p8 = scmp.lt.u32.totalorder %s7377_s21, %s12066_s3 }
  0x54   : > { %p7380_p4 = pnand %p7378_p1, %p7624_p7 }
  0x56   : > { %p7381_p6 = pneg %p7380_p4 }
  0x58   : > { %p7386_p9 = pnand %p7384_p8, %p7381_p6 }
  0x5a   : > { %7389 = shalt.err (!%p7386_p9)
}
  0x5b   : > { %s7390_s25 = scalar_lea.vmem %s281_s18, 1280  ;;  %p7398_p11 = scmp.lt.s32.totalorder %s281_s18, %s281_s18 }
  0x5c   : > { %p7391_p2 = scmp.ne.s32.totalorder %s281_s18, %s7390_s25  ;;  %p7399_p12 = scmp.lt.s32.totalorder %s7390_s25, %s7390_s25 }
  0x5e   : > { %p7393_p3 = pnand %p7391_p2, %p7624_p7  ;;  %p7400_p13 = por %p7399_p12, %p7398_p11 }
  0x60   : > { %p7394_p10 = pneg %p7393_p3 }
  0x62   : > { %p7401_p0 = pnand %p7400_p13, %p7394_p10 }
  0x64   : > { %7404 = shalt.err (!%p7401_p0)
}
  0x65   : > { %s7528_s26 = smov 256   ;;  %s7529_s27 = smov 16  }
  0x66   : > { %7210 = dma.hbm_to_vmem [thread:$0]  (!%p7610_p5), %s12066_s3, 1280, %s281_s18, [#allocation4], %s7528_s26, %s7528_s26, %s7529_s27  }
  0x67   : > { %s7530_s10 = smov [#allocation11]   ;;  %s7531_s17 = smov [#allocation14]  }
  0x68   : > { %s304_s14 = sshll.u32 %s7530_s10, 4  ;;  %s330_s19 = sshll.u32 %s7531_s17, 4  ;;  %s305_s14 = int_to_ptr.vmem [resolvable:$true] %s304_s14  ;;  %s7714_s19 = int_to_ptr.vmem [resolvable:$true] %s330_s19 }
  0x69   : > { %s7405_s15 = scalar_lea.hbm %s12068_s5, 8704 }
  0x6a   : > { %p7406_p1 = scmp.ne.s32.totalorder %s12068_s5, %s7405_s15  ;;  %p7412_p8 = scmp.lt.u32.totalorder %s7405_s15, %s12068_s5 }
  0x6c   : > { %p7408_p4 = pnand %p7406_p1, %p7624_p7 }
  0x6e   : > { %p7409_p6 = pneg %p7408_p4 }
  0x70   : > { %p7414_p9 = pnand %p7412_p8, %p7409_p6 }
  0x72   : > { %7417 = shalt.err (!%p7414_p9)
}
  0x73   : > { %s7418_s25 = scalar_lea.vmem %s305_s14, 8704  ;;  %p7426_p11 = scmp.lt.s32.totalorder %s305_s14, %s305_s14 }
  0x74   : > { %p7419_p2 = scmp.ne.s32.totalorder %s305_s14, %s7418_s25  ;;  %p7427_p12 = scmp.lt.s32.totalorder %s7418_s25, %s7418_s25 }
  0x76   : > { %p7421_p3 = pnand %p7419_p2, %p7624_p7  ;;  %p7428_p13 = por %p7427_p12, %p7426_p11 }
  0x78   : > { %p7422_p10 = pneg %p7421_p3 }
  0x7a   : > { %p7429_p0 = pnand %p7428_p13, %p7422_p10 }
  0x7c   : > { %7432 = shalt.err (!%p7429_p0)
}
  0x7d   : > { %7216 = dma.hbm_to_vmem [thread:$0]  (!%p7610_p5), %s12068_s5, 8704, %s305_s14, [#allocation10], %s7528_s26, %s7528_s26, %s7529_s27  }
  0x7e   : > { %s7433_s20 = scalar_lea.hbm %s12070_s7, 512 }
  0x7f   : > { %p7434_p1 = scmp.ne.s32.totalorder %s12070_s7, %s7433_s20  ;;  %p7440_p8 = scmp.lt.u32.totalorder %s7433_s20, %s12070_s7 }
  0x81   : > { %p7436_p4 = pnand %p7434_p1, %p7624_p7 }
  0x83   : > { %p7437_p6 = pneg %p7436_p4 }
  0x85   : > { %p7442_p9 = pnand %p7440_p8, %p7437_p6 }
  0x87   : > { %7445 = shalt.err (!%p7442_p9)
}
  0x88   : > { %s7446_s26 = scalar_lea.vmem %s7714_s19, 512  ;;  %p7454_p11 = scmp.lt.s32.totalorder %s7714_s19, %s7714_s19 }
  0x89   : > { %p7447_p2 = scmp.ne.s32.totalorder %s7714_s19, %s7446_s26  ;;  %p7455_p12 = scmp.lt.s32.totalorder %s7446_s26, %s7446_s26 }
  0x8b   : > { %p7449_p3 = pnand %p7447_p2, %p7624_p7  ;;  %p7456_p13 = por %p7455_p12, %p7454_p11 }
  0x8d   : > { %p7450_p10 = pneg %p7449_p3 }
  0x8f   : > { %p7457_p0 = pnand %p7456_p13, %p7450_p10 }
  0x91   : > { %7460 = shalt.err (!%p7457_p0)
}
  0x92   : > { %s7532_s27 = smov 128   ;;  %s7533_s14 = smov 8  }
  0x93   : > { %7222 = dma.hbm_to_vmem [thread:$0]  (!%p7610_p5), %s12070_s7, 512, %s7714_s19, [#allocation13], %s7532_s27, %s7532_s27, %s7533_s14  }
  0x94   : > { %s7534_s25 = smov [#allocation15]   ;;  %s7461_s17 = scalar_lea.hbm %s12071_s8, 8192 }
  0x95   : > { %s343_s28 = sshll.u32 %s7534_s25, 4  ;;  %p7462_p1 = scmp.ne.s32.totalorder %s12071_s8, %s7461_s17  ;;  %s344_s28 = int_to_ptr.vmem [resolvable:$true] %s343_s28 }
  0x96   : > { %p7468_p8 = scmp.lt.u32.totalorder %s7461_s17, %s12071_s8 }
  0x97   : > { %p7464_p4 = pnand %p7462_p1, %p7624_p7 }
  0x99   : > { %p7465_p6 = pneg %p7464_p4 }
  0x9b   : > { %p7470_p9 = pnand %p7468_p8, %p7465_p6 }
  0x9d   : > { %7473 = shalt.err (!%p7470_p9)
}
  0x9e   : > { %s7474_s19 = scalar_lea.vmem %s344_s28, 8192  ;;  %p7482_p11 = scmp.lt.s32.totalorder %s344_s28, %s344_s28 }
  0x9f   : > { %p7475_p2 = scmp.ne.s32.totalorder %s344_s28, %s7474_s19  ;;  %p7483_p12 = scmp.lt.s32.totalorder %s7474_s19, %s7474_s19 }
  0xa1   : > { %p7477_p3 = pnand %p7475_p2, %p7624_p7  ;;  %p7484_p13 = por %p7483_p12, %p7482_p11 }
  0xa3   : > { %p7478_p10 = pneg %p7477_p3 }
  0xa5   : > { %p7485_p0 = pnand %p7484_p13, %p7478_p10 }
  0xa7   : > { %7488 = shalt.err (!%p7485_p0)
}
  0xa8   : > { %7225 = dma.hbm_to_vmem [thread:$0]  (!%p7610_p5), %s12071_s8, 8192, %s344_s28, [#allocation16], %s7532_s27, %s7532_s27, %s7533_s14  }
  0xa9   : > { %p12244_p1 = scmp.ne.s32.totalorder %s12241_s13, 0 }
  0xab   : > { %367 = sbr.rel (%p12244_p1) target bundleno = 1975 (0x7b7), region = 56 }
  0xb2   : > { %p12245_p4 = scmp.eq.s32.totalorder %s7595_s12, 0 }
  0xb4   : > { %7494 = dma.done.wait (%p12245_p4), [#allocation5], 16   ;;  %p12246_p7 = pmov %p12245_p4 }
  0xb5   : > { %p12247_p6 = pmov %p12245_p4 }
  0xb6   : > { %7496 = vsyncadd (%p12246_p7), [#allocation5], 4294967280 }
  0xb7   : > { %7498 = dma.done.wait (%p12247_p6), [#allocation7], 16   ;;  %p12248_p8 = pmov %p12245_p4 }
  0xb8   : > { %p12249_p9 = pmov %p12245_p4 }
  0xb9   : > { %7500 = vsyncadd (%p12248_p8), [#allocation7], 4294967280 }
  0xba   : > { %7502 = dma.done.wait (%p12249_p9), [#allocation4], 1280   ;;  %p12250_p5 = pmov %p12245_p4 }
  0xbb   : > { %p12251_p2 = pmov %p12245_p4 }
  0xbc   : > { %7504 = vsyncadd (%p12250_p5), [#allocation4], 4294966016 }
  0xbd   : > { %7506 = dma.done.wait (%p12251_p2), [#allocation10], 8736   ;;  %p12252_p3 = pmov %p12251_p2 }
  0xbe   : > { %p12253_p10 = pmov %p12251_p2 }
  0xbf   : > { %7508 = vsyncadd (%p12252_p3), [#allocation10], 4294958560 }
  0xc0   : > { %7510 = dma.done.wait (%p12253_p10), [#allocation13], 12800   ;;  %p12254_p11 = pmov %p12251_p2 }
  0xc1   : > { %p12255_p12 = pmov %p12251_p2 }
  0xc2   : > { %7512 = vsyncadd (%p12254_p11), [#allocation13], 4294954496 }
  0xc3   : > { %7514 = dma.done.wait (%p12255_p12), [#allocation16], 8192   ;;  %p12256_p13 = pmov %p12251_p2 }
  0xc5   : > { %7516 = vsyncadd (%p12256_p13), [#allocation16], 4294959104 }
  0xc6   : > { %401 = sfence }
  0xc7   : > { %p432_p0 = scmp.lt.s32.totalorder %s7595_s12, 1  ;;  %s6680_s13 = sld [smem:[#allocation3 + $0x2]]  ;;  %v12075_v50 = vmov 0.0|0.0   ;;  %vm2373_vm0 = vcmask 523264   ;;  %vm4056_vm1 = vcmask 1045504   ;;  %vm3842_vm2 = vcmask 1046528  }
  0xc8   : > { %s6676_s16 = sld [smem:[#allocation3 + $0x1]]  ;;  %s7535_s18 = smov 126   ;;  %6896 = vmatprep.subr.bf16.mxu0 %v12075_v50  ;;  %6944 = vmatprep.subr.bf16.mxu1 %v12075_v50  ;;  %vm4501_vm3 = vcmask 1044480   ;;  %vm4715_vm4 = vcmask 1043456   ;;  %vm5160_vm5 = vcmask 1042432   ;;  %vm5374_vm6 = vcmask 1041408  }
  0xc9   : > { %s12928_s12 = smov (!%p432_p0, %s7595_s12), 1  ;;  %s7536_s25 = smov 127   ;;  %vm5819_vm7 = vcmask 1040384   ;;  %vm6119_vm8 = vcmask 261120  }
  0xca   : > { %s7168_s24 = smul.u32 72, %s12928_s12  ;;  %s6688_s28 = sld [smem:[#allocation3 + $0x4]] }
  0xcb   : > { %s6692_s29 = sld [smem:[#allocation3 + $0x5]]  ;;  %s6700_s10 = sld [smem:[#allocation3 + $0x7]] }
  0xcc   : > { %s7809_s23 = scalar_lea.vmem %s12063_s0, %s7168_s24  ;;  %s6704_s17 = sld [smem:[#allocation3 + $0x8]] }
  0xcd   : > { %v7811_v0 = vstv %s6680_s13  ;;  %v7814_v1 = vld [vmem:[%s7809_s23] sm:$0xff]  ;;  %v7817_v3 = vld [vmem:[%s7809_s23 + $0x8] sm:$0xff]  ;;  %v7828_v8 = vld [vmem:[%s7809_s23 + $0x18] sm:$0xff]  ;;  %s6677_s20 = sld [smem:[#allocation3 + $0xa]]  ;;  %s6681_s21 = sld [smem:[#allocation3 + $0xb]] }
  0xce   : > { %v523_v2 = vstv %s6676_s16  ;;  %v724_v4 = vmul.f32 %v7811_v0, %v7814_v1  ;;  %v725_v6 = vmul.f32 %v7811_v0, %v7817_v3  ;;  %v7831_v9 = vld [vmem:[%s7809_s23 + $0x10] sm:$0xff]  ;;  %v727_v12 = vmul.f32 %v7811_v0, %v7828_v8  ;;  %v7849_v16 = vld [vmem:[%s7809_s23 + $0x1] sm:$0xff]  ;;  %v7882_v28 = vld [vmem:[%s7809_s23 + $0x19] sm:$0xff]  ;;  %s6689_s15 = sld [smem:[#allocation3 + $0xd]]  ;;  %s6693_s22 = sld [smem:[#allocation3 + $0xe]] }
  0xcf   : > { %v524_v5 = vmul.f32 %v523_v2, %v7814_v1  ;;  %v525_v7 = vmul.f32 %v523_v2, %v7817_v3  ;;  %v527_v10 = vmul.f32 %v523_v2, %v7828_v8  ;;  %v526_v11 = vmul.f32 %v523_v2, %v7831_v9  ;;  %v7844_v14 = vld [vmem:[%s7809_s23 + $0x9] sm:$0xff]  ;;  %v7861_v20 = vld [vmem:[%s7809_s23 + $0x20] sm:$0xff]  ;;  %v7885_v29 = vld [vmem:[%s7809_s23 + $0x11] sm:$0xff]  ;;  %s6701_s19 = sld [smem:[#allocation3 + $0x10]]  ;;  %s6705_s26 = sld [smem:[#allocation3 + $0x11]] }
  0xd0   : > { %740 = vrot.lane.b32.xlu1 %v724_v4, %s7535_s18  ;;  %v726_v13 = vmul.f32 %v7811_v0, %v7831_v9  ;;  %v7846_v15 = vstv %s6688_s28  ;;  %v7858_v19 = vld [vmem:[%s7809_s23 + $0x28] sm:$0xff]  ;;  %v528_v22 = vmul.f32 %v523_v2, %v7861_v20  ;;  %v728_v27 = vmul.f32 %v7811_v0, %v7861_v20  ;;  %v7894_v32 = vld [vmem:[%s7809_s23 + $0x38] sm:$0xff]  ;;  %s450_s11 = sld [smem:[#allocation3]]  ;;  %s6678_s13 = sld [smem:[#allocation3 + $0x13]] }
  0xd1   : > { %540 = vrot.lane.b32.xlu0 %v524_v5, %s7536_s25  ;;  %v1005_v17 = vmul.f32 %v7846_v15, %v7844_v14  ;;  %v1004_v18 = vmul.f32 %v7846_v15, %v7849_v16  ;;  %v529_v21 = vmul.f32 %v523_v2, %v7858_v19  ;;  %v7867_v23 = vstv %s6692_s29  ;;  %12257 = vst [vmem:[#allocation23_spill] sm:$0xff] %v7894_v32  ;;  %v7897_v33 = vld [vmem:[%s7809_s23 + $0x30] sm:$0xff]  ;;  %v7915_v40 = vld [vmem:[%s7809_s23 + $0x2] sm:$0xff]  ;;  %s6684_s16 = sld [smem:[#allocation3 + $0x3]]  ;;  %s6696_s24 = sld [smem:[#allocation3 + $0x6]] }
  0xd2   : > { %v1205_v24 = vmul.f32 %v7867_v23, %v7844_v14  ;;  %v1204_v25 = vmul.f32 %v7867_v23, %v7849_v16  ;;  %v729_v26 = vmul.f32 %v7811_v0, %v7858_v19  ;;  %v1007_v30 = vmul.f32 %v7846_v15, %v7882_v28  ;;  %12258 = vst [vmem:[#allocation24_spill] sm:$0xff] %v7897_v33  ;;  %v7910_v38 = vld [vmem:[%s7809_s23 + $0xa] sm:$0xff]  ;;  %v7933_v46 = vld [vmem:[%s7809_s23 + $0x21] sm:$0xff]  ;;  %v7969_v59 = vld [vmem:[%s7809_s23 + $0x12] sm:$0xff]  ;;  %s6682_s27 = sld [smem:[#allocation3 + $0x14]]  ;;  %s1882_s14 = sld [smem:[#allocation6]] }
  0xd3   : > { %v1006_v31 = vmul.f32 %v7846_v15, %v7885_v29  ;;  %v531_v34 = vmul.f32 %v523_v2, %v7894_v32  ;;  %v530_v35 = vmul.f32 %v523_v2, %v7897_v33  ;;  %v1207_v36 = vmul.f32 %v7867_v23, %v7882_v28  ;;  %v7930_v45 = vld [vmem:[%s7809_s23 + $0x29] sm:$0xff]  ;;  %12260 = vst [vmem:[#allocation26_spill] sm:$0xff] %v7933_v46  ;;  %v7966_v58 = vld [vmem:[%s7809_s23 + $0x1a] sm:$0xff]  ;;  %v7989_v4 = vld [vmem:[%s7809_s23 + $0x31] sm:$0xff]  ;;  %s6690_s28 = sld [smem:[#allocation3 + $0x16]]  ;;  %s6694_s29 = sld [smem:[#allocation3 + $0x17]] }
  0xd4   : > { %742 = vrot.lane.b32.xlu1 %v725_v6, %s7535_s18  ;;  %v1206_v37 = vmul.f32 %v7867_v23, %v7885_v29  ;;  %v7912_v39 = vstv %s6700_s10  ;;  %v731_v43 = vmul.f32 %v7811_v0, %v7894_v32  ;;  %v730_v44 = vmul.f32 %v7811_v0, %v7897_v33  ;;  %12259 = vst [vmem:[#allocation25_spill] sm:$0xff] %v7930_v45  ;;  %v7986_v2 = vld [vmem:[%s7809_s23 + $0x39] sm:$0xff]  ;;  %s6702_s10 = sld [smem:[#allocation3 + $0x19]] }
  0xd5   : > { %542 = vrot.lane.b32.xlu0 %v525_v7, %s7536_s25  ;;  %v1485_v41 = vmul.f32 %v7912_v39, %v7910_v38  ;;  %v1484_v42 = vmul.f32 %v7912_v39, %v7915_v40  ;;  %v1009_v47 = vmul.f32 %v7846_v15, %v7930_v45  ;;  %v1008_v48 = vmul.f32 %v7846_v15, %v7933_v46 }
  0xd6   : > { %v7941_v49 = vstv %s6704_s17  ;;  %v7951_v53 = vstv %s6677_s20  ;;  %v1209_v56 = vmul.f32 %v7867_v23, %v7930_v45  ;;  %v1208_v57 = vmul.f32 %v7867_v23, %v7933_v46  ;;  %12261 = vst [vmem:[#allocation27_spill] sm:$0xff] %v7989_v4  ;;  %s6673_s17 = sld [smem:[#allocation3 + $0x9]]  ;;  %s6706_s20 = sld [smem:[#allocation3 + $0x1a]] }
  0xd7   : > { %v1685_v51 = vmul.f32 %v7941_v49, %v7910_v38  ;;  %v1684_v52 = vmul.f32 %v7941_v49, %v7915_v40  ;;  %v575_v54 = vmul.f32 %v7951_v53, %v7817_v3  ;;  %v574_v55 = vmul.f32 %v7951_v53, %v7814_v1 }
  0xd8   : > { %546 = vrot.lane.b32.xlu1 %v527_v10, %s7536_s25  ;;  %v1487_v60 = vmul.f32 %v7912_v39, %v7966_v58  ;;  %v1486_v61 = vmul.f32 %v7912_v39, %v7969_v59  ;;  %v7977_v62 = vstv %s6681_s21  ;;  %v1011_v5 = vmul.f32 %v7846_v15, %v7986_v2  ;;  %s6679_s21 = sld [smem:[#allocation3 + $0x1c]] }
  0xd9   : > { %544 = vrot.lane.b32.xlu0 %v526_v11, %s7536_s25  ;;  %v775_v63 = vmul.f32 %v7977_v62, %v7817_v3  ;;  %v774_v0 = vmul.f32 %v7977_v62, %v7814_v1  ;;  %v1010_v6 = vmul.f32 %v7846_v15, %v7989_v4  ;;  %v1687_v7 = vmul.f32 %v7941_v49, %v7966_v58 }
  0xda   : > { %v1686_v10 = vmul.f32 %v7941_v49, %v7969_v59  ;;  %v577_v11 = vmul.f32 %v7951_v53, %v7828_v8  ;;  %v1210_v15 = vmul.f32 %v7867_v23, %v7989_v4  ;;  %v8202_v50 = vstv %s6696_s24  ;;  %s6703_s24 = sld [smem:[#allocation3 + $0x22]] }
  0xdc   : > { %746 = vrot.lane.b32.xlu1 %v727_v12, %s7535_s18  ;;  %v576_v12 = vmul.f32 %v7951_v53, %v7831_v9 }
  0xdd   : > { %744 = vrot.lane.b32.xlu0 %v726_v13, %s7535_s18  ;;  %v1211_v13 = vmul.f32 %v7867_v23, %v7986_v2  ;;  %v777_v23 = vmul.f32 %v7977_v62, %v7828_v8 }
  0xe0   : > { %1022 = vrot.lane.b32.xlu1 %v1005_v17, %s7536_s25  ;;  %v8016_v17 = vld [vmem:[%s7809_s23 + $0x2a] sm:$0xff] }
  0xe1   : > { %1020 = vrot.lane.b32.xlu0 %v1004_v18, %s7536_s25  ;;  %v8019_v18 = vld [vmem:[%s7809_s23 + $0x22] sm:$0xff] }
  0xe4   : > { %550 = vrot.lane.b32.xlu1 %v529_v21, %s7536_s25  ;;  %v1489_v21 = vmul.f32 %v7912_v39, %v8016_v17 }
  0xe5   : > { %548 = vrot.lane.b32.xlu0 %v528_v22, %s7536_s25  ;;  %v1488_v22 = vmul.f32 %v7912_v39, %v8019_v18 }
  0xe8   : > { %1222 = vrot.lane.b32.xlu1 %v1205_v24, %s7535_s18  ;;  %v776_v24 = vmul.f32 %v7977_v62, %v7831_v9 }
  0xe9   : > { %1220 = vrot.lane.b32.xlu0 %v1204_v25, %s7535_s18  ;;  %v8033_v25 = vstv %s6689_s15  ;;  %s6685_s15 = sld [smem:[#allocation3 + $0xc]] }
  0xec   : > { %750 = vrot.lane.b32.xlu1 %v729_v26, %s7535_s18  ;;  %v1055_v26 = vmul.f32 %v8033_v25, %v7844_v14 }
  0xed   : > { %748 = vrot.lane.b32.xlu0 %v728_v27, %s7535_s18  ;;  %v1054_v27 = vmul.f32 %v8033_v25, %v7849_v16 }
  0xf0   : > { %1026 = vrot.lane.b32.xlu1 %v1007_v30, %s7536_s25  ;;  %v1689_v30 = vmul.f32 %v7941_v49, %v8016_v17 }
  0xf1   : > { %1024 = vrot.lane.b32.xlu0 %v1006_v31, %s7536_s25  ;;  %v1688_v31 = vmul.f32 %v7941_v49, %v8019_v18 }
  0xf4   : > { %554 = vrot.lane.b32.xlu1 %v531_v34, %s7536_s25  ;;  %v579_v34 = vmul.f32 %v7951_v53, %v7858_v19 }
  0xf5   : > { %552 = vrot.lane.b32.xlu0 %v530_v35, %s7536_s25  ;;  %v578_v35 = vmul.f32 %v7951_v53, %v7861_v20 }
  0xf8   : > { %1226 = vrot.lane.b32.xlu1 %v1207_v36, %s7535_s18  ;;  %v8053_v36 = vstv %s6693_s22  ;;  %s6697_s22 = sld [smem:[#allocation3 + $0xf]] }
  0xf9   : > { %1224 = vrot.lane.b32.xlu0 %v1206_v37, %s7535_s18  ;;  %v1255_v37 = vmul.f32 %v8053_v36, %v7844_v14 }
  0xfc   : > { %1502 = vrot.lane.b32.xlu1 %v1485_v41, %s7536_s25  ;;  %v1254_v41 = vmul.f32 %v8053_v36, %v7849_v16 }
  0xfd   : > { %1500 = vrot.lane.b32.xlu0 %v1484_v42, %s7536_s25  ;;  %v8062_v42 = vld [vmem:[%s7809_s23 + $0x3a] sm:$0xff] }
  0xfe   : > { %12262 = vst [vmem:[#allocation28_spill] sm:$0xff] %v8062_v42 }
 0x100   : > { %754 = vrot.lane.b32.xlu1 %v731_v43, %s7535_s18  ;;  %v8065_v43 = vld [vmem:[%s7809_s23 + $0x32] sm:$0xff] }
 0x101   : > { %752 = vrot.lane.b32.xlu0 %v730_v44, %s7535_s18  ;;  %12263 = vst [vmem:[#allocation29_spill] sm:$0xff] %v8065_v43  ;;  %v1491_v44 = vmul.f32 %v7912_v39, %v8062_v42 }
 0x104   : > { %1030 = vrot.lane.b32.xlu1 %v1009_v47, %s7536_s25  ;;  %v1490_v47 = vmul.f32 %v7912_v39, %v8065_v43  ;;  %v1057_v39 = vmul.f32 %v8033_v25, %v7882_v28 }
 0x105   : > { %1028 = vrot.lane.b32.xlu0 %v1008_v48, %s7536_s25 }
 0x108   : > { %1702 = vrot.lane.b32.xlu1 %v1685_v51, %s7535_s18 }
 0x109   : > { %1700 = vrot.lane.b32.xlu0 %v1684_v52, %s7535_s18  ;;  %v779_v52 = vmul.f32 %v7977_v62, %v7858_v19 }
 0x10c   : > { %592 = vrot.lane.b32.xlu1 %v575_v54, %s7536_s25  ;;  %v778_v54 = vmul.f32 %v7977_v62, %v7861_v20 }
 0x10d   : > { %590 = vrot.lane.b32.xlu0 %v574_v55, %s7536_s25 }
 0x110   : > { %1230 = vrot.lane.b32.xlu1 %v1209_v56, %s7535_s18 }
 0x111   : > { %1228 = vrot.lane.b32.xlu0 %v1208_v57, %s7535_s18  ;;  %v1056_v57 = vmul.f32 %v8033_v25, %v7885_v29 }
 0x114   : > { %1506 = vrot.lane.b32.xlu1 %v1487_v60, %s7536_s25 }
 0x115   : > { %1504 = vrot.lane.b32.xlu0 %v1486_v61, %s7536_s25 }
 0x118   : > { %792 = vrot.lane.b32.xlu1 %v775_v63, %s7535_s18  ;;  %v1691_v63 = vmul.f32 %v7941_v49, %v8062_v42 }
 0x119   : > { %790 = vrot.lane.b32.xlu0 %v774_v0, %s7535_s18  ;;  %v1690_v0 = vmul.f32 %v7941_v49, %v8065_v43  ;;  %v1257_v49 = vmul.f32 %v8053_v36, %v7882_v28 }
 0x11c   : > { %1034 = vrot.lane.b32.xlu1 %v1011_v5, %s7536_s25 }
 0x11d   : > { %1032 = vrot.lane.b32.xlu0 %v1010_v6, %s7536_s25 }
 0x120   : > { %1706 = vrot.lane.b32.xlu1 %v1687_v7, %s7535_s18  ;;  %v581_v7 = vmul.f32 %v7951_v53, %v7894_v32 }
 0x121   : > { %1704 = vrot.lane.b32.xlu0 %v1686_v10, %s7535_s18  ;;  %v580_v10 = vmul.f32 %v7951_v53, %v7897_v33 }
 0x124   : > { %596 = vrot.lane.b32.xlu1 %v577_v11, %s7536_s25 }
 0x125   : > { %594 = vrot.lane.b32.xlu0 %v576_v12, %s7536_s25 }
 0x128   : > { %1234 = vrot.lane.b32.xlu1 %v1211_v13, %s7535_s18  ;;  %v1256_v13 = vmul.f32 %v8053_v36, %v7885_v29 }
 0x129   : > { %1232 = vrot.lane.b32.xlu0 %v1210_v15, %s7535_s18  ;;  %v8121_v15 = vstv %s6701_s19  ;;  %s6683_s19 = sld [smem:[#allocation3 + $0x1d]] }
 0x12a   : > { %v1535_v53 = vmul.f32 %v8121_v15, %v7910_v38 }
 0x12c   : > { %1510 = vrot.lane.b32.xlu1 %v1489_v21, %s7536_s25 }
 0x12d   : > { %1508 = vrot.lane.b32.xlu0 %v1488_v22, %s7536_s25 }
 0x130   : > { %796 = vrot.lane.b32.xlu1 %v777_v23, %s7535_s18  ;;  %v1534_v23 = vmul.f32 %v8121_v15, %v7915_v40 }
 0x131   : > { %794 = vrot.lane.b32.xlu0 %v776_v24, %s7535_s18 }
 0x134   : > { %1072 = vrot.lane.b32.xlu1 %v1055_v26, %s7536_s25 }
 0x135   : > { %1070 = vrot.lane.b32.xlu0 %v1054_v27, %s7536_s25  ;;  %v781_v27 = vmul.f32 %v7977_v62, %v7894_v32 }
 0x138   : > { %1710 = vrot.lane.b32.xlu1 %v1689_v30, %s7535_s18  ;;  %v780_v30 = vmul.f32 %v7977_v62, %v7897_v33 }
 0x139   : > { %1708 = vrot.lane.b32.xlu0 %v1688_v31, %s7535_s18 }
 0x13c   : > { %600 = vrot.lane.b32.xlu1 %v579_v34, %s7536_s25 }
 0x13d   : > { %598 = vrot.lane.b32.xlu0 %v578_v35, %s7536_s25  ;;  %v8147_v35 = vstv %s450_s11  ;;  %s6708_s11 = sld [smem:[#allocation6 + $0x1]] }
 0x140   : > { %1272 = vrot.lane.b32.xlu1 %v1255_v37, %s7535_s18  ;;  %v1059_v37 = vmul.f32 %v8033_v25, %v7930_v45 }
 0x141   : > { %1270 = vrot.lane.b32.xlu0 %v1254_v41, %s7535_s18  ;;  %v1058_v41 = vmul.f32 %v8033_v25, %v7933_v46 }
 0x142   : > { %v8073_v48 = vpop.permute.xlu1 %740 }
 0x143   : > { %v8075_v51 = vpop.permute.xlu0 %540 }
 0x144   : > { %1514 = vrot.lane.b32.xlu1 %v1491_v44, %s7536_s25  ;;  %v8155_v44 = vstv %s6705_s26  ;;  %s6691_s26 = sld [smem:[#allocation3 + $0x1f]] }
 0x145   : > { %1512 = vrot.lane.b32.xlu0 %v1490_v47, %s7536_s25 }
 0x146   : > { %v8083_v55 = vpop.permute.xlu1 %742 }
 0x147   : > { %v543_v56 = vpop.permute.xlu0 %542 }
 0x148   : > { %800 = vrot.lane.b32.xlu1 %v779_v52, %s7535_s18  ;;  %v452_v52 = vmul.f32 %v8147_v35, %v7814_v1 }
 0x149   : > { %798 = vrot.lane.b32.xlu0 %v778_v54, %s7535_s18  ;;  %v453_v54 = vmul.f32 %v8147_v35, %v7817_v3 }
 0x14a   : > { %v8091_v60 = vpop.permute.xlu1 %546 }
 0x14b   : > { %v8093_v61 = vpop.permute.xlu0 %544 }
 0x14c   : > { %1076 = vrot.lane.b32.xlu1 %v1057_v39, %s7536_s25  ;;  %v1735_v39 = vmul.f32 %v8155_v44, %v7910_v38 }
 0x14d   : > { %1074 = vrot.lane.b32.xlu0 %v1056_v57, %s7536_s25  ;;  %v1734_v57 = vmul.f32 %v8155_v44, %v7915_v40 }
 0x14e   : > { %v8101_v5 = vpop.permute.xlu1 %746 }
 0x14f   : > { %v8103_v6 = vpop.permute.xlu0 %744 }
 0x150   : > { %1714 = vrot.lane.b32.xlu1 %v1691_v63, %s7535_s18  ;;  %v8171_v63 = vstv %s6678_s13  ;;  %s6695_s13 = sld [smem:[#allocation3 + $0x20]] }
 0x151   : > { %1712 = vrot.lane.b32.xlu0 %v1690_v0, %s7535_s18 }
 0x152   : > { %v8111_v11 = vpop.permute.xlu1 %1022 }
 0x153   : > { %v8113_v12 = vpop.permute.xlu0 %1020 }
 0x154   : > { %604 = vrot.lane.b32.xlu1 %v581_v7, %s7536_s25 }
 0x155   : > { %602 = vrot.lane.b32.xlu0 %v580_v10, %s7536_s25  ;;  %v564_v10 = vadd.f32 %v8075_v51, %v452_v52  ;;  %v1259_v52 = vmul.f32 %v8053_v36, %v7930_v45 }
 0x156   : > { %v8123_v21 = vpop.permute.xlu1 %550 }
 0x157   : > { %v8125_v22 = vpop.permute.xlu0 %548  ;;  %v764_v51 = vadd.f32 %v8073_v48, %v564_v10  ;;  %v459_v48 = vmul.f32 %v8147_v35, %v7894_v32  ;;  %v8210_v32 = vstv %s6682_s27  ;;  %s6707_s27 = sld [smem:[#allocation3 + $0x23]] }
 0x158   : > { %12264 = vst [vmem:[#allocation30_spill] sm:$0xff] %v8125_v22  ;;  %1276 = vrot.lane.b32.xlu1 %v1257_v49, %s7535_s18  ;;  %v565_v49 = vadd.f32 %v543_v56, %v453_v54  ;;  %v1258_v54 = vmul.f32 %v8053_v36, %v7933_v46 }
 0x159   : > { %1274 = vrot.lane.b32.xlu0 %v1256_v13, %s7535_s18  ;;  %v8174_v13 = vstv %s6684_s16  ;;  %s8764_s16 = sld [smem:[#allocation3 + $0x12]] }
 0x15a   : > { %v8133_v24 = vpop.permute.xlu1 %1222  ;;  %v765_v56 = vadd.f32 %v8083_v55, %v565_v49  ;;  %v458_v55 = vmul.f32 %v8147_v35, %v7897_v33  ;;  %v939_v33 = vmul.f32 %v8174_v13, %v7986_v2 }
 0x15b   : > { %v8135_v26 = vpop.permute.xlu0 %1220 }
 0x15c   : > { %1552 = vrot.lane.b32.xlu1 %v1535_v53, %s7536_s25  ;;  %v625_v53 = vmul.f32 %v8171_v63, %v7817_v3 }
 0x15d   : > { %1550 = vrot.lane.b32.xlu0 %v1534_v23, %s7536_s25  ;;  %v624_v23 = vmul.f32 %v8171_v63, %v7814_v1 }
 0x15e   : > { %v8143_v31 = vpop.permute.xlu1 %750 }
 0x15f   : > { %12265 = vst [vmem:[#allocation31_spill] sm:$0xff] %v8143_v31  ;;  %v8145_v34 = vpop.permute.xlu0 %748 }
 0x160   : > { %12266 = vst [vmem:[#allocation32_spill] sm:$0xff] %v8145_v34  ;;  %804 = vrot.lane.b32.xlu1 %v781_v27, %s7535_s18 }
 0x161   : > { %802 = vrot.lane.b32.xlu0 %v780_v30, %s7535_s18 }
 0x162   : > { %v8157_v62 = vpop.permute.xlu1 %1026 }
 0x163   : > { %v8159_v47 = vpop.permute.xlu0 %1024 }
 0x164   : > { %1080 = vrot.lane.b32.xlu1 %v1059_v37, %s7536_s25  ;;  %v933_v37 = vmul.f32 %v8174_v13, %v7844_v14 }
 0x165   : > { %1078 = vrot.lane.b32.xlu0 %v1058_v41, %s7536_s25  ;;  %v932_v41 = vmul.f32 %v8174_v13, %v7849_v16 }
 0x166   : > { %v555_v0 = vpop.permute.xlu1 %554  ;;  %v941_v10 = vadd.f32 %v933_v37, %v765_v56 }
 0x167   : > { %v553_v7 = vpop.permute.xlu0 %552  ;;  %v940_v49 = vadd.f32 %v932_v41, %v764_v51  ;;  %v938_v51 = vmul.f32 %v8174_v13, %v7989_v4  ;;  %v571_v41 = vadd.f32 %v555_v0, %v459_v48 }
 0x168   : > { %1752 = vrot.lane.b32.xlu1 %v1735_v39, %s7535_s18  ;;  %v1045_v56 = vadd.f32 %v8111_v11, %v941_v10  ;;  %v570_v34 = vadd.f32 %v553_v7, %v458_v55  ;;  %v825_v11 = vmul.f32 %v8210_v32, %v7817_v3 }
 0x169   : > { %1750 = vrot.lane.b32.xlu0 %v1734_v57, %s7535_s18  ;;  %v1044_v37 = vadd.f32 %v8113_v12, %v940_v49  ;;  %v824_v12 = vmul.f32 %v8210_v32, %v7814_v1 }
 0x16a   : > { %v8182_v27 = vpop.permute.xlu1 %1226  ;;  %v1245_v31 = vadd.f32 %v8133_v24, %v1045_v56 }
 0x16b   : > { %v8184_v30 = vpop.permute.xlu0 %1224  ;;  %v1244_v22 = vadd.f32 %v8135_v26, %v1044_v37  ;;  %v1061_v26 = vmul.f32 %v8033_v25, %v7986_v2 }
 0x16c   : > { %642 = vrot.lane.b32.xlu1 %v625_v53, %s7536_s25  ;;  %v1537_v53 = vmul.f32 %v8121_v15, %v7966_v58 }
 0x16d   : > { %640 = vrot.lane.b32.xlu0 %v624_v23, %s7536_s25  ;;  %v1536_v23 = vmul.f32 %v8121_v15, %v7969_v59 }
 0x16e   : > { %v1503_v39 = vpop.permute.xlu1 %1502 }
 0x16f   : > { %v1501_v57 = vpop.permute.xlu0 %1500 }
 0x170   : > { %1280 = vrot.lane.b32.xlu1 %v1259_v52, %s7535_s18  ;;  %v1413_v52 = vmul.f32 %v8202_v50, %v7910_v38 }
 0x171   : > { %1278 = vrot.lane.b32.xlu0 %v1258_v54, %s7535_s18  ;;  %v1412_v54 = vmul.f32 %v8202_v50, %v7915_v40 }
 0x172   : > { %v755_v46 = vpop.permute.xlu1 %754 }
 0x173   : > { %v753_v45 = vpop.permute.xlu0 %752  ;;  %v771_v43 = vadd.f32 %v755_v46, %v571_v41  ;;  %v1421_v46 = vadd.f32 %v1413_v52, %v1245_v31  ;;  %v1736_v31 = vmul.f32 %v8155_v44, %v7969_v59  ;;  %v627_v52 = vmul.f32 %v8171_v63, %v7828_v8 }
 0x174   : > { %v770_v42 = vadd.f32 %v753_v45, %v570_v34  ;;  %1556 = vrot.lane.b32.xlu1 %v1537_v53, %s7536_s25  ;;  %v1420_v45 = vadd.f32 %v1412_v54, %v1244_v22  ;;  %v1060_v34 = vmul.f32 %v8033_v25, %v7989_v4  ;;  %v1737_v22 = vmul.f32 %v8155_v44, %v7966_v58 }
 0x175   : > { %1554 = vrot.lane.b32.xlu0 %v1536_v23, %s7536_s25  ;;  %v8230_v0 = vadd.f32 %v939_v33, %v771_v43  ;;  %v1525_v33 = vadd.f32 %v1503_v39, %v1421_v46  ;;  %v455_v25 = vmul.f32 %v8147_v35, %v7828_v8  ;;  %v454_v39 = vmul.f32 %v8147_v35, %v7831_v9 }
 0x176   : > { %v8232_v7 = vadd.f32 %v938_v51, %v770_v42  ;;  %v8234_v48 = vpop.permute.xlu1 %1030  ;;  %v1524_v43 = vadd.f32 %v1501_v57, %v1420_v45  ;;  %v8244_v42 = vstv %s1882_s14  ;;  %v626_v54 = vmul.f32 %v8171_v63, %v7831_v9  ;;  %s6698_s14 = sld [smem:[#allocation3 + $0x18]] }
 0x177   : > { %v8236_v24 = vpop.permute.xlu0 %1028  ;;  %v935_v45 = vmul.f32 %v8174_v13, %v7882_v28 }
 0x178   : > { %842 = vrot.lane.b32.xlu1 %v825_v11, %s7535_s18  ;;  %v567_v11 = vadd.f32 %v8091_v60, %v455_v25  ;;  %v1261_v60 = vmul.f32 %v8053_v36, %v7986_v2 }
 0x179   : > { %840 = vrot.lane.b32.xlu0 %v824_v12, %s7535_s18  ;;  %v566_v12 = vadd.f32 %v8093_v61, %v454_v39  ;;  %v1260_v61 = vmul.f32 %v8053_v36, %v7989_v4 }
 0x17a   : > { %v1703_v55 = vpop.permute.xlu1 %1702 }
 0x17b   : > { %v1701_v10 = vpop.permute.xlu0 %1700  ;;  %v1725_v49 = vadd.f32 %v1703_v55, %v1525_v33  ;;  %v767_v33 = vadd.f32 %v8101_v5, %v567_v11  ;;  %v934_v55 = vmul.f32 %v8174_v13, %v7885_v29 }
 0x17c   : > { %v1724_v53 = vadd.f32 %v1701_v10, %v1524_v43  ;;  %1084 = vrot.lane.b32.xlu1 %v1061_v26, %s7536_s25  ;;  %v766_v43 = vadd.f32 %v8103_v6, %v566_v12  ;;  %v12267_v10 = vmov 0.0|0.0  }
 0x17d   : > { %1082 = vrot.lane.b32.xlu0 %v1060_v34, %s7536_s25  ;;  %v1885_v57 = vadd.f32 %v8244_v42, %v1725_v49  ;;  %v943_v49 = vadd.f32 %v935_v45, %v767_v33 }
 0x17e   : > { %v1884_v23 = vadd.f32 %v8244_v42, %v1724_v53  ;;  %v8258_v51 = vpop.permute.xlu1 %592  ;;  %v942_v53 = vadd.f32 %v934_v55, %v766_v43 }
 0x17f   : > { %v8260_v56 = vpop.permute.xlu0 %590  ;;  %v1893_v41 = vmax.f32 %v1885_v57, 0.0  ;;  %v1047_v36 = vadd.f32 %v8157_v62, %v943_v49  ;;  %v827_v62 = vmul.f32 %v8210_v32, %v7828_v8  ;;  %v1739_v49 = vmul.f32 %v8155_v44, %v8016_v17 }
 0x180   : > { %v1892_v37 = vmax.f32 %v1884_v23, 0.0  ;;  %1756 = vrot.lane.b32.xlu1 %v1737_v22, %s7535_s18  ;;  %v1539_v22 = vmul.f32 %v8121_v15, %v8016_v17  ;;  %v1046_v25 = vadd.f32 %v8159_v47, %v942_v53  ;;  %v826_v47 = vmul.f32 %v8210_v32, %v7831_v9 }
 0x181   : > { %1754 = vrot.lane.b32.xlu0 %v1736_v31, %s7535_s18  ;;  %v1538_v31 = vmul.f32 %v8121_v15, %v8019_v18  ;;  %v1247_v23 = vadd.f32 %v8182_v27, %v1047_v36  ;;  %v1738_v53 = vmul.f32 %v8155_v44, %v8019_v18 }
 0x182   : > { %v6897_v46 = vpack.c.bf16 %v1893_v41, %v1892_v37  ;;  %v8272_v26 = vpop.permute.xlu1 %1230  ;;  %v1246_v37 = vadd.f32 %v8184_v30, %v1046_v25  ;;  %v1415_v41 = vmul.f32 %v8202_v50, %v7966_v58 }
 0x183   : > { %v8274_v34 = vpop.permute.xlu0 %1228 }
 0x184   : > { %6898 = vmatpush1.bf16.msra.mxu0 %v6897_v46  ;;  %6946 = vmatpush1.bf16.msra.mxu1 %v6897_v46  ;;  %v1423_v11 = vadd.f32 %v1415_v41, %v1247_v23  ;;  %v628_v41 = vmul.f32 %v8171_v63, %v7861_v20 }
 0x185   : > { %646 = vrot.lane.b32.xlu1 %v627_v52, %s7536_s25  ;;  %644 = vrot.lane.b32.xlu0 %v626_v54, %s7536_s25  ;;  %v1414_v52 = vmul.f32 %v8202_v50, %v7969_v59  ;;  %v8312_v54 = vstv %s6690_s28  ;;  %s6709_s28 = sld [smem:[#allocation6 + $0x2]] }
 0x186   : > { %6899 = vmatprep.subr.bf16.mxu0 %v12267_v10  ;;  %6947 = vmatprep.subr.bf16.mxu1 %v12267_v10  ;;  %v1507_v5 = vpop.permute.xlu1 %1506  ;;  %v1105_v46 = vmul.f32 %v8312_v54, %v7844_v14  ;;  %v1104_v45 = vmul.f32 %v8312_v54, %v7849_v16 }
 0x187   : > { %v1505_v6 = vpop.permute.xlu0 %1504  ;;  %v1422_v12 = vadd.f32 %v1414_v52, %v1246_v37  ;;  %v1527_v8 = vadd.f32 %v1507_v5, %v1423_v11  ;;  %v456_v5 = vmul.f32 %v8147_v35, %v7861_v20  ;;  %v629_v37 = vmul.f32 %v8171_v63, %v7858_v19  ;;  %v12271_v11 = vld [vmem:[#allocation29_spill] sm:$0xff] }
 0x189   : > { %1284 = vrot.lane.b32.xlu1 %v1261_v60, %s7535_s18  ;;  %1282 = vrot.lane.b32.xlu0 %v1260_v61, %s7535_s18  ;;  %v1526_v33 = vadd.f32 %v1505_v6, %v1422_v12  ;;  %v457_v61 = vmul.f32 %v8147_v35, %v7858_v19  ;;  %v8343_v35 = vstv %s6694_s29  ;;  %v1418_v12 = vmul.f32 %v8202_v50, %v12271_v11  ;;  %s6675_s29 = sld [smem:[#allocation3 + $0x1b]] }
 0x18a   : > { %v8296_v39 = vpop.permute.xlu1 %792 }
 0x18b   : > { %v8298_v57 = vpop.permute.xlu0 %790  ;;  %v569_v52 = vadd.f32 %v8123_v21, %v457_v61  ;;  %v12273_v21 = vld [vmem:[#allocation31_spill] sm:$0xff]  ;;  %v12275_v61 = vld [vmem:[#allocation26_spill] sm:$0xff] }
 0x18d   : > { %1560 = vrot.lane.b32.xlu1 %v1539_v22, %s7536_s25  ;;  %1558 = vrot.lane.b32.xlu0 %v1538_v31, %s7536_s25 }
 0x18e   : > { %v1035_v27 = vpop.permute.xlu1 %1034 }
 0x18f   : > { %v1033_v30 = vpop.permute.xlu0 %1032 }
 0x191   : > { %846 = vrot.lane.b32.xlu1 %v827_v62, %s7535_s18  ;;  %844 = vrot.lane.b32.xlu0 %v826_v47, %s7535_s18  ;;  %v12270_v62 = vld [vmem:[#allocation28_spill] sm:$0xff] }
 0x192   : > { %v1707_v9 = vpop.permute.xlu1 %1706  ;;  %v1419_v47 = vmul.f32 %v8202_v50, %v12270_v62 }
 0x193   : > { %v1705_v43 = vpop.permute.xlu0 %1704  ;;  %v1727_v55 = vadd.f32 %v1707_v9, %v1527_v8  ;;  %v1051_v8 = vadd.f32 %v1035_v27, %v8230_v0  ;;  %v1305_v0 = vmul.f32 %v8343_v35, %v7844_v14 }
 0x194   : > { %v1726_v60 = vadd.f32 %v1705_v43, %v1526_v33  ;;  %v1050_v33 = vadd.f32 %v1033_v30, %v8232_v7  ;;  %v769_v43 = vadd.f32 %v12273_v21, %v569_v52  ;;  %v1304_v7 = vmul.f32 %v8343_v35, %v7849_v16 }
 0x195   : > { %1122 = vrot.lane.b32.xlu1 %v1105_v46, %s7536_s25  ;;  %1120 = vrot.lane.b32.xlu0 %v1104_v45, %s7536_s25  ;;  %v1887_v6 = vadd.f32 %v8244_v42, %v1727_v55  ;;  %v12272_v46 = vld [vmem:[#allocation30_spill] sm:$0xff]  ;;  %v12274_v55 = vld [vmem:[#allocation25_spill] sm:$0xff] }
 0x196   : > { %v1886_v22 = vadd.f32 %v8244_v42, %v1726_v60  ;;  %v8332_v31 = vpop.permute.xlu1 %596  ;;  %v568_v45 = vadd.f32 %v12272_v46, %v456_v5  ;;  %v937_v60 = vmul.f32 %v8174_v13, %v12274_v55  ;;  %v1417_v46 = vmul.f32 %v8202_v50, %v8016_v17 }
 0x197   : > { %12268 = vst [vmem:[#allocation33_spill] sm:$0xff] %v8332_v31  ;;  %v8334_v36 = vpop.permute.xlu0 %594  ;;  %v1895_v25 = vmax.f32 %v1887_v6, 0.0 }
 0x198   : > { %12269 = vst [vmem:[#allocation34_spill] sm:$0xff] %v8334_v36  ;;  %v1894_v23 = vmax.f32 %v1886_v22, 0.0  ;;  %v12276_v22 = vld [vmem:[#allocation32_spill] sm:$0xff] }
 0x199   : > { %1760 = vrot.lane.b32.xlu1 %v1739_v49, %s7535_s18  ;;  %1758 = vrot.lane.b32.xlu0 %v1738_v53, %s7535_s18  ;;  %v936_v49 = vmul.f32 %v8174_v13, %v12275_v61  ;;  %v768_v36 = vadd.f32 %v12276_v22, %v568_v45  ;;  %v1416_v45 = vmul.f32 %v8202_v50, %v8019_v18 }
 0x19a   : > { %v6900_v9 = vpack.c.bf16 %v1895_v25, %v1894_v23  ;;  %v1235_v53 = vpop.permute.xlu1 %1234  ;;  %v945_v25 = vadd.f32 %v937_v60, %v769_v43  ;;  %v1107_v50 = vmul.f32 %v8312_v54, %v7882_v28 }
 0x19b   : > { %v1233_v6 = vpop.permute.xlu0 %1232  ;;  %v1251_v31 = vadd.f32 %v1235_v53, %v1051_v8  ;;  %v944_v23 = vadd.f32 %v936_v49, %v768_v36  ;;  %v1741_v49 = vmul.f32 %v8155_v44, %v12270_v62  ;;  %v1740_v53 = vmul.f32 %v8155_v44, %v12271_v11 }
 0x19c   : > { %v1250_v4 = vadd.f32 %v1233_v6, %v1050_v33  ;;  %6901 = vmatpush1.bf16.msra.mxu0 %v6900_v9  ;;  %6949 = vmatpush1.bf16.msra.mxu1 %v6900_v9  ;;  %v1049_v52 = vadd.f32 %v8234_v48, %v945_v25  ;;  %v828_v48 = vmul.f32 %v8210_v32, %v7861_v20  ;;  %v12277_v25 = vld [vmem:[#allocation23_spill] sm:$0xff] }
 0x19d   : > { %650 = vrot.lane.b32.xlu1 %v629_v37, %s7536_s25  ;;  %648 = vrot.lane.b32.xlu0 %v628_v41, %s7536_s25  ;;  %v8366_v13 = vadd.f32 %v1419_v47, %v1251_v31  ;;  %v1541_v37 = vmul.f32 %v8121_v15, %v12270_v62  ;;  %v1540_v41 = vmul.f32 %v8121_v15, %v12271_v11 }
 0x19e   : > { %6902 = vmatprep.subr.bf16.mxu0 %v12267_v10  ;;  %6950 = vmatprep.subr.bf16.mxu1 %v12267_v10  ;;  %v8368_v27 = vadd.f32 %v1418_v12, %v1250_v4  ;;  %v1511_v30 = vpop.permute.xlu1 %1510  ;;  %v1048_v31 = vadd.f32 %v8236_v24, %v944_v23  ;;  %v1249_v36 = vadd.f32 %v8272_v26, %v1049_v52  ;;  %v12278_v23 = vld [vmem:[#allocation24_spill] sm:$0xff] }
 0x19f   : > { %v1509_v5 = vpop.permute.xlu0 %1508  ;;  %v829_v15 = vmul.f32 %v8210_v32, %v7858_v19  ;;  %v1106_v33 = vmul.f32 %v8312_v54, %v7885_v29  ;;  %v631_v62 = vmul.f32 %v8171_v63, %v12277_v25  ;;  %v630_v44 = vmul.f32 %v8171_v63, %v12278_v23 }
 0x1a0   : > { %v1248_v12 = vadd.f32 %v8274_v34, %v1048_v31  ;;  %v1425_v34 = vadd.f32 %v1417_v46, %v1249_v36  ;;  %v1307_v52 = vmul.f32 %v8343_v35, %v7882_v28  ;;  %v1306_v31 = vmul.f32 %v8343_v35, %v7885_v29 }
 0x1a1   : > { %1322 = vrot.lane.b32.xlu1 %v1305_v0, %s7535_s18  ;;  %1320 = vrot.lane.b32.xlu0 %v1304_v7, %s7535_s18  ;;  %v8432_v36 = vstv %s6702_s10  ;;  %s6710_s10 = sld [smem:[#allocation6 + $0x3]] }
 0x1a2   : > { %v8378_v4 = vpop.permute.xlu1 %796  ;;  %v1424_v8 = vadd.f32 %v1416_v45, %v1248_v12  ;;  %v1529_v19 = vadd.f32 %v1511_v30, %v1425_v34  ;;  %v1585_v46 = vmul.f32 %v8432_v36, %v7910_v38  ;;  %v1584_v28 = vmul.f32 %v8432_v36, %v7915_v40 }
 0x1a3   : > { %v8380_v47 = vpop.permute.xlu0 %794 }
 0x1a4   : > { %v1528_v9 = vadd.f32 %v1509_v5, %v1424_v8 }
 0x1a5   : > { %1564 = vrot.lane.b32.xlu1 %v1541_v37, %s7536_s25  ;;  %1562 = vrot.lane.b32.xlu0 %v1540_v41, %s7536_s25 }
 0x1a6   : > { %v8394_v24 = vpop.permute.xlu1 %1072 }
 0x1a7   : > { %v8396_v26 = vpop.permute.xlu0 %1070 }
 0x1a9   : > { %850 = vrot.lane.b32.xlu1 %v829_v15, %s7535_s18  ;;  %848 = vrot.lane.b32.xlu0 %v828_v48, %s7535_s18  ;;  %v831_v15 = vmul.f32 %v8210_v32, %v12277_v25  ;;  %v830_v48 = vmul.f32 %v8210_v32, %v12278_v23 }
 0x1aa   : > { %v1711_v21 = vpop.permute.xlu1 %1710 }
 0x1ab   : > { %v1709_v20 = vpop.permute.xlu0 %1708  ;;  %v1729_v43 = vadd.f32 %v1711_v21, %v1529_v19  ;;  %v8462_v19 = vstv %s6673_s17  ;;  %v8466_v21 = vstv %s6706_s20  ;;  %s6819_s17 = sshll.u32 %s12928_s12, 4 }
 0x1ac   : > { %v1728_v60 = vadd.f32 %v1709_v20, %v1528_v9 }
 0x1ad   : > { %1126 = vrot.lane.b32.xlu1 %v1107_v50, %s7536_s25  ;;  %1124 = vrot.lane.b32.xlu0 %v1106_v33, %s7536_s25  ;;  %v1889_v6 = vadd.f32 %v8244_v42, %v1729_v43  ;;  %v1109_v50 = vmul.f32 %v8312_v54, %v12274_v55  ;;  %v1108_v33 = vmul.f32 %v8312_v54, %v12275_v61 }
 0x1ae   : > { %v1888_v22 = vadd.f32 %v8244_v42, %v1728_v60  ;;  %v8412_v0 = vpop.permute.xlu1 %600 }
 0x1af   : > { %v8414_v7 = vpop.permute.xlu0 %598  ;;  %v1897_v30 = vmax.f32 %v1889_v6, 0.0  ;;  %v470_v6 = vmul.f32 %v8462_v19, %v7814_v1 }
 0x1b0   : > { %v1896_v5 = vmax.f32 %v1888_v22, 0.0 }
 0x1b1   : > { %1764 = vrot.lane.b32.xlu1 %v1741_v49, %s7535_s18  ;;  %1762 = vrot.lane.b32.xlu0 %v1740_v53, %s7535_s18  ;;  %v471_v53 = vmul.f32 %v8462_v19, %v7817_v3  ;;  %v8480_v3 = vstv %s6679_s21 }
 0x1b2   : > { %v6903_v11 = vpack.c.bf16 %v1897_v30, %v1896_v5  ;;  %v8422_v37 = vpop.permute.xlu1 %1272 }
 0x1b3   : > { %v8424_v41 = vpop.permute.xlu0 %1270 }
 0x1b4   : > { %6904 = vmatpush1.bf16.msra.mxu0 %v6903_v11  ;;  %6952 = vmatpush1.bf16.msra.mxu1 %v6903_v11  ;;  %v8491_v11 = vld [vmem:[%s7809_s23 + $0x8] sm:$0xff] }
 0x1b5   : > { %654 = vrot.lane.b32.xlu1 %v631_v62, %s7536_s25  ;;  %652 = vrot.lane.b32.xlu0 %v630_v44, %s7536_s25  ;;  %v8486_v62 = vstv %s6685_s15  ;;  %v675_v1 = vmul.f32 %v8491_v11, %v8480_v3  ;;  %s441_s15 = scalar_lea.vmem %s12072_s9, %s6819_s17 }
 0x1b6   : > { %6905 = vmatprep.subr.bf16.mxu0 %v12267_v10  ;;  %6953 = vmatprep.subr.bf16.mxu1 %v12267_v10  ;;  %v1515_v63 = vpop.permute.xlu1 %1514 }
 0x1b7   : > { %v1513_v12 = vpop.permute.xlu0 %1512  ;;  %v1531_v32 = vadd.f32 %v1515_v63, %v8366_v13  ;;  %v1785_v13 = vmul.f32 %v8466_v21, %v7910_v38  ;;  %v614_v63 = vadd.f32 %v8260_v56, %v470_v6 }
 0x1b8   : > { %v1530_v9 = vadd.f32 %v1513_v12, %v8368_v27  ;;  %v1784_v27 = vmul.f32 %v8466_v21, %v7915_v40 }
 0x1b9   : > { %1326 = vrot.lane.b32.xlu1 %v1307_v52, %s7535_s18  ;;  %1324 = vrot.lane.b32.xlu0 %v1306_v31, %s7535_s18  ;;  %v615_v31 = vadd.f32 %v8258_v51, %v471_v53  ;;  %v1308_v51 = vmul.f32 %v8343_v35, %v12275_v61  ;;  %v1586_v61 = vmul.f32 %v8432_v36, %v7969_v59 }
 0x1ba   : > { %v8442_v29 = vpop.permute.xlu1 %800 }
 0x1bb   : > { %v8444_v45 = vpop.permute.xlu0 %798 }
 0x1bd   : > { %1602 = vrot.lane.b32.xlu1 %v1585_v46, %s7536_s25  ;;  %1600 = vrot.lane.b32.xlu0 %v1584_v28, %s7536_s25  ;;  %v951_v46 = vmul.f32 %v8486_v62, %v7844_v14  ;;  %v1309_v14 = vmul.f32 %v8343_v35, %v12274_v55  ;;  %v1587_v55 = vmul.f32 %v8432_v36, %v7966_v58 }
 0x1be   : > { %v8452_v34 = vpop.permute.xlu1 %1076 }
 0x1bf   : > { %v8454_v8 = vpop.permute.xlu0 %1074 }
 0x1c1   : > { %854 = vrot.lane.b32.xlu1 %v831_v15, %s7535_s18  ;;  %852 = vrot.lane.b32.xlu0 %v830_v48, %s7535_s18  ;;  %v815_v48 = vadd.f32 %v8296_v39, %v615_v31 }
 0x1c2   : > { %v1715_v20 = vpop.permute.xlu1 %1714 }
 0x1c3   : > { %v1713_v43 = vpop.permute.xlu0 %1712  ;;  %v1731_v60 = vadd.f32 %v1715_v20, %v1531_v32  ;;  %v8520_v32 = vstv %s6697_s22 }
 0x1c4   : > { %v1730_v49 = vadd.f32 %v1713_v43, %v1530_v9  ;;  %v8530_v43 = vstv %s6683_s19  ;;  %v1430_v6 = vmul.f32 %v8520_v32, %v7915_v40  ;;  %v12279_v40 = vld [vmem:[#allocation27_spill] sm:$0xff] }
 0x1c5   : > { %1130 = vrot.lane.b32.xlu1 %v1109_v50, %s7536_s25  ;;  %1128 = vrot.lane.b32.xlu0 %v1108_v33, %s7536_s25  ;;  %v1891_v22 = vadd.f32 %v8244_v42, %v1731_v60  ;;  %v814_v50 = vadd.f32 %v8298_v57, %v614_v63  ;;  %v950_v33 = vmul.f32 %v8486_v62, %v7849_v16 }
 0x1c6   : > { %v1890_v30 = vadd.f32 %v8244_v42, %v1730_v49  ;;  %v8482_v5 = vpop.permute.xlu1 %604  ;;  %v8496_v42 = vld [vmem:[%s7809_s23] sm:$0xff]  ;;  %v959_v57 = vadd.f32 %v951_v46, %v815_v48  ;;  %v1787_v48 = vmul.f32 %v8466_v21, %v7966_v58 }
 0x1c7   : > { %v8484_v25 = vpop.permute.xlu0 %602  ;;  %v1899_v23 = vmax.f32 %v1891_v22, 0.0  ;;  %v674_v52 = vmul.f32 %v8496_v42, %v8480_v3  ;;  %v958_v16 = vadd.f32 %v950_v33, %v814_v50  ;;  %v1786_v50 = vmul.f32 %v8466_v21, %v7969_v59  ;;  %v8567_v33 = vld [vmem:[%s7809_s23 + $0x18] sm:$0xff] }
 0x1c8   : > { %v1898_v44 = vmax.f32 %v1890_v30, 0.0  ;;  %v1095_v9 = vadd.f32 %v8394_v24, %v959_v57  ;;  %v875_v24 = vmul.f32 %v8491_v11, %v8530_v43 }
 0x1c9   : > { %1802 = vrot.lane.b32.xlu1 %v1785_v13, %s7535_s18  ;;  %1800 = vrot.lane.b32.xlu0 %v1784_v27, %s7535_s18  ;;  %v1094_v20 = vadd.f32 %v8396_v26, %v958_v16  ;;  %v1431_v27 = vmul.f32 %v8520_v32, %v7910_v38  ;;  %v874_v26 = vmul.f32 %v8496_v42, %v8530_v43 }
 0x1ca   : > { %v6906_v12 = vpack.c.bf16 %v1899_v23, %v1898_v44  ;;  %v8504_v28 = vpop.permute.xlu1 %1276  ;;  %v1295_v53 = vadd.f32 %v8422_v37, %v1095_v9  ;;  %v1111_v38 = vmul.f32 %v8312_v54, %v7986_v2  ;;  %v1110_v23 = vmul.f32 %v8312_v54, %v12279_v40  ;;  %v12280_v9 = vld [vmem:[#allocation33_spill] sm:$0xff] }
 0x1cb   : > { %v8506_v15 = vpop.permute.xlu0 %1274  ;;  %v1294_v13 = vadd.f32 %v8424_v41, %v1094_v20  ;;  %v473_v54 = vmul.f32 %v8567_v33, %v8462_v19 }
 0x1cc   : > { %6907 = vmatpush1.bf16.msra.mxu0 %v6906_v12  ;;  %6955 = vmatpush1.bf16.msra.mxu1 %v6906_v12  ;;  %v1439_v41 = vadd.f32 %v1431_v27, %v1295_v53  ;;  %v12281_v53 = vld [vmem:[#allocation34_spill] sm:$0xff] }
 0x1cd   : > { %692 = vrot.lane.b32.xlu1 %v675_v1, %s7536_s25  ;;  %690 = vrot.lane.b32.xlu0 %v674_v52, %s7536_s25  ;;  %v1438_v30 = vadd.f32 %v1430_v6, %v1294_v13  ;;  %v8558_v52 = vstv %s6708_s11  ;;  %v617_v20 = vadd.f32 %v12280_v9, %v473_v54  ;;  %v8591_v6 = vld [vmem:[%s7809_s23 + $0x19] sm:$0xff] }
 0x1ce   : > { %6908 = vmatprep.subr.bf16.mxu0 %v12267_v10  ;;  %6956 = vmatprep.subr.bf16.mxu1 %v12267_v10  ;;  %v1553_v56 = vpop.permute.xlu1 %1552  ;;  %12282 = vst [vmem:[#allocation28_spill] sm:$0xff] %v8591_v6 }
 0x1cf   : > { %v1551_v39 = vpop.permute.xlu0 %1550  ;;  %v1575_v44 = vadd.f32 %v1553_v56, %v1439_v41 }
 0x1d0   : > { %v1574_v1 = vadd.f32 %v1551_v39, %v1438_v30  ;;  %v817_v30 = vadd.f32 %v8378_v4, %v617_v20  ;;  %v8658_v20 = vld [vmem:[%s7809_s23 + $0x1] sm:$0xff] }
 0x1d1   : > { %1330 = vrot.lane.b32.xlu1 %v1309_v14, %s7535_s18  ;;  %1328 = vrot.lane.b32.xlu0 %v1308_v51, %s7535_s18  ;;  %v8572_v14 = vld [vmem:[%s7809_s23 + $0x10] sm:$0xff] }
 0x1d2   : > { %v8532_v60 = vpop.permute.xlu1 %804  ;;  %v472_v51 = vmul.f32 %v8572_v14, %v8462_v19 }
 0x1d3   : > { %v8534_v49 = vpop.permute.xlu0 %802 }
 0x1d4   : > { %v616_v13 = vadd.f32 %v12281_v53, %v472_v51 }
 0x1d5   : > { %1606 = vrot.lane.b32.xlu1 %v1587_v55, %s7536_s25  ;;  %1604 = vrot.lane.b32.xlu0 %v1586_v61, %s7536_s25  ;;  %v677_v55 = vmul.f32 %v8567_v33, %v8480_v3  ;;  %v676_v61 = vmul.f32 %v8572_v14, %v8480_v3 }
 0x1d6   : > { %v8548_v22 = vpop.permute.xlu1 %1080 }
 0x1d7   : > { %v8550_v37 = vpop.permute.xlu0 %1078 }
 0x1d9   : > { %892 = vrot.lane.b32.xlu1 %v875_v24, %s7535_s18  ;;  %890 = vrot.lane.b32.xlu0 %v874_v26, %s7535_s18  ;;  %v953_v24 = vmul.f32 %v8591_v6, %v8486_v62 }
 0x1da   : > { %v1753_v31 = vpop.permute.xlu1 %1752 }
 0x1db   : > { %v1751_v63 = vpop.permute.xlu0 %1750  ;;  %v1775_v12 = vadd.f32 %v1753_v31, %v1575_v44  ;;  %v1310_v31 = vmul.f32 %v8343_v35, %v12279_v40 }
 0x1dc   : > { %v1774_v46 = vadd.f32 %v1751_v63, %v1574_v1  ;;  %v1311_v1 = vmul.f32 %v8343_v35, %v7986_v2  ;;  %v961_v63 = vadd.f32 %v953_v24, %v817_v30  ;;  %v1589_v2 = vmul.f32 %v8432_v36, %v8016_v17 }
 0x1dd   : > { %1134 = vrot.lane.b32.xlu1 %v1111_v38, %s7536_s25  ;;  %1132 = vrot.lane.b32.xlu0 %v1110_v23, %s7536_s25  ;;  %v1903_v56 = vadd.f32 %v8558_v52, %v1775_v12  ;;  %v816_v38 = vadd.f32 %v8380_v47, %v616_v13  ;;  %v8602_v23 = vld [vmem:[%s7809_s23 + $0x11] sm:$0xff]  ;;  %v1588_v35 = vmul.f32 %v8432_v36, %v8019_v18 }
 0x1de   : > { %v1902_v39 = vadd.f32 %v8558_v52, %v1774_v46  ;;  %v8578_v57 = vpop.permute.xlu1 %642  ;;  %12283 = vst [vmem:[#allocation29_spill] sm:$0xff] %v8602_v23  ;;  %v952_v44 = vmul.f32 %v8602_v23, %v8486_v62  ;;  %v1097_v40 = vadd.f32 %v8452_v34, %v961_v63  ;;  %v8634_v18 = vld [vmem:[%s7809_s23 + $0x12] sm:$0xff]  ;;  %v8670_v63 = vld [vmem:[%s7809_s23 + $0x22] sm:$0xff] }
 0x1df   : > { %v8580_v58 = vpop.permute.xlu0 %640  ;;  %v1911_v59 = vmax.f32 %v1903_v56, 0.0  ;;  %v8629_v56 = vld [vmem:[%s7809_s23 + $0x1a] sm:$0xff]  ;;  %v1432_v34 = vmul.f32 %v8634_v18, %v8520_v32 }
 0x1e0   : > { %v1910_v16 = vmax.f32 %v1902_v39, 0.0  ;;  %v960_v12 = vadd.f32 %v952_v44, %v816_v38  ;;  %v1297_v54 = vadd.f32 %v8504_v28, %v1097_v40  ;;  %v1433_v17 = vmul.f32 %v8629_v56, %v8520_v32 }
 0x1e1   : > { %1806 = vrot.lane.b32.xlu1 %v1787_v48, %s7535_s18  ;;  %1804 = vrot.lane.b32.xlu0 %v1786_v50, %s7535_s18  ;;  %v876_v28 = vmul.f32 %v8572_v14, %v8530_v43 }
 0x1e2   : > { %v6909_v27 = vpack.c.bf16 %v1911_v59, %v1910_v16  ;;  %v8595_v26 = vpop.permute.xlu1 %1280  ;;  %v1096_v46 = vadd.f32 %v8454_v8, %v960_v12  ;;  %v877_v8 = vmul.f32 %v8567_v33, %v8530_v43  ;;  %v1441_v16 = vadd.f32 %v1433_v17, %v1297_v54 }
 0x1e3   : > { %v8597_v41 = vpop.permute.xlu0 %1278 }
 0x1e4   : > { %6910 = vmatpush1.bf16.msra.mxu0 %v6909_v27  ;;  %6958 = vmatpush1.bf16.msra.mxu1 %v6909_v27  ;;  %v1296_v51 = vadd.f32 %v8506_v15, %v1096_v46  ;;  %v8644_v15 = vstv %s6691_s26 }
 0x1e5   : > { %696 = vrot.lane.b32.xlu1 %v677_v55, %s7536_s25  ;;  %694 = vrot.lane.b32.xlu0 %v676_v61, %s7536_s25  ;;  %v8653_v61 = vld [vmem:[%s7809_s23 + $0x9] sm:$0xff]  ;;  %v1154_v53 = vmul.f32 %v8658_v20, %v8644_v15 }
 0x1e6   : > { %6911 = vmatprep.subr.bf16.mxu0 %v12267_v10  ;;  %6959 = vmatprep.subr.bf16.mxu1 %v12267_v10  ;;  %v1557_v4 = vpop.permute.xlu1 %1556  ;;  %v1440_v55 = vadd.f32 %v1432_v34, %v1296_v51  ;;  %v1155_v9 = vmul.f32 %v8653_v61, %v8644_v15 }
 0x1e7   : > { %v1555_v47 = vpop.permute.xlu0 %1554  ;;  %v1577_v13 = vadd.f32 %v1557_v4, %v1441_v16  ;;  %v1788_v4 = vmul.f32 %v8670_v63, %v8466_v21 }
 0x1e8   : > { %v1576_v27 = vadd.f32 %v1555_v47, %v1440_v55  ;;  %v8675_v47 = vld [vmem:[%s7809_s23 + $0x28] sm:$0xff] }
 0x1e9   : > { %1334 = vrot.lane.b32.xlu1 %v1311_v1, %s7535_s18  ;;  %1332 = vrot.lane.b32.xlu0 %v1310_v31, %s7535_s18  ;;  %v8665_v1 = vld [vmem:[%s7809_s23 + $0x2a] sm:$0xff]  ;;  %12284 = vst [vmem:[#allocation30_spill] sm:$0xff] %v8675_v47  ;;  %v475_v12 = vmul.f32 %v8675_v47, %v8462_v19 }
 0x1ea   : > { %v8622_v48 = vpop.permute.xlu1 %842  ;;  %v1789_v31 = vmul.f32 %v8665_v1, %v8466_v21 }
 0x1eb   : > { %v8624_v50 = vpop.permute.xlu0 %840  ;;  %v619_v16 = vadd.f32 %v8412_v0, %v475_v12 }
 0x1ed   : > { %1610 = vrot.lane.b32.xlu1 %v1589_v2, %s7536_s25  ;;  %1608 = vrot.lane.b32.xlu0 %v1588_v35, %s7536_s25  ;;  %v8680_v2 = vld [vmem:[%s7809_s23 + $0x20] sm:$0xff] }
 0x1ee   : > { %v8646_v39 = vpop.permute.xlu1 %1084  ;;  %12285 = vst [vmem:[#allocation31_spill] sm:$0xff] %v8680_v2  ;;  %v474_v35 = vmul.f32 %v8680_v2, %v8462_v19 }
 0x1ef   : > { %v8648_v59 = vpop.permute.xlu0 %1082 }
 0x1f0   : > { %v618_v55 = vadd.f32 %v8414_v7, %v474_v35 }
 0x1f1   : > { %896 = vrot.lane.b32.xlu1 %v877_v8, %s7535_s18  ;;  %894 = vrot.lane.b32.xlu0 %v876_v28, %s7535_s18  ;;  %v679_v8 = vmul.f32 %v8675_v47, %v8480_v3  ;;  %v678_v28 = vmul.f32 %v8680_v2, %v8480_v3 }
 0x1f2   : > { %v1757_v24 = vpop.permute.xlu1 %1756 }
 0x1f3   : > { %v1755_v30 = vpop.permute.xlu0 %1754  ;;  %v1777_v38 = vadd.f32 %v1757_v24, %v1577_v13  ;;  %v8701_v13 = vld [vmem:[%s7809_s23 + $0x29] sm:$0xff] }
 0x1f4   : > { %v1776_v44 = vadd.f32 %v1755_v30, %v1576_v27  ;;  %v955_v27 = vmul.f32 %v8701_v13, %v8486_v62 }
 0x1f5   : > { %1172 = vrot.lane.b32.xlu1 %v1155_v9, %s7536_s25  ;;  %1170 = vrot.lane.b32.xlu0 %v1154_v53, %s7536_s25  ;;  %v1905_v40 = vadd.f32 %v8558_v52, %v1777_v38  ;;  %v8698_v53 = vstv %s6695_s13  ;;  %v819_v38 = vadd.f32 %v8442_v29, %v619_v16 }
 0x1f6   : > { %v1904_v46 = vadd.f32 %v8558_v52, %v1776_v44  ;;  %v818_v44 = vadd.f32 %v8444_v45, %v618_v55  ;;  %v1355_v7 = vmul.f32 %v8653_v61, %v8698_v53  ;;  %v1354_v29 = vmul.f32 %v8658_v20, %v8698_v53 }
 0x1f7   : > { %v8686_v54 = vpop.permute.xlu1 %646  ;;  %v8688_v51 = vpop.permute.xlu0 %644  ;;  %v1913_v17 = vmax.f32 %v1905_v40, 0.0  ;;  %v963_v12 = vadd.f32 %v955_v27, %v819_v38  ;;  %v8727_v40 = vld [vmem:[%s7809_s23 + $0x3a] sm:$0xff]  ;;  %v1435_v38 = vmul.f32 %v8665_v1, %v8520_v32 }
 0x1f8   : > { %v1912_v34 = vmax.f32 %v1904_v46, 0.0  ;;  %v1591_v46 = vmul.f32 %v8727_v40, %v8432_v36 }
 0x1f9   : > { %1810 = vrot.lane.b32.xlu1 %v1789_v31, %s7535_s18  ;;  %1808 = vrot.lane.b32.xlu0 %v1788_v4, %s7535_s18  ;;  %v8712_v31 = vld [vmem:[%s7809_s23 + $0x21] sm:$0xff] }
 0x1fa   : > { %v6912_v9 = vpack.c.bf16 %v1913_v17, %v1912_v34  ;;  %v954_v0 = vmul.f32 %v8712_v31, %v8486_v62  ;;  %v8732_v17 = vld [vmem:[%s7809_s23 + $0x32] sm:$0xff] }
 0x1fb   : > { %v8705_v24 = vpop.permute.xlu1 %1284  ;;  %v8707_v30 = vpop.permute.xlu0 %1282  ;;  %v1590_v34 = vmul.f32 %v8732_v17, %v8432_v36  ;;  %v879_v36 = vmul.f32 %v8675_v47, %v8530_v43 }
 0x1fc   : > { %6913 = vmatpush1.bf16.msra.mxu0 %v6912_v9  ;;  %6961 = vmatpush1.bf16.msra.mxu1 %v6912_v9  ;;  %v962_v35 = vadd.f32 %v954_v0, %v818_v44  ;;  %v1434_v44 = vmul.f32 %v8670_v63, %v8520_v32 }
 0x1fd   : > { %700 = vrot.lane.b32.xlu1 %v679_v8, %s7536_s25  ;;  %698 = vrot.lane.b32.xlu0 %v678_v28, %s7536_s25  ;;  %v1099_v8 = vadd.f32 %v8548_v22, %v963_v12  ;;  %v878_v22 = vmul.f32 %v8680_v2, %v8530_v43 }
 0x1fe   : > { %6914 = vmatprep.subr.bf16.mxu0 %v12267_v10  ;;  %6962 = vmatprep.subr.bf16.mxu1 %v12267_v10  ;;  %v1098_v28 = vadd.f32 %v8550_v37, %v962_v35 }
 0x1ff   : > { %v1561_v45 = vpop.permute.xlu1 %1560  ;;  %v1559_v4 = vpop.permute.xlu0 %1558  ;;  %v1299_v9 = vadd.f32 %v8595_v26, %v1099_v8 }
 0x200   : > { %v1298_v27 = vadd.f32 %v8597_v41, %v1098_v28 }
 0x201   : > { %1372 = vrot.lane.b32.xlu1 %v1355_v7, %s7535_s18  ;;  %1370 = vrot.lane.b32.xlu0 %v1354_v29, %s7535_s18  ;;  %v1443_v41 = vadd.f32 %v1435_v38, %v1299_v9  ;;  %v1157_v7 = vmul.f32 %v8591_v6, %v8644_v15  ;;  %v1156_v29 = vmul.f32 %v8602_v23, %v8644_v15  ;;  %v8773_v38 = vld [vmem:[%s7809_s23 + $0x38] sm:$0xff] }
 0x202   : > { %v1442_v0 = vadd.f32 %v1434_v44, %v1298_v27  ;;  %v1791_v9 = vmul.f32 %v8727_v40, %v8466_v21  ;;  %v1790_v27 = vmul.f32 %v8732_v17, %v8466_v21 }
 0x203   : > { %v8738_v16 = vpop.permute.xlu1 %846  ;;  %v8740_v55 = vpop.permute.xlu0 %844  ;;  %v1579_v12 = vadd.f32 %v1561_v45, %v1443_v41  ;;  %v477_v45 = vmul.f32 %v8773_v38, %v8462_v19 }
 0x204   : > { %12286 = vst [vmem:[#allocation25_spill] sm:$0xff] %v8740_v55  ;;  %v1578_v35 = vadd.f32 %v1559_v4, %v1442_v0  ;;  %v8778_v4 = vld [vmem:[%s7809_s23 + $0x30] sm:$0xff] }
 0x205   : > { %1614 = vrot.lane.b32.xlu1 %v1591_v46, %s7536_s25  ;;  %1612 = vrot.lane.b32.xlu0 %v1590_v34, %s7536_s25  ;;  %v476_v44 = vmul.f32 %v8778_v4, %v8462_v19  ;;  %v680_v19 = vmul.f32 %v8778_v4, %v8480_v3 }
 0x207   : > { %v8754_v37 = vpop.permute.xlu1 %1122  ;;  %v8756_v26 = vpop.permute.xlu0 %1120 }
 0x209   : > { %900 = vrot.lane.b32.xlu1 %v879_v36, %s7535_s18  ;;  %898 = vrot.lane.b32.xlu0 %v878_v22, %s7535_s18 }
 0x20b   : > { %v1761_v46 = vpop.permute.xlu1 %1760  ;;  %v1759_v34 = vpop.permute.xlu0 %1758 }
 0x20c   : > { %v1779_v8 = vadd.f32 %v1761_v46, %v1579_v12  ;;  %v1778_v28 = vadd.f32 %v1759_v34, %v1578_v35  ;;  %v621_v12 = vadd.f32 %v8482_v5, %v477_v45  ;;  %v620_v35 = vadd.f32 %v8484_v25, %v476_v44  ;;  %v8793_v34 = vld [vmem:[%s7809_s23 + $0x39] sm:$0xff] }
 0x20d   : > { %1176 = vrot.lane.b32.xlu1 %v1157_v7, %s7536_s25  ;;  %1174 = vrot.lane.b32.xlu0 %v1156_v29, %s7536_s25  ;;  %v681_v29 = vmul.f32 %v8773_v38, %v8480_v3  ;;  %v8809_v5 = vstv %s8764_s16  ;;  %v1357_v25 = vmul.f32 %v8591_v6, %v8698_v53  ;;  %v8821_v45 = vstv %s6703_s24 }
 0x20e   : > { %v1907_v36 = vadd.f32 %v8558_v52, %v1779_v8  ;;  %v1906_v22 = vadd.f32 %v8558_v52, %v1778_v28  ;;  %v957_v8 = vmul.f32 %v8793_v34, %v8486_v62 }
 0x20f   : > { %v651_v41 = vpop.permute.xlu1 %650  ;;  %v649_v0 = vpop.permute.xlu0 %648 }
 0x210   : > { %v1915_v21 = vmax.f32 %v1907_v36, 0.0  ;;  %v1914_v7 = vmax.f32 %v1906_v22, 0.0  ;;  %v820_v36 = vadd.f32 %v8534_v49, %v620_v35  ;;  %v8804_v22 = vld [vmem:[%s7809_s23 + $0x31] sm:$0xff]  ;;  %v493_v49 = vmul.f32 %v8675_v47, %v8809_v5  ;;  %v8833_v35 = vld [vmem:[%s7809_s23 + $0x2] sm:$0xff] }
 0x211   : > { %1814 = vrot.lane.b32.xlu1 %v1791_v9, %s7535_s18  ;;  %1812 = vrot.lane.b32.xlu0 %v1790_v27, %s7535_s18  ;;  %v821_v27 = vadd.f32 %v8532_v60, %v621_v12  ;;  %v956_v3 = vmul.f32 %v8804_v22, %v8486_v62  ;;  %v1356_v60 = vmul.f32 %v8602_v23, %v8698_v53 }
 0x212   : > { %v6915_v46 = vpack.c.bf16 %v1915_v21, %v1914_v7  ;;  %v492_v62 = vmul.f32 %v8680_v2, %v8809_v5 }
 0x213   : > { %v8797_v28 = vpop.permute.xlu1 %1322  ;;  %v8799_v9 = vpop.permute.xlu0 %1320  ;;  %v965_v7 = vadd.f32 %v957_v8, %v821_v27  ;;  %v669_v8 = vadd.f32 %v651_v41, %v493_v49 }
 0x214   : > { %6916 = vmatpush1.bf16.msra.mxu0 %v6915_v46  ;;  %6964 = vmatpush1.bf16.msra.mxu1 %v6915_v46  ;;  %v1634_v46 = vmul.f32 %v8833_v35, %v8821_v45  ;;  %v668_v27 = vadd.f32 %v649_v0, %v492_v62 }
 0x215   : > { %704 = vrot.lane.b32.xlu1 %v681_v29, %s7536_s25  ;;  %702 = vrot.lane.b32.xlu0 %v680_v19, %s7536_s25  ;;  %v964_v29 = vadd.f32 %v956_v3, %v820_v36  ;;  %v8828_v19 = vld [vmem:[%s7809_s23 + $0xa] sm:$0xff]  ;;  %v1101_v2 = vadd.f32 %v8646_v39, %v965_v7  ;;  %v1437_v36 = vmul.f32 %v8727_v40, %v8520_v32  ;;  %s6686_s23 = sld [smem:[#allocation3 + $0x15]] }
 0x216   : > { %6917 = vmatprep.subr.bf16.mxu0 %v12267_v10  ;;  %6965 = vmatprep.subr.bf16.mxu1 %v12267_v10  ;;  %v1635_v12 = vmul.f32 %v8828_v19, %v8821_v45  ;;  %v1436_v3 = vmul.f32 %v8732_v17, %v8520_v32  ;;  %v880_v32 = vmul.f32 %v8778_v4, %v8530_v43 }
 0x217   : > { %v1565_v44 = vpop.permute.xlu1 %1564  ;;  %v1563_v21 = vpop.permute.xlu0 %1562  ;;  %v1100_v47 = vadd.f32 %v8648_v59, %v964_v29  ;;  %v1301_v23 = vadd.f32 %v8705_v24, %v1101_v2  ;;  %v881_v59 = vmul.f32 %v8773_v38, %v8530_v43  ;;  %v1159_v24 = vmul.f32 %v8701_v13, %v8644_v15 }
 0x218   : > { %v8865_v43 = vstv %s6707_s27 }
 0x219   : > { %1376 = vrot.lane.b32.xlu1 %v1357_v25, %s7535_s18  ;;  %1374 = vrot.lane.b32.xlu0 %v1356_v60, %s7535_s18  ;;  %v1300_v55 = vadd.f32 %v8707_v30, %v1100_v47  ;;  %v1445_v47 = vadd.f32 %v1437_v36, %v1301_v23  ;;  %v1158_v30 = vmul.f32 %v8712_v31, %v8644_v15 }
 0x21a   : > { %v1835_v23 = vmul.f32 %v8828_v19, %v8865_v43 }
 0x21b   : > { %v851_v25 = vpop.permute.xlu1 %850  ;;  %v849_v60 = vpop.permute.xlu0 %848  ;;  %v1444_v2 = vadd.f32 %v1436_v3, %v1300_v55  ;;  %v1581_v49 = vadd.f32 %v1565_v44, %v1445_v47  ;;  %v1834_v55 = vmul.f32 %v8833_v35, %v8865_v43  ;;  %v489_v44 = vmul.f32 %v8491_v11, %v8809_v5 }
 0x21c   : > { %v8845_v6 = vadd.f32 %v851_v25, %v669_v8  ;;  %v8847_v39 = vadd.f32 %v849_v60, %v668_v27  ;;  %v8879_v25 = vstv %s6686_s23  ;;  %v1358_v47 = vmul.f32 %v8712_v31, %v8698_v53 }
 0x21d   : > { %1652 = vrot.lane.b32.xlu1 %v1635_v12, %s7536_s25  ;;  %1650 = vrot.lane.b32.xlu0 %v1634_v46, %s7536_s25  ;;  %v1580_v62 = vadd.f32 %v1563_v21, %v1444_v2  ;;  %v488_v21 = vmul.f32 %v8496_v42, %v8809_v5  ;;  %v665_v2 = vadd.f32 %v8578_v57, %v489_v44 }
 0x21e   : > { %v1637_v57 = vmul.f32 %v8629_v56, %v8821_v45 }
 0x21f   : > { %v8855_v41 = vpop.permute.xlu1 %1126  ;;  %v8857_v0 = vpop.permute.xlu0 %1124 }
 0x221   : > { %904 = vrot.lane.b32.xlu1 %v881_v59, %s7535_s18  ;;  %902 = vrot.lane.b32.xlu0 %v880_v32, %s7535_s18  ;;  %v1359_v32 = vmul.f32 %v8701_v13, %v8698_v53 }
 0x223   : > { %v1765_v7 = vpop.permute.xlu1 %1764  ;;  %v1763_v29 = vpop.permute.xlu0 %1762 }
 0x224   : > { %v1781_v12 = vadd.f32 %v1765_v7, %v1581_v49  ;;  %v1780_v46 = vadd.f32 %v1763_v29, %v1580_v62  ;;  %v865_v7 = vadd.f32 %v8622_v48, %v665_v2  ;;  %v495_v48 = vmul.f32 %v8773_v38, %v8809_v5 }
 0x225   : > { %1180 = vrot.lane.b32.xlu1 %v1159_v24, %s7536_s25  ;;  %1178 = vrot.lane.b32.xlu0 %v1158_v30, %s7536_s25  ;;  %v969_v30 = vmul.f32 %v8653_v61, %v8879_v25 }
 0x226   : > { %v1909_v8 = vadd.f32 %v8558_v52, %v1781_v12  ;;  %v1908_v27 = vadd.f32 %v8558_v52, %v1780_v46  ;;  %v664_v52 = vadd.f32 %v8580_v58, %v488_v21  ;;  %v968_v12 = vmul.f32 %v8658_v20, %v8879_v25 }
 0x227   : > { %v655_v36 = vpop.permute.xlu1 %654  ;;  %v653_v3 = vpop.permute.xlu0 %652  ;;  %v1636_v58 = vmul.f32 %v8634_v18, %v8821_v45  ;;  %v8911_v21 = vstv %s6698_s14 }
 0x228   : > { %v1917_v60 = vmax.f32 %v1909_v8, 0.0  ;;  %v1916_v59 = vmax.f32 %v1908_v27, 0.0  ;;  %v864_v29 = vadd.f32 %v8624_v50, %v664_v52  ;;  %v494_v50 = vmul.f32 %v8778_v4, %v8809_v5 }
 0x229   : > { %1852 = vrot.lane.b32.xlu1 %v1835_v23, %s7535_s18  ;;  %1850 = vrot.lane.b32.xlu0 %v1834_v55, %s7535_s18  ;;  %v977_v55 = vadd.f32 %v969_v30, %v865_v7  ;;  %v1161_v8 = vmul.f32 %v8793_v34, %v8644_v15  ;;  %v1160_v27 = vmul.f32 %v8804_v22, %v8644_v15 }
 0x22a   : > { %v6918_v24 = vpack.c.bf16 %v1917_v60, %v1916_v59  ;;  %v976_v44 = vadd.f32 %v968_v12, %v864_v29  ;;  %v1449_v2 = vmul.f32 %v8828_v19, %v8911_v21  ;;  %v1448_v52 = vmul.f32 %v8833_v35, %v8911_v21 }
 0x22b   : > { %v8891_v49 = vpop.permute.xlu1 %1326  ;;  %v8893_v62 = vpop.permute.xlu0 %1324  ;;  %v1145_v60 = vadd.f32 %v8754_v37, %v977_v55  ;;  %v8947_v55 = vstv %s6709_s28 }
 0x22c   : > { %6919 = vmatpush1.bf16.msra.mxu0 %v6918_v24  ;;  %6967 = vmatpush1.bf16.msra.mxu1 %v6918_v24  ;;  %v1144_v59 = vadd.f32 %v8756_v26, %v976_v44  ;;  %v1837_v26 = vmul.f32 %v8629_v56, %v8865_v43 }
 0x22d   : > { %1380 = vrot.lane.b32.xlu1 %v1359_v32, %s7535_s18  ;;  %1378 = vrot.lane.b32.xlu0 %v1358_v47, %s7535_s18  ;;  %v671_v32 = vadd.f32 %v655_v36, %v495_v48  ;;  %v670_v47 = vadd.f32 %v653_v3, %v494_v50  ;;  %v1345_v7 = vadd.f32 %v8797_v28, %v1145_v60 }
 0x22e   : > { %6920 = vmatprep.subr.bf16.mxu0 %v12267_v10  ;;  %6968 = vmatprep.subr.bf16.mxu1 %v12267_v10  ;;  %v1344_v29 = vadd.f32 %v8799_v9, %v1144_v59  ;;  %v1836_v36 = vmul.f32 %v8634_v18, %v8865_v43  ;;  %v491_v59 = vmul.f32 %v8567_v33, %v8809_v5 }
 0x22f   : > { %v1603_v46 = vpop.permute.xlu1 %1602  ;;  %v1601_v23 = vpop.permute.xlu0 %1600  ;;  %v1457_v28 = vadd.f32 %v1449_v2, %v1345_v7 }
 0x230   : > { %v1456_v9 = vadd.f32 %v1448_v52, %v1344_v29  ;;  %v667_v7 = vadd.f32 %v8686_v54, %v491_v59  ;;  %v1839_v29 = vmul.f32 %v8665_v1, %v8865_v43 }
 0x231   : > { %1656 = vrot.lane.b32.xlu1 %v1637_v57, %s7536_s25  ;;  %1654 = vrot.lane.b32.xlu0 %v1636_v58, %s7536_s25  ;;  %v1361_v57 = vmul.f32 %v8793_v34, %v8698_v53  ;;  %v1360_v58 = vmul.f32 %v8804_v22, %v8698_v53  ;;  %v1625_v48 = vadd.f32 %v1603_v46, %v1457_v28 }
 0x232   : > { %v1624_v50 = vadd.f32 %v1601_v23, %v1456_v9  ;;  %v1638_v53 = vmul.f32 %v8670_v63, %v8821_v45  ;;  %v490_v46 = vmul.f32 %v8572_v14, %v8809_v5  ;;  %v1838_v5 = vmul.f32 %v8670_v63, %v8865_v43  ;;  %v12287_v9 = vld [vmem:[#allocation28_spill] sm:$0xff] }
 0x233   : > { %v855_v24 = vpop.permute.xlu1 %854  ;;  %v853_v30 = vpop.permute.xlu0 %852  ;;  %v867_v28 = vadd.f32 %v8738_v16, %v667_v7  ;;  %v1640_v16 = vmul.f32 %v8732_v17, %v8821_v45 }
 0x234   : > { %v8927_v15 = vadd.f32 %v855_v24, %v671_v32  ;;  %v8929_v37 = vadd.f32 %v853_v30, %v670_v47  ;;  %v1639_v32 = vmul.f32 %v8665_v1, %v8821_v45 }
 0x235   : > { %1184 = vrot.lane.b32.xlu1 %v1161_v8, %s7536_s25  ;;  %1182 = vrot.lane.b32.xlu0 %v1160_v27, %s7536_s25 }
 0x237   : > { %v8937_v3 = vpop.permute.xlu1 %1130  ;;  %v8939_v12 = vpop.permute.xlu0 %1128 }
 0x239   : > { %1856 = vrot.lane.b32.xlu1 %v1837_v26, %s7535_s18  ;;  %1854 = vrot.lane.b32.xlu0 %v1836_v36, %s7535_s18  ;;  %v666_v26 = vadd.f32 %v8688_v51, %v490_v46  ;;  %v1641_v51 = vmul.f32 %v8727_v40, %v8821_v45 }
 0x23b   : > { %v1803_v44 = vpop.permute.xlu1 %1802  ;;  %v1801_v8 = vpop.permute.xlu0 %1800 }
 0x23c   : > { %v1825_v27 = vadd.f32 %v1803_v44, %v1625_v48  ;;  %v1824_v60 = vadd.f32 %v1801_v8, %v1624_v50  ;;  %v12288_v50 = vld [vmem:[#allocation25_spill] sm:$0xff] }
 0x23d   : > { %1384 = vrot.lane.b32.xlu1 %v1361_v57, %s7535_s18  ;;  %1382 = vrot.lane.b32.xlu0 %v1360_v58, %s7535_s18  ;;  %v971_v57 = vmul.f32 %v12287_v9, %v8879_v25  ;;  %v8972_v58 = vstv %s6675_s29  ;;  %v866_v44 = vadd.f32 %v12288_v50, %v666_v26  ;;  %v12289_v8 = vld [vmem:[#allocation29_spill] sm:$0xff] }
 0x23e   : > { %v1921_v23 = vadd.f32 %v8947_v55, %v1825_v27  ;;  %v1920_v47 = vadd.f32 %v8947_v55, %v1824_v60  ;;  %v970_v27 = vmul.f32 %v12289_v8, %v8879_v25  ;;  %v507_v60 = vmul.f32 %v8491_v11, %v8972_v58 }
 0x23f   : > { %v693_v2 = vpop.permute.xlu1 %692  ;;  %v691_v52 = vpop.permute.xlu0 %690  ;;  %v506_v59 = vmul.f32 %v8496_v42, %v8972_v58  ;;  %v1841_v11 = vmul.f32 %v8727_v40, %v8865_v43  ;;  %v1840_v42 = vmul.f32 %v8732_v17, %v8865_v43 }
 0x240   : > { %v1929_v24 = vmax.f32 %v1921_v23, 0.0  ;;  %v1928_v30 = vmax.f32 %v1920_v47, 0.0  ;;  %v978_v23 = vadd.f32 %v970_v27, %v866_v44  ;;  %v1955_v47 = vld [vmem:[#allocation11 + $0x8] sm:$0xff]  ;;  %v715_v7 = vadd.f32 %v693_v2, %v507_v60 }
 0x241   : > { %1660 = vrot.lane.b32.xlu1 %v1639_v32, %s7536_s25  ;;  %1658 = vrot.lane.b32.xlu0 %v1638_v53, %s7536_s25  ;;  %v979_v32 = vadd.f32 %v971_v57, %v867_v28 }
 0x242   : > { %v6921_v36 = vpack.c.bf16 %v1929_v24, %v1928_v30  ;;  %v2140_v24 = vld [vmem:[#allocation11 + $0x118] sm:$0xff]  ;;  %v1146_v45 = vadd.f32 %v8857_v0, %v978_v23  ;;  %2052 = vmatprep.mubr.f32.mxu0 %v1955_v47 }
 0x243   : > { %v8974_v54 = vpop.permute.xlu1 %1330  ;;  %v8976_v48 = vpop.permute.xlu0 %1328  ;;  %v1147_v30 = vadd.f32 %v8855_v41, %v979_v32  ;;  %2237 = vmatprep.mubr.f32.mxu1 %v2140_v24  ;;  %v1450_v41 = vmul.f32 %v8634_v18, %v8911_v21 }
 0x244   : > { %6922 = vmatpush1.bf16.msra.mxu0 %v6921_v36  ;;  %6970 = vmatpush1.bf16.msra.mxu1 %v6921_v36  ;;  %v1346_v57 = vadd.f32 %v8893_v62, %v1146_v45 }
 0x245   : > { %1860 = vrot.lane.b32.xlu1 %v1839_v29, %s7535_s18  ;;  %1858 = vrot.lane.b32.xlu0 %v1838_v5, %s7535_s18  ;;  %v714_v29 = vadd.f32 %v691_v52, %v506_v59  ;;  %v1451_v5 = vmul.f32 %v8629_v56, %v8911_v21  ;;  %v1347_v28 = vadd.f32 %v8891_v49, %v1147_v30 }
 0x246   : > { %6923 = vmatprep.subr.bf16.mxu0 %v12267_v10  ;;  %6971 = vmatprep.subr.bf16.mxu1 %v12267_v10  ;;  %v1458_v44 = vadd.f32 %v1450_v41, %v1346_v57 }
 0x247   : > { %v1607_v53 = vpop.permute.xlu1 %1606  ;;  %v1605_v46 = vpop.permute.xlu0 %1604  ;;  %v1459_v52 = vadd.f32 %v1451_v5, %v1347_v28 }
 0x249   : > { %1664 = vrot.lane.b32.xlu1 %v1641_v51, %s7536_s25  ;;  %1662 = vrot.lane.b32.xlu0 %v1640_v16, %s7536_s25  ;;  %v1627_v27 = vadd.f32 %v1607_v53, %v1459_v52  ;;  %v1626_v51 = vadd.f32 %v1605_v46, %v1458_v44  ;;  %v973_v53 = vmul.f32 %v8701_v13, %v8879_v25  ;;  %s6699_s25 = sld [smem:[#allocation3 + $0x21]] }
 0x24a   : > { %v972_v46 = vmul.f32 %v8712_v31, %v8879_v25 }
 0x24b   : > { %v893_v26 = vpop.permute.xlu1 %892  ;;  %v891_v36 = vpop.permute.xlu0 %890  ;;  %v981_v5 = vadd.f32 %v973_v53, %v8845_v6  ;;  %v1452_v6 = vmul.f32 %v8670_v63, %v8911_v21 }
 0x24c   : > { %v9007_v50 = vadd.f32 %v893_v26, %v715_v7  ;;  %v9009_v43 = vadd.f32 %v891_v36, %v714_v29  ;;  %v980_v41 = vadd.f32 %v972_v46, %v8847_v39 }
 0x24d   : > { %1864 = vrot.lane.b32.xlu1 %v1841_v11, %s7535_s18  ;;  %1862 = vrot.lane.b32.xlu0 %v1840_v42, %s7535_s18  ;;  %v1149_v26 = vadd.f32 %v8937_v3, %v981_v5  ;;  %s6687_s18 = sld [smem:[#allocation3 + $0x1e]] }
 0x24e   : > { %v1148_v36 = vadd.f32 %v8939_v12, %v980_v41 }
 0x24f   : > { %v9013_v0 = vpop.permute.xlu1 %1134  ;;  %v9015_v2 = vpop.permute.xlu0 %1132  ;;  %v1349_v52 = vadd.f32 %v8974_v54, %v1149_v26 }
 0x250   : > { %v1348_v44 = vadd.f32 %v8976_v48, %v1148_v36 }
 0x252   : > { %v1460_v12 = vadd.f32 %v1452_v6, %v1348_v44 }
 0x253   : > { %v1807_v16 = vpop.permute.xlu1 %1806  ;;  %v1805_v49 = vpop.permute.xlu0 %1804 }
 0x254   : > { %v1827_v60 = vadd.f32 %v1807_v16, %v1627_v27  ;;  %v1826_v62 = vadd.f32 %v1805_v49, %v1626_v51  ;;  %v1453_v27 = vmul.f32 %v8665_v1, %v8911_v21 }
 0x256   : > { %v1923_v59 = vadd.f32 %v8947_v55, %v1827_v60  ;;  %v1922_v32 = vadd.f32 %v8947_v55, %v1826_v62  ;;  %v1461_v3 = vadd.f32 %v1453_v27, %v1349_v52 }
 0x257   : > { %v9019_v23 = vpop.permute.xlu1 %696  ;;  %v9021_v47 = vpop.permute.xlu0 %694 }
 0x258   : > { %v1931_v24 = vmax.f32 %v1923_v59, 0.0  ;;  %v1930_v30 = vmax.f32 %v1922_v32, 0.0 }
 0x25a   : > { %v6924_v11 = vpack.c.bf16 %v1931_v24, %v1930_v30 }
 0x25b   : > { %v1335_v42 = vpop.permute.xlu1 %1334  ;;  %v1333_v45 = vpop.permute.xlu0 %1332 }
 0x25c   : > { %6925 = vmatpush1.bf16.msra.mxu0 %v6924_v11  ;;  %6973 = vmatpush1.bf16.msra.mxu1 %v6924_v11 }
 0x25d   : > { %6926 = vmatprep.subr.bf16.mxu0 %v12267_v10  ;;  %6974 = vmatprep.subr.bf16.mxu1 %v12267_v10 }
 0x25f   : > { %v1611_v7 = vpop.permute.xlu1 %1610  ;;  %v1609_v29 = vpop.permute.xlu0 %1608 }
 0x260   : > { %v1629_v16 = vadd.f32 %v1611_v7, %v1461_v3  ;;  %v1628_v49 = vadd.f32 %v1609_v29, %v1460_v12  ;;  %v975_v7 = vmul.f32 %v8793_v34, %v8879_v25  ;;  %v974_v29 = vmul.f32 %v8804_v22, %v8879_v25 }
 0x262   : > { %v983_v52 = vadd.f32 %v975_v7, %v8927_v15  ;;  %v982_v44 = vadd.f32 %v974_v29, %v8929_v37  ;;  %v9081_v29 = vstv %s6687_s18 }
 0x263   : > { %v9033_v28 = vpop.permute.xlu1 %896  ;;  %v9035_v57 = vpop.permute.xlu0 %894 }
 0x264   : > { %v1151_v27 = vadd.f32 %v9013_v0, %v983_v52  ;;  %v1150_v6 = vadd.f32 %v9015_v2, %v982_v44  ;;  %v987_v44 = vmul.f32 %v8653_v61, %v9081_v29 }
 0x266   : > { %v1351_v25 = vadd.f32 %v1335_v42, %v1151_v27  ;;  %v986_v27 = vmul.f32 %v8658_v20, %v9081_v29 }
 0x267   : > { %v9043_v51 = vpop.permute.xlu1 %1172  ;;  %v9045_v39 = vpop.permute.xlu0 %1170 }
 0x26b   : > { %v1811_v60 = vpop.permute.xlu1 %1810  ;;  %v1809_v62 = vpop.permute.xlu0 %1808 }
 0x26c   : > { %v1829_v59 = vadd.f32 %v1811_v60, %v1629_v16  ;;  %v1828_v54 = vadd.f32 %v1809_v62, %v1628_v49  ;;  %v1350_v16 = vadd.f32 %v1333_v45, %v1150_v6  ;;  %v1455_v49 = vmul.f32 %v8727_v40, %v8911_v21 }
 0x26d   : > { %v1454_v60 = vmul.f32 %v8732_v17, %v8911_v21 }
 0x26e   : > { %v1925_v48 = vadd.f32 %v8947_v55, %v1829_v59  ;;  %v1924_v32 = vadd.f32 %v8947_v55, %v1828_v54  ;;  %v1463_v37 = vadd.f32 %v1455_v49, %v1351_v25  ;;  %v995_v25 = vadd.f32 %v987_v44, %v9007_v50 }
 0x26f   : > { %v9049_v24 = vpop.permute.xlu1 %700  ;;  %v9051_v30 = vpop.permute.xlu0 %698  ;;  %v1462_v0 = vadd.f32 %v1454_v60, %v1350_v16  ;;  %v994_v16 = vadd.f32 %v986_v27, %v9009_v43  ;;  %v9091_v49 = vstv %s6699_s25  ;;  %v509_v43 = vmul.f32 %v8567_v33, %v8972_v58 }
 0x270   : > { %v1933_v11 = vmax.f32 %v1925_v48, 0.0  ;;  %v1932_v53 = vmax.f32 %v1924_v32, 0.0  ;;  %v1195_v60 = vadd.f32 %v9043_v51, %v995_v25  ;;  %v1466_v50 = vmul.f32 %v8833_v35, %v9091_v49 }
 0x271   : > { %v1194_v61 = vadd.f32 %v9045_v39, %v994_v16  ;;  %v508_v51 = vmul.f32 %v8572_v14, %v8972_v58  ;;  %v989_v35 = vmul.f32 %v12287_v9, %v9081_v29  ;;  %v988_v33 = vmul.f32 %v12289_v8, %v9081_v29  ;;  %v12290_v16 = vld [vmem:[#allocation30_spill] sm:$0xff] }
 0x272   : > { %v6927_v46 = vpack.c.bf16 %v1933_v11, %v1932_v53 }
 0x273   : > { %v1373_v5 = vpop.permute.xlu1 %1372  ;;  %v1371_v41 = vpop.permute.xlu0 %1370 }
 0x274   : > { %6928 = vmatpush1.bf16.msra.mxu0 %v6927_v46  ;;  %6976 = vmatpush1.bf16.msra.mxu1 %v6927_v46 }
 0x275   : > { %6929 = vmatprep.subr.bf16.mxu0 %v12267_v10  ;;  %6977 = vmatprep.subr.bf16.mxu1 %v12267_v10 }
 0x277   : > { %v1615_v26 = vpop.permute.xlu1 %1614  ;;  %v1613_v36 = vpop.permute.xlu0 %1612 }
 0x278   : > { %v1631_v2 = vadd.f32 %v1615_v26, %v1463_v37  ;;  %v1630_v59 = vadd.f32 %v1613_v36, %v1462_v0  ;;  %v1395_v0 = vadd.f32 %v1373_v5, %v1195_v60  ;;  %v717_v5 = vadd.f32 %v9019_v23, %v509_v43 }
 0x279   : > { %v511_v60 = vmul.f32 %v12290_v16, %v8972_v58 }
 0x27b   : > { %v9063_v3 = vpop.permute.xlu1 %900  ;;  %v9065_v12 = vpop.permute.xlu0 %898 }
 0x27f   : > { %v9071_v62 = vpop.permute.xlu1 %1176  ;;  %v9073_v15 = vpop.permute.xlu0 %1174 }
 0x283   : > { %v1815_v54 = vpop.permute.xlu1 %1814  ;;  %v1813_v48 = vpop.permute.xlu0 %1812 }
 0x284   : > { %v1831_v32 = vadd.f32 %v1815_v54, %v1631_v2  ;;  %v1830_v42 = vadd.f32 %v1813_v48, %v1630_v59  ;;  %v1394_v2 = vadd.f32 %v1371_v41, %v1194_v61  ;;  %v1467_v59 = vmul.f32 %v8828_v19, %v9091_v49  ;;  %v12291_v61 = vld [vmem:[#allocation31_spill] sm:$0xff] }
 0x285   : > { %v716_v41 = vadd.f32 %v9021_v47, %v508_v51 }
 0x286   : > { %v1927_v45 = vadd.f32 %v8947_v55, %v1831_v32  ;;  %v1926_v11 = vadd.f32 %v8947_v55, %v1830_v42  ;;  %v1475_v48 = vadd.f32 %v1467_v59, %v1395_v0  ;;  %v1474_v32 = vadd.f32 %v1466_v50, %v1394_v2 }
 0x287   : > { %v9077_v53 = vpop.permute.xlu1 %704  ;;  %v9079_v21 = vpop.permute.xlu0 %702  ;;  %v1469_v59 = vmul.f32 %v8629_v56, %v9091_v49  ;;  %v991_v56 = vmul.f32 %v8701_v13, %v9081_v29 }
 0x288   : > { %v1935_v46 = vmax.f32 %v1927_v45, 0.0  ;;  %v1934_v7 = vmax.f32 %v1926_v11, 0.0  ;;  %v9117_v45 = vstv %s6710_s10 }
 0x28a   : > { %v6930_v52 = vpack.c.bf16 %v1935_v46, %v1934_v7  ;;  %v917_v46 = vadd.f32 %v9033_v28, %v717_v5  ;;  %v916_v7 = vadd.f32 %v9035_v57, %v716_v41  ;;  %v510_v28 = vmul.f32 %v12291_v61, %v8972_v58 }
 0x28b   : > { %v1377_v26 = vpop.permute.xlu1 %1376  ;;  %v1375_v36 = vpop.permute.xlu0 %1374 }
 0x28c   : > { %6931 = vmatpush1.bf16.msra.mxu0 %v6930_v52  ;;  %6979 = vmatpush1.bf16.msra.mxu1 %v6930_v52  ;;  %v997_v9 = vadd.f32 %v989_v35, %v917_v46  ;;  %v513_v35 = vmul.f32 %v8773_v38, %v8972_v58  ;;  %v992_v38 = vmul.f32 %v8804_v22, %v9081_v29 }
 0x28d   : > { %6932 = vmatprep.subr.bf16.mxu0 %v12267_v10  ;;  %6980 = vmatprep.subr.bf16.mxu1 %v12267_v10  ;;  %v1470_v22 = vmul.f32 %v8670_v63, %v9091_v49 }
 0x28e   : > { %v1197_v57 = vadd.f32 %v9071_v62, %v997_v9  ;;  %v719_v62 = vadd.f32 %v9049_v24, %v511_v60  ;;  %v512_v24 = vmul.f32 %v8778_v4, %v8972_v58 }
 0x28f   : > { %v1653_v55 = vpop.permute.xlu1 %1652  ;;  %v1651_v6 = vpop.permute.xlu0 %1650 }
 0x290   : > { %v1675_v19 = vadd.f32 %v1653_v55, %v1475_v48  ;;  %v1674_v42 = vadd.f32 %v1651_v6, %v1474_v32  ;;  %v996_v6 = vadd.f32 %v988_v33, %v916_v7  ;;  %v1397_v51 = vadd.f32 %v1377_v26, %v1197_v57 }
 0x291   : > { %v1468_v32 = vmul.f32 %v8634_v18, %v9091_v49  ;;  %v990_v26 = vmul.f32 %v8712_v31, %v9081_v29  ;;  %v919_v18 = vadd.f32 %v9063_v3, %v719_v62  ;;  %v721_v3 = vadd.f32 %v9077_v53, %v513_v35  ;;  %v2341_v35 = vld [vmem:[#allocation12 + $0x8] sm:$0xff] }
 0x292   : > { %v1196_v0 = vadd.f32 %v9073_v15, %v996_v6  ;;  %v718_v15 = vadd.f32 %v9051_v30, %v510_v28 }
 0x293   : > { %v9095_v37 = vpop.permute.xlu1 %904  ;;  %v9097_v20 = vpop.permute.xlu0 %902 }
 0x294   : > { %v1396_v48 = vadd.f32 %v1375_v36, %v1196_v0  ;;  %v918_v41 = vadd.f32 %v9065_v12, %v718_v15  ;;  %v720_v12 = vadd.f32 %v9079_v21, %v512_v24  ;;  %v1473_v0 = vmul.f32 %v8727_v40, %v9091_v49 }
 0x296   : > { %v998_v31 = vadd.f32 %v990_v26, %v918_v41  ;;  %v920_v53 = vadd.f32 %v9097_v20, %v720_v12  ;;  %v2342_v12 = vld [vmem:[#allocation12 + $0x30] sm:$0xff] }
 0x297   : > { %v9107_v39 = vpop.permute.xlu1 %1180  ;;  %v9109_v54 = vpop.permute.xlu0 %1178 }
 0x298   : > { %v1198_v58 = vadd.f32 %v9109_v54, %v998_v31  ;;  %v1000_v61 = vadd.f32 %v992_v38, %v920_v53  ;;  %v2357_v38 = vld [vmem:[#allocation12 + $0x180] sm:$0xff]  ;;  %v1957_v53 = vld [vmem:[#allocation11 + $0x18] sm:$0xff] }
 0x29b   : > { %v1853_v14 = vpop.permute.xlu1 %1852  ;;  %v1851_v11 = vpop.permute.xlu0 %1850 }
 0x29c   : > { %v1875_v52 = vadd.f32 %v1853_v14, %v1675_v19  ;;  %v1874_v23 = vadd.f32 %v1851_v11, %v1674_v42  ;;  %v1477_v19 = vadd.f32 %v1469_v59, %v1397_v51  ;;  %v1476_v42 = vadd.f32 %v1468_v32, %v1396_v48 }
 0x29d   : > { %v999_v11 = vadd.f32 %v991_v56, %v919_v18 }
 0x29e   : > { %v1939_v47 = vadd.f32 %v9117_v45, %v1875_v52  ;;  %v1938_v44 = vadd.f32 %v9117_v45, %v1874_v23  ;;  %v993_v52 = vmul.f32 %v8793_v34, %v9081_v29  ;;  %v1471_v34 = vmul.f32 %v8665_v1, %v9091_v49 }
 0x29f   : > { %v1381_v27 = vpop.permute.xlu1 %1380  ;;  %v1379_v55 = vpop.permute.xlu0 %1378  ;;  %v1199_v4 = vadd.f32 %v9107_v39, %v999_v11 }
 0x2a0   : > { %v1947_v25 = vmax.f32 %v1939_v47, 0.0  ;;  %v1946_v8 = vmax.f32 %v1938_v44, 0.0  ;;  %v921_v44 = vadd.f32 %v9095_v37, %v721_v3  ;;  %v1398_v39 = vadd.f32 %v1379_v55, %v1198_v58  ;;  %v2340_v3 = vld [vmem:[#allocation12] sm:$0xff]  ;;  %v2345_v58 = vld [vmem:[#allocation12 + $0x68] sm:$0xff] }
 0x2a1   : > { %v1399_v29 = vadd.f32 %v1381_v27, %v1199_v4  ;;  %v2359_v4 = vld [vmem:[#allocation12 + $0x1b0] sm:$0xff] }
 0x2a2   : > { %v6933_v2 = vpack.c.bf16 %v1947_v25, %v1946_v8  ;;  %v1001_v8 = vadd.f32 %v993_v52, %v921_v44  ;;  %v1478_v28 = vadd.f32 %v1470_v22, %v1398_v39  ;;  %v1954_v44 = vld [vmem:[#allocation11] sm:$0xff] }
 0x2a3   : > { %v1657_v50 = vpop.permute.xlu1 %1656  ;;  %v1655_v43 = vpop.permute.xlu0 %1654  ;;  %v1479_v37 = vadd.f32 %v1471_v34, %v1399_v29  ;;  %v7010_v34 = vpack.c.bf16 %v2359_v4, %v2357_v38  ;;  %v2344_v22 = vld [vmem:[#allocation12 + $0x60] sm:$0xff]  ;;  %v2346_v29 = vld [vmem:[#allocation12 + $0x90] sm:$0xff]  ;;  %v1971_v38 = vld [vmem:[#allocation11 + $0x88] sm:$0xff] }
 0x2a4   : > { %6934 = vmatpush1.bf16.msra.mxu0 %v6933_v2  ;;  %6982 = vmatpush1.bf16.msra.mxu1 %v6933_v2  ;;  %v1677_v30 = vadd.f32 %v1657_v50, %v1477_v19  ;;  %v1676_v33 = vadd.f32 %v1655_v43, %v1476_v42  ;;  %v1472_v2 = vmul.f32 %v8732_v17, %v9091_v49  ;;  %v2156_v4 = vld [vmem:[#allocation11 + $0x198] sm:$0xff] }
 0x2a5   : > { %6935 = vmatprep.subr.bf16.mxu0 %v12267_v10  ;;  %6983 = vmatprep.subr.bf16.mxu1 %v12267_v10 }
 0x2a7   : > { %v1185_v36 = vpop.permute.xlu1 %1184  ;;  %v1183_v5 = vpop.permute.xlu0 %1182 }
 0x2a8   : > { %v1201_v1 = vadd.f32 %v1185_v36, %v1001_v8  ;;  %v1200_v20 = vadd.f32 %v1183_v5, %v1000_v61  ;;  %v2349_v8 = vld [vmem:[#allocation12 + $0xc8] sm:$0xff]  ;;  %v2368_v61 = vld [vmem:[#allocation12 + $0x278] sm:$0xff] }
 0x2ab   : > { %v1857_v13 = vpop.permute.xlu1 %1856  ;;  %v1855_v14 = vpop.permute.xlu0 %1854 }
 0x2ac   : > { %v1877_v46 = vadd.f32 %v1857_v13, %v1677_v30  ;;  %v1876_v7 = vadd.f32 %v1855_v14, %v1676_v33  ;;  %v2343_v33 = vld [vmem:[#allocation12 + $0x38] sm:$0xff]  ;;  %v2358_v13 = vld [vmem:[#allocation12 + $0x188] sm:$0xff] }
 0x2ad   : > { %v2360_v14 = vld [vmem:[#allocation12 + $0x1b8] sm:$0xff] }
 0x2ae   : > { %v1941_v23 = vadd.f32 %v9117_v45, %v1877_v46  ;;  %v1940_v47 = vadd.f32 %v9117_v45, %v1876_v7  ;;  %v6992_v46 = vpack.c.bf16 %v2343_v33, %v2341_v35  ;;  %v7008_v7 = vpack.c.bf16 %v2360_v14, %v2358_v13  ;;  %v2147_v35 = vld [vmem:[#allocation11 + $0x150] sm:$0xff]  ;;  %v2149_v13 = vld [vmem:[#allocation11 + $0x160] sm:$0xff]  ;;  %v1967_v14 = vld [vmem:[#allocation11 + $0x68] sm:$0xff] }
 0x2af   : > { %v1385_v9 = vpop.permute.xlu1 %1384  ;;  %v1383_v21 = vpop.permute.xlu0 %1382  ;;  %v1964_v33 = vld [vmem:[#allocation11 + $0x50] sm:$0xff] }
 0x2b0   : > { %v1949_v6 = vmax.f32 %v1941_v23, 0.0  ;;  %v1948_v54 = vmax.f32 %v1940_v47, 0.0  ;;  %v1401_v59 = vadd.f32 %v1385_v9, %v1201_v1  ;;  %v1400_v50 = vadd.f32 %v1383_v21, %v1200_v20  ;;  %v2347_v23 = vld [vmem:[#allocation12 + $0x98] sm:$0xff]  ;;  %v2142_v9 = vld [vmem:[#allocation11 + $0x128] sm:$0xff] }
 0x2b1   : > { %v2364_v47 = vld [vmem:[#allocation12 + $0x218] sm:$0xff]  ;;  %v6994_v21 = vpack.c.bf16 %v2342_v12, %v2340_v3  ;;  %v6996_v39 = vpack.c.bf16 %v2347_v23, %v2345_v58  ;;  %v1959_v1 = vld [vmem:[#allocation11 + $0x28] sm:$0xff]  ;;  %v1968_v12 = vld [vmem:[#allocation11 + $0x70] sm:$0xff] }
 0x2b2   : > { %v6936_v25 = vpack.c.bf16 %v1949_v6, %v1948_v54  ;;  %v1481_v36 = vadd.f32 %v1473_v0, %v1401_v59  ;;  %v1480_v5 = vadd.f32 %v1472_v2, %v1400_v50  ;;  %v2361_v54 = vld [vmem:[#allocation12 + $0x1e0] sm:$0xff]  ;;  %v2144_v20 = vld [vmem:[#allocation11 + $0x138] sm:$0xff]  ;;  %v2367_v50 = vld [vmem:[#allocation12 + $0x270] sm:$0xff] }
 0x2b3   : > { %v1661_v16 = vpop.permute.xlu1 %1660  ;;  %v1659_v60 = vpop.permute.xlu0 %1658  ;;  %v2365_v59 = vld [vmem:[#allocation12 + $0x240] sm:$0xff]  ;;  %v2154_v3 = vld [vmem:[#allocation11 + $0x188] sm:$0xff]  ;;  %v2155_v23 = vld [vmem:[#allocation11 + $0x190] sm:$0xff] }
 0x2b4   : > { %6937 = vmatpush1.bf16.msra.mxu0 %v6936_v25  ;;  %6985 = vmatpush1.bf16.msra.mxu1 %v6936_v25  ;;  %v1679_v63 = vadd.f32 %v1661_v16, %v1479_v37  ;;  %v1678_v27 = vadd.f32 %v1659_v60, %v1478_v28  ;;  %v2363_v25 = vld [vmem:[#allocation12 + $0x210] sm:$0xff]  ;;  %v2351_v16 = vld [vmem:[#allocation12 + $0xf8] sm:$0xff]  ;;  %v2366_v60 = vld [vmem:[#allocation12 + $0x248] sm:$0xff] }
 0x2b5   : > { %6938 = vmatprep.subr.bf16.mxu0 %v12267_v10  ;;  %6986 = vmatprep.subr.bf16.mxu1 %v12267_v10  ;;  %v1956_v37 = vld [vmem:[#allocation11 + $0x10] sm:$0xff]  ;;  %v2141_v28 = vld [vmem:[#allocation11 + $0x120] sm:$0xff]  ;;  %v7000_v0 = vpack.c.bf16 %v2351_v16, %v2349_v8  ;;  %v7016_v2 = vpack.c.bf16 %v2368_v61, %v2366_v60  ;;  %v1981_v60 = vld [vmem:[#allocation11 + $0xd8] sm:$0xff] }
 0x2b6   : > { %v1970_v58 = vld [vmem:[#allocation11 + $0x80] sm:$0xff]  ;;  %v2163_v16 = vld [vmem:[#allocation11 + $0x1d0] sm:$0xff]  ;;  %v2166_v61 = vld [vmem:[#allocation11 + $0x1e8] sm:$0xff] }
 0x2b7   : > { %v1861_v55 = vpop.permute.xlu1 %1860  ;;  %v1859_v57 = vpop.permute.xlu0 %1858  ;;  %v1978_v8 = vld [vmem:[#allocation11 + $0xc0] sm:$0xff] }
 0x2b8   : > { %v1879_v43 = vadd.f32 %v1861_v55, %v1679_v63  ;;  %v1878_v51 = vadd.f32 %v1859_v57, %v1678_v27  ;;  %v6998_v63 = vpack.c.bf16 %v2346_v29, %v2344_v22  ;;  %v7014_v27 = vpack.c.bf16 %v2363_v25, %v2361_v54  ;;  %v2348_v55 = vld [vmem:[#allocation12 + $0xc0] sm:$0xff]  ;;  %v2350_v57 = vld [vmem:[#allocation12 + $0xf0] sm:$0xff]  ;;  %v1977_v22 = vld [vmem:[#allocation11 + $0xb8] sm:$0xff] }
 0x2b9   : > { %v2162_v29 = vld [vmem:[#allocation11 + $0x1c8] sm:$0xff]  ;;  %v2164_v25 = vld [vmem:[#allocation11 + $0x1d8] sm:$0xff] }
 0x2ba   : > { %v1943_v48 = vadd.f32 %v9117_v45, %v1879_v43  ;;  %v1942_v32 = vadd.f32 %v9117_v45, %v1878_v51  ;;  %v2353_v43 = vld [vmem:[#allocation12 + $0x128] sm:$0xff]  ;;  %v2355_v51 = vld [vmem:[#allocation12 + $0x158] sm:$0xff] }
 0x2bb   : > { %v1665_v62 = vpop.permute.xlu1 %1664  ;;  %v1663_v15 = vpop.permute.xlu0 %1662  ;;  %v1979_v54 = vld [vmem:[#allocation11 + $0xc8] sm:$0xff] }
 0x2bc   : > { %v1951_v56 = vmax.f32 %v1943_v48, 0.0  ;;  %v1950_v26 = vmax.f32 %v1942_v32, 0.0  ;;  %v1681_v18 = vadd.f32 %v1665_v62, %v1481_v36  ;;  %v1680_v41 = vadd.f32 %v1663_v15, %v1480_v5  ;;  %v2370_v48 = vld [vmem:[#allocation12 + $0x2a8] sm:$0xff]  ;;  %v2372_v32 = vld [vmem:[#allocation12 + $0x2d8] sm:$0xff]  ;;  %v1958_v62 = vld [vmem:[#allocation11 + $0x20] sm:$0xff] }
 0x2bd   : > { %v2143_v15 = vld [vmem:[#allocation11 + $0x130] sm:$0xff]  ;;  %v7002_v36 = vpack.c.bf16 %v2350_v57, %v2348_v55  ;;  %v7018_v5 = vpack.c.bf16 %v2367_v50, %v2365_v59  ;;  %v1985_v55 = vld [vmem:[#allocation11 + $0xf8] sm:$0xff]  ;;  %v2170_v57 = vld [vmem:[#allocation11 + $0x208] sm:$0xff] }
 0x2be   : > { %v6939_v40 = vpack.c.bf16 %v1951_v56, %v1950_v26  ;;  %v1961_v56 = vld [vmem:[#allocation11 + $0x38] sm:$0xff]  ;;  %v2146_v26 = vld [vmem:[#allocation11 + $0x148] sm:$0xff] }
 0x2bf   : > { %v1865_v19 = vpop.permute.xlu1 %1864  ;;  %v1863_v42 = vpop.permute.xlu0 %1862  ;;  %v1987_v59 = vld [vmem:[#allocation11 + $0x108] sm:$0xff]  ;;  %v2172_v50 = vld [vmem:[#allocation11 + $0x218] sm:$0xff] }
 0x2c0   : > { %v1881_v17 = vadd.f32 %v1865_v19, %v1681_v18  ;;  %v1880_v49 = vadd.f32 %v1863_v42, %v1680_v41  ;;  %6940 = vmatpush1.bf16.msra.mxu0 %v6939_v40  ;;  %6988 = vmatpush1.bf16.msra.mxu1 %v6939_v40  ;;  %v7004_v18 = vpack.c.bf16 %v2355_v51, %v2353_v43  ;;  %v1960_v40 = vld [vmem:[#allocation11 + $0x30] sm:$0xff]  ;;  %v2145_v19 = vld [vmem:[#allocation11 + $0x140] sm:$0xff]  ;;  %v1963_v42 = vld [vmem:[#allocation11 + $0x48] sm:$0xff] }
 0x2c1   : > { %6941 = vmatprep.subr.bf16.mxu0 %v12267_v10  ;;  %6989 = vmatprep.subr.bf16.mxu1 %v12267_v10  ;;  %v2362_v10 = vld [vmem:[#allocation12 + $0x1e8] sm:$0xff]  ;;  %v7020_v41 = vpack.c.bf16 %v2372_v32, %v2370_v48  ;;  %v1986_v43 = vld [vmem:[#allocation11 + $0x100] sm:$0xff]  ;;  %v2171_v51 = vld [vmem:[#allocation11 + $0x210] sm:$0xff] }
 0x2c2   : > { %v1945_v24 = vadd.f32 %v9117_v45, %v1881_v17  ;;  %v1944_v30 = vadd.f32 %v9117_v45, %v1880_v49  ;;  %v2139_v45 = vld [vmem:[#allocation11 + $0x110] sm:$0xff]  ;;  %v7012_v6 = vpack.c.bf16 %v2364_v47, %v2362_v10  ;;  %v2148_v17 = vld [vmem:[#allocation11 + $0x158] sm:$0xff]  ;;  %v1962_v49 = vld [vmem:[#allocation11 + $0x40] sm:$0xff] }
 0x2c3   : > { %v1973_v10 = vld [vmem:[#allocation11 + $0x98] sm:$0xff]  ;;  %v2158_v47 = vld [vmem:[#allocation11 + $0x1a8] sm:$0xff]  ;;  %v2352_v48 = vld [vmem:[#allocation12 + $0x120] sm:$0xff] }
 0x2c4   : > { %v1953_v11 = vmax.f32 %v1945_v24, 0.0  ;;  %v1952_v31 = vmax.f32 %v1944_v30, 0.0  ;;  %v1965_v24 = vld [vmem:[#allocation11 + $0x58] sm:$0xff]  ;;  %v2150_v30 = vld [vmem:[#allocation11 + $0x168] sm:$0xff]  ;;  %v2354_v32 = vld [vmem:[#allocation12 + $0x150] sm:$0xff] }
 0x2c6   : > { %v6942_v52 = vpack.c.bf16 %v1953_v11, %v1952_v31  ;;  %v2152_v11 = vld [vmem:[#allocation11 + $0x178] sm:$0xff]  ;;  %v1966_v31 = vld [vmem:[#allocation11 + $0x60] sm:$0xff] }
 0x2c8   : > { %6943 = vmatpush1.bf16.msra.mxu0 %v6942_v52  ;;  %6991 = vmatpush1.bf16.msra.mxu1 %v6942_v52  ;;  %v2153_v52 = vld [vmem:[#allocation11 + $0x180] sm:$0xff] }
 0x2c9   : > { %6993 = vmatprep.subr.bf16.mxu0 %v6992_v46  ;;  %7009 = vmatprep.subr.bf16.mxu1 %v7008_v7  ;;  %v2151_v46 = vld [vmem:[#allocation11 + $0x170] sm:$0xff]  ;;  %v1969_v7 = vld [vmem:[#allocation11 + $0x78] sm:$0xff] }
 0x2cb   : > { %2053 = vmatmul.mubr.f32.vlgmr.msra.gmra.mrb[0].mxu0 %v1954_v44  ;;  %2238 = vmatmul.mubr.f32.vlgmr.msra.gmra.mrb[0].mxu1 %v2139_v45  ;;  %v1972_v44 = vld [vmem:[#allocation11 + $0x90] sm:$0xff]  ;;  %v2157_v45 = vld [vmem:[#allocation11 + $0x1a0] sm:$0xff] }
 0x2cc   : > { %2057 = vmatprep.mubr.f32.mxu0 %v1957_v53  ;;  %2242 = vmatprep.mubr.f32.mxu1 %v2142_v9  ;;  %v1975_v53 = vld [vmem:[#allocation11 + $0xa8] sm:$0xff]  ;;  %v2160_v9 = vld [vmem:[#allocation11 + $0x1b8] sm:$0xff] }
 0x2cd   : > { %6995 = vmatpush1.bf16.msra.mxu0 %v6994_v21  ;;  %7011 = vmatpush1.bf16.msra.mxu1 %v7010_v34  ;;  %v1974_v21 = vld [vmem:[#allocation11 + $0xa0] sm:$0xff]  ;;  %v2159_v34 = vld [vmem:[#allocation11 + $0x1b0] sm:$0xff] }
 0x2ce   : > { %6997 = vmatprep.subr.bf16.mxu0 %v6996_v39  ;;  %7013 = vmatprep.subr.bf16.mxu1 %v7012_v6  ;;  %v1976_v39 = vld [vmem:[#allocation11 + $0xb0] sm:$0xff]  ;;  %v2161_v6 = vld [vmem:[#allocation11 + $0x1c0] sm:$0xff] }
 0x2cf   : > { %2058 = vmatmul.mubr.f32.gmra.mrb[2].mxu0 %v1956_v37  ;;  %2243 = vmatmul.mubr.f32.gmra.mrb[2].mxu1 %v2141_v28  ;;  %v1980_v37 = vld [vmem:[#allocation11 + $0xd0] sm:$0xff]  ;;  %v2165_v28 = vld [vmem:[#allocation11 + $0x1e0] sm:$0xff] }
 0x2d0   : > { %2062 = vmatprep.mubr.f32.mxu0 %v1959_v1  ;;  %2247 = vmatprep.mubr.f32.mxu1 %v2144_v20  ;;  %v1983_v1 = vld [vmem:[#allocation11 + $0xe8] sm:$0xff]  ;;  %v2168_v20 = vld [vmem:[#allocation11 + $0x1f8] sm:$0xff] }
 0x2d1   : > { %6999 = vmatpush1.bf16.msra.mxu0 %v6998_v63  ;;  %7015 = vmatpush1.bf16.msra.mxu1 %v7014_v27  ;;  %v1982_v63 = vld [vmem:[#allocation11 + $0xe0] sm:$0xff]  ;;  %v2167_v27 = vld [vmem:[#allocation11 + $0x1f0] sm:$0xff] }
 0x2d2   : > { %7001 = vmatprep.subr.bf16.mxu0 %v7000_v0  ;;  %7017 = vmatprep.subr.bf16.mxu1 %v7016_v2  ;;  %v1984_v0 = vld [vmem:[#allocation11 + $0xf0] sm:$0xff]  ;;  %v2169_v2 = vld [vmem:[#allocation11 + $0x200] sm:$0xff] }
 0x2d3   : > { %2063 = vmatmul.mubr.f32.gmra.mrb[4].mxu0 %v1958_v62  ;;  %2248 = vmatmul.mubr.f32.gmra.mrb[4].mxu1 %v2143_v15  ;;  %v2369_v62 = vld [vmem:[#allocation12 + $0x2a0] sm:$0xff]  ;;  %v7006_v15 = vpack.c.bf16 %v2354_v32, %v2352_v48 }
 0x2d4   : > { %2067 = vmatprep.mubr.f32.mxu0 %v1961_v56  ;;  %2252 = vmatprep.mubr.f32.mxu1 %v2146_v26  ;;  %v2371_v56 = vld [vmem:[#allocation12 + $0x2d0] sm:$0xff] }
 0x2d5   : > { %7003 = vmatpush1.bf16.msra.mxu0 %v7002_v36  ;;  %7019 = vmatpush1.bf16.msra.mxu1 %v7018_v5  ;;  %v7022_v26 = vpack.c.bf16 %v2371_v56, %v2369_v62  ;;  %v12097_v36 = vmov 0.0   ;;  %v2828_v5 = vld [vmem:[#allocation12 + $0x18] sm:$0xff]  ;;  %v2855_v62 = vld [vmem:[#allocation12 + $0x2b0] sm:$0xff]  ;;  %v3262_v56 = vld [vmem:[#allocation12 + $0x28] sm:$0xff] }
 0x2d6   : > { %7005 = vmatprep.subr.bf16.mxu0 %v7004_v18  ;;  %7021 = vmatprep.subr.bf16.mxu1 %v7020_v41  ;;  %v2830_v18 = vld [vmem:[#allocation12 + $0x48] sm:$0xff]  ;;  %v2844_v41 = vld [vmem:[#allocation12 + $0x198] sm:$0xff] }
 0x2d7   : > { %2068 = vmatmul.mubr.f32.gmra.mrb[6].mxu0 %v1960_v40  ;;  %2253 = vmatmul.mubr.f32.gmra.mrb[6].mxu1 %v2145_v19  ;;  %v7024_v40 = vpack.c.bf16 %v2830_v18, %v2828_v5  ;;  %v2846_v19 = vld [vmem:[#allocation12 + $0x1c8] sm:$0xff]  ;;  %v3280_v18 = vld [vmem:[#allocation12 + $0x1d8] sm:$0xff] }
 0x2d8   : > { %2072 = vmatprep.mubr.f32.mxu0 %v1963_v42  ;;  %2257 = vmatprep.mubr.f32.mxu1 %v2148_v17  ;;  %v7040_v42 = vpack.c.bf16 %v2846_v19, %v2844_v41  ;;  %v2827_v17 = vld [vmem:[#allocation12 + $0x10] sm:$0xff]  ;;  %v3278_v5 = vld [vmem:[#allocation12 + $0x1a8] sm:$0xff] }
 0x2d9   : > { %7007 = vmatpush1.bf16.msra.mxu0 %v7006_v15  ;;  %7023 = vmatpush1.bf16.msra.mxu1 %v7022_v26  ;;  %v2857_v15 = vld [vmem:[#allocation12 + $0x2e0] sm:$0xff]  ;;  %v3264_v26 = vld [vmem:[#allocation12 + $0x58] sm:$0xff] }
 0x2da   : > { %7025 = vmatprep.subr.bf16.mxu0 %v7024_v40  ;;  %7041 = vmatprep.subr.bf16.mxu1 %v7040_v42 }
 0x2db   : > { %2073 = vmatmul.mubr.f32.gmra.mrb[8].mxu0 %v1962_v49  ;;  %2258 = vmatmul.mubr.f32.gmra.mrb[8].mxu1 %v2147_v35  ;;  %v2829_v49 = vld [vmem:[#allocation12 + $0x40] sm:$0xff]  ;;  %v2843_v35 = vld [vmem:[#allocation12 + $0x190] sm:$0xff] }
 0x2dc   : > { %2077 = vmatprep.mubr.f32.mxu0 %v1965_v24  ;;  %2262 = vmatprep.mubr.f32.mxu1 %v2150_v30  ;;  %v2845_v24 = vld [vmem:[#allocation12 + $0x1c0] sm:$0xff]  ;;  %v2832_v30 = vld [vmem:[#allocation12 + $0x78] sm:$0xff] }
 0x2df   : > { %2078 = vmatmul.mubr.f32.gmra.mrb[10].mxu0 %v1964_v33  ;;  %2263 = vmatmul.mubr.f32.gmra.mrb[10].mxu1 %v2149_v13  ;;  %v2834_v33 = vld [vmem:[#allocation12 + $0xa8] sm:$0xff]  ;;  %v2848_v13 = vld [vmem:[#allocation12 + $0x1f8] sm:$0xff] }
 0x2e0   : > { %2082 = vmatprep.mubr.f32.mxu0 %v1967_v14  ;;  %2267 = vmatprep.mubr.f32.mxu1 %v2152_v11  ;;  %v2850_v14 = vld [vmem:[#allocation12 + $0x228] sm:$0xff] }
 0x2e3   : > { %2083 = vmatmul.mubr.f32.gmra.mrb[12].mxu0 %v1966_v31  ;;  %2268 = vmatmul.mubr.f32.gmra.mrb[12].mxu1 %v2151_v46 }
 0x2e4   : > { %2087 = vmatprep.mubr.f32.mxu0 %v1969_v7  ;;  %2272 = vmatprep.mubr.f32.mxu1 %v2154_v3 }
 0x2e7   : > { %2088 = vmatmul.mubr.f32.gmra.mrb[14].mxu0 %v1968_v12  ;;  %2273 = vmatmul.mubr.f32.gmra.mrb[14].mxu1 %v2153_v52  ;;  %v7026_v12 = vpack.c.bf16 %v2829_v49, %v2827_v17  ;;  %v7042_v52 = vpack.c.bf16 %v2845_v24, %v2843_v35  ;;  %v7054_v35 = vpack.c.bf16 %v2857_v15, %v2855_v62 }
 0x2e8   : > { %2092 = vmatprep.mubr.f32.mxu0 %v1971_v38  ;;  %2277 = vmatprep.mubr.f32.mxu1 %v2156_v4  ;;  %v2831_v38 = vld [vmem:[#allocation12 + $0x70] sm:$0xff]  ;;  %v2833_v4 = vld [vmem:[#allocation12 + $0xa0] sm:$0xff]  ;;  %v7056_v24 = vpack.c.bf16 %v3264_v26, %v3262_v56 }
 0x2eb   : > { %2093 = vmatmul.mubr.f32.gmra.mrb[16].mxu0 %v1970_v58  ;;  %2278 = vmatmul.mubr.f32.gmra.mrb[16].mxu1 %v2155_v23  ;;  %v7028_v58 = vpack.c.bf16 %v2834_v33, %v2832_v30  ;;  %v7044_v23 = vpack.c.bf16 %v2850_v14, %v2848_v13  ;;  %v7072_v30 = vpack.c.bf16 %v3280_v18, %v3278_v5 }
 0x2ec   : > { %2097 = vmatprep.mubr.f32.mxu0 %v1973_v10  ;;  %2282 = vmatprep.mubr.f32.mxu1 %v2158_v47  ;;  %v2847_v10 = vld [vmem:[#allocation12 + $0x1f0] sm:$0xff]  ;;  %v2849_v47 = vld [vmem:[#allocation12 + $0x220] sm:$0xff] }
 0x2ef   : > { %2098 = vmatmul.mubr.f32.gmra.mrb[18].mxu0 %v1972_v44  ;;  %2283 = vmatmul.mubr.f32.gmra.mrb[18].mxu1 %v2157_v45  ;;  %v2836_v44 = vld [vmem:[#allocation12 + $0xd8] sm:$0xff]  ;;  %v2838_v45 = vld [vmem:[#allocation12 + $0x108] sm:$0xff] }
 0x2f0   : > { %2102 = vmatprep.mubr.f32.mxu0 %v1975_v53  ;;  %2287 = vmatprep.mubr.f32.mxu1 %v2160_v9  ;;  %v2852_v53 = vld [vmem:[#allocation12 + $0x258] sm:$0xff]  ;;  %v2854_v9 = vld [vmem:[#allocation12 + $0x288] sm:$0xff] }
 0x2f3   : > { %2103 = vmatmul.mubr.f32.gmra.mrb[20].mxu0 %v1974_v21  ;;  %2288 = vmatmul.mubr.f32.gmra.mrb[20].mxu1 %v2159_v34 }
 0x2f4   : > { %2107 = vmatprep.mubr.f32.mxu0 %v1977_v22  ;;  %2292 = vmatprep.mubr.f32.mxu1 %v2162_v29 }
 0x2f7   : > { %2108 = vmatmul.mubr.f32.gmra.mrb[22].mxu0 %v1976_v39  ;;  %2293 = vmatmul.mubr.f32.gmra.mrb[22].mxu1 %v2161_v6  ;;  %v7030_v6 = vpack.c.bf16 %v2833_v4, %v2831_v38 }
 0x2f8   : > { %2112 = vmatprep.mubr.f32.mxu0 %v1979_v54  ;;  %2297 = vmatprep.mubr.f32.mxu1 %v2164_v25  ;;  %v7046_v54 = vpack.c.bf16 %v2849_v47, %v2847_v10  ;;  %v2835_v25 = vld [vmem:[#allocation12 + $0xd0] sm:$0xff] }
 0x2fb   : > { %2113 = vmatmul.mubr.f32.gmra.mrb[24].mxu0 %v1978_v8  ;;  %2298 = vmatmul.mubr.f32.gmra.mrb[24].mxu1 %v2163_v16  ;;  %v2837_v8 = vld [vmem:[#allocation12 + $0x100] sm:$0xff]  ;;  %v7032_v16 = vpack.c.bf16 %v2838_v45, %v2836_v44 }
 0x2fc   : > { %2117 = vmatprep.mubr.f32.mxu0 %v1981_v60  ;;  %2302 = vmatprep.mubr.f32.mxu1 %v2166_v61  ;;  %v7048_v60 = vpack.c.bf16 %v2854_v9, %v2852_v53  ;;  %v2851_v61 = vld [vmem:[#allocation12 + $0x250] sm:$0xff] }
 0x2ff   : > { %2118 = vmatmul.mubr.f32.gmra.mrb[26].mxu0 %v1980_v37  ;;  %2303 = vmatmul.mubr.f32.gmra.mrb[26].mxu1 %v2165_v28  ;;  %v2853_v37 = vld [vmem:[#allocation12 + $0x280] sm:$0xff]  ;;  %v2840_v28 = vld [vmem:[#allocation12 + $0x138] sm:$0xff] }
 0x300   : > { %2122 = vmatprep.mubr.f32.mxu0 %v1983_v1  ;;  %2307 = vmatprep.mubr.f32.mxu1 %v2168_v20  ;;  %v2842_v1 = vld [vmem:[#allocation12 + $0x168] sm:$0xff]  ;;  %v2856_v20 = vld [vmem:[#allocation12 + $0x2b8] sm:$0xff] }
 0x301   : > { %v7036_v48 = vpack.c.bf16 %v2842_v1, %v2840_v28 }
 0x303   : > { %2123 = vmatmul.mubr.f32.gmra.mrb[28].mxu0 %v1982_v63  ;;  %2308 = vmatmul.mubr.f32.gmra.mrb[28].mxu1 %v2167_v27  ;;  %v2858_v63 = vld [vmem:[#allocation12 + $0x2e8] sm:$0xff] }
 0x304   : > { %2127 = vmatprep.mubr.f32.mxu0 %v1985_v55  ;;  %2312 = vmatprep.mubr.f32.mxu1 %v2170_v57  ;;  %v7052_v32 = vpack.c.bf16 %v2858_v63, %v2856_v20 }
 0x307   : > { %2128 = vmatmul.mubr.f32.gmra.mrb[30].mxu0 %v1984_v0  ;;  %2313 = vmatmul.mubr.f32.gmra.mrb[30].mxu1 %v2169_v2 }
 0x308   : > { %2132 = vmatprep.mubr.f32.mxu0 %v1987_v59  ;;  %2317 = vmatprep.mubr.f32.mxu1 %v2172_v50  ;;  %v7034_v59 = vpack.c.bf16 %v2837_v8, %v2835_v25  ;;  %v7050_v50 = vpack.c.bf16 %v2853_v37, %v2851_v61 }
 0x30b   : > { %2133 = vmatmul.mubr.f32.gmra.mrb[32].mxu0 %v1986_v43  ;;  %2318 = vmatmul.mubr.f32.gmra.mrb[32].mxu1 %v2171_v51  ;;  %v2839_v43 = vld [vmem:[#allocation12 + $0x130] sm:$0xff]  ;;  %v2841_v51 = vld [vmem:[#allocation12 + $0x160] sm:$0xff] }
 0x30c   : > { %2489 = vmatprep.mubr.f32.mxu0 %v12097_v36  ;;  %2656 = vmatprep.mubr.f32.mxu1 %v12097_v36  ;;  %v7038_v49 = vpack.c.bf16 %v2841_v51, %v2839_v43 }
 0x39e   : > { %v2054_v11 = vpop.f32.mrb[0].mxu0  ;;  %v2239_v31 = vpop.f32.mrb[0].mxu1 }
 0x39f   : > { %v9177_v46 = vmax.f32 %v2054_v11, %v2239_v31  ;;  %v2056_v7 = vpop.f32.mrb[1].mxu0  ;;  %v2241_v3 = vpop.f32.mrb[1].mxu1 }
 0x3a1   : > { %6711 = vmatmul.mubr.msk.f32.vlgmr.msra.gmra.mrb[34].mxu0 %vm2373_vm0, %v9177_v46  ;;  %6728 = vmatmul.mubr.msk.f32.vlgmr.msra.gmra.mrb[34].mxu1 %vm2373_vm0, %v9177_v46 }
 0x3a2   : > { %v2059_v21 = vpop.f32.mrb[2].mxu0  ;;  %v2244_v34 = vpop.f32.mrb[2].mxu1  ;;  %2495 = vmatprep.mubr.f32.mxu0 %v12097_v36  ;;  %2662 = vmatprep.mubr.f32.mxu1 %v12097_v36 }
 0x3a3   : > { %v9185_v22 = vmax.f32 %v2059_v21, %v2244_v34  ;;  %v2061_v29 = vpop.f32.mrb[3].mxu0  ;;  %v2246_v39 = vpop.f32.mrb[3].mxu1  ;;  %7027 = vmatpush1.bf16.msra.mxu0 %v7026_v12  ;;  %7043 = vmatpush1.bf16.msra.mxu1 %v7042_v52 }
 0x3a4   : > { %7029 = vmatprep.subr.bf16.mxu0 %v7028_v58  ;;  %7045 = vmatprep.subr.bf16.mxu1 %v7044_v23 }
 0x3a5   : > { %6712 = vmatmul.mubr.msk.f32.gmra.mrb[36].mxu0 %vm2373_vm0, %v9185_v22  ;;  %6729 = vmatmul.mubr.msk.f32.gmra.mrb[36].mxu1 %vm2373_vm0, %v9185_v22 }
 0x3a6   : > { %v2064_v27 = vpop.f32.mrb[4].mxu0  ;;  %v2249_v55 = vpop.f32.mrb[4].mxu1  ;;  %2501 = vmatprep.mubr.f32.mxu0 %v12097_v36  ;;  %2668 = vmatprep.mubr.f32.mxu1 %v12097_v36 }
 0x3a7   : > { %v9193_v57 = vmax.f32 %v2064_v27, %v2249_v55  ;;  %v2066_v0 = vpop.f32.mrb[5].mxu0  ;;  %v2251_v2 = vpop.f32.mrb[5].mxu1  ;;  %7031 = vmatpush1.bf16.msra.mxu0 %v7030_v6  ;;  %7047 = vmatpush1.bf16.msra.mxu1 %v7046_v54 }
 0x3a8   : > { %7033 = vmatprep.subr.bf16.mxu0 %v7032_v16  ;;  %7049 = vmatprep.subr.bf16.mxu1 %v7048_v60 }
 0x3a9   : > { %6713 = vmatmul.mubr.msk.f32.gmra.mrb[38].mxu0 %vm2373_vm0, %v9193_v57  ;;  %6730 = vmatmul.mubr.msk.f32.gmra.mrb[38].mxu1 %vm2373_vm0, %v9193_v57 }
 0x3aa   : > { %v2069_v41 = vpop.f32.mrb[6].mxu0  ;;  %v2254_v40 = vpop.f32.mrb[6].mxu1  ;;  %2507 = vmatprep.mubr.f32.mxu0 %v12097_v36  ;;  %2674 = vmatprep.mubr.f32.mxu1 %v12097_v36 }
 0x3ab   : > { %v9201_v19 = vmax.f32 %v2069_v41, %v2254_v40  ;;  %v2071_v42 = vpop.f32.mrb[7].mxu0  ;;  %v2256_v17 = vpop.f32.mrb[7].mxu1  ;;  %7035 = vmatpush1.bf16.msra.mxu0 %v7034_v59  ;;  %7051 = vmatpush1.bf16.msra.mxu1 %v7050_v50 }
 0x3ac   : > { %7037 = vmatprep.subr.bf16.mxu0 %v7036_v48  ;;  %7053 = vmatprep.subr.bf16.mxu1 %v7052_v32 }
 0x3ad   : > { %6714 = vmatmul.mubr.msk.f32.gmra.mrb[40].mxu0 %vm2373_vm0, %v9201_v19  ;;  %6731 = vmatmul.mubr.msk.f32.gmra.mrb[40].mxu1 %vm2373_vm0, %v9201_v19 }
 0x3ae   : > { %v2074_v33 = vpop.f32.mrb[8].mxu0  ;;  %v2259_v13 = vpop.f32.mrb[8].mxu1  ;;  %2513 = vmatprep.mubr.f32.mxu0 %v12097_v36  ;;  %2680 = vmatprep.mubr.f32.mxu1 %v12097_v36 }
 0x3af   : > { %v9209_v14 = vmax.f32 %v2074_v33, %v2259_v13  ;;  %v2076_v11 = vpop.f32.mrb[9].mxu0  ;;  %v2261_v31 = vpop.f32.mrb[9].mxu1  ;;  %7039 = vmatpush1.bf16.msra.mxu0 %v7038_v49  ;;  %7055 = vmatpush1.bf16.msra.mxu1 %v7054_v35 }
 0x3b0   : > { %7057 = vmatprep.subr.bf16.mxu0 %v7056_v24  ;;  %7073 = vmatprep.subr.bf16.mxu1 %v7072_v30 }
 0x3b1   : > { %6715 = vmatmul.mubr.msk.f32.gmra.mrb[42].mxu0 %vm2373_vm0, %v9209_v14  ;;  %6732 = vmatmul.mubr.msk.f32.gmra.mrb[42].mxu1 %vm2373_vm0, %v9209_v14 }
 0x3b2   : > { %v2079_v7 = vpop.f32.mrb[10].mxu0  ;;  %v2264_v3 = vpop.f32.mrb[10].mxu1  ;;  %2519 = vmatprep.mubr.f32.mxu0 %v12097_v36  ;;  %2686 = vmatprep.mubr.f32.mxu1 %v12097_v36 }
 0x3b3   : > { %v9217_v12 = vmax.f32 %v2079_v7, %v2264_v3  ;;  %v2081_v52 = vpop.f32.mrb[11].mxu0  ;;  %v2266_v38 = vpop.f32.mrb[11].mxu1 }
 0x3b4   : > { %v3261_v52 = vld [vmem:[#allocation12 + $0x20] sm:$0xff]  ;;  %v3263_v38 = vld [vmem:[#allocation12 + $0x50] sm:$0xff] }
 0x3b5   : > { %6716 = vmatmul.mubr.msk.f32.gmra.mrb[44].mxu0 %vm2373_vm0, %v9217_v12  ;;  %6733 = vmatmul.mubr.msk.f32.gmra.mrb[44].mxu1 %vm2373_vm0, %v9217_v12 }
 0x3b6   : > { %v2084_v4 = vpop.f32.mrb[12].mxu0  ;;  %v2269_v58 = vpop.f32.mrb[12].mxu1  ;;  %2525 = vmatprep.mubr.f32.mxu0 %v12097_v36  ;;  %2692 = vmatprep.mubr.f32.mxu1 %v12097_v36 }
 0x3b7   : > { %v9225_v23 = vmax.f32 %v2084_v4, %v2269_v58  ;;  %v2086_v10 = vpop.f32.mrb[13].mxu0  ;;  %v2271_v47 = vpop.f32.mrb[13].mxu1  ;;  %v3277_v4 = vld [vmem:[#allocation12 + $0x1a0] sm:$0xff]  ;;  %v3279_v58 = vld [vmem:[#allocation12 + $0x1d0] sm:$0xff] }
 0x3b8   : > { %v3266_v10 = vld [vmem:[#allocation12 + $0x88] sm:$0xff]  ;;  %v3268_v47 = vld [vmem:[#allocation12 + $0xb8] sm:$0xff] }
 0x3b9   : > { %6717 = vmatmul.mubr.msk.f32.gmra.mrb[46].mxu0 %vm2373_vm0, %v9225_v23  ;;  %6734 = vmatmul.mubr.msk.f32.gmra.mrb[46].mxu1 %vm2373_vm0, %v9225_v23 }
 0x3ba   : > { %v2089_v44 = vpop.f32.mrb[14].mxu0  ;;  %v2274_v45 = vpop.f32.mrb[14].mxu1  ;;  %2531 = vmatprep.mubr.f32.mxu0 %v12097_v36  ;;  %2698 = vmatprep.mubr.f32.mxu1 %v12097_v36 }
 0x3bb   : > { %v9233_v53 = vmax.f32 %v2089_v44, %v2274_v45  ;;  %v2091_v9 = vpop.f32.mrb[15].mxu0  ;;  %v2276_v21 = vpop.f32.mrb[15].mxu1  ;;  %v3282_v44 = vld [vmem:[#allocation12 + $0x208] sm:$0xff]  ;;  %v3284_v45 = vld [vmem:[#allocation12 + $0x238] sm:$0xff] }
 0x3bc   : > { %v7058_v9 = vpack.c.bf16 %v3263_v38, %v3261_v52  ;;  %v7074_v21 = vpack.c.bf16 %v3279_v58, %v3277_v4  ;;  %v3882_v4 = vld [vmem:[#allocation8 + $0x4] ss:$8 sm:$0x3] }
 0x3bd   : > { %6718 = vmatmul.mubr.msk.f32.gmra.mrb[48].mxu0 %vm2373_vm0, %v9233_v53  ;;  %6735 = vmatmul.mubr.msk.f32.gmra.mrb[48].mxu1 %vm2373_vm0, %v9233_v53 }
 0x3be   : > { %v2094_v34 = vpop.f32.mrb[16].mxu0  ;;  %v2279_v29 = vpop.f32.mrb[16].mxu1  ;;  %2537 = vmatprep.mubr.f32.mxu0 %v12097_v36  ;;  %2704 = vmatprep.mubr.f32.mxu1 %v12097_v36 }
 0x3bf   : > { %v9241_v39 = vmax.f32 %v2094_v34, %v2279_v29  ;;  %v2096_v6 = vpop.f32.mrb[17].mxu0  ;;  %v2281_v54 = vpop.f32.mrb[17].mxu1  ;;  %v3265_v34 = vld [vmem:[#allocation12 + $0x80] sm:$0xff]  ;;  %v3267_v29 = vld [vmem:[#allocation12 + $0xb0] sm:$0xff] }
 0x3c0   : > { %v7060_v6 = vpack.c.bf16 %v3268_v47, %v3266_v10  ;;  %v7076_v54 = vpack.c.bf16 %v3284_v45, %v3282_v44 }
 0x3c1   : > { %6719 = vmatmul.mubr.msk.f32.gmra.mrb[50].mxu0 %vm2373_vm0, %v9241_v39  ;;  %6736 = vmatmul.mubr.msk.f32.gmra.mrb[50].mxu1 %vm2373_vm0, %v9241_v39 }
 0x3c2   : > { %v2099_v25 = vpop.f32.mrb[18].mxu0  ;;  %v2284_v8 = vpop.f32.mrb[18].mxu1  ;;  %2543 = vmatprep.mubr.f32.mxu0 %v12097_v36  ;;  %2710 = vmatprep.mubr.f32.mxu1 %v12097_v36 }
 0x3c3   : > { %v9249_v16 = vmax.f32 %v2099_v25, %v2284_v8  ;;  %v2101_v60 = vpop.f32.mrb[19].mxu0  ;;  %v2286_v61 = vpop.f32.mrb[19].mxu1  ;;  %v3281_v25 = vld [vmem:[#allocation12 + $0x200] sm:$0xff]  ;;  %v3283_v8 = vld [vmem:[#allocation12 + $0x230] sm:$0xff] }
 0x3c4   : > { %v3270_v60 = vld [vmem:[#allocation12 + $0xe8] sm:$0xff]  ;;  %v3272_v61 = vld [vmem:[#allocation12 + $0x118] sm:$0xff] }
 0x3c5   : > { %6720 = vmatmul.mubr.msk.f32.gmra.mrb[52].mxu0 %vm2373_vm0, %v9249_v16  ;;  %6737 = vmatmul.mubr.msk.f32.gmra.mrb[52].mxu1 %vm2373_vm0, %v9249_v16 }
 0x3c6   : > { %v2104_v37 = vpop.f32.mrb[20].mxu0  ;;  %v2289_v28 = vpop.f32.mrb[20].mxu1  ;;  %2549 = vmatprep.mubr.f32.mxu0 %v12097_v36  ;;  %2716 = vmatprep.mubr.f32.mxu1 %v12097_v36 }
 0x3c7   : > { %v9257_v1 = vmax.f32 %v2104_v37, %v2289_v28  ;;  %v2106_v20 = vpop.f32.mrb[21].mxu0  ;;  %v2291_v63 = vpop.f32.mrb[21].mxu1  ;;  %v3286_v37 = vld [vmem:[#allocation12 + $0x268] sm:$0xff]  ;;  %v3288_v28 = vld [vmem:[#allocation12 + $0x298] sm:$0xff] }
 0x3c8   : > { %v7062_v20 = vpack.c.bf16 %v3267_v29, %v3265_v34  ;;  %v7078_v63 = vpack.c.bf16 %v3283_v8, %v3281_v25  ;;  %v4321_v25 = vld [vmem:[#allocation8 + $0x12] ss:$8 sm:$0x3]  ;;  %v4541_v8 = vld [vmem:[#allocation8 + $0x15] ss:$8 sm:$0x3] }
 0x3c9   : > { %6721 = vmatmul.mubr.msk.f32.gmra.mrb[54].mxu0 %vm2373_vm0, %v9257_v1  ;;  %6738 = vmatmul.mubr.msk.f32.gmra.mrb[54].mxu1 %vm2373_vm0, %v9257_v1 }
 0x3ca   : > { %v2109_v27 = vpop.f32.mrb[22].mxu0  ;;  %v2294_v55 = vpop.f32.mrb[22].mxu1  ;;  %2555 = vmatprep.mubr.f32.mxu0 %v12097_v36  ;;  %2722 = vmatprep.mubr.f32.mxu1 %v12097_v36 }
 0x3cb   : > { %v9265_v0 = vmax.f32 %v2109_v27, %v2294_v55  ;;  %v2111_v2 = vpop.f32.mrb[23].mxu0  ;;  %v2296_v59 = vpop.f32.mrb[23].mxu1  ;;  %v3269_v27 = vld [vmem:[#allocation12 + $0xe0] sm:$0xff]  ;;  %v3271_v55 = vld [vmem:[#allocation12 + $0x110] sm:$0xff] }
 0x3cc   : > { %v7064_v2 = vpack.c.bf16 %v3272_v61, %v3270_v60  ;;  %v7080_v59 = vpack.c.bf16 %v3288_v28, %v3286_v37 }
 0x3cd   : > { %6722 = vmatmul.mubr.msk.f32.gmra.mrb[56].mxu0 %vm2373_vm0, %v9265_v0  ;;  %6739 = vmatmul.mubr.msk.f32.gmra.mrb[56].mxu1 %vm2373_vm0, %v9265_v0 }
 0x3ce   : > { %v2114_v50 = vpop.f32.mrb[24].mxu0  ;;  %v2299_v43 = vpop.f32.mrb[24].mxu1  ;;  %2561 = vmatprep.mubr.f32.mxu0 %v12097_v36  ;;  %2728 = vmatprep.mubr.f32.mxu1 %v12097_v36 }
 0x3cf   : > { %v9273_v51 = vmax.f32 %v2114_v50, %v2299_v43  ;;  %v2116_v48 = vpop.f32.mrb[25].mxu0  ;;  %v2301_v32 = vpop.f32.mrb[25].mxu1  ;;  %v3285_v50 = vld [vmem:[#allocation12 + $0x260] sm:$0xff]  ;;  %v3287_v43 = vld [vmem:[#allocation12 + $0x290] sm:$0xff] }
 0x3d0   : > { %v3274_v48 = vld [vmem:[#allocation12 + $0x148] sm:$0xff]  ;;  %v3276_v32 = vld [vmem:[#allocation12 + $0x178] sm:$0xff] }
 0x3d1   : > { %6723 = vmatmul.mubr.msk.f32.gmra.mrb[58].mxu0 %vm2373_vm0, %v9273_v51  ;;  %6740 = vmatmul.mubr.msk.f32.gmra.mrb[58].mxu1 %vm2373_vm0, %v9273_v51 }
 0x3d2   : > { %v2119_v62 = vpop.f32.mrb[26].mxu0  ;;  %v2304_v15 = vpop.f32.mrb[26].mxu1  ;;  %2567 = vmatprep.mubr.f32.mxu0 %v12097_v36  ;;  %2734 = vmatprep.mubr.f32.mxu1 %v12097_v36 }
 0x3d3   : > { %v9281_v56 = vmax.f32 %v2119_v62, %v2304_v15  ;;  %v2121_v26 = vpop.f32.mrb[27].mxu0  ;;  %v2306_v5 = vpop.f32.mrb[27].mxu1  ;;  %v3290_v62 = vld [vmem:[#allocation12 + $0x2c8] sm:$0xff]  ;;  %v3292_v15 = vld [vmem:[#allocation12 + $0x2f8] sm:$0xff] }
 0x3d4   : > { %v7066_v26 = vpack.c.bf16 %v3271_v55, %v3269_v27  ;;  %v7082_v5 = vpack.c.bf16 %v3287_v43, %v3285_v50 }
 0x3d5   : > { %6724 = vmatmul.mubr.msk.f32.gmra.mrb[60].mxu0 %vm2373_vm0, %v9281_v56  ;;  %6741 = vmatmul.mubr.msk.f32.gmra.mrb[60].mxu1 %vm2373_vm0, %v9281_v56 }
 0x3d6   : > { %v2124_v18 = vpop.f32.mrb[28].mxu0  ;;  %v2309_v41 = vpop.f32.mrb[28].mxu1  ;;  %2573 = vmatprep.mubr.f32.mxu0 %v12097_v36  ;;  %2740 = vmatprep.mubr.f32.mxu1 %v12097_v36 }
 0x3d7   : > { %v9289_v40 = vmax.f32 %v2124_v18, %v2309_v41  ;;  %v2126_v42 = vpop.f32.mrb[29].mxu0  ;;  %v2311_v17 = vpop.f32.mrb[29].mxu1  ;;  %v3273_v18 = vld [vmem:[#allocation12 + $0x140] sm:$0xff]  ;;  %v7068_v41 = vpack.c.bf16 %v3276_v32, %v3274_v48  ;;  %v5200_v48 = vld [vmem:[#allocation8 + $0x26] ss:$8 sm:$0x3] }
 0x3d8   : > { %v7084_v42 = vpack.c.bf16 %v3292_v15, %v3290_v62  ;;  %v3275_v17 = vld [vmem:[#allocation12 + $0x170] sm:$0xff] }
 0x3d9   : > { %6725 = vmatmul.mubr.msk.f32.gmra.mrb[62].mxu0 %vm2373_vm0, %v9289_v40  ;;  %6742 = vmatmul.mubr.msk.f32.gmra.mrb[62].mxu1 %vm2373_vm0, %v9289_v40 }
 0x3da   : > { %v2129_v49 = vpop.f32.mrb[30].mxu0  ;;  %v2314_v35 = vpop.f32.mrb[30].mxu1  ;;  %2579 = vmatprep.mubr.f32.mxu0 %v12097_v36  ;;  %2746 = vmatprep.mubr.f32.mxu1 %v12097_v36 }
 0x3db   : > { %v9297_v24 = vmax.f32 %v2129_v49, %v2314_v35  ;;  %v2131_v30 = vpop.f32.mrb[31].mxu0  ;;  %v2316_v33 = vpop.f32.mrb[31].mxu1  ;;  %v3289_v49 = vld [vmem:[#allocation12 + $0x2c0] sm:$0xff]  ;;  %v3291_v35 = vld [vmem:[#allocation12 + $0x2f0] sm:$0xff] }
 0x3dc   : > { %v7070_v30 = vpack.c.bf16 %v3275_v17, %v3273_v18  ;;  %v7086_v33 = vpack.c.bf16 %v3291_v35, %v3289_v49 }
 0x3dd   : > { %6726 = vmatmul.mubr.msk.f32.gmra.mrb[64].mxu0 %vm2373_vm0, %v9297_v24  ;;  %6743 = vmatmul.mubr.msk.f32.gmra.mrb[64].mxu1 %vm2373_vm0, %v9297_v24 }
 0x3de   : > { %v2134_v13 = vpop.f32.mrb[32].mxu0  ;;  %v2319_v11 = vpop.f32.mrb[32].mxu1  ;;  %2585 = vmatprep.mubr.f32.mxu0 %v12097_v36  ;;  %2752 = vmatprep.mubr.f32.mxu1 %v12097_v36 }
 0x3df   : > { %v9305_v31 = vmax.f32 %v2134_v13, %v2319_v11  ;;  %v2136_v7 = vpop.f32.mrb[33].mxu0  ;;  %v2321_v3 = vpop.f32.mrb[33].mxu1  ;;  %v3740_v13 = vld [vmem:[#allocation8 + $0x1] ss:$8 sm:$0x3] }
 0x3e1   : > { %6727 = vmatmul.mubr.msk.f32.gmra.mrb[66].mxu0 %vm2373_vm0, %v9305_v31  ;;  %6744 = vmatmul.mubr.msk.f32.gmra.mrb[66].mxu1 %vm2373_vm0, %v9305_v31 }
 0x3e2   : > { %2923 = vmatprep.mubr.f32.mxu0 %v12097_v36  ;;  %3090 = vmatprep.mubr.f32.mxu1 %v12097_v36 }
 0x3e5   : > { %6745 = vmatmul.mubr.msk.f32.vlgmr.msra.gmra.mrb[68].mxu0 %vm2373_vm0, %v9177_v46  ;;  %6762 = vmatmul.mubr.msk.f32.vlgmr.msra.gmra.mrb[68].mxu1 %vm2373_vm0, %v9177_v46 }
 0x3e6   : > { %2929 = vmatprep.mubr.f32.mxu0 %v12097_v36  ;;  %3096 = vmatprep.mubr.f32.mxu1 %v12097_v36 }
 0x3e7   : > { %7059 = vmatpush1.bf16.msra.mxu0 %v7058_v9  ;;  %7075 = vmatpush1.bf16.msra.mxu1 %v7074_v21  ;;  %v4096_v21 = vld [vmem:[#allocation8 + $0x7] ss:$8 sm:$0x3] }
 0x3e8   : > { %7061 = vmatprep.subr.bf16.mxu0 %v7060_v6  ;;  %7077 = vmatprep.subr.bf16.mxu1 %v7076_v54 }
 0x3e9   : > { %6746 = vmatmul.mubr.msk.f32.gmra.mrb[70].mxu0 %vm2373_vm0, %v9185_v22  ;;  %6763 = vmatmul.mubr.msk.f32.gmra.mrb[70].mxu1 %vm2373_vm0, %v9185_v22 }
 0x3ea   : > { %2935 = vmatprep.mubr.f32.mxu0 %v12097_v36  ;;  %3102 = vmatprep.mubr.f32.mxu1 %v12097_v36 }
 0x3eb   : > { %7063 = vmatpush1.bf16.msra.mxu0 %v7062_v20  ;;  %7079 = vmatpush1.bf16.msra.mxu1 %v7078_v63  ;;  %v4755_v20 = vld [vmem:[#allocation8 + $0x20] ss:$8 sm:$0x3]  ;;  %v4980_v63 = vld [vmem:[#allocation8 + $0x23] ss:$8 sm:$0x3] }
 0x3ec   : > { %7065 = vmatprep.subr.bf16.mxu0 %v7064_v2  ;;  %7081 = vmatprep.subr.bf16.mxu1 %v7080_v59 }
 0x3ed   : > { %6747 = vmatmul.mubr.msk.f32.gmra.mrb[72].mxu0 %vm2373_vm0, %v9193_v57  ;;  %6764 = vmatmul.mubr.msk.f32.gmra.mrb[72].mxu1 %vm2373_vm0, %v9193_v57 }
 0x3ee   : > { %2941 = vmatprep.mubr.f32.mxu0 %v12097_v36  ;;  %3108 = vmatprep.mubr.f32.mxu1 %v12097_v36 }
 0x3ef   : > { %7067 = vmatpush1.bf16.msra.mxu0 %v7066_v26  ;;  %7083 = vmatpush1.bf16.msra.mxu1 %v7082_v5 }
 0x3f0   : > { %7069 = vmatprep.subr.bf16.mxu0 %v7068_v41  ;;  %7085 = vmatprep.subr.bf16.mxu1 %v7084_v42  ;;  %v5414_v41 = vld [vmem:[#allocation8 + $0x31] ss:$8 sm:$0x3] }
 0x3f1   : > { %6748 = vmatmul.mubr.msk.f32.gmra.mrb[74].mxu0 %vm2373_vm0, %v9201_v19  ;;  %6765 = vmatmul.mubr.msk.f32.gmra.mrb[74].mxu1 %vm2373_vm0, %v9201_v19 }
 0x3f2   : > { %2947 = vmatprep.mubr.f32.mxu0 %v12097_v36  ;;  %3114 = vmatprep.mubr.f32.mxu1 %v12097_v36 }
 0x3f3   : > { %7071 = vmatpush1.bf16.msra.mxu0 %v7070_v30  ;;  %7087 = vmatpush1.bf16.msra.mxu1 %v7086_v33 }
 0x3f5   : > { %6749 = vmatmul.mubr.msk.f32.gmra.mrb[76].mxu0 %vm2373_vm0, %v9209_v14  ;;  %6766 = vmatmul.mubr.msk.f32.gmra.mrb[76].mxu1 %vm2373_vm0, %v9209_v14 }
 0x3f6   : > { %2953 = vmatprep.mubr.f32.mxu0 %v12097_v36  ;;  %3120 = vmatprep.mubr.f32.mxu1 %v12097_v36 }
 0x3f9   : > { %6750 = vmatmul.mubr.msk.f32.gmra.mrb[78].mxu0 %vm2373_vm0, %v9217_v12  ;;  %6767 = vmatmul.mubr.msk.f32.gmra.mrb[78].mxu1 %vm2373_vm0, %v9217_v12 }
 0x3fa   : > { %2959 = vmatprep.mubr.f32.mxu0 %v12097_v36  ;;  %3126 = vmatprep.mubr.f32.mxu1 %v12097_v36 }
 0x3fd   : > { %6751 = vmatmul.mubr.msk.f32.gmra.mrb[80].mxu0 %vm2373_vm0, %v9225_v23  ;;  %6768 = vmatmul.mubr.msk.f32.gmra.mrb[80].mxu1 %vm2373_vm0, %v9225_v23 }
 0x3fe   : > { %2965 = vmatprep.mubr.f32.mxu0 %v12097_v36  ;;  %3132 = vmatprep.mubr.f32.mxu1 %v12097_v36 }
 0x401   : > { %6752 = vmatmul.mubr.msk.f32.gmra.mrb[82].mxu0 %vm2373_vm0, %v9233_v53  ;;  %6769 = vmatmul.mubr.msk.f32.gmra.mrb[82].mxu1 %vm2373_vm0, %v9233_v53 }
 0x402   : > { %2971 = vmatprep.mubr.f32.mxu0 %v12097_v36  ;;  %3138 = vmatprep.mubr.f32.mxu1 %v12097_v36 }
 0x405   : > { %6753 = vmatmul.mubr.msk.f32.gmra.mrb[84].mxu0 %vm2373_vm0, %v9241_v39  ;;  %6770 = vmatmul.mubr.msk.f32.gmra.mrb[84].mxu1 %vm2373_vm0, %v9241_v39 }
 0x406   : > { %2977 = vmatprep.mubr.f32.mxu0 %v12097_v36  ;;  %3144 = vmatprep.mubr.f32.mxu1 %v12097_v36 }
 0x409   : > { %6754 = vmatmul.mubr.msk.f32.gmra.mrb[86].mxu0 %vm2373_vm0, %v9249_v16  ;;  %6771 = vmatmul.mubr.msk.f32.gmra.mrb[86].mxu1 %vm2373_vm0, %v9249_v16 }
 0x40a   : > { %2983 = vmatprep.mubr.f32.mxu0 %v12097_v36  ;;  %3150 = vmatprep.mubr.f32.mxu1 %v12097_v36 }
 0x40d   : > { %6755 = vmatmul.mubr.msk.f32.gmra.mrb[88].mxu0 %vm2373_vm0, %v9257_v1  ;;  %6772 = vmatmul.mubr.msk.f32.gmra.mrb[88].mxu1 %vm2373_vm0, %v9257_v1 }
 0x40e   : > { %2989 = vmatprep.mubr.f32.mxu0 %v12097_v36  ;;  %3156 = vmatprep.mubr.f32.mxu1 %v12097_v36 }
 0x411   : > { %6756 = vmatmul.mubr.msk.f32.gmra.mrb[90].mxu0 %vm2373_vm0, %v9265_v0  ;;  %6773 = vmatmul.mubr.msk.f32.gmra.mrb[90].mxu1 %vm2373_vm0, %v9265_v0 }
 0x412   : > { %2995 = vmatprep.mubr.f32.mxu0 %v12097_v36  ;;  %3162 = vmatprep.mubr.f32.mxu1 %v12097_v36 }
 0x415   : > { %6757 = vmatmul.mubr.msk.f32.gmra.mrb[92].mxu0 %vm2373_vm0, %v9273_v51  ;;  %6774 = vmatmul.mubr.msk.f32.gmra.mrb[92].mxu1 %vm2373_vm0, %v9273_v51 }
 0x416   : > { %3001 = vmatprep.mubr.f32.mxu0 %v12097_v36  ;;  %3168 = vmatprep.mubr.f32.mxu1 %v12097_v36 }
 0x419   : > { %6758 = vmatmul.mubr.msk.f32.gmra.mrb[94].mxu0 %vm2373_vm0, %v9281_v56  ;;  %6775 = vmatmul.mubr.msk.f32.gmra.mrb[94].mxu1 %vm2373_vm0, %v9281_v56 }
 0x41a   : > { %3007 = vmatprep.mubr.f32.mxu0 %v12097_v36  ;;  %3174 = vmatprep.mubr.f32.mxu1 %v12097_v36 }
 0x41d   : > { %6759 = vmatmul.mubr.msk.f32.gmra.mrb[96].mxu0 %vm2373_vm0, %v9289_v40  ;;  %6776 = vmatmul.mubr.msk.f32.gmra.mrb[96].mxu1 %vm2373_vm0, %v9289_v40 }
 0x41e   : > { %3013 = vmatprep.mubr.f32.mxu0 %v12097_v36  ;;  %3180 = vmatprep.mubr.f32.mxu1 %v12097_v36 }
 0x421   : > { %6760 = vmatmul.mubr.msk.f32.gmra.mrb[98].mxu0 %vm2373_vm0, %v9297_v24  ;;  %6777 = vmatmul.mubr.msk.f32.gmra.mrb[98].mxu1 %vm2373_vm0, %v9297_v24 }
 0x422   : > { %3019 = vmatprep.mubr.f32.mxu0 %v12097_v36  ;;  %3186 = vmatprep.mubr.f32.mxu1 %v12097_v36 }
 0x425   : > { %6761 = vmatmul.mubr.msk.f32.gmra.mrb[100].mxu0 %vm2373_vm0, %v9305_v31  ;;  %6778 = vmatmul.mubr.msk.f32.gmra.mrb[100].mxu1 %vm2373_vm0, %v9305_v31 }
 0x426   : > { %3357 = vmatprep.mubr.f32.mxu0 %v12097_v36  ;;  %3524 = vmatprep.mubr.f32.mxu1 %v12097_v36 }
 0x429   : > { %6779 = vmatmul.mubr.msk.f32.vlgmr.msra.gmra.mrb[102].mxu0 %vm2373_vm0, %v9177_v46  ;;  %6796 = vmatmul.mubr.msk.f32.vlgmr.msra.gmra.mrb[102].mxu1 %vm2373_vm0, %v9177_v46  ;;  %v3705_v46 = vlaneseq }
 0x42a   : > { %3363 = vmatprep.mubr.f32.mxu0 %v12097_v36  ;;  %3530 = vmatprep.mubr.f32.mxu1 %v12097_v36 }
 0x42d   : > { %6780 = vmatmul.mubr.msk.f32.gmra.mrb[104].mxu0 %vm2373_vm0, %v9185_v22  ;;  %6797 = vmatmul.mubr.msk.f32.gmra.mrb[104].mxu1 %vm2373_vm0, %v9185_v22  ;;  %v3706_v22 = vshrl.u32 %v3705_v46, 7 }
 0x42e   : > { %3369 = vmatprep.mubr.f32.mxu0 %v12097_v36  ;;  %3536 = vmatprep.mubr.f32.mxu1 %v12097_v36 }
 0x431   : > { %6781 = vmatmul.mubr.msk.f32.gmra.mrb[106].mxu0 %vm2373_vm0, %v9193_v57  ;;  %6798 = vmatmul.mubr.msk.f32.gmra.mrb[106].mxu1 %vm2373_vm0, %v9193_v57  ;;  %v3703_v57 = vld [vmem:[#allocation8] ss:$8 sm:$0x3] }
 0x432   : > { %3375 = vmatprep.mubr.f32.mxu0 %v12097_v36  ;;  %3542 = vmatprep.mubr.f32.mxu1 %v12097_v36 }
 0x435   : > { %6782 = vmatmul.mubr.msk.f32.gmra.mrb[108].mxu0 %vm2373_vm0, %v9201_v19  ;;  %6799 = vmatmul.mubr.msk.f32.gmra.mrb[108].mxu1 %vm2373_vm0, %v9201_v19  ;;  %v9517_v19 = vsub.s32 0, %v3706_v22 }
 0x436   : > { %3381 = vmatprep.mubr.f32.mxu0 %v12097_v36  ;;  %3548 = vmatprep.mubr.f32.mxu1 %v12097_v36 }
 0x437   : > { %12292 = vst [vmem:[#allocation26_spill] sm:$0xff] %v9517_v19  ;;  %v9576_v59 = vrot.slane %v3740_v13, %v9517_v19  ;;  %v9579_v50 = vrot.slane %v3882_v4, %v9517_v19  ;;  %v9585_v26 = vrot.slane %v4096_v21, %v9517_v19  ;;  %v9594_v17 = vrot.slane %v4321_v25, %v9517_v19 }
 0x438   : > { %v9597_v49 = vrot.slane %v4541_v8, %v9517_v19  ;;  %v9600_v35 = vrot.slane %v4755_v20, %v9517_v19 }
 0x439   : > { %6783 = vmatmul.mubr.msk.f32.gmra.mrb[110].mxu0 %vm2373_vm0, %v9209_v14  ;;  %6800 = vmatmul.mubr.msk.f32.gmra.mrb[110].mxu1 %vm2373_vm0, %v9209_v14  ;;  %v3810_v14 = vld [vmem:[#allocation8 + $0x3] ss:$8 sm:$0x3]  ;;  %12294 = vst [vmem:[#allocation23_spill] sm:$0xff] %v9585_v26  ;;  %12297 = vst [vmem:[#allocation33_spill] sm:$0xff] %v9594_v17 }
 0x43a   : > { %3387 = vmatprep.mubr.f32.mxu0 %v12097_v36  ;;  %3554 = vmatprep.mubr.f32.mxu1 %v12097_v36  ;;  %12298 = vst [vmem:[#allocation34_spill] sm:$0xff] %v9597_v49  ;;  %12299 = vst [vmem:[#allocation28_spill] sm:$0xff] %v9600_v35 }
 0x43d   : > { %6784 = vmatmul.mubr.msk.f32.gmra.mrb[112].mxu0 %vm2373_vm0, %v9217_v12  ;;  %6801 = vmatmul.mubr.msk.f32.gmra.mrb[112].mxu1 %vm2373_vm0, %v9217_v12  ;;  %v9519_v12 = vsub.s32 1, %v3706_v22  ;;  %v9612_v22 = vrot.slane %v4980_v63, %v9517_v19 }
 0x43e   : > { %3393 = vmatprep.mubr.f32.mxu0 %v12097_v36  ;;  %3560 = vmatprep.mubr.f32.mxu1 %v12097_v36 }
 0x43f   : > { %12293 = vst [vmem:[#allocation32_spill] sm:$0xff] %v9519_v12  ;;  %v9534_v3 = vrot.slane %v3810_v14, %v9519_v12  ;;  %v9582_v43 = vrot.slane %v3740_v13, %v9519_v12  ;;  %v9588_v5 = vrot.slane %v3882_v4, %v9519_v12  ;;  %v9591_v18 = vrot.slane %v4096_v21, %v9519_v12 }
 0x440   : > { %v9603_v30 = vrot.slane %v4321_v25, %v9519_v12  ;;  %v9606_v33 = vrot.slane %v4541_v8, %v9519_v12  ;;  %v9609_v46 = vrot.slane %v4755_v20, %v9519_v12  ;;  %12303 = vst [vmem:[#allocation31_spill] sm:$0xff] %v9612_v22  ;;  %v9638_v8 = vrot.slane %v5414_v41, %v9519_v12 }
 0x441   : > { %6785 = vmatmul.mubr.msk.f32.gmra.mrb[114].mxu0 %vm2373_vm0, %v9225_v23  ;;  %6802 = vmatmul.mubr.msk.f32.gmra.mrb[114].mxu1 %vm2373_vm0, %v9225_v23  ;;  %v4024_v23 = vld [vmem:[#allocation8 + $0x6] ss:$8 sm:$0x3]  ;;  %12295 = vst [vmem:[#allocation24_spill] sm:$0xff] %v9588_v5  ;;  %12296 = vst [vmem:[#allocation27_spill] sm:$0xff] %v9591_v18 }
 0x442   : > { %3399 = vmatprep.mubr.f32.mxu0 %v12097_v36  ;;  %3566 = vmatprep.mubr.f32.mxu1 %v12097_v36  ;;  %v9531_v7 = vrot.slane %v4024_v23, %v9517_v19  ;;  %v9537_v52 = vrot.slane %v4024_v23, %v9519_v12  ;;  %12300 = vst [vmem:[#allocation25_spill] sm:$0xff] %v9603_v30  ;;  %12301 = vst [vmem:[#allocation29_spill] sm:$0xff] %v9606_v33 }
 0x443   : > { %12302 = vst [vmem:[#allocation30_spill] sm:$0xff] %v9609_v46  ;;  %12308 = vst [vmem:[#allocation39_spill] sm:$0xff] %v9638_v8 }
 0x445   : > { %6786 = vmatmul.mubr.msk.f32.gmra.mrb[116].mxu0 %vm2373_vm0, %v9233_v53  ;;  %6803 = vmatmul.mubr.msk.f32.gmra.mrb[116].mxu1 %vm2373_vm0, %v9233_v53  ;;  %v4244_v53 = vld [vmem:[#allocation8 + $0x11] ss:$8 sm:$0x3] }
 0x446   : > { %3405 = vmatprep.mubr.f32.mxu0 %v12097_v36  ;;  %3572 = vmatprep.mubr.f32.mxu1 %v12097_v36  ;;  %v9540_v38 = vrot.slane %v4244_v53, %v9517_v19  ;;  %v9549_v9 = vrot.slane %v4244_v53, %v9519_v12  ;;  %v9618_v53 = vrot.slane %v5200_v48, %v9517_v19 }
 0x448   : > { %12304 = vst [vmem:[#allocation35_spill] sm:$0xff] %v9618_v53 }
 0x449   : > { %6787 = vmatmul.mubr.msk.f32.gmra.mrb[118].mxu0 %vm2373_vm0, %v9241_v39  ;;  %6804 = vmatmul.mubr.msk.f32.gmra.mrb[118].mxu1 %vm2373_vm0, %v9241_v39  ;;  %v4469_v39 = vld [vmem:[#allocation8 + $0x14] ss:$8 sm:$0x3] }
 0x44a   : > { %3411 = vmatprep.mubr.f32.mxu0 %v12097_v36  ;;  %3578 = vmatprep.mubr.f32.mxu1 %v12097_v36  ;;  %v9543_v44 = vrot.slane %v4469_v39, %v9517_v19  ;;  %v9552_v29 = vrot.slane %v4469_v39, %v9519_v12  ;;  %v9621_v39 = vrot.slane %v5414_v41, %v9517_v19 }
 0x44c   : > { %12305 = vst [vmem:[#allocation36_spill] sm:$0xff] %v9621_v39 }
 0x44d   : > { %6788 = vmatmul.mubr.msk.f32.gmra.mrb[120].mxu0 %vm2373_vm0, %v9249_v16  ;;  %6805 = vmatmul.mubr.msk.f32.gmra.mrb[120].mxu1 %vm2373_vm0, %v9249_v16  ;;  %v4683_v16 = vld [vmem:[#allocation8 + $0x17] ss:$8 sm:$0x3] }
 0x44e   : > { %3417 = vmatprep.mubr.f32.mxu0 %v12097_v36  ;;  %3584 = vmatprep.mubr.f32.mxu1 %v12097_v36  ;;  %v9546_v45 = vrot.slane %v4683_v16, %v9517_v19  ;;  %v9555_v6 = vrot.slane %v4683_v16, %v9519_v12  ;;  %v9624_v16 = vrot.slane %v4980_v63, %v9519_v12 }
 0x450   : > { %12306 = vst [vmem:[#allocation37_spill] sm:$0xff] %v9624_v16 }
 0x451   : > { %6789 = vmatmul.mubr.msk.f32.gmra.mrb[122].mxu0 %vm2373_vm0, %v9257_v1  ;;  %6806 = vmatmul.mubr.msk.f32.gmra.mrb[122].mxu1 %vm2373_vm0, %v9257_v1  ;;  %v4903_v1 = vld [vmem:[#allocation8 + $0x22] ss:$8 sm:$0x3] }
 0x452   : > { %3423 = vmatprep.mubr.f32.mxu0 %v12097_v36  ;;  %3590 = vmatprep.mubr.f32.mxu1 %v12097_v36  ;;  %v9558_v54 = vrot.slane %v4903_v1, %v9517_v19  ;;  %v9567_v37 = vrot.slane %v4903_v1, %v9519_v12 }
 0x455   : > { %6790 = vmatmul.mubr.msk.f32.gmra.mrb[124].mxu0 %vm2373_vm0, %v9265_v0  ;;  %6807 = vmatmul.mubr.msk.f32.gmra.mrb[124].mxu1 %vm2373_vm0, %v9265_v0  ;;  %v5128_v0 = vld [vmem:[#allocation8 + $0x25] ss:$8 sm:$0x3] }
 0x456   : > { %3429 = vmatprep.mubr.f32.mxu0 %v12097_v36  ;;  %3596 = vmatprep.mubr.f32.mxu1 %v12097_v36  ;;  %v9561_v60 = vrot.slane %v5128_v0, %v9517_v19  ;;  %v9570_v28 = vrot.slane %v5128_v0, %v9519_v12 }
 0x459   : > { %6791 = vmatmul.mubr.msk.f32.gmra.mrb[126].mxu0 %vm2373_vm0, %v9273_v51  ;;  %6808 = vmatmul.mubr.msk.f32.gmra.mrb[126].mxu1 %vm2373_vm0, %v9273_v51  ;;  %v9522_v51 = vrot.slane %v3703_v57, %v9517_v19 }
 0x45a   : > { %3435 = vmatprep.mubr.f32.mxu0 %v12097_v36  ;;  %3602 = vmatprep.mubr.f32.mxu1 %v12097_v36 }
 0x45d   : > { %6792 = vmatmul.mubr.msk.f32.gmra.mrb[128].mxu0 %vm2373_vm0, %v9281_v56  ;;  %6809 = vmatmul.mubr.msk.f32.gmra.mrb[128].mxu1 %vm2373_vm0, %v9281_v56  ;;  %v9525_v56 = vrot.slane %v3810_v14, %v9517_v19 }
 0x45e   : > { %3441 = vmatprep.mubr.f32.mxu0 %v12097_v36  ;;  %3608 = vmatprep.mubr.f32.mxu1 %v12097_v36 }
 0x461   : > { %6793 = vmatmul.mubr.msk.f32.gmra.mrb[130].mxu0 %vm2373_vm0, %v9289_v40  ;;  %6810 = vmatmul.mubr.msk.f32.gmra.mrb[130].mxu1 %vm2373_vm0, %v9289_v40  ;;  %v9528_v40 = vrot.slane %v3703_v57, %v9519_v12 }
 0x462   : > { %3447 = vmatprep.mubr.f32.mxu0 %v12097_v36  ;;  %3614 = vmatprep.mubr.f32.mxu1 %v12097_v36 }
 0x465   : > { %6794 = vmatmul.mubr.msk.f32.gmra.mrb[132].mxu0 %vm2373_vm0, %v9297_v24  ;;  %6811 = vmatmul.mubr.msk.f32.gmra.mrb[132].mxu1 %vm2373_vm0, %v9297_v24  ;;  %v5342_v24 = vld [vmem:[#allocation8 + $0x30] ss:$8 sm:$0x3] }
 0x466   : > { %3453 = vmatprep.mubr.f32.mxu0 %v12097_v36  ;;  %3620 = vmatprep.mubr.f32.mxu1 %v12097_v36  ;;  %v9564_v61 = vrot.slane %v5342_v24, %v9517_v19  ;;  %v9573_v2 = vrot.slane %v5342_v24, %v9519_v12 }
 0x469   : > { %6795 = vmatmul.mubr.msk.f32.gmra.mrb[134].mxu0 %vm2373_vm0, %v9305_v31  ;;  %6812 = vmatmul.mubr.msk.f32.gmra.mrb[134].mxu1 %vm2373_vm0, %v9305_v31 }
 0x46a   : > { %6190 = vmatprep.mubr.f32.mxu0 %v12097_v36  ;;  %6276 = vmatprep.mubr.f32.mxu1 %v12097_v36 }
 0x474   : > { %v2491_v11 = vpop.f32.mrb[34].mxu0  ;;  %v2658_v31 = vpop.f32.mrb[34].mxu1 }
 0x475   : > { %v2759_v58 = vmax.f32 %v2491_v11, %v2658_v31  ;;  %v2493_v10 = vpop.f32.mrb[35].mxu0  ;;  %v2660_v47 = vpop.f32.mrb[35].mxu1  ;;  %v9631_v31 = vrot.slane %v5200_v48, %v9519_v12 }
 0x476   : > { %v2760_v34 = vmax.f32 %v2493_v10, %v2660_v47 }
 0x477   : > { %2793 = vst [vmem:[#allocation2] sm:$0xff] %v2759_v58  ;;  %12307 = vst [vmem:[#allocation38_spill] sm:$0xff] %v9631_v31  ;;  %v9634_v4 = vmul.f32 %v9522_v51, %v2759_v58 }
 0x478   : > { %2794 = vst [vmem:[#allocation2 + $0x8] sm:$0xff] %v2760_v34  ;;  %v2497_v27 = vpop.f32.mrb[36].mxu0  ;;  %v2664_v55 = vpop.f32.mrb[36].mxu1  ;;  %v9642_v63 = vmul.f32 %v9528_v40, %v2760_v34 }
 0x479   : > { %v2761_v32 = vmax.f32 %v2497_v27, %v2664_v55  ;;  %v2499_v62 = vpop.f32.mrb[37].mxu0  ;;  %v2666_v15 = vpop.f32.mrb[37].mxu1 }
 0x47a   : > { %v2762_v42 = vmax.f32 %v2499_v62, %v2666_v15 }
 0x47b   : > { %v9615_v57 = vmul.f32 %v9525_v56, %v2761_v32  ;;  %v4038_v1 = vmul.f32 %v9531_v7, %v2761_v32  ;;  %v9645_v48 = vmul.f32 %v9522_v51, %v2761_v32 }
 0x47c   : > { %v2503_v14 = vpop.f32.mrb[38].mxu0  ;;  %v2670_v23 = vpop.f32.mrb[38].mxu1  ;;  %v9628_v0 = vmul.f32 %v9534_v3, %v2762_v42  ;;  %v4039_v21 = vmul.f32 %v9537_v52, %v2762_v42  ;;  %v9648_v58 = vmul.f32 %v9528_v40, %v2762_v42 }
 0x47d   : > { %v2763_v24 = vmax.f32 %v2503_v14, %v2670_v23  ;;  %v2505_v13 = vpop.f32.mrb[39].mxu0  ;;  %v2672_v11 = vpop.f32.mrb[39].mxu1  ;;  %v3844_v15 = vrot.slane %v9615_v57, 1 }
 0x47e   : > { %v3805_v10 = vld [vmem:[#allocation2] sm:$0xfe]  ;;  %v2764_v25 = vmax.f32 %v2505_v13, %v2672_v11  ;;  %12309 = vst [vmem:[#allocation40_spill] sm:$0xff] %v9648_v58  ;;  %v4058_v11 = vrot.slane %v4038_v1, 2  ;;  %v4061_v57 = vrot.slane %v4039_v21, 2 }
 0x47f   : > { %v4019_v47 = vld [vmem:[#allocation2] sm:$0xfc]  ;;  %v3806_v27 = vld [vmem:[#allocation2 + $0x8] sm:$0xfe]  ;;  %v9653_v41 = vmul.f32 %v9525_v56, %v2763_v24  ;;  %v4040_v14 = vmul.f32 %v9531_v7, %v2763_v24  ;;  %v3822_v13 = vmul.f32 %v9525_v56, %v3805_v10  ;;  %v9664_v39 = vmul.f32 %v9522_v51, %v2763_v24 }
 0x480   : > { %v4036_v20 = vmul.f32 %v9531_v7, %v4019_v47  ;;  %v4020_v55 = vld [vmem:[#allocation2 + $0x8] sm:$0xfc]  ;;  %v2509_v23 = vpop.f32.mrb[40].mxu0  ;;  %v2676_v34 = vpop.f32.mrb[40].mxu1  ;;  %v9659_v47 = vmul.f32 %v9534_v3, %v2764_v25  ;;  %v4041_v31 = vmul.f32 %v9537_v52, %v2764_v25  ;;  %v9671_v21 = vmul.f32 %v9528_v40, %v2764_v25 }
 0x481   : > { %v4037_v62 = vmul.f32 %v9537_v52, %v4020_v55  ;;  %v2511_v42 = vpop.f32.mrb[41].mxu0  ;;  %v2678_v36 = vpop.f32.mrb[41].mxu1  ;;  %v3823_v55 = vmul.f32 %v9534_v3, %v3806_v27  ;;  %v4063_v8 = vrot.slane %v4040_v14, 2  ;;  %12310 = vst [vmem:[#allocation41_spill] sm:$0xff] %v9664_v39  ;;  %v2765_v53 = vmax.f32 %v2509_v23, %v2676_v34 }
 0x482   : > { %v4057_v16 = vrot.slane %v4036_v20, 2  ;;  %v2766_v10 = vmax.f32 %v2511_v42, %v2678_v36  ;;  %v4065_v46 = vrot.slane %v4041_v31, 2  ;;  %v3843_v27 = vrot.slane %v3822_v13, 1  ;;  %12312 = vst [vmem:[#allocation43_spill] sm:$0xff] %v9671_v21 }
 0x483   : > { %v4060_v1 = vrot.slane %v4037_v62, 2  ;;  %v9668_v22 = vsel %vm4056_vm1, %v4058_v11, %v4063_v8  ;;  %v9675_v24 = vmul.f32 %v9531_v7, %v2765_v53  ;;  %v3846_v62 = vrot.slane %v3823_v55, 1 }
 0x484   : > { %12311 = vst [vmem:[#allocation42_spill] sm:$0xff] %v9668_v22  ;;  %v2515_v33 = vpop.f32.mrb[42].mxu0  ;;  %v2682_v30 = vpop.f32.mrb[42].mxu1  ;;  %v9678_v23 = vsel %vm4056_vm1, %v4061_v57, %v4065_v46  ;;  %v9681_v34 = vmul.f32 %v9537_v52, %v2766_v10  ;;  %v9684_v13 = vsel %vm4056_vm1, %v4057_v16, %v4058_v11  ;;  %v9687_v25 = vmul.f32 %v9525_v56, %v2765_v53 }
 0x485   : > { %v2517_v14 = vpop.f32.mrb[43].mxu0  ;;  %v2684_v36 = vpop.f32.mrb[43].mxu1  ;;  %12313 = vst [vmem:[#allocation44_spill] sm:$0xff] %v9678_v23  ;;  %v2767_v31 = vmax.f32 %v2515_v33, %v2682_v30  ;;  %12314 = vst [vmem:[#allocation45_spill] sm:$0xff] %v9684_v13  ;;  %v12108_v42 = vrot.slane %v9675_v24, 2  ;;  %v9691_v32 = vsel %vm4056_vm1, %v4060_v1, %v4061_v57  ;;  %v9694_v55 = vmul.f32 %v9534_v3, %v2766_v10 }
 0x486   : > { %v2768_v20 = vmax.f32 %v2517_v14, %v2684_v36  ;;  %12315 = vst [vmem:[#allocation46_spill] sm:$0xff] %v9691_v32  ;;  %v12316_v33 = vrot.slane %v9653_v41, 1  ;;  %v3777_v36 = vld [vmem:[#allocation8 + $0x2] ss:$8 sm:$0x3]  ;;  %v9708_v23 = vsel %vm3842_vm2, %v3843_v27, %v3844_v15  ;;  %v12321_v32 = vrot.slane %v9628_v0, 1 }
 0x487   : > { %2801 = vst [vmem:[#allocation2 + $0xc0] sm:$0xff] %v2767_v31  ;;  %v9705_v11 = vsel %vm4056_vm1, %v4063_v8, %v12108_v42  ;;  %12319 = vst [vmem:[#allocation49_spill] sm:$0xff] %v9708_v23  ;;  %v12320_v31 = vrot.slane %v9659_v47, 1  ;;  %v9718_v13 = vmul.f32 %v9522_v51, %v2765_v53  ;;  %v9721_v8 = vmul.f32 %v9528_v40, %v2766_v10  ;;  %v3953_v27 = vld [vmem:[#allocation8 + $0x5] ss:$8 sm:$0x3] }
 0x488   : > { %v2521_v22 = vpop.f32.mrb[44].mxu0  ;;  %v2688_v30 = vpop.f32.mrb[44].mxu1  ;;  %v9700_v16 = vsel %vm3842_vm2, %v3844_v15, %v12316_v33  ;;  %12318 = vst [vmem:[#allocation48_spill] sm:$0xff] %v9705_v11  ;;  %2802 = vst [vmem:[#allocation2 + $0xc8] sm:$0xff] %v2768_v20  ;;  %v12338_v21 = vrot.slane %v9687_v25, 1  ;;  %v12340_v58 = vrot.slane %v9675_v24, 2 }
 0x489   : > { %12317 = vst [vmem:[#allocation47_spill] sm:$0xff] %v9700_v16  ;;  %v2769_v57 = vmax.f32 %v2521_v22, %v2688_v30  ;;  %v2523_v1 = vpop.f32.mrb[45].mxu0  ;;  %v2690_v14 = vpop.f32.mrb[45].mxu1  ;;  %v9715_v33 = vsel %vm3842_vm2, %v12321_v32, %v12320_v31  ;;  %12323 = vst [vmem:[#allocation51_spill] sm:$0xff] %v9718_v13  ;;  %v12325_v22 = vrot.slane %v9681_v34, 2  ;;  %v12329_v31 = vrot.slane %v9628_v0, 1 }
 0x48a   : > { %12322 = vst [vmem:[#allocation50_spill] sm:$0xff] %v9715_v33  ;;  %12324 = vst [vmem:[#allocation52_spill] sm:$0xff] %v9721_v8  ;;  %v2770_v15 = vmax.f32 %v2523_v1, %v2690_v14  ;;  %v4167_v1 = vld [vmem:[#allocation8 + $0x10] ss:$8 sm:$0x3]  ;;  %v9743_v14 = vrot.slane %v3777_v36, %v9519_v12  ;;  %v9757_v33 = vrot.slane %v3953_v27, %v9517_v19  ;;  %v12335_v0 = vrot.slane %v9653_v41, 1 }
 0x48b   : > { %v9726_v20 = vsel %vm4056_vm1, %v4065_v46, %v12325_v22  ;;  %v9730_v42 = vmul.f32 %v9540_v38, %v2769_v57  ;;  %v9733_v32 = vmul.f32 %v9543_v44, %v2769_v57  ;;  %v9736_v51 = vmul.f32 %v9546_v45, %v2769_v57 }
 0x48c   : > { %12326 = vst [vmem:[#allocation53_spill] sm:$0xff] %v9726_v20  ;;  %v2527_v53 = vpop.f32.mrb[46].mxu0  ;;  %v2694_v10 = vpop.f32.mrb[46].mxu1  ;;  %v9740_v46 = vrot.slane %v3777_v36, %v9517_v19  ;;  %12328 = vst [vmem:[#allocation55_spill] sm:$0xff] %v9743_v14  ;;  %v9748_v22 = vsel %vm3842_vm2, %v3846_v62, %v12329_v31  ;;  %v9751_v30 = vmul.f32 %v9549_v9, %v2770_v15  ;;  %v12334_v36 = vrot.slane %v9687_v25, 1 }
 0x48d   : > { %12330 = vst [vmem:[#allocation56_spill] sm:$0xff] %v9748_v22  ;;  %v9754_v57 = vmul.f32 %v9552_v29, %v2770_v15  ;;  %v2771_v40 = vmax.f32 %v2527_v53, %v2694_v10  ;;  %v2529_v20 = vpop.f32.mrb[47].mxu0  ;;  %v2696_v11 = vpop.f32.mrb[47].mxu1  ;;  %12331 = vst [vmem:[#allocation57_spill] sm:$0xff] %v9757_v33  ;;  %v9765_v53 = vmul.f32 %v9555_v6, %v2770_v15  ;;  %v12342_v5 = vrot.slane %v9694_v55, 1 }
 0x48e   : > { %12327 = vst [vmem:[#allocation54_spill] sm:$0xff] %v9740_v46  ;;  %v9762_v31 = vmax.f32 %v2529_v20, %v2696_v11  ;;  %v3807_v16 = vld [vmem:[#allocation2 + $0xc0] sm:$0x1]  ;;  %v4233_v23 = vld [vmem:[#allocation2 + $0xc0] sm:$0xfc]  ;;  %v9768_v10 = vrot.slane %v4167_v1, %v9517_v19  ;;  %v9771_v33 = vrot.slane %v3953_v27, %v9519_v12  ;;  %v9778_v11 = vsel %vm3842_vm2, %v12335_v0, %v12334_v36 }
 0x48f   : > { %v4021_v22 = vld [vmem:[#allocation2 + $0xc0] sm:$0x3]  ;;  %12336 = vst [vmem:[#allocation60_spill] sm:$0xff] %v9778_v11  ;;  %v3830_v20 = vmul.f32 %v9525_v56, %v3807_v16  ;;  %v4256_v15 = vmul.f32 %v9540_v38, %v4233_v23  ;;  %v4464_v14 = vld [vmem:[#allocation2 + $0xc0] sm:$0xf8] }
 0x490   : > { %12332 = vst [vmem:[#allocation58_spill] sm:$0xff] %v9768_v10  ;;  %12333 = vst [vmem:[#allocation59_spill] sm:$0xff] %v9771_v33  ;;  %v4044_v62 = vmul.f32 %v9531_v7, %v4021_v22  ;;  %v4678_v46 = vld [vmem:[#allocation2 + $0xc0] sm:$0xf0]  ;;  %v3808_v35 = vld [vmem:[#allocation2 + $0xc8] sm:$0x1]  ;;  %v9784_v10 = vrot.slane %v4167_v1, %v9519_v12  ;;  %v9787_v27 = vmul.f32 %v9543_v44, %v4464_v14 }
 0x491   : > { %v9790_v41 = vmul.f32 %v9546_v45, %v4678_v46  ;;  %v3831_v36 = vmul.f32 %v9534_v3, %v3808_v35  ;;  %v4022_v0 = vld [vmem:[#allocation2 + $0xc8] sm:$0x3]  ;;  %v4234_v56 = vld [vmem:[#allocation2 + $0xc8] sm:$0xfc]  ;;  %v3857_v16 = vrot.slane %v3830_v20, 1  ;;  %v2533_v1 = vpop.f32.mrb[48].mxu0  ;;  %v9800_v46 = vmul.f32 %v9540_v38, %v2771_v40 }
 0x492   : > { %12337 = vst [vmem:[#allocation61_spill] sm:$0xff] %v9784_v10  ;;  %v4071_v23 = vrot.slane %v4044_v62, 2  ;;  %v4045_v22 = vmul.f32 %v9537_v52, %v4022_v0  ;;  %v9797_v14 = vmul.f32 %v9549_v9, %v4234_v56  ;;  %v4465_v33 = vld [vmem:[#allocation2 + $0xc8] sm:$0xf8]  ;;  %v9803_v3 = vmul.f32 %v9543_v44, %v2771_v40  ;;  %v2700_v35 = vpop.f32.mrb[48].mxu1  ;;  %v2535_v7 = vpop.f32.mrb[49].mxu0 }
 0x493   : > { %v3859_v10 = vrot.slane %v3831_v36, 1  ;;  %v4276_v20 = vrot.slane %v4256_v15, 2  ;;  %v4679_v62 = vld [vmem:[#allocation2 + $0xc8] sm:$0xf0]  ;;  %v9806_v52 = vmul.f32 %v9546_v45, %v2771_v40  ;;  %v9810_v36 = vmul.f32 %v9549_v9, %v9762_v31  ;;  %v2702_v56 = vpop.f32.mrb[49].mxu1 }
 0x494   : > { %v9814_v0 = vmul.f32 %v9552_v29, %v9762_v31  ;;  %v2539_v11 = vpop.f32.mrb[50].mxu0  ;;  %v4073_v8 = vrot.slane %v4045_v22, 2  ;;  %v2706_v13 = vpop.f32.mrb[50].mxu1  ;;  %v9822_v39 = vsel %vm3842_vm2, %v12338_v21, %v3857_v16  ;;  %v9827_v18 = vsel %vm4056_vm1, %v12340_v58, %v4071_v23 }
 0x495   : > { %v2541_v40 = vpop.f32.mrb[51].mxu0  ;;  %12339 = vst [vmem:[#allocation62_spill] sm:$0xff] %v9822_v39  ;;  %12341 = vst [vmem:[#allocation63_spill] sm:$0xff] %v9827_v18  ;;  %v9832_v49 = vsel %vm3842_vm2, %v12342_v5, %v3859_v10  ;;  %v9835_v22 = vmul.f32 %v9552_v29, %v4465_v33  ;;  %v2708_v17 = vpop.f32.mrb[51].mxu1  ;;  %v9839_v25 = vmul.f32 %v9555_v6, %v4679_v62  ;;  %v4282_v21 = vrot.slane %v9800_v46, 2 }
 0x496   : > { %12343 = vst [vmem:[#allocation64_spill] sm:$0xff] %v9832_v49  ;;  %v4508_v24 = vrot.slane %v9803_v3, 3  ;;  %v12344_v58 = vrot.slane %v9730_v42, 2  ;;  %v4722_v5 = vrot.slane %v9806_v52, 4  ;;  %v4284_v33 = vrot.slane %v9810_v36, 2 }
 0x497   : > { %v4510_v10 = vrot.slane %v9814_v0, 3  ;;  %v12346_v62 = vrot.slane %v9681_v34, 2  ;;  %v4700_v36 = vmul.f32 %v9555_v6, %v9762_v31  ;;  %v12352_v34 = vrot.slane %v9736_v51, 4 }
 0x498   : > { %v9846_v16 = vsel %vm4056_vm1, %v4276_v20, %v12344_v58  ;;  %v2545_v23 = vpop.f32.mrb[52].mxu0  ;;  %v2712_v15 = vpop.f32.mrb[52].mxu1  ;;  %v12348_v46 = vmov %v12344_v58  ;;  %v12350_v20 = vrot.slane %v9733_v32, 3  ;;  %v12354_v42 = vrot.slane %v9751_v30, 2 }
 0x499   : > { %12345 = vst [vmem:[#allocation65_spill] sm:$0xff] %v9846_v16  ;;  %v9854_v18 = vsel %vm4056_vm1, %v12346_v62, %v4073_v8  ;;  %v9859_v3 = vsel %vm4056_vm1, %v12348_v46, %v4282_v21  ;;  %v2547_v0 = vpop.f32.mrb[53].mxu0  ;;  %v2714_v58 = vpop.f32.mrb[53].mxu1  ;;  %v9871_v8 = vsel %vm4715_vm4, %v12352_v34, %v4722_v5  ;;  %v12356_v46 = vrot.slane %v9754_v57, 3 }
 0x49a   : > { %12347 = vst [vmem:[#allocation66_spill] sm:$0xff] %v9854_v18  ;;  %12349 = vst [vmem:[#allocation67_spill] sm:$0xff] %v9859_v3  ;;  %v9864_v52 = vsel %vm4501_vm3, %v12350_v20, %v4508_v24  ;;  %v9876_v62 = vsel %vm4056_vm1, %v12354_v42, %v4284_v33  ;;  %v4724_v18 = vrot.slane %v4700_v36, 4  ;;  %v2774_v31 = vmax.f32 %v2535_v7, %v2702_v56 }
 0x49b   : > { %12351 = vst [vmem:[#allocation68_spill] sm:$0xff] %v9864_v52  ;;  %12353 = vst [vmem:[#allocation69_spill] sm:$0xff] %v9871_v8  ;;  %v9881_v20 = vsel %vm4501_vm3, %v12356_v46, %v4510_v10  ;;  %v2773_v52 = vmax.f32 %v2533_v1, %v2700_v35  ;;  %v2775_v3 = vmax.f32 %v2539_v11, %v2706_v13  ;;  %v12358_v46 = vrot.slane %v9765_v53, 4 }
 0x49c   : > { %12355 = vst [vmem:[#allocation70_spill] sm:$0xff] %v9876_v62  ;;  %12357 = vst [vmem:[#allocation71_spill] sm:$0xff] %v9881_v20  ;;  %v2776_v49 = vmax.f32 %v2541_v40, %v2708_v17  ;;  %v2777_v42 = vmax.f32 %v2545_v23, %v2712_v15  ;;  %v2551_v62 = vpop.f32.mrb[54].mxu0  ;;  %v2718_v16 = vpop.f32.mrb[54].mxu1  ;;  %v9898_v13 = vmul.f32 %v9549_v9, %v2774_v31  ;;  %v4719_v20 = vrot.slane %v9839_v25, 4 }
 0x49d   : > { %v9884_v39 = vmul.f32 %v9540_v38, %v2773_v52  ;;  %v9887_v34 = vmul.f32 %v9543_v44, %v2773_v52  ;;  %v9890_v8 = vmul.f32 %v9546_v45, %v2773_v52  ;;  %v9895_v1 = vsel %vm4715_vm4, %v12358_v46, %v4724_v18  ;;  %2809 = vst [vmem:[#allocation2 + $0x180] sm:$0xff] %v2775_v3  ;;  %v2553_v7 = vpop.f32.mrb[55].mxu0  ;;  %v2720_v35 = vpop.f32.mrb[55].mxu1 }
 0x49e   : > { %12359 = vst [vmem:[#allocation72_spill] sm:$0xff] %v9895_v1  ;;  %v9901_v17 = vmul.f32 %v9552_v29, %v2774_v31  ;;  %v9904_v11 = vmul.f32 %v9555_v6, %v2774_v31  ;;  %2810 = vst [vmem:[#allocation2 + $0x188] sm:$0xff] %v2776_v49  ;;  %v9910_v23 = vmul.f32 %v9558_v54, %v2777_v42  ;;  %v4505_v49 = vrot.slane %v9835_v22, 3 }
 0x49f   : > { %v12121_v56 = vrot.slane %v9884_v39, 2  ;;  %v12122_v15 = vrot.slane %v9887_v34, 3  ;;  %v9916_v3 = vmul.f32 %v9561_v60, %v2777_v42  ;;  %v12362_v52 = vrot.slane %v9890_v8, 4 }
 0x4a0   : > { %v2557_v31 = vpop.f32.mrb[56].mxu0  ;;  %v2724_v1 = vpop.f32.mrb[56].mxu1  ;;  %v12364_v22 = vrot.slane %v9898_v13, 2  ;;  %v2778_v25 = vmax.f32 %v2547_v0, %v2714_v58  ;;  %v12374_v0 = vrot.slane %v9787_v27, 3  ;;  %v12376_v58 = vrot.slane %v9736_v51, 4 }
 0x4a1   : > { %v9922_v46 = vsel %vm4056_vm1, %v4282_v21, %v12121_v56  ;;  %v9927_v40 = vsel %vm4501_vm3, %v4508_v24, %v12122_v15  ;;  %v9932_v36 = vsel %vm4715_vm4, %v4722_v5, %v12362_v52  ;;  %v12366_v21 = vrot.slane %v9901_v17, 3  ;;  %v2559_v5 = vpop.f32.mrb[57].mxu0  ;;  %v2726_v52 = vpop.f32.mrb[57].mxu1 }
 0x4a2   : > { %12360 = vst [vmem:[#allocation73_spill] sm:$0xff] %v9922_v46  ;;  %12361 = vst [vmem:[#allocation74_spill] sm:$0xff] %v9927_v40  ;;  %v9938_v26 = vsel %vm4056_vm1, %v4284_v33, %v12364_v22  ;;  %v12368_v24 = vrot.slane %v9904_v11, 4  ;;  %v2779_v40 = vmax.f32 %v2551_v62, %v2718_v16  ;;  %v9951_v46 = vmax.f32 %v2553_v7, %v2720_v35 }
 0x4a3   : > { %12363 = vst [vmem:[#allocation75_spill] sm:$0xff] %v9932_v36  ;;  %12365 = vst [vmem:[#allocation76_spill] sm:$0xff] %v9938_v26  ;;  %v9943_v56 = vsel %vm4501_vm3, %v4510_v10, %v12366_v21  ;;  %v9954_v22 = vmax.f32 %v2557_v31, %v2724_v1  ;;  %v9956_v10 = vmax.f32 %v2559_v5, %v2726_v52  ;;  %v12370_v21 = vrot.slane %v9694_v55, 1 }
 0x4a4   : > { %12367 = vst [vmem:[#allocation77_spill] sm:$0xff] %v9943_v56  ;;  %v9948_v15 = vsel %vm4715_vm4, %v4724_v18, %v12368_v24  ;;  %v12371_v18 = vrot.slane %v9659_v47, 1  ;;  %v12373_v36 = vrot.slane %v9733_v32, 3  ;;  %v12377_v62 = vrot.slane %v9790_v41, 4  ;;  %v4241_v35 = vld [vmem:[#allocation2 + $0x180] sm:$0x3] }
 0x4a5   : > { %12369 = vst [vmem:[#allocation78_spill] sm:$0xff] %v9948_v15  ;;  %v12379_v55 = vrot.slane %v9751_v30, 2  ;;  %v12380_v47 = vrot.slane %v9797_v14, 2  ;;  %v12382_v32 = vrot.slane %v9754_v57, 3  ;;  %v4680_v51 = vld [vmem:[#allocation2 + $0x180] sm:$0xf]  ;;  %v4264_v30 = vmul.f32 %v9540_v38, %v4241_v35 }
 0x4a6   : > { %v9963_v24 = vsel %vm3842_vm2, %v12371_v18, %v12370_v21  ;;  %v9970_v16 = vsel %vm4501_vm3, %v12374_v0, %v12373_v36  ;;  %v9977_v1 = vsel %vm4715_vm4, %v12377_v62, %v12376_v58  ;;  %v4466_v36 = vld [vmem:[#allocation2 + $0x180] sm:$0x7]  ;;  %v12384_v41 = vrot.slane %v9765_v53, 4  ;;  %v4892_v52 = vld [vmem:[#allocation2 + $0x180] sm:$0xf0] }
 0x4a7   : > { %12372 = vst [vmem:[#allocation79_spill] sm:$0xff] %v9963_v24  ;;  %12375 = vst [vmem:[#allocation80_spill] sm:$0xff] %v9970_v16  ;;  %v9984_v7 = vsel %vm4056_vm1, %v12380_v47, %v12379_v55  ;;  %v9989_v27 = vsel %vm4501_vm3, %v4505_v49, %v12382_v32  ;;  %v4489_v14 = vmul.f32 %v9543_v44, %v4466_v36  ;;  %v5123_v21 = vld [vmem:[#allocation2 + $0x180] sm:$0xe0]  ;;  %v4242_v0 = vld [vmem:[#allocation2 + $0x188] sm:$0x3] }
 0x4a8   : > { %12378 = vst [vmem:[#allocation81_spill] sm:$0xff] %v9977_v1  ;;  %12381 = vst [vmem:[#allocation82_spill] sm:$0xff] %v9984_v7  ;;  %v9994_v31 = vsel %vm4715_vm4, %v4719_v20, %v12384_v41  ;;  %v4703_v5 = vmul.f32 %v9546_v45, %v4680_v51  ;;  %v5337_v57 = vld [vmem:[#allocation2 + $0x180] sm:$0xc0]  ;;  %v4915_v49 = vmul.f32 %v9558_v54, %v4892_v52  ;;  %v4467_v58 = vld [vmem:[#allocation2 + $0x188] sm:$0x7] }
 0x4a9   : > { %12383 = vst [vmem:[#allocation83_spill] sm:$0xff] %v9989_v27  ;;  %12385 = vst [vmem:[#allocation84_spill] sm:$0xff] %v9994_v31  ;;  %v5140_v18 = vmul.f32 %v9561_v60, %v5123_v21  ;;  %v10002_v53 = vmul.f32 %v9564_v61, %v2777_v42  ;;  %v10005_v20 = vmul.f32 %v9567_v37, %v2778_v25  ;;  %v4290_v38 = vrot.slane %v4264_v30, 2  ;;  %v4681_v62 = vld [vmem:[#allocation2 + $0x188] sm:$0xf]  ;;  %v10014_v32 = vpop.f32.mrb[58].mxu0 }
 0x4aa   : > { %v10008_v44 = vmul.f32 %v9564_v61, %v5337_v57  ;;  %v4265_v45 = vmul.f32 %v9549_v9, %v4242_v0  ;;  %v4893_v55 = vld [vmem:[#allocation2 + $0x188] sm:$0xf0]  ;;  %v10012_v47 = vmul.f32 %v9570_v28, %v2778_v25  ;;  %v4516_v35 = vrot.slane %v4489_v14, 3  ;;  %v10019_v30 = vpop.f32.mrb[58].mxu1  ;;  %v10025_v33 = vpop.f32.mrb[59].mxu0 }
 0x4ab   : > { %12386 = vst [vmem:[#allocation85_spill] sm:$0xff] %v10002_v53  ;;  %v4730_v36 = vrot.slane %v4703_v5, 4  ;;  %v4935_v42 = vrot.slane %v4915_v49, 4  ;;  %v10017_v51 = vmul.f32 %v9552_v29, %v4467_v58  ;;  %v5124_v41 = vld [vmem:[#allocation2 + $0x188] sm:$0xe0]  ;;  %v5161_v52 = vrot.slane %v5140_v18, 5 }
 0x4ac   : > { %12387 = vst [vmem:[#allocation86_spill] sm:$0xff] %v10008_v44  ;;  %v4292_v21 = vrot.slane %v4265_v45, 2  ;;  %v5338_v57 = vld [vmem:[#allocation2 + $0x188] sm:$0xc0]  ;;  %v10022_v9 = vmul.f32 %v9573_v2, %v2778_v25  ;;  %v4919_v0 = vmul.f32 %v9558_v54, %v2779_v40  ;;  %v10027_v15 = vpop.f32.mrb[59].mxu1  ;;  %v10030_v14 = vmul.f32 %v9555_v6, %v4681_v62  ;;  %v10039_v18 = vpop.f32.mrb[60].mxu0 }
 0x4ad   : > { %v10033_v29 = vmul.f32 %v9567_v37, %v4893_v55  ;;  %v10036_v5 = vmul.f32 %v9570_v28, %v5124_v41  ;;  %v5144_v49 = vmul.f32 %v9561_v60, %v2779_v40  ;;  %v10041_v25 = vpop.f32.mrb[60].mxu1  ;;  %v12388_v58 = vrot.slane %v9884_v39, 2  ;;  %v10055_v41 = vpop.f32.mrb[61].mxu0  ;;  %v4612_v16 = vld [vmem:[#allocation8 + $0x16] ss:$8 sm:$0x3] }
 0x4ae   : > { %v10050_v62 = vmul.f32 %v9573_v2, %v5338_v57  ;;  %v10053_v55 = vmul.f32 %v9564_v61, %v2779_v40  ;;  %v10057_v56 = vpop.f32.mrb[61].mxu1  ;;  %v12391_v31 = vrot.slane %v9887_v34, 3  ;;  %v12393_v39 = vrot.slane %v9890_v8, 4  ;;  %v10075_v6 = vpop.f32.mrb[62].mxu0 }
 0x4af   : > { %v10046_v45 = vsel %vm4056_vm1, %v12388_v58, %v4290_v38  ;;  %v12395_v57 = vrot.slane %v9898_v13, 2  ;;  %v10077_v44 = vpop.f32.mrb[62].mxu1  ;;  %v4732_v34 = vrot.slane %v10030_v14, 4  ;;  %v12397_v8 = vrot.slane %v9910_v23, 4 }
 0x4b0   : > { %12389 = vst [vmem:[#allocation87_spill] sm:$0xff] %v10046_v45  ;;  %12390 = vst [vmem:[#allocation88_spill] sm:$0xff] %v10053_v55  ;;  %v10062_v1 = vsel %vm4501_vm3, %v12391_v31, %v4516_v35  ;;  %v10067_v38 = vsel %vm4715_vm4, %v12393_v39, %v4730_v36  ;;  %v4938_v31 = vrot.slane %v10033_v29, 4  ;;  %v12399_v13 = vrot.slane %v9916_v3, 5  ;;  %v2744_v39 = vpop.f32.mrb[63].mxu1 }
 0x4b1   : > { %12392 = vst [vmem:[#allocation89_spill] sm:$0xff] %v10062_v1  ;;  %12394 = vst [vmem:[#allocation90_spill] sm:$0xff] %v10067_v38  ;;  %v10072_v58 = vsel %vm4056_vm1, %v12395_v57, %v4292_v21  ;;  %v10084_v35 = vsel %vm4715_vm4, %v4935_v42, %v12397_v8  ;;  %v2577_v21 = vpop.f32.mrb[63].mxu0  ;;  %v4941_v38 = vrot.slane %v4919_v0, 4  ;;  %v5167_v14 = vrot.slane %v5144_v49, 5  ;;  %v2748_v57 = vpop.f32.mrb[64].mxu1 }
 0x4b2   : > { %12396 = vst [vmem:[#allocation91_spill] sm:$0xff] %v10072_v58  ;;  %12398 = vst [vmem:[#allocation92_spill] sm:$0xff] %v10084_v35  ;;  %v10089_v36 = vsel %vm5160_vm5, %v5161_v52, %v12399_v13  ;;  %v4939_v1 = vrot.slane %v10005_v20, 4  ;;  %v4920_v42 = vmul.f32 %v9567_v37, %v9951_v46  ;;  %v10099_v8 = vmul.f32 %v9570_v28, %v9951_v46  ;;  %v2581_v40 = vpop.f32.mrb[64].mxu0 }
 0x4b3   : > { %12400 = vst [vmem:[#allocation93_spill] sm:$0xff] %v10089_v36  ;;  %v12402_v52 = vrot.slane %v9910_v23, 4  ;;  %v12404_v0 = vrot.slane %v9916_v3, 5  ;;  %v10113_v20 = vmul.f32 %v9573_v2, %v9951_v46  ;;  %v10117_v29 = vmul.f32 %v9558_v54, %v9954_v22 }
 0x4b4   : > { %12401 = vst [vmem:[#allocation94_spill] sm:$0xff] %v10099_v8  ;;  %v4943_v53 = vrot.slane %v4920_v42, 4  ;;  %v10123_v3 = vmul.f32 %v9561_v60, %v9954_v22  ;;  %v10130_v35 = vmul.f32 %v9567_v37, %v9956_v10  ;;  %v10139_v58 = vmul.f32 %v9564_v61, %v9954_v22 }
 0x4b5   : > { %v10104_v13 = vsel %vm4715_vm4, %v12402_v52, %v4941_v38  ;;  %v10109_v49 = vsel %vm5160_vm5, %v12404_v0, %v5167_v14  ;;  %12406 = vst [vmem:[#allocation97_spill] sm:$0xff] %v10113_v20  ;;  %v2583_v0 = vpop.f32.mrb[65].mxu0  ;;  %v10149_v55 = vmul.f32 %v9570_v28, %v9956_v10  ;;  %v2783_v42 = vmax.f32 %v10014_v32, %v10019_v30 }
 0x4b6   : > { %12403 = vst [vmem:[#allocation95_spill] sm:$0xff] %v10104_v13  ;;  %12405 = vst [vmem:[#allocation96_spill] sm:$0xff] %v10109_v49  ;;  %v2750_v49 = vpop.f32.mrb[65].mxu1  ;;  %v12128_v13 = vrot.slane %v10117_v29, 4  ;;  %v10133_v23 = vsel %vm4715_vm4, %v4939_v1, %v4943_v53  ;;  %v12411_v45 = vrot.slane %v10123_v3, 5  ;;  %v2785_v36 = vmax.f32 %v10039_v18, %v10041_v25 }
 0x4b7   : > { %12407 = vst [vmem:[#allocation98_spill] sm:$0xff] %v10133_v23  ;;  %12408 = vst [vmem:[#allocation99_spill] sm:$0xff] %v10139_v58  ;;  %v2587_v23 = vpop.f32.mrb[66].mxu0  ;;  %v2754_v52 = vpop.f32.mrb[66].mxu1  ;;  %v12414_v32 = vrot.slane %v10130_v35, 4  ;;  %v12416_v26 = vrot.slane %v10017_v51, 3 }
 0x4b8   : > { %v10144_v46 = vsel %vm4715_vm4, %v4941_v38, %v12128_v13  ;;  %12410 = vst [vmem:[#allocation101_spill] sm:$0xff] %v10149_v55  ;;  %v10156_v22 = vsel %vm5160_vm5, %v5167_v14, %v12411_v45  ;;  %v10160_v38 = vmul.f32 %v9573_v2, %v9956_v10  ;;  %v2784_v13 = vmax.f32 %v10025_v33, %v10027_v15  ;;  %v2756_v27 = vpop.f32.mrb[67].mxu1 }
 0x4b9   : > { %12409 = vst [vmem:[#allocation100_spill] sm:$0xff] %v10144_v46  ;;  %12412 = vst [vmem:[#allocation102_spill] sm:$0xff] %v10156_v22  ;;  %v2589_v46 = vpop.f32.mrb[67].mxu0  ;;  %v10169_v30 = vsel %vm4715_vm4, %v4943_v53, %v12414_v32  ;;  %v2786_v45 = vmax.f32 %v10055_v41, %v10057_v56  ;;  %v2787_v10 = vmax.f32 %v10075_v6, %v10077_v44  ;;  %v4398_v22 = vld [vmem:[#allocation8 + $0x13] ss:$8 sm:$0x3] }
 0x4ba   : > { %12413 = vst [vmem:[#allocation103_spill] sm:$0xff] %v10160_v38  ;;  %12415 = vst [vmem:[#allocation104_spill] sm:$0xff] %v10169_v30  ;;  %v2788_v14 = vmax.f32 %v2577_v21, %v2744_v39  ;;  %v2789_v15 = vmax.f32 %v2581_v40, %v2748_v57  ;;  %v2790_v33 = vmax.f32 %v2583_v0, %v2750_v49  ;;  %v12417_v53 = vrot.slane %v9901_v17, 3  ;;  %v3092_v51 = vpop.f32.mrb[68].mxu1  ;;  %v12454_v41 = vld [vmem:[#allocation27_spill] sm:$0xff] }
 0x4bb   : > { %2817 = vst [vmem:[#allocation2 + $0x240] sm:$0xff] %v2783_v42  ;;  %2818 = vst [vmem:[#allocation2 + $0x248] sm:$0xff] %v2784_v13  ;;  %v2791_v18 = vmax.f32 %v2587_v23, %v2754_v52  ;;  %v2792_v25 = vmax.f32 %v2589_v46, %v2756_v27  ;;  %v12419_v56 = vrot.slane %v9904_v11, 4  ;;  %v10188_v6 = vsel %vm4715_vm4, %v4938_v31, %v4939_v1  ;;  %v2925_v27 = vpop.f32.mrb[68].mxu0  ;;  %v3094_v1 = vpop.f32.mrb[69].mxu1 }
 0x4bc   : > { %2819 = vst [vmem:[#allocation2 + $0x270] sm:$0xff] %v2785_v36  ;;  %v10180_v42 = vsel %vm4501_vm3, %v12417_v53, %v12416_v26  ;;  %12421 = vst [vmem:[#allocation107_spill] sm:$0xff] %v10188_v6  ;;  %v4826_v40 = vld [vmem:[#allocation8 + $0x21] ss:$8 sm:$0x3]  ;;  %v3193_v11 = vmax.f32 %v2925_v27, %v3092_v51  ;;  %v10194_v31 = vrot.slane %v4398_v22, %v9517_v19  ;;  %v12424_v39 = vrot.slane %v10099_v8, 5 }
 0x4bd   : > { %12418 = vst [vmem:[#allocation105_spill] sm:$0xff] %v10180_v42  ;;  %v10185_v44 = vsel %vm4715_vm4, %v12419_v56, %v4732_v34  ;;  %2820 = vst [vmem:[#allocation2 + $0x278] sm:$0xff] %v2786_v45  ;;  %v2927_v34 = vpop.f32.mrb[69].mxu0  ;;  %v10197_v21 = vrot.slane %v4612_v16, %v9517_v19  ;;  %v12425_v57 = vrot.slane %v10012_v47, 5  ;;  %v12427_v49 = vrot.slane %v10113_v20, 6 }
 0x4be   : > { %12420 = vst [vmem:[#allocation106_spill] sm:$0xff] %v10185_v44  ;;  %2821 = vst [vmem:[#allocation2 + $0x2a0] sm:$0xff] %v2787_v10  ;;  %v3194_v36 = vmax.f32 %v2927_v34, %v3094_v1  ;;  %v12428_v23 = vrot.slane %v10022_v9, 6  ;;  %v5562_v0 = vld [vmem:[#allocation8 + $0x33] ss:$8 sm:$0x3]  ;;  %v3752_v46 = vmul.f32 %v9576_v59, %v3193_v11  ;;  %v10215_v32 = vrot.slane %v4826_v40, %v9517_v19 }
 0x4bf   : > { %2822 = vst [vmem:[#allocation2 + $0x2a8] sm:$0xff] %v2788_v14  ;;  %2823 = vst [vmem:[#allocation2 + $0x2d0] sm:$0xff] %v2789_v15  ;;  %v10204_v13 = vsel %vm5160_vm5, %v12425_v57, %v12424_v39  ;;  %v10218_v45 = vrot.slane %v4398_v22, %v9519_v12  ;;  %v10221_v10 = vrot.slane %v4612_v16, %v9519_v12  ;;  %v2931_v15 = vpop.f32.mrb[70].mxu0  ;;  %v12435_v53 = vrot.slane %v10036_v5, 5 }
 0x4c0   : > { %2824 = vst [vmem:[#allocation2 + $0x2d8] sm:$0xff] %v2790_v33  ;;  %2825 = vst [vmem:[#allocation2 + $0x300] sm:$0xff] %v2791_v18  ;;  %v10211_v52 = vsel %vm5374_vm6, %v12428_v23, %v12427_v49  ;;  %v3753_v14 = vmul.f32 %v9582_v43, %v3194_v36  ;;  %v3098_v33 = vpop.f32.mrb[70].mxu1  ;;  %v10225_v18 = vrot.slane %v4826_v40, %v9519_v12  ;;  %v12437_v22 = vmov %v12428_v23 }
 0x4c1   : > { %2826 = vst [vmem:[#allocation2 + $0x308] sm:$0xff] %v2792_v25  ;;  %12422 = vst [vmem:[#allocation108_spill] sm:$0xff] %v10194_v31  ;;  %v12434_v25 = vmov %v12425_v57  ;;  %v12438_v16 = vrot.slane %v10050_v62, 6  ;;  %v10242_v40 = vadd.f32 %v3752_v46, %v9634_v4  ;;  %v3195_v1 = vmax.f32 %v2931_v15, %v3098_v33  ;;  %v3100_v15 = vpop.f32.mrb[71].mxu1  ;;  %v12483_v31 = vld [vmem:[#allocation29_spill] sm:$0xff] }
 0x4c2   : > { %12423 = vst [vmem:[#allocation109_spill] sm:$0xff] %v10197_v21  ;;  %12426 = vst [vmem:[#allocation110_spill] sm:$0xff] %v10204_v13  ;;  %v10232_v56 = vsel %vm5160_vm5, %v12435_v53, %v12434_v25  ;;  %v4900_v51 = vld [vmem:[#allocation2 + $0x240] sm:$0xf]  ;;  %v10245_v47 = vrot.slane %v5562_v0, %v9517_v19  ;;  %v10248_v5 = vrot.slane %v5562_v0, %v9519_v12  ;;  %v4901_v39 = vld [vmem:[#allocation2 + $0x248] sm:$0xf] }
 0x4c3   : > { %12429 = vst [vmem:[#allocation111_spill] sm:$0xff] %v10211_v52  ;;  %3227 = vst [vmem:[#allocation2 + $0x10] sm:$0xff] %v3193_v11  ;;  %v10239_v27 = vsel %vm5374_vm6, %v12438_v16, %v12437_v22  ;;  %v5125_v11 = vld [vmem:[#allocation2 + $0x240] sm:$0x1f]  ;;  %v4923_v9 = vmul.f32 %v9558_v54, %v4900_v51  ;;  %v5126_v57 = vld [vmem:[#allocation2 + $0x248] sm:$0x1f]  ;;  %v10256_v49 = vadd.f32 %v3753_v14, %v9642_v63 }
 0x4c4   : > { %12430 = vst [vmem:[#allocation112_spill] sm:$0xff] %v10215_v32  ;;  %12431 = vst [vmem:[#allocation113_spill] sm:$0xff] %v10218_v45  ;;  %v5339_v34 = vld [vmem:[#allocation2 + $0x240] sm:$0x3f]  ;;  %v5148_v62 = vmul.f32 %v9561_v60, %v5125_v11  ;;  %v4924_v4 = vmul.f32 %v9567_v37, %v4901_v39  ;;  %v10260_v23 = vmul.f32 %v9570_v28, %v5126_v57  ;;  %v5340_v46 = vld [vmem:[#allocation2 + $0x248] sm:$0x3f] }
 0x4c5   : > { %12432 = vst [vmem:[#allocation114_spill] sm:$0xff] %v10221_v10  ;;  %3228 = vst [vmem:[#allocation2 + $0x18] sm:$0xff] %v3194_v36  ;;  %v10253_v36 = vmul.f32 %v9564_v61, %v5339_v34  ;;  %v3754_v0 = vmul.f32 %v9576_v59, %v3195_v1  ;;  %v10264_v54 = vmul.f32 %v9579_v50, %v3195_v1  ;;  %v2933_v60 = vpop.f32.mrb[71].mxu0  ;;  %v4949_v61 = vrot.slane %v4923_v9, 4  ;;  %v3104_v16 = vpop.f32.mrb[72].mxu1 }
 0x4c6   : > { %12433 = vst [vmem:[#allocation115_spill] sm:$0xff] %v10225_v18  ;;  %12436 = vst [vmem:[#allocation116_spill] sm:$0xff] %v10232_v56  ;;  %v5175_v33 = vrot.slane %v5148_v62, 5  ;;  %v10268_v63 = vmul.f32 %v9573_v2, %v5340_v46  ;;  %v2937_v14 = vpop.f32.mrb[72].mxu0  ;;  %v4951_v37 = vrot.slane %v4924_v4, 4  ;;  %v12446_v11 = vrot.slane %v10117_v29, 4 }
 0x4c7   : > { %12439 = vst [vmem:[#allocation117_spill] sm:$0xff] %v10239_v27  ;;  %12440 = vst [vmem:[#allocation118_spill] sm:$0xff] %v10245_v47  ;;  %v10272_v53 = vadd.f32 %v3754_v0, %v9645_v48  ;;  %v3915_v22 = vrot.slane %v10264_v54, 1  ;;  %v2939_v51 = vpop.f32.mrb[73].mxu0  ;;  %v12448_v9 = vrot.slane %v10123_v3, 5  ;;  %v12450_v48 = vld [vmem:[#allocation23_spill] sm:$0xff]  ;;  %v3197_v28 = vmax.f32 %v2937_v14, %v3104_v16 }
 0x4c8   : > { %12441 = vst [vmem:[#allocation119_spill] sm:$0xff] %v10248_v5  ;;  %12442 = vst [vmem:[#allocation120_spill] sm:$0xff] %v10253_v36  ;;  %v10278_v34 = vsel %vm4715_vm4, %v12446_v11, %v4949_v61  ;;  %v4110_v4 = vmul.f32 %v12450_v48, %v3195_v1  ;;  %v3106_v46 = vpop.f32.mrb[73].mxu1  ;;  %v12451_v0 = vrot.slane %v10130_v35, 4  ;;  %v2943_v1 = vpop.f32.mrb[74].mxu0  ;;  %v12457_v16 = vld [vmem:[#allocation40_spill] sm:$0xff] }
 0x4c9   : > { %12443 = vst [vmem:[#allocation121_spill] sm:$0xff] %v10260_v23  ;;  %12444 = vst [vmem:[#allocation122_spill] sm:$0xff] %v10268_v63  ;;  %v10283_v2 = vsel %vm5160_vm5, %v12448_v9, %v5175_v33  ;;  %v3196_v33 = vmax.f32 %v2933_v60, %v3100_v15  ;;  %v12453_v9 = vld [vmem:[#allocation24_spill] sm:$0xff]  ;;  %v3110_v17 = vpop.f32.mrb[74].mxu1  ;;  %v3756_v15 = vmul.f32 %v9576_v59, %v3197_v28 }
 0x4ca   : > { %12445 = vst [vmem:[#allocation123_spill] sm:$0xff] %v10272_v53  ;;  %12447 = vst [vmem:[#allocation124_spill] sm:$0xff] %v10278_v34  ;;  %v3877_v39 = vld [vmem:[#allocation2 + $0x10] sm:$0xfe]  ;;  %v10290_v54 = vsel %vm4715_vm4, %v12451_v0, %v4951_v37  ;;  %v4129_v26 = vrot.slane %v4110_v4, 2  ;;  %v3112_v58 = vpop.f32.mrb[75].mxu1  ;;  %v3198_v38 = vmax.f32 %v2939_v51, %v3106_v46 }
 0x4cb   : > { %12449 = vst [vmem:[#allocation125_spill] sm:$0xff] %v10283_v2  ;;  %v4091_v57 = vld [vmem:[#allocation2 + $0x10] sm:$0xfc]  ;;  %12452 = vst [vmem:[#allocation23_spill] sm:$0xff] %v10290_v54  ;;  %v3894_v29 = vmul.f32 %v9579_v50, %v3877_v39  ;;  %v3755_v37 = vmul.f32 %v9582_v43, %v3196_v33  ;;  %v3897_v0 = vmul.f32 %v12453_v9, %v3196_v33  ;;  %v2945_v39 = vpop.f32.mrb[75].mxu0  ;;  %v3116_v20 = vpop.f32.mrb[76].mxu1 }
 0x4cc   : > { %v4108_v61 = vmul.f32 %v12450_v48, %v4091_v57  ;;  %v3878_v3 = vld [vmem:[#allocation2 + $0x18] sm:$0xfe]  ;;  %v4111_v60 = vmul.f32 %v12454_v41, %v3196_v33  ;;  %v2949_v33 = vpop.f32.mrb[76].mxu0  ;;  %v3200_v23 = vmax.f32 %v2945_v39, %v3112_v58  ;;  %v4113_v55 = vmul.f32 %v12454_v41, %v3198_v38 }
 0x4cd   : > { %v4092_v11 = vld [vmem:[#allocation2 + $0x18] sm:$0xfc]  ;;  %v3895_v25 = vmul.f32 %v12453_v9, %v3878_v3  ;;  %v3914_v36 = vrot.slane %v3894_v29, 1  ;;  %v10307_v4 = vadd.f32 %v3755_v37, %v12457_v16  ;;  %v3918_v29 = vrot.slane %v3897_v0, 1  ;;  %v2951_v8 = vpop.f32.mrb[77].mxu0  ;;  %v3118_v37 = vpop.f32.mrb[77].mxu1 }
 0x4ce   : > { %v4109_v62 = vmul.f32 %v12454_v41, %v4092_v11  ;;  %v4128_v35 = vrot.slane %v4108_v61, 2  ;;  %v4132_v61 = vrot.slane %v4111_v60, 2  ;;  %v12459_v11 = vld [vmem:[#allocation41_spill] sm:$0xff]  ;;  %v3201_v16 = vmax.f32 %v2949_v33, %v3116_v20  ;;  %v2955_v20 = vpop.f32.mrb[78].mxu0  ;;  %v3122_v46 = vpop.f32.mrb[78].mxu1 }
 0x4cf   : > { %v3917_v57 = vrot.slane %v3895_v25, 1  ;;  %v10301_v3 = vsel %vm3842_vm2, %v3914_v36, %v3915_v22  ;;  %12458 = vst [vmem:[#allocation40_spill] sm:$0xff] %v10307_v4  ;;  %v10310_v63 = vadd.f32 %v3756_v15, %v12459_v11  ;;  %v3898_v25 = vmul.f32 %v9579_v50, %v3197_v28  ;;  %v12482_v34 = vld [vmem:[#allocation25_spill] sm:$0xff] }
 0x4d0   : > { %v4131_v2 = vrot.slane %v4109_v62, 2  ;;  %12455 = vst [vmem:[#allocation24_spill] sm:$0xff] %v10301_v3  ;;  %v10304_v14 = vsel %vm4056_vm1, %v4128_v35, %v4129_v26  ;;  %v4112_v62 = vmul.f32 %v12450_v48, %v3197_v28  ;;  %v3199_v35 = vmax.f32 %v2943_v1, %v3110_v17  ;;  %3235 = vst [vmem:[#allocation2 + $0xd0] sm:$0xff] %v3201_v16  ;;  %v12465_v1 = vld [vmem:[#allocation43_spill] sm:$0xff] }
 0x4d1   : > { %12456 = vst [vmem:[#allocation27_spill] sm:$0xff] %v10304_v14  ;;  %12460 = vst [vmem:[#allocation41_spill] sm:$0xff] %v10310_v63  ;;  %v10315_v36 = vsel %vm3842_vm2, %v3917_v57, %v3918_v29  ;;  %v3920_v60 = vrot.slane %v3898_v25, 1  ;;  %v3757_v11 = vmul.f32 %v9582_v43, %v3198_v38  ;;  %v3899_v28 = vmul.f32 %v12453_v9, %v3198_v38  ;;  %v12467_v25 = vld [vmem:[#allocation51_spill] sm:$0xff] }
 0x4d2   : > { %12461 = vst [vmem:[#allocation126_spill] sm:$0xff] %v10315_v36  ;;  %v10318_v0 = vsel %vm4056_vm1, %v4131_v2, %v4132_v61  ;;  %v4134_v15 = vrot.slane %v4112_v62, 2  ;;  %v3758_v57 = vmul.f32 %v9576_v59, %v3199_v35  ;;  %v10331_v17 = vmul.f32 %v9579_v50, %v3199_v35  ;;  %v2957_v62 = vpop.f32.mrb[79].mxu0 }
 0x4d3   : > { %12462 = vst [vmem:[#allocation127_spill] sm:$0xff] %v10318_v0  ;;  %v10325_v51 = vsel %vm3842_vm2, %v3915_v22, %v3920_v60  ;;  %v10334_v2 = vmul.f32 %v12450_v48, %v3199_v35  ;;  %v10337_v39 = vadd.f32 %v3757_v11, %v12465_v1  ;;  %v3922_v38 = vrot.slane %v3899_v28, 1  ;;  %v12473_v1 = vld [vmem:[#allocation52_spill] sm:$0xff] }
 0x4d4   : > { %12463 = vst [vmem:[#allocation128_spill] sm:$0xff] %v10325_v51  ;;  %v10328_v58 = vsel %vm4056_vm1, %v4129_v26, %v4134_v15  ;;  %v4136_v59 = vrot.slane %v4113_v55, 2  ;;  %v10340_v22 = vadd.f32 %v3758_v57, %v12467_v25  ;;  %v3124_v26 = vpop.f32.mrb[79].mxu1  ;;  %v3924_v33 = vrot.slane %v10331_v17, 1  ;;  %v2961_v25 = vpop.f32.mrb[80].mxu0 }
 0x4d5   : > { %12464 = vst [vmem:[#allocation129_spill] sm:$0xff] %v10328_v58  ;;  %12466 = vst [vmem:[#allocation43_spill] sm:$0xff] %v10337_v39  ;;  %v4138_v30 = vrot.slane %v10334_v2, 2  ;;  %v3759_v35 = vmul.f32 %v9582_v43, %v3200_v23  ;;  %v10346_v16 = vmul.f32 %v12453_v9, %v3200_v23  ;;  %v10349_v47 = vsel %vm3842_vm2, %v3918_v29, %v3922_v38  ;;  %v10357_v57 = vld [vmem:[#allocation8 + $0x24] ss:$8 sm:$0x3] }
 0x4d6   : > { %12468 = vst [vmem:[#allocation51_spill] sm:$0xff] %v10340_v22  ;;  %12469 = vst [vmem:[#allocation130_spill] sm:$0xff] %v10349_v47  ;;  %v10352_v11 = vsel %vm4056_vm1, %v4132_v61, %v4136_v59  ;;  %v10355_v55 = vmul.f32 %v12454_v41, %v3200_v23  ;;  %v3202_v28 = vmax.f32 %v2951_v8, %v3118_v37  ;;  %v10359_v17 = vld [vmem:[#allocation8 + $0x27] ss:$8 sm:$0x3]  ;;  %v3128_v52 = vpop.f32.mrb[80].mxu1 }
 0x4d7   : > { %12470 = vst [vmem:[#allocation131_spill] sm:$0xff] %v10352_v11  ;;  %v10362_v2 = vsel %vm3842_vm2, %v3920_v60, %v3924_v33  ;;  %v10365_v43 = vsel %vm4056_vm1, %v4134_v15, %v4138_v30  ;;  %v10368_v29 = vadd.f32 %v3759_v35, %v12473_v1  ;;  %v12141_v61 = vrot.slane %v10346_v16, 1  ;;  %v2963_v13 = vpop.f32.mrb[81].mxu0  ;;  %v3130_v60 = vpop.f32.mrb[81].mxu1 }
 0x4d8   : > { %12471 = vst [vmem:[#allocation132_spill] sm:$0xff] %v10362_v2  ;;  %12472 = vst [vmem:[#allocation133_spill] sm:$0xff] %v10365_v43  ;;  %v12142_v23 = vrot.slane %v10355_v55, 2  ;;  %v3203_v8 = vmax.f32 %v2955_v20, %v3122_v46  ;;  %v3204_v37 = vmax.f32 %v2957_v62, %v3124_v26  ;;  %v10372_v27 = vmax.f32 %v2961_v25, %v3128_v52  ;;  %v3879_v20 = vld [vmem:[#allocation2 + $0xd0] sm:$0x1]  ;;  %v10409_v42 = vpop.f32.mrb[82].mxu0 }
 0x4d9   : > { %12474 = vst [vmem:[#allocation52_spill] sm:$0xff] %v10368_v29  ;;  %3236 = vst [vmem:[#allocation2 + $0xd8] sm:$0xff] %v3202_v28  ;;  %v10377_v15 = vsel %vm3842_vm2, %v3922_v38, %v12141_v61  ;;  %v10379_v35 = vmax.f32 %v2963_v13, %v3130_v60  ;;  %v10383_v1 = vrot.slane %v10357_v57, %v9517_v19  ;;  %v4093_v46 = vld [vmem:[#allocation2 + $0xd0] sm:$0x3]  ;;  %v4310_v62 = vld [vmem:[#allocation2 + $0xd0] sm:$0xfc] }
 0x4da   : > { %12475 = vst [vmem:[#allocation134_spill] sm:$0xff] %v10377_v15  ;;  %v10387_v28 = vrot.slane %v10359_v17, %v9517_v19  ;;  %v10392_v52 = vsel %vm4056_vm1, %v4136_v59, %v12142_v23  ;;  %v12479_v38 = vld [vmem:[#allocation33_spill] sm:$0xff]  ;;  %v12480_v13 = vld [vmem:[#allocation34_spill] sm:$0xff]  ;;  %v12481_v60 = vld [vmem:[#allocation28_spill] sm:$0xff]  ;;  %v3902_v56 = vmul.f32 %v9579_v50, %v3879_v20  ;;  %v4116_v54 = vmul.f32 %v12450_v48, %v4093_v46  ;;  %v2969_v48 = vpop.f32.mrb[83].mxu0 }
 0x4db   : > { %12476 = vst [vmem:[#allocation135_spill] sm:$0xff] %v10383_v1  ;;  %12478 = vst [vmem:[#allocation137_spill] sm:$0xff] %v10392_v52  ;;  %v10395_v26 = vmul.f32 %v12479_v38, %v3203_v8  ;;  %v10398_v25 = vmul.f32 %v12480_v13, %v3203_v8  ;;  %v10401_v61 = vmul.f32 %v12481_v60, %v3203_v8  ;;  %v4536_v59 = vld [vmem:[#allocation2 + $0xd0] sm:$0xf8] }
 0x4dc   : > { %12477 = vst [vmem:[#allocation136_spill] sm:$0xff] %v10387_v28  ;;  %v4333_v6 = vmul.f32 %v12479_v38, %v4310_v62  ;;  %v4750_v23 = vld [vmem:[#allocation2 + $0xd0] sm:$0xf0]  ;;  %v10407_v44 = vmul.f32 %v12482_v34, %v3204_v37  ;;  %v10411_v28 = vpop.f32.mrb[82].mxu1  ;;  %v4553_v1 = vmul.f32 %v12480_v13, %v4536_v59  ;;  %v3928_v46 = vrot.slane %v3902_v56, 1 }
 0x4dd   : > { %v4767_v8 = vmul.f32 %v12481_v60, %v4750_v23  ;;  %v4354_v18 = vrot.slane %v10395_v26, 2  ;;  %v4574_v50 = vrot.slane %v10398_v25, 3  ;;  %v3136_v20 = vpop.f32.mrb[83].mxu1  ;;  %v4142_v62 = vrot.slane %v4116_v54, 2  ;;  %v12487_v54 = vld [vmem:[#allocation30_spill] sm:$0xff] }
 0x4de   : > { %v4353_v10 = vrot.slane %v4333_v6, 2  ;;  %v4788_v45 = vrot.slane %v10401_v61, 4  ;;  %v4573_v52 = vrot.slane %v4553_v1, 3  ;;  %v10420_v43 = vmul.f32 %v12483_v31, %v3204_v37 }
 0x4df   : > { %v4787_v32 = vrot.slane %v4767_v8, 4  ;;  %v10423_v23 = vsel %vm3842_vm2, %v3924_v33, %v3928_v46  ;;  %v10426_v26 = vsel %vm4056_vm1, %v4138_v30, %v4142_v62  ;;  %v4770_v61 = vmul.f32 %v12487_v54, %v3204_v37  ;;  %v10438_v30 = vpop.f32.mrb[84].mxu0  ;;  %v10440_v62 = vpop.f32.mrb[84].mxu1 }
 0x4e0   : > { %12484 = vst [vmem:[#allocation33_spill] sm:$0xff] %v10423_v23  ;;  %12485 = vst [vmem:[#allocation34_spill] sm:$0xff] %v10426_v26  ;;  %v3880_v25 = vld [vmem:[#allocation2 + $0xd8] sm:$0x1]  ;;  %v4311_v56 = vld [vmem:[#allocation2 + $0xd8] sm:$0xfc]  ;;  %v10429_v6 = vsel %vm4056_vm1, %v4353_v10, %v4354_v18  ;;  %v10436_v46 = vsel %vm4501_vm3, %v4573_v52, %v4574_v50 }
 0x4e1   : > { %v4094_v59 = vld [vmem:[#allocation2 + $0xd8] sm:$0x3]  ;;  %12486 = vst [vmem:[#allocation28_spill] sm:$0xff] %v10429_v6  ;;  %v3903_v1 = vmul.f32 %v12453_v9, %v3880_v25  ;;  %v4334_v21 = vmul.f32 %v12482_v34, %v4311_v56  ;;  %v4537_v29 = vld [vmem:[#allocation2 + $0xd8] sm:$0xf8]  ;;  %12488 = vst [vmem:[#allocation25_spill] sm:$0xff] %v10436_v46  ;;  %v10445_v37 = vsel %vm4715_vm4, %v4787_v32, %v4788_v45 }
 0x4e2   : > { %v4117_v8 = vmul.f32 %v12454_v41, %v4094_v59  ;;  %v4751_v33 = vld [vmem:[#allocation2 + $0xd8] sm:$0xf0]  ;;  %v4554_v10 = vmul.f32 %v12483_v31, %v4537_v29  ;;  %12489 = vst [vmem:[#allocation29_spill] sm:$0xff] %v10445_v37  ;;  %v4577_v41 = vrot.slane %v10420_v43, 3  ;;  %v10448_v9 = vpop.f32.mrb[85].mxu0  ;;  %v10450_v25 = vpop.f32.mrb[85].mxu1  ;;  %v4337_v29 = vmul.f32 %v12479_v38, %v10372_v27 }
 0x4e3   : > { %v4768_v26 = vmul.f32 %v12487_v54, %v4751_v33  ;;  %v3930_v59 = vrot.slane %v3903_v1, 1  ;;  %v4356_v56 = vrot.slane %v4334_v21, 2  ;;  %v4791_v46 = vrot.slane %v4770_v61, 4  ;;  %v2979_v32 = vpop.f32.mrb[86].mxu0  ;;  %v3146_v37 = vpop.f32.mrb[86].mxu1 }
 0x4e4   : > { %v4144_v52 = vrot.slane %v4117_v8, 2  ;;  %v4576_v6 = vrot.slane %v4554_v10, 3  ;;  %v4557_v33 = vmul.f32 %v12480_v13, %v10372_v27  ;;  %v12490_v43 = vrot.slane %v10346_v16, 1  ;;  %v2981_v10 = vpop.f32.mrb[87].mxu0  ;;  %v3148_v22 = vpop.f32.mrb[87].mxu1 }
 0x4e5   : > { %v4790_v23 = vrot.slane %v4768_v26, 4  ;;  %v12492_v1 = vrot.slane %v10355_v55, 2  ;;  %v12494_v26 = vrot.slane %v10407_v44, 2  ;;  %v4771_v8 = vmul.f32 %v12481_v60, %v10372_v27 }
 0x4e6   : > { %v10459_v11 = vsel %vm3842_vm2, %v12490_v43, %v3930_v59  ;;  %v10474_v16 = vsel %vm4501_vm3, %v4576_v6, %v4577_v41  ;;  %v4359_v55 = vrot.slane %v4337_v29, 2  ;;  %v4579_v43 = vrot.slane %v4557_v33, 3  ;;  %v2985_v33 = vpop.f32.mrb[88].mxu0 }
 0x4e7   : > { %12491 = vst [vmem:[#allocation30_spill] sm:$0xff] %v10459_v11  ;;  %v10464_v21 = vsel %vm4056_vm1, %v12492_v1, %v4144_v52  ;;  %v10469_v61 = vsel %vm4056_vm1, %v4356_v56, %v12494_v26  ;;  %12496 = vst [vmem:[#allocation140_spill] sm:$0xff] %v10474_v16  ;;  %v10477_v59 = vsel %vm4715_vm4, %v4790_v23, %v4791_v46  ;;  %v4793_v52 = vrot.slane %v4771_v8, 4  ;;  %v3152_v8 = vpop.f32.mrb[88].mxu1  ;;  %v2987_v11 = vpop.f32.mrb[89].mxu0 }
 0x4e8   : > { %12493 = vst [vmem:[#allocation138_spill] sm:$0xff] %v10464_v21  ;;  %12495 = vst [vmem:[#allocation139_spill] sm:$0xff] %v10469_v61  ;;  %v4338_v1 = vmul.f32 %v12482_v34, %v10379_v35  ;;  %v4558_v56 = vmul.f32 %v12483_v31, %v10379_v35  ;;  %v4772_v27 = vmul.f32 %v12487_v54, %v10379_v35  ;;  %v3154_v35 = vpop.f32.mrb[89].mxu1 }
 0x4e9   : > { %12497 = vst [vmem:[#allocation141_spill] sm:$0xff] %v10477_v59  ;;  %v10486_v26 = vsel %vm4056_vm1, %v4354_v18, %v4359_v55  ;;  %v10489_v6 = vsel %vm4501_vm3, %v4574_v50, %v4579_v43  ;;  %v3207_v23 = vmax.f32 %v10409_v42, %v10411_v28  ;;  %v3208_v29 = vmax.f32 %v2969_v48, %v3136_v20 }
 0x4ea   : > { %12498 = vst [vmem:[#allocation142_spill] sm:$0xff] %v10486_v26  ;;  %12499 = vst [vmem:[#allocation143_spill] sm:$0xff] %v10489_v6  ;;  %v10494_v59 = vsel %vm4715_vm4, %v4788_v45, %v4793_v52  ;;  %v4361_v16 = vrot.slane %v4338_v1, 2  ;;  %v4581_v21 = vrot.slane %v4558_v56, 3  ;;  %v4795_v61 = vrot.slane %v4772_v27, 4 }
 0x4eb   : > { %12500 = vst [vmem:[#allocation144_spill] sm:$0xff] %v10494_v59  ;;  %v10497_v18 = vmul.f32 %v12479_v38, %v3207_v23  ;;  %v10500_v50 = vmul.f32 %v12480_v13, %v3207_v23  ;;  %v10503_v6 = vmul.f32 %v12481_v60, %v3207_v23  ;;  %v10506_v42 = vmul.f32 %v12482_v34, %v3208_v29  ;;  %v2991_v59 = vpop.f32.mrb[90].mxu0 }
 0x4ec   : > { %v12501_v45 = vrot.slane %v10407_v44, 2  ;;  %v10514_v48 = vsel %vm4501_vm3, %v4577_v41, %v4581_v21  ;;  %v10517_v20 = vsel %vm4715_vm4, %v4791_v46, %v4795_v61  ;;  %v10520_v1 = vmul.f32 %v12483_v31, %v3208_v29  ;;  %v2993_v56 = vpop.f32.mrb[91].mxu0 }
 0x4ed   : > { %12503 = vst [vmem:[#allocation146_spill] sm:$0xff] %v10514_v48  ;;  %12504 = vst [vmem:[#allocation147_spill] sm:$0xff] %v10517_v20  ;;  %v10528_v41 = vmul.f32 %v12487_v54, %v3208_v29  ;;  %v3209_v46 = vmax.f32 %v10438_v30, %v10440_v62  ;;  %v3210_v20 = vmax.f32 %v10448_v9, %v10450_v25  ;;  %v12505_v27 = vrot.slane %v10497_v18, 2 }
 0x4ee   : > { %v10511_v28 = vsel %vm4056_vm1, %v12501_v45, %v4361_v16  ;;  %v3158_v45 = vpop.f32.mrb[90].mxu1  ;;  %v12507_v44 = vrot.slane %v10500_v50, 3  ;;  %v12509_v29 = vrot.slane %v10503_v6, 4  ;;  %v12511_v30 = vrot.slane %v10506_v42, 2 }
 0x4ef   : > { %12502 = vst [vmem:[#allocation145_spill] sm:$0xff] %v10511_v28  ;;  %v3160_v48 = vpop.f32.mrb[91].mxu1  ;;  %v10537_v23 = vsel %vm4056_vm1, %v4359_v55, %v12505_v27  ;;  %v12513_v9 = vrot.slane %v10520_v1, 3  ;;  %v12151_v55 = vrot.slane %v10528_v41, 4  ;;  %3243 = vst [vmem:[#allocation2 + $0x190] sm:$0xff] %v3209_v46  ;;  %v10560_v27 = vmax.f32 %v2981_v10, %v3148_v22  ;;  %v12517_v46 = vld [vmem:[#allocation35_spill] sm:$0xff] }
 0x4f0   : > { %12506 = vst [vmem:[#allocation148_spill] sm:$0xff] %v10537_v23  ;;  %v10542_v28 = vsel %vm4501_vm3, %v4579_v43, %v12507_v44  ;;  %v10547_v26 = vsel %vm4715_vm4, %v4793_v52, %v12509_v29  ;;  %v10552_v62 = vsel %vm4056_vm1, %v4361_v16, %v12511_v30  ;;  %3244 = vst [vmem:[#allocation2 + $0x198] sm:$0xff] %v3210_v20  ;;  %v3164_v16 = vpop.f32.mrb[92].mxu1  ;;  %v12519_v22 = vld [vmem:[#allocation36_spill] sm:$0xff]  ;;  %v12521_v10 = vld [vmem:[#allocation37_spill] sm:$0xff] }
 0x4f1   : > { %12508 = vst [vmem:[#allocation149_spill] sm:$0xff] %v10542_v28  ;;  %12510 = vst [vmem:[#allocation150_spill] sm:$0xff] %v10547_v26  ;;  %v10557_v25 = vsel %vm4501_vm3, %v4581_v21, %v12513_v9  ;;  %v3211_v43 = vmax.f32 %v2979_v32, %v3146_v37  ;;  %v3213_v44 = vmax.f32 %v2985_v33, %v3152_v8  ;;  %v2997_v28 = vpop.f32.mrb[92].mxu0  ;;  %v12516_v21 = vld [vmem:[#allocation31_spill] sm:$0xff]  ;;  %v10580_v32 = vpop.f32.mrb[93].mxu1 }
 0x4f2   : > { %12512 = vst [vmem:[#allocation151_spill] sm:$0xff] %v10552_v62  ;;  %12514 = vst [vmem:[#allocation152_spill] sm:$0xff] %v10557_v25  ;;  %v10562_v52 = vmax.f32 %v2987_v11, %v3154_v35  ;;  %v3215_v29 = vmax.f32 %v2991_v59, %v3158_v45  ;;  %v3216_v26 = vmax.f32 %v2993_v56, %v3160_v48  ;;  %v10578_v11 = vpop.f32.mrb[93].mxu0  ;;  %v10608_v58 = vpop.f32.mrb[94].mxu1 }
 0x4f3   : > { %v10567_v30 = vsel %vm4715_vm4, %v4795_v61, %v12151_v55  ;;  %v10570_v9 = vmul.f32 %v12516_v21, %v3211_v43  ;;  %v10573_v20 = vmul.f32 %v12517_v46, %v3211_v43  ;;  %v10576_v37 = vmul.f32 %v12519_v22, %v3211_v43  ;;  %v12522_v61 = vld [vmem:[#allocation38_spill] sm:$0xff]  ;;  %v10606_v23 = vpop.f32.mrb[94].mxu0  ;;  %v10624_v62 = vpop.f32.mrb[95].mxu1 }
 0x4f4   : > { %12515 = vst [vmem:[#allocation153_spill] sm:$0xff] %v10567_v30  ;;  %v10584_v59 = vmul.f32 %v12521_v10, %v10560_v27  ;;  %v10588_v33 = vmul.f32 %v12522_v61, %v10560_v27  ;;  %v10591_v8 = vmul.f32 %v12516_v21, %v3213_v44  ;;  %v10594_v35 = vmul.f32 %v12517_v46, %v3213_v44  ;;  %v10622_v30 = vpop.f32.mrb[95].mxu0  ;;  %v3176_v3 = vpop.f32.mrb[96].mxu1 }
 0x4f5   : > { %12518 = vst [vmem:[#allocation31_spill] sm:$0xff] %v10573_v20  ;;  %12520 = vst [vmem:[#allocation35_spill] sm:$0xff] %v10576_v37  ;;  %v10600_v43 = vmul.f32 %v12519_v22, %v3213_v44  ;;  %v10613_v45 = vmul.f32 %v12521_v10, %v10562_v52  ;;  %v10617_v44 = vmul.f32 %v12522_v61, %v10562_v52 }
 0x4f6   : > { %12523 = vst [vmem:[#allocation36_spill] sm:$0xff] %v10594_v35  ;;  %3250 = vst [vmem:[#allocation2 + $0x228] sm:$0xff] %v3216_v26  ;;  %v10620_v56 = vmul.f32 %v12516_v21, %v3215_v29  ;;  %v4318_v55 = vld [vmem:[#allocation2 + $0x190] sm:$0x3]  ;;  %v12526_v48 = vrot.slane %v10591_v8, 4  ;;  %v10634_v20 = vmul.f32 %v12517_v46, %v3215_v29  ;;  %v10637_v15 = vmul.f32 %v12519_v22, %v3215_v29 }
 0x4f7   : > { %12524 = vst [vmem:[#allocation37_spill] sm:$0xff] %v10600_v43  ;;  %12525 = vst [vmem:[#allocation38_spill] sm:$0xff] %v10617_v44  ;;  %v4538_v25 = vld [vmem:[#allocation2 + $0x190] sm:$0x7]  ;;  %v12527_v43 = vrot.slane %v10570_v9, 4  ;;  %v10640_v7 = vmul.f32 %v12521_v10, %v3216_v26  ;;  %v4341_v2 = vmul.f32 %v12479_v38, %v4318_v55 }
 0x4f8   : > { %v4752_v37 = vld [vmem:[#allocation2 + $0x190] sm:$0xf]  ;;  %12529 = vst [vmem:[#allocation155_spill] sm:$0xff] %v10634_v20  ;;  %12530 = vst [vmem:[#allocation156_spill] sm:$0xff] %v10637_v15  ;;  %v4561_v24 = vmul.f32 %v12480_v13, %v4538_v25  ;;  %v4969_v0 = vld [vmem:[#allocation2 + $0x190] sm:$0xf0]  ;;  %v3217_v13 = vmax.f32 %v2997_v28, %v3164_v16 }
 0x4f9   : > { %v10631_v35 = vsel %vm4715_vm4, %v12527_v43, %v12526_v48  ;;  %v4775_v39 = vmul.f32 %v12481_v60, %v4752_v37  ;;  %v5195_v63 = vld [vmem:[#allocation2 + $0x190] sm:$0xe0]  ;;  %v10646_v48 = vmul.f32 %v12522_v61, %v3216_v26  ;;  %v4992_v43 = vmul.f32 %v12516_v21, %v4969_v0  ;;  %v4319_v47 = vld [vmem:[#allocation2 + $0x198] sm:$0x3]  ;;  %v4970_v4 = vld [vmem:[#allocation2 + $0x198] sm:$0xf0] }
 0x4fa   : > { %12528 = vst [vmem:[#allocation154_spill] sm:$0xff] %v10631_v35  ;;  %v5409_v14 = vld [vmem:[#allocation2 + $0x190] sm:$0xc0]  ;;  %v10650_v29 = vmul.f32 %v12517_v46, %v5195_v63  ;;  %v4539_v38 = vld [vmem:[#allocation2 + $0x198] sm:$0x7]  ;;  %v4367_v25 = vrot.slane %v4341_v2, 2  ;;  %v4342_v51 = vmul.f32 %v12482_v34, %v4319_v47 }
 0x4fb   : > { %12531 = vst [vmem:[#allocation157_spill] sm:$0xff] %v10646_v48  ;;  %v10653_v35 = vmul.f32 %v12519_v22, %v5409_v14  ;;  %v4753_v55 = vld [vmem:[#allocation2 + $0x198] sm:$0xf]  ;;  %v4587_v60 = vrot.slane %v4561_v24, 3  ;;  %v4801_v37 = vrot.slane %v4775_v39, 4  ;;  %v10656_v26 = vpop.f32.mrb[96].mxu0  ;;  %v4562_v14 = vmul.f32 %v12483_v31, %v4539_v38 }
 0x4fc   : > { %12532 = vst [vmem:[#allocation158_spill] sm:$0xff] %v10650_v29  ;;  %v5012_v53 = vrot.slane %v4992_v43, 4  ;;  %v5196_v36 = vld [vmem:[#allocation2 + $0x198] sm:$0xe0]  ;;  %3251 = vst [vmem:[#allocation2 + $0x250] sm:$0xff] %v3217_v13  ;;  %v12534_v28 = vrot.slane %v10497_v18, 2  ;;  %v4776_v18 = vmul.f32 %v12487_v54, %v4753_v55 }
 0x4fd   : > { %12533 = vst [vmem:[#allocation159_spill] sm:$0xff] %v10653_v35  ;;  %v12535_v47 = vrot.slane %v10500_v50, 3  ;;  %v12537_v39 = vrot.slane %v10503_v6, 4  ;;  %v4369_v16 = vrot.slane %v4342_v51, 2  ;;  %v5410_v31 = vld [vmem:[#allocation2 + $0x198] sm:$0xc0] }
 0x4fe   : > { %v10664_v24 = vsel %vm4056_vm1, %v12534_v28, %v4367_v25  ;;  %v3011_v43 = vpop.f32.mrb[97].mxu0  ;;  %v3178_v38 = vpop.f32.mrb[97].mxu1  ;;  %v4589_v13 = vrot.slane %v4562_v14, 3  ;;  %v4993_v25 = vmul.f32 %v12521_v10, %v4970_v4  ;;  %v10679_v28 = vmul.f32 %v12522_v61, %v5196_v36  ;;  %v12588_v48 = vld [vmem:[#allocation50_spill] sm:$0xff] }
 0x4ff   : > { %v10669_v34 = vsel %vm4501_vm3, %v12535_v47, %v4587_v60  ;;  %v10674_v2 = vsel %vm4715_vm4, %v12537_v39, %v4801_v37  ;;  %v3015_v50 = vpop.f32.mrb[98].mxu0  ;;  %v3182_v60 = vpop.f32.mrb[98].mxu1  ;;  %v12539_v47 = vrot.slane %v10506_v42, 2  ;;  %v12540_v37 = vld [vmem:[#allocation39_spill] sm:$0xff]  ;;  %v12542_v39 = vrot.slane %v10570_v9, 4 }
 0x500   : > { %12536 = vst [vmem:[#allocation160_spill] sm:$0xff] %v10669_v34  ;;  %12538 = vst [vmem:[#allocation161_spill] sm:$0xff] %v10674_v2  ;;  %v10687_v51 = vmul.f32 %v12540_v37, %v5410_v31  ;;  %v5020_v4 = vrot.slane %v10613_v45, 4  ;;  %v3017_v54 = vpop.f32.mrb[99].mxu0  ;;  %v3184_v36 = vpop.f32.mrb[99].mxu1  ;;  %v12543_v55 = vrot.slane %v10520_v1, 3 }
 0x501   : > { %v10684_v6 = vsel %vm4056_vm1, %v12539_v47, %v4369_v16  ;;  %v10692_v14 = vsel %vm4715_vm4, %v5012_v53, %v12542_v39  ;;  %v4803_v42 = vrot.slane %v4776_v18, 4  ;;  %v5015_v16 = vrot.slane %v4993_v25, 4  ;;  %v3188_v0 = vpop.f32.mrb[100].mxu1  ;;  %v12635_v2 = vld [vmem:[#allocation73_spill] sm:$0xff] }
 0x502   : > { %12541 = vst [vmem:[#allocation162_spill] sm:$0xff] %v10687_v51  ;;  %v10698_v63 = vsel %vm4501_vm3, %v12543_v55, %v4589_v13  ;;  %v5235_v47 = vrot.slane %v10679_v28, 5  ;;  %v12545_v31 = vrot.slane %v10584_v59, 4  ;;  %v5022_v45 = vrot.slane %v10620_v56, 4  ;;  %v3190_v15 = vpop.f32.mrb[101].mxu1 }
 0x503   : > { %12544 = vst [vmem:[#allocation163_spill] sm:$0xff] %v10698_v63  ;;  %v12547_v1 = vrot.slane %v10528_v41, 4  ;;  %v12162_v55 = vrot.slane %v10640_v7, 4  ;;  %v12551_v56 = vrot.slane %v10591_v8, 4  ;;  %v3218_v59 = vmax.f32 %v10578_v11, %v10580_v32  ;;  %v5411_v41 = vld [vmem:[#allocation2 + $0x250] sm:$0x3f] }
 0x504   : > { %v10704_v9 = vsel %vm4715_vm4, %v12545_v31, %v5020_v4  ;;  %v12549_v18 = vmov %v12545_v31  ;;  %v3021_v31 = vpop.f32.mrb[100].mxu0  ;;  %v3220_v53 = vmax.f32 %v10622_v30, %v10624_v62  ;;  %v5485_v11 = vld [vmem:[#allocation8 + $0x32] ss:$8 sm:$0x3]  ;;  %v10743_v32 = vmul.f32 %v12519_v22, %v5411_v41  ;;  %v3526_v20 = vpop.f32.mrb[102].mxu1  ;;  %v12580_v62 = vld [vmem:[#allocation126_spill] sm:$0xff] }
 0x505   : > { %12546 = vst [vmem:[#allocation164_spill] sm:$0xff] %v10704_v9  ;;  %v10712_v13 = vsel %vm4715_vm4, %v12547_v1, %v4803_v42  ;;  %v10717_v25 = vsel %vm4715_vm4, %v5015_v16, %v12549_v18  ;;  %v10724_v39 = vsel %vm4715_vm4, %v12551_v56, %v5022_v45  ;;  %v4977_v42 = vld [vmem:[#allocation2 + $0x250] sm:$0xf]  ;;  %v3219_v16 = vmax.f32 %v10606_v23, %v10608_v58  ;;  %v3023_v18 = vpop.f32.mrb[101].mxu0 }
 0x506   : > { %12548 = vst [vmem:[#allocation165_spill] sm:$0xff] %v10712_v13  ;;  %12550 = vst [vmem:[#allocation166_spill] sm:$0xff] %v10717_v25  ;;  %v5197_v1 = vld [vmem:[#allocation2 + $0x250] sm:$0x1f]  ;;  %v10734_v28 = vsel %vm4715_vm4, %v5020_v4, %v12162_v55  ;;  %v5000_v8 = vmul.f32 %v12516_v21, %v4977_v42  ;;  %v3221_v58 = vmax.f32 %v10656_v26, %v3176_v3  ;;  %v12619_v25 = vld [vmem:[#allocation30_spill] sm:$0xff] }
 0x507   : > { %12552 = vst [vmem:[#allocation167_spill] sm:$0xff] %v10724_v39  ;;  %12553 = vst [vmem:[#allocation168_spill] sm:$0xff] %v10734_v28  ;;  %v10738_v56 = vmul.f32 %v12517_v46, %v5197_v1  ;;  %v3222_v23 = vmax.f32 %v3011_v43, %v3178_v38  ;;  %v3223_v4 = vmax.f32 %v3015_v50, %v3182_v60  ;;  %v3359_v1 = vpop.f32.mrb[102].mxu0  ;;  %v12561_v60 = vrot.slane %v10588_v33, 5  ;;  %v12581_v33 = vld [vmem:[#allocation123_spill] sm:$0xff] }
 0x508   : > { %12555 = vst [vmem:[#allocation170_spill] sm:$0xff] %v10743_v32  ;;  %3252 = vst [vmem:[#allocation2 + $0x258] sm:$0xff] %v3218_v59  ;;  %v5026_v55 = vrot.slane %v5000_v8, 4  ;;  %v3224_v46 = vmax.f32 %v3017_v54, %v3184_v36  ;;  %v3225_v42 = vmax.f32 %v3021_v31, %v3188_v0  ;;  %v3226_v30 = vmax.f32 %v3023_v18, %v3190_v15  ;;  %v3361_v41 = vpop.f32.mrb[103].mxu0  ;;  %v3528_v59 = vpop.f32.mrb[103].mxu1  ;;  %v12567_v31 = vld [vmem:[#allocation55_spill] sm:$0xff] }
 0x509   : > { %12554 = vst [vmem:[#allocation169_spill] sm:$0xff] %v10738_v56  ;;  %3253 = vst [vmem:[#allocation2 + $0x280] sm:$0xff] %v3219_v16  ;;  %v3627_v22 = vmax.f32 %v3359_v1, %v3526_v20  ;;  %v10749_v3 = vrot.slane %v5485_v11, %v9517_v19  ;;  %v3628_v0 = vmax.f32 %v3361_v41, %v3528_v59  ;;  %v5552_v15 = vld [vmem:[#allocation2 + $0x248] sm:$0xc0]  ;;  %v12560_v20 = vld [vmem:[#allocation54_spill] sm:$0xff]  ;;  %v12563_v36 = vrot.slane %v10617_v44, 5 }
 0x50a   : > { %3254 = vst [vmem:[#allocation2 + $0x288] sm:$0xff] %v3220_v53  ;;  %3255 = vst [vmem:[#allocation2 + $0x2b0] sm:$0xff] %v3221_v58  ;;  %v10752_v26 = vsel %vm4715_vm4, %v5022_v45, %v5026_v55  ;;  %v10756_v43 = vrot.slane %v10357_v57, %v9519_v12  ;;  %v10760_v38 = vrot.slane %v10359_v17, %v9519_v12  ;;  %v12564_v53 = vmov %v12561_v60  ;;  %v5554_v45 = vld [vmem:[#allocation2 + $0x278] sm:$0xff]  ;;  %v5556_v55 = vld [vmem:[#allocation2 + $0x2a8] sm:$0xff]  ;;  %v3365_v18 = vpop.f32.mrb[104].mxu0  ;;  %v3532_v8 = vpop.f32.mrb[104].mxu1 }
 0x50b   : > { %3256 = vst [vmem:[#allocation2 + $0x2b8] sm:$0xff] %v3222_v23  ;;  %3257 = vst [vmem:[#allocation2 + $0x2e0] sm:$0xff] %v3223_v4  ;;  %v3789_v50 = vmul.f32 %v12560_v20, %v3627_v22  ;;  %v10766_v54 = vsel %vm5160_vm5, %v5235_v47, %v12561_v60  ;;  %v10773_v57 = vsel %vm5160_vm5, %v12564_v53, %v12563_v36  ;;  %v3367_v4 = vpop.f32.mrb[105].mxu0  ;;  %v12575_v60 = vld [vmem:[#allocation49_spill] sm:$0xff]  ;;  %v12576_v53 = vld [vmem:[#allocation56_spill] sm:$0xff] }
 0x50c   : > { %12556 = vst [vmem:[#allocation171_spill] sm:$0xff] %v10749_v3  ;;  %12557 = vst [vmem:[#allocation172_spill] sm:$0xff] %v10752_v26  ;;  %v10777_v17 = vmul.f32 %v12540_v37, %v10560_v27  ;;  %v3790_v16 = vmul.f32 %v12567_v31, %v3628_v0  ;;  %v10782_v47 = vmul.f32 %v12540_v37, %v10562_v52 }
 0x50d   : > { %3258 = vst [vmem:[#allocation2 + $0x2e8] sm:$0xff] %v3224_v46  ;;  %3259 = vst [vmem:[#allocation2 + $0x310] sm:$0xff] %v3225_v42  ;;  %v10786_v58 = vrot.slane %v5485_v11, %v9519_v12  ;;  %v3797_v23 = vadd.f32 %v3789_v50, %v10242_v40  ;;  %v3629_v27 = vmax.f32 %v3365_v18, %v3532_v8  ;;  %v3534_v46 = vpop.f32.mrb[105].mxu1  ;;  %v12578_v8 = vld [vmem:[#allocation58_spill] sm:$0xff] }
 0x50e   : > { %12558 = vst [vmem:[#allocation173_spill] sm:$0xff] %v10756_v43  ;;  %12559 = vst [vmem:[#allocation174_spill] sm:$0xff] %v10760_v38  ;;  %v10791_v1 = vmul.f32 %v10248_v5, %v5552_v15  ;;  %v3798_v52 = vadd.f32 %v3790_v16, %v10256_v49  ;;  %v3630_v59 = vmax.f32 %v3367_v4, %v3534_v46  ;;  %v12577_v16 = vld [vmem:[#allocation57_spill] sm:$0xff]  ;;  %v3371_v4 = vpop.f32.mrb[106].mxu0 }
 0x50f   : > { %3260 = vst [vmem:[#allocation2 + $0x318] sm:$0xff] %v3226_v30  ;;  %3661 = vst [vmem:[#allocation2 + $0x20] sm:$0xff] %v3627_v22  ;;  %v4978_v30 = vld [vmem:[#allocation2 + $0x258] sm:$0xf]  ;;  %v10798_v11 = vmul.f32 %v10248_v5, %v5556_v55  ;;  %v3869_v36 = vadd.f32 %v12575_v60, %v3797_v23  ;;  %v3791_v49 = vmul.f32 %v12560_v20, %v3629_v27  ;;  %v3373_v23 = vpop.f32.mrb[107].mxu0 }
 0x510   : > { %12562 = vst [vmem:[#allocation54_spill] sm:$0xff] %v10766_v54  ;;  %12565 = vst [vmem:[#allocation175_spill] sm:$0xff] %v10773_v57  ;;  %v5198_v22 = vld [vmem:[#allocation2 + $0x258] sm:$0x1f]  ;;  %v5001_v40 = vmul.f32 %v12521_v10, %v4978_v30  ;;  %v3870_v18 = vadd.f32 %v12576_v53, %v3798_v52  ;;  %v10814_v55 = vmul.f32 %v12578_v8, %v3629_v27  ;;  %v3538_v10 = vpop.f32.mrb[106].mxu1  ;;  %v12579_v30 = vld [vmem:[#allocation24_spill] sm:$0xff] }
 0x511   : > { %12566 = vst [vmem:[#allocation176_spill] sm:$0xff] %v10777_v17  ;;  %3662 = vst [vmem:[#allocation2 + $0x28] sm:$0xff] %v3628_v0  ;;  %v5412_v41 = vld [vmem:[#allocation2 + $0x258] sm:$0x3f]  ;;  %v10795_v0 = vmul.f32 %v10248_v5, %v5554_v45  ;;  %v10802_v50 = vmul.f32 %v12522_v61, %v5198_v22  ;;  %v10811_v45 = vmul.f32 %v12577_v16, %v3629_v27  ;;  %v3540_v60 = vpop.f32.mrb[107].mxu1  ;;  %v12587_v27 = vld [vmem:[#allocation47_spill] sm:$0xff] }
 0x512   : > { %12568 = vst [vmem:[#allocation55_spill] sm:$0xff] %v10782_v47  ;;  %12569 = vst [vmem:[#allocation177_spill] sm:$0xff] %v10786_v58  ;;  %v10805_v15 = vmul.f32 %v12540_v37, %v5412_v41  ;;  %v5028_v46 = vrot.slane %v5001_v40, 4  ;;  %v3940_v22 = vadd.f32 %v12579_v30, %v3869_v36  ;;  %v3792_v41 = vmul.f32 %v12567_v31, %v3630_v59  ;;  %v3544_v44 = vpop.f32.mrb[108].mxu1  ;;  %v12603_v57 = vld [vmem:[#allocation65_spill] sm:$0xff]  ;;  %v12604_v58 = vld [vmem:[#allocation132_spill] sm:$0xff] }
 0x513   : > { %12570 = vst [vmem:[#allocation178_spill] sm:$0xff] %v10791_v1  ;;  %12571 = vst [vmem:[#allocation179_spill] sm:$0xff] %v10795_v0  ;;  %v3941_v21 = vadd.f32 %v12580_v62, %v3870_v18  ;;  %v3799_v42 = vadd.f32 %v3791_v49, %v12581_v33  ;;  %v12582_v40 = vrot.slane %v10640_v7, 4  ;;  %v12585_v62 = vld [vmem:[#allocation59_spill] sm:$0xff]  ;;  %v12586_v33 = vld [vmem:[#allocation61_spill] sm:$0xff]  ;;  %v3377_v7 = vpop.f32.mrb[108].mxu0  ;;  %v3631_v19 = vmax.f32 %v3371_v4, %v3538_v10 }
 0x514   : > { %12572 = vst [vmem:[#allocation180_spill] sm:$0xff] %v10798_v11  ;;  %12573 = vst [vmem:[#allocation181_spill] sm:$0xff] %v10802_v50  ;;  %v3968_v32 = vmul.f32 %v12585_v62, %v3630_v59  ;;  %v3379_v28 = vpop.f32.mrb[109].mxu0  ;;  %v12594_v10 = vld [vmem:[#allocation46_spill] sm:$0xff] }
 0x515   : > { %12574 = vst [vmem:[#allocation182_spill] sm:$0xff] %v10805_v15  ;;  %v10826_v61 = vsel %vm4715_vm4, %v12582_v40, %v5028_v46  ;;  %v12584_v15 = vld [vmem:[#allocation40_spill] sm:$0xff]  ;;  %v3871_v50 = vadd.f32 %v12587_v27, %v3799_v42  ;;  %v12591_v27 = vrot.slane %v10814_v55, 2  ;;  %v4183_v4 = vmul.f32 %v12578_v8, %v3631_v19 }
 0x516   : > { %v3948_v52 = vld [vmem:[#allocation2 + $0x20] sm:$0xfe]  ;;  %12583 = vst [vmem:[#allocation49_spill] sm:$0xff] %v10826_v61  ;;  %v3800_v37 = vadd.f32 %v3792_v41, %v12584_v15  ;;  %v3546_v61 = vpop.f32.mrb[109].mxu1  ;;  %v12589_v41 = vld [vmem:[#allocation128_spill] sm:$0xff]  ;;  %v3989_v29 = vrot.slane %v3968_v32, 1 }
 0x517   : > { %v4162_v53 = vld [vmem:[#allocation2 + $0x20] sm:$0xfc]  ;;  %v3965_v36 = vmul.f32 %v12577_v16, %v3948_v52 }
 0x518   : > { %v4179_v30 = vmul.f32 %v12578_v8, %v4162_v53  ;;  %v3949_v56 = vld [vmem:[#allocation2 + $0x28] sm:$0xfe]  ;;  %v3872_v52 = vadd.f32 %v12588_v48, %v3800_v37  ;;  %v4182_v53 = vmul.f32 %v12586_v33, %v3630_v59 }
 0x519   : > { %v4163_v5 = vld [vmem:[#allocation2 + $0x28] sm:$0xfc]  ;;  %v3966_v18 = vmul.f32 %v12585_v62, %v3949_v56  ;;  %v3985_v46 = vrot.slane %v3965_v36, 1  ;;  %v3942_v56 = vadd.f32 %v12589_v41, %v3871_v50  ;;  %v10848_v50 = vpop.f32.mrb[110].mxu1 }
 0x51a   : > { %v4180_v49 = vmul.f32 %v12586_v33, %v4163_v5  ;;  %v4199_v40 = vrot.slane %v4179_v30, 2  ;;  %v12590_v5 = vrot.slane %v10811_v45, 1  ;;  %v12592_v30 = vld [vmem:[#allocation130_spill] sm:$0xff]  ;;  %v4203_v48 = vrot.slane %v4182_v53, 2 }
 0x51b   : > { %v3988_v35 = vrot.slane %v3966_v18, 1  ;;  %v3943_v12 = vadd.f32 %v12592_v30, %v3872_v52  ;;  %v3632_v18 = vmax.f32 %v3373_v23, %v3540_v60  ;;  %v12593_v52 = vld [vmem:[#allocation45_spill] sm:$0xff] }
 0x51c   : > { %v4202_v15 = vrot.slane %v4180_v49, 2  ;;  %v3987_v42 = vsel %vm3842_vm2, %v3985_v46, %v12590_v5  ;;  %v4201_v36 = vsel %vm4056_vm1, %v4199_v40, %v12591_v27  ;;  %v10846_v49 = vpop.f32.mrb[110].mxu0  ;;  %v3633_v46 = vmax.f32 %v3377_v7, %v3544_v44  ;;  %v10853_v40 = vpop.f32.mrb[111].mxu1  ;;  %v12596_v7 = vld [vmem:[#allocation41_spill] sm:$0xff] }
 0x51d   : > { %v4011_v37 = vadd.f32 %v3987_v42, %v3940_v22  ;;  %v3990_v59 = vsel %vm3842_vm2, %v3988_v35, %v3989_v29  ;;  %v3634_v5 = vmax.f32 %v3379_v28, %v3546_v61  ;;  %v10851_v11 = vpop.f32.mrb[111].mxu0  ;;  %v3793_v22 = vmul.f32 %v12560_v20, %v3631_v19  ;;  %v12595_v28 = vld [vmem:[#allocation27_spill] sm:$0xff] }
 0x51e   : > { %v4012_v32 = vadd.f32 %v3990_v59, %v3941_v21  ;;  %v4204_v41 = vsel %vm4056_vm1, %v4202_v15, %v4203_v48  ;;  %v3969_v35 = vmul.f32 %v12577_v16, %v3631_v19  ;;  %v3794_v21 = vmul.f32 %v12567_v31, %v3632_v18  ;;  %v10869_v30 = vpop.f32.mrb[112].mxu0  ;;  %v12597_v19 = vld [vmem:[#allocation127_spill] sm:$0xff] }
 0x51f   : > { %v4083_v53 = vadd.f32 %v12593_v52, %v4011_v37  ;;  %v10862_v60 = vmul.f32 %v12585_v62, %v3632_v18  ;;  %v10865_v44 = vmul.f32 %v12586_v33, %v3632_v18  ;;  %v3801_v15 = vadd.f32 %v3793_v22, %v12596_v7  ;;  %v10871_v37 = vpop.f32.mrb[112].mxu1  ;;  %v10877_v18 = vpop.f32.mrb[113].mxu0  ;;  %v12599_v22 = vld [vmem:[#allocation60_spill] sm:$0xff] }
 0x520   : > { %v4084_v23 = vadd.f32 %v12594_v10, %v4012_v32  ;;  %v3991_v42 = vrot.slane %v3969_v35, 1  ;;  %v4205_v27 = vrot.slane %v4183_v4, 2  ;;  %v12598_v32 = vld [vmem:[#allocation43_spill] sm:$0xff]  ;;  %v10879_v1 = vpop.f32.mrb[113].mxu1  ;;  %v12600_v4 = vrot.slane %v10811_v45, 1  ;;  %v10893_v45 = vpop.f32.mrb[114].mxu0 }
 0x521   : > { %v4154_v61 = vadd.f32 %v12595_v28, %v4083_v53  ;;  %v3802_v52 = vadd.f32 %v3794_v21, %v12598_v32  ;;  %v3993_v10 = vrot.slane %v10862_v60, 1  ;;  %v4207_v0 = vrot.slane %v10865_v44, 2  ;;  %v12602_v60 = vld [vmem:[#allocation79_spill] sm:$0xff] }
 0x522   : > { %v4155_v59 = vadd.f32 %v12597_v19, %v4084_v23  ;;  %v3873_v35 = vadd.f32 %v12599_v22, %v3801_v15  ;;  %v3992_v28 = vsel %vm3842_vm2, %v12600_v4, %v3991_v42  ;;  %v12601_v7 = vrot.slane %v10814_v55, 2  ;;  %v10895_v22 = vpop.f32.mrb[114].mxu1  ;;  %v12605_v55 = vld [vmem:[#allocation82_spill] sm:$0xff] }
 0x523   : > { %v4225_v53 = vadd.f32 %v4201_v36, %v4154_v61  ;;  %v4013_v19 = vadd.f32 %v3992_v28, %v3942_v56  ;;  %v3874_v32 = vadd.f32 %v12602_v60, %v3802_v52  ;;  %v3994_v44 = vsel %vm3842_vm2, %v3989_v29, %v3993_v10  ;;  %v12607_v56 = vld [vmem:[#allocation134_spill] sm:$0xff]  ;;  %v10901_v29 = vpop.f32.mrb[115].mxu0  ;;  %v12609_v28 = vld [vmem:[#allocation129_spill] sm:$0xff] }
 0x524   : > { %v4206_v23 = vsel %vm4056_vm1, %v12601_v7, %v4205_v27  ;;  %v4226_v21 = vadd.f32 %v4204_v41, %v4155_v59  ;;  %v3944_v36 = vadd.f32 %v12604_v58, %v3873_v35  ;;  %v4014_v61 = vadd.f32 %v3994_v44, %v3943_v12  ;;  %v12606_v7 = vld [vmem:[#allocation42_spill] sm:$0xff]  ;;  %v12608_v58 = vld [vmem:[#allocation44_spill] sm:$0xff]  ;;  %v12611_v44 = vld [vmem:[#allocation131_spill] sm:$0xff] }
 0x525   : > { %v4302_v54 = vadd.f32 %v12603_v57, %v4225_v53  ;;  %v4208_v15 = vsel %vm4056_vm1, %v4203_v48, %v4207_v0  ;;  %v4085_v41 = vadd.f32 %v12606_v7, %v4013_v19  ;;  %v3945_v59 = vadd.f32 %v12607_v56, %v3874_v32  ;;  %v10903_v57 = vpop.f32.mrb[115].mxu1  ;;  %v12610_v19 = vld [vmem:[#allocation51_spill] sm:$0xff] }
 0x526   : > { %v4303_v4 = vadd.f32 %v12605_v55, %v4226_v21  ;;  %v3795_v52 = vmul.f32 %v12560_v20, %v3633_v46  ;;  %v4086_v12 = vadd.f32 %v12608_v58, %v4014_v61  ;;  %v10907_v48 = vmul.f32 %v12577_v16, %v3633_v46  ;;  %v3401_v58 = vpop.f32.mrb[116].mxu0 }
 0x527   : > { %v10910_v53 = vmul.f32 %v12578_v8, %v3633_v46  ;;  %v3796_v35 = vmul.f32 %v12567_v31, %v3634_v5  ;;  %v4156_v21 = vadd.f32 %v12609_v28, %v4085_v41  ;;  %v10916_v20 = vmul.f32 %v12585_v62, %v3634_v5  ;;  %v12612_v46 = vld [vmem:[#allocation52_spill] sm:$0xff]  ;;  %v3568_v31 = vpop.f32.mrb[116].mxu1  ;;  %v12613_v41 = vld [vmem:[#allocation62_spill] sm:$0xff]  ;;  %v3403_v51 = vpop.f32.mrb[117].mxu0 }
 0x528   : > { %v3803_v60 = vadd.f32 %v3795_v52, %v12610_v19  ;;  %v10919_v32 = vmul.f32 %v12586_v33, %v3634_v5  ;;  %v4157_v61 = vadd.f32 %v12611_v44, %v4086_v12  ;;  %v12186_v55 = vrot.slane %v10907_v48, 1  ;;  %v3570_v5 = vpop.f32.mrb[117].mxu1  ;;  %v12614_v44 = vld [vmem:[#allocation64_spill] sm:$0xff] }
 0x529   : > { %v12187_v7 = vrot.slane %v10910_v53, 2  ;;  %v3804_v56 = vadd.f32 %v3796_v35, %v12612_v46  ;;  %v4227_v47 = vadd.f32 %v4206_v23, %v4156_v21  ;;  %v12615_v23 = vld [vmem:[#allocation67_spill] sm:$0xff]  ;;  %v12617_v19 = vrot.slane %v10916_v20, 1 }
 0x52a   : > { %v3875_v28 = vadd.f32 %v12613_v41, %v3803_v60  ;;  %v4228_v17 = vadd.f32 %v4208_v15, %v4157_v61  ;;  %v3996_v12 = vsel %vm3842_vm2, %v3991_v42, %v12186_v55  ;;  %v12616_v60 = vld [vmem:[#allocation33_spill] sm:$0xff]  ;;  %v12618_v61 = vld [vmem:[#allocation70_spill] sm:$0xff]  ;;  %v11021_v26 = vmax.f32 %v3403_v51, %v3570_v5 }
 0x52b   : > { %v4210_v35 = vsel %vm4056_vm1, %v4205_v27, %v12187_v7  ;;  %v3876_v46 = vadd.f32 %v12614_v44, %v3804_v56  ;;  %v4304_v21 = vadd.f32 %v12615_v23, %v4227_v47  ;;  %v4015_v52 = vadd.f32 %v3996_v12, %v3944_v36  ;;  %v10949_v44 = vpop.f32.mrb[118].mxu0  ;;  %v10951_v47 = vpop.f32.mrb[118].mxu1 }
 0x52c   : > { %v10937_v41 = vadd.f32 %v12616_v60, %v3875_v28  ;;  %v3998_v15 = vsel %vm3842_vm2, %v3993_v10, %v12617_v19  ;;  %v4305_v9 = vadd.f32 %v12618_v61, %v4228_v17  ;;  %v12620_v27 = vrot.slane %v10919_v32, 2  ;;  %v12621_v28 = vld [vmem:[#allocation48_spill] sm:$0xff]  ;;  %v10960_v10 = vpop.f32.mrb[119].mxu0  ;;  %v12624_v60 = vld [vmem:[#allocation139_spill] sm:$0xff] }
 0x52d   : > { %v10944_v42 = vadd.f32 %v12619_v25, %v3876_v46  ;;  %v4016_v55 = vadd.f32 %v3998_v15, %v3945_v59  ;;  %v4087_v36 = vadd.f32 %v12621_v28, %v4015_v52  ;;  %v3635_v12 = vmax.f32 %v10846_v49, %v10848_v50  ;;  %v10962_v59 = vpop.f32.mrb[119].mxu1  ;;  %v12623_v46 = vld [vmem:[#allocation28_spill] sm:$0xff]  ;;  %v12625_v50 = vld [vmem:[#allocation133_spill] sm:$0xff] }
 0x52e   : > { %v4212_v56 = vsel %vm4056_vm1, %v4207_v0, %v12620_v27  ;;  %v3636_v17 = vmax.f32 %v10851_v11, %v10853_v40  ;;  %v3637_v25 = vmax.f32 %v10869_v30, %v10871_v37  ;;  %v12622_v0 = vld [vmem:[#allocation53_spill] sm:$0xff]  ;;  %v10966_v23 = vadd.f32 %v12623_v46, %v4302_v54  ;;  %v12626_v40 = vld [vmem:[#allocation108_spill] sm:$0xff] }
 0x52f   : > { %v4088_v19 = vadd.f32 %v12622_v0, %v4016_v55  ;;  %v3638_v52 = vmax.f32 %v10877_v18, %v10879_v1  ;;  %v10971_v49 = vadd.f32 %v12624_v60, %v4303_v4  ;;  %v4158_v11 = vadd.f32 %v12625_v50, %v4087_v36  ;;  %3669 = vst [vmem:[#allocation2 + $0xe0] sm:$0xff] %v3635_v12  ;;  %v12627_v37 = vld [vmem:[#allocation109_spill] sm:$0xff]  ;;  %v12628_v55 = vld [vmem:[#allocation112_spill] sm:$0xff]  ;;  %v12631_v18 = vld [vmem:[#allocation114_spill] sm:$0xff]  ;;  %v10995_v0 = vpop.f32.mrb[120].mxu1 }
 0x530   : > { %3670 = vst [vmem:[#allocation2 + $0xe8] sm:$0xff] %v3636_v17  ;;  %v10975_v30 = vmul.f32 %v12626_v40, %v3637_v25  ;;  %v10978_v15 = vmul.f32 %v12627_v37, %v3637_v25  ;;  %v10981_v61 = vmul.f32 %v12628_v55, %v3637_v25  ;;  %v12629_v54 = vld [vmem:[#allocation137_spill] sm:$0xff]  ;;  %v12632_v36 = vld [vmem:[#allocation115_spill] sm:$0xff]  ;;  %v10993_v17 = vpop.f32.mrb[120].mxu0  ;;  %v12637_v60 = vld [vmem:[#allocation76_spill] sm:$0xff] }
 0x531   : > { %v4159_v27 = vadd.f32 %v12629_v54, %v4088_v19  ;;  %v12630_v28 = vld [vmem:[#allocation113_spill] sm:$0xff]  ;;  %v10988_v4 = vmul.f32 %v12631_v18, %v3638_v52  ;;  %v10991_v12 = vmul.f32 %v12632_v36, %v3638_v52  ;;  %v4229_v46 = vadd.f32 %v4210_v35, %v4158_v11  ;;  %v11000_v50 = vpop.f32.mrb[121].mxu0  ;;  %v11002_v54 = vpop.f32.mrb[121].mxu1  ;;  %v12636_v11 = vld [vmem:[#allocation142_spill] sm:$0xff] }
 0x532   : > { %v10985_v1 = vmul.f32 %v12630_v28, %v3638_v52  ;;  %12633 = vst [vmem:[#allocation56_spill] sm:$0xff] %v11000_v50  ;;  %12634 = vst [vmem:[#allocation57_spill] sm:$0xff] %v11002_v54  ;;  %v3639_v35 = vmax.f32 %v10893_v45, %v10895_v22  ;;  %v11011_v25 = vadd.f32 %v12636_v11, %v4304_v21  ;;  %v11023_v13 = vpop.f32.mrb[122].mxu0 }
 0x533   : > { %v4230_v7 = vadd.f32 %v4212_v56, %v4159_v27  ;;  %v4306_v63 = vadd.f32 %v12635_v2, %v4229_v46  ;;  %v3640_v19 = vmax.f32 %v10901_v29, %v10903_v57  ;;  %v12638_v56 = vld [vmem:[#allocation145_spill] sm:$0xff]  ;;  %v3641_v52 = vmax.f32 %v3401_v58, %v3568_v31  ;;  %12639 = vst [vmem:[#allocation58_spill] sm:$0xff] %v11023_v13  ;;  %v11025_v2 = vpop.f32.mrb[122].mxu1  ;;  %v12643_v46 = vld [vmem:[#allocation148_spill] sm:$0xff] }
 0x534   : > { %v11019_v27 = vadd.f32 %v12638_v56, %v4305_v9  ;;  %12640 = vst [vmem:[#allocation24_spill] sm:$0xff] %v11025_v2  ;;  %v11028_v45 = vmul.f32 %v12626_v40, %v3639_v35  ;;  %v11031_v22 = vmul.f32 %v12627_v37, %v3639_v35  ;;  %v11034_v29 = vmul.f32 %v12628_v55, %v3639_v35  ;;  %v11039_v9 = vpop.f32.mrb[123].mxu0  ;;  %v11041_v51 = vpop.f32.mrb[123].mxu1 }
 0x535   : > { %v11016_v39 = vadd.f32 %v12637_v60, %v4230_v7  ;;  %v11037_v57 = vmul.f32 %v12630_v28, %v3640_v19  ;;  %12641 = vst [vmem:[#allocation126_spill] sm:$0xff] %v11039_v9  ;;  %12642 = vst [vmem:[#allocation123_spill] sm:$0xff] %v11041_v51  ;;  %v11044_v5 = vmul.f32 %v12631_v18, %v3640_v19  ;;  %v11068_v54 = vpop.f32.mrb[124].mxu0 }
 0x536   : > { %v3950_v7 = vld [vmem:[#allocation2 + $0xe0] sm:$0x1]  ;;  %v4387_v31 = vld [vmem:[#allocation2 + $0xe0] sm:$0xfc]  ;;  %v11047_v21 = vmul.f32 %v12632_v36, %v3640_v19  ;;  %v11050_v60 = vadd.f32 %v12643_v46, %v4306_v63  ;;  %v11053_v35 = vmul.f32 %v12626_v40, %v3641_v52  ;;  %v11059_v51 = vmul.f32 %v12627_v37, %v3641_v52  ;;  %12644 = vst [vmem:[#allocation40_spill] sm:$0xff] %v11068_v54 }
 0x537   : > { %v4164_v58 = vld [vmem:[#allocation2 + $0xe0] sm:$0x3]  ;;  %v3973_v11 = vmul.f32 %v12577_v16, %v3950_v7  ;;  %v4410_v34 = vmul.f32 %v12626_v40, %v4387_v31  ;;  %v4607_v38 = vld [vmem:[#allocation2 + $0xe0] sm:$0xf8]  ;;  %v3951_v9 = vld [vmem:[#allocation2 + $0xe8] sm:$0x1]  ;;  %v11065_v16 = vmul.f32 %v12628_v55, %v3641_v52 }
 0x538   : > { %v4187_v56 = vmul.f32 %v12578_v8, %v4164_v58  ;;  %v4821_v43 = vld [vmem:[#allocation2 + $0xe0] sm:$0xf0]  ;;  %v4624_v19 = vmul.f32 %v12627_v37, %v4607_v38  ;;  %v3974_v46 = vmul.f32 %v12585_v62, %v3951_v9  ;;  %v4165_v13 = vld [vmem:[#allocation2 + $0xe8] sm:$0x3]  ;;  %v4388_v2 = vld [vmem:[#allocation2 + $0xe8] sm:$0xfc] }
 0x539   : > { %v4838_v63 = vmul.f32 %v12628_v55, %v4821_v43  ;;  %v4608_v50 = vld [vmem:[#allocation2 + $0xe8] sm:$0xf8]  ;;  %v3999_v8 = vrot.slane %v3973_v11, 1  ;;  %v4430_v58 = vrot.slane %v4410_v34, 2  ;;  %v4188_v31 = vmul.f32 %v12586_v33, %v4165_v13  ;;  %v11071_v62 = vpop.f32.mrb[124].mxu1  ;;  %v11073_v9 = vpop.f32.mrb[125].mxu0 }
 0x53a   : > { %v4213_v7 = vrot.slane %v4187_v56, 2  ;;  %v4822_v40 = vld [vmem:[#allocation2 + $0xe8] sm:$0xf0]  ;;  %v4644_v3 = vrot.slane %v4624_v19, 3  ;;  %v4001_v37 = vrot.slane %v3974_v46, 1  ;;  %v4411_v43 = vmul.f32 %v12630_v28, %v4388_v2  ;;  %12645 = vst [vmem:[#allocation59_spill] sm:$0xff] %v11073_v9 }
 0x53b   : > { %v4858_v38 = vrot.slane %v4838_v63, 4  ;;  %v12646_v52 = vrot.slane %v10907_v48, 1  ;;  %v12647_v34 = vrot.slane %v10910_v53, 2  ;;  %v4215_v33 = vrot.slane %v4188_v31, 2  ;;  %v11082_v19 = vpop.f32.mrb[125].mxu1  ;;  %v11089_v54 = vpop.f32.mrb[126].mxu0 }
 0x53c   : > { %v4625_v56 = vmul.f32 %v12631_v18, %v4608_v50  ;;  %v12648_v2 = vrot.slane %v10916_v20, 1  ;;  %v4433_v9 = vrot.slane %v4411_v43, 2  ;;  %v4839_v48 = vmul.f32 %v12632_v36, %v4822_v40  ;;  %v12651_v40 = vld [vmem:[#allocation63_spill] sm:$0xff] }
 0x53d   : > { %v4000_v11 = vsel %vm3842_vm2, %v12646_v52, %v3999_v8  ;;  %v4214_v13 = vsel %vm4056_vm1, %v12647_v34, %v4213_v7  ;;  %v11091_v8 = vpop.f32.mrb[126].mxu1  ;;  %v12649_v7 = vrot.slane %v10919_v32, 2  ;;  %v11100_v52 = vpop.f32.mrb[127].mxu0 }
 0x53e   : > { %v4017_v63 = vadd.f32 %v4000_v11, %v10937_v41  ;;  %v4002_v46 = vsel %vm3842_vm2, %v12648_v2, %v4001_v37  ;;  %v4647_v31 = vrot.slane %v4625_v56, 3  ;;  %v12650_v41 = vrot.slane %v10975_v30, 2  ;;  %v11102_v37 = vpop.f32.mrb[127].mxu1  ;;  %v12653_v2 = vld [vmem:[#allocation66_spill] sm:$0xff] }
 0x53f   : > { %v4018_v53 = vadd.f32 %v4002_v46, %v10944_v42  ;;  %v4216_v50 = vsel %vm4056_vm1, %v12649_v7, %v4215_v33  ;;  %v4861_v11 = vrot.slane %v4839_v48, 4  ;;  %v12652_v42 = vrot.slane %v10978_v15, 3  ;;  %v12657_v48 = vld [vmem:[#allocation34_spill] sm:$0xff] }
 0x540   : > { %v4432_v20 = vsel %vm4056_vm1, %v4430_v58, %v12650_v41  ;;  %v4089_v43 = vadd.f32 %v12651_v40, %v4017_v63  ;;  %v12654_v56 = vrot.slane %v10981_v61, 4  ;;  %v12655_v58 = vrot.slane %v10985_v1, 2 }
 0x541   : > { %v4456_v34 = vadd.f32 %v4432_v20, %v10966_v23  ;;  %v4646_v32 = vsel %vm4501_vm3, %v4644_v3, %v12652_v42  ;;  %v4090_v33 = vadd.f32 %v12653_v2, %v4018_v53  ;;  %v12656_v41 = vrot.slane %v10988_v4, 3  ;;  %v12658_v20 = vld [vmem:[#allocation80_spill] sm:$0xff]  ;;  %v11125_v2 = vpop.f32.mrb[128].mxu0 }
 0x542   : > { %v4860_v46 = vsel %vm4715_vm4, %v4858_v38, %v12654_v56  ;;  %v4435_v7 = vsel %vm4056_vm1, %v4433_v9, %v12655_v58  ;;  %v4160_v23 = vadd.f32 %v12657_v48, %v4089_v43  ;;  %v12659_v53 = vrot.slane %v10991_v12, 4  ;;  %12660 = vst [vmem:[#allocation61_spill] sm:$0xff] %v11125_v2  ;;  %v11127_v38 = vpop.f32.mrb[128].mxu1  ;;  %v12661_v56 = vld [vmem:[#allocation138_spill] sm:$0xff] }
 0x543   : > { %v4649_v63 = vsel %vm4501_vm3, %v4647_v31, %v12656_v41  ;;  %v4528_v40 = vadd.f32 %v12658_v20, %v4456_v34  ;;  %v4457_v3 = vadd.f32 %v4435_v7, %v10971_v49  ;;  %v4161_v9 = vadd.f32 %v12661_v56, %v4090_v33  ;;  %v11133_v41 = vpop.f32.mrb[129].mxu0  ;;  %v11135_v34 = vpop.f32.mrb[129].mxu1  ;;  %v12663_v7 = vld [vmem:[#allocation25_spill] sm:$0xff] }
 0x544   : > { %v4863_v42 = vsel %vm4715_vm4, %v4861_v11, %v12659_v53  ;;  %v4436_v58 = vrot.slane %v11028_v45, 2  ;;  %v4650_v31 = vrot.slane %v11031_v22, 3  ;;  %v4864_v43 = vrot.slane %v11034_v29, 4  ;;  %12662 = vst [vmem:[#allocation47_spill] sm:$0xff] %v11133_v41  ;;  %v12664_v11 = vld [vmem:[#allocation83_spill] sm:$0xff] }
 0x545   : > { %v4231_v49 = vadd.f32 %v4214_v13, %v4160_v23  ;;  %v4599_v48 = vadd.f32 %v12663_v7, %v4528_v40  ;;  %v4529_v20 = vadd.f32 %v12664_v11, %v4457_v3  ;;  %v12193_v53 = vrot.slane %v11037_v57, 2  ;;  %v12668_v13 = vld [vmem:[#allocation87_spill] sm:$0xff]  ;;  %v12669_v7 = vld [vmem:[#allocation140_spill] sm:$0xff] }
 0x546   : > { %v4232_v2 = vadd.f32 %v4216_v50, %v4161_v9  ;;  %v12665_v33 = vrot.slane %v10975_v30, 2  ;;  %v12666_v22 = vrot.slane %v10978_v15, 3  ;;  %v12667_v56 = vrot.slane %v10981_v61, 4  ;;  %v11152_v50 = vpop.f32.mrb[130].mxu0  ;;  %v11154_v30 = vpop.f32.mrb[130].mxu1  ;;  %v12670_v9 = vld [vmem:[#allocation91_spill] sm:$0xff] }
 0x547   : > { %v4308_v23 = vadd.f32 %v12668_v13, %v4231_v49  ;;  %v4670_v40 = vadd.f32 %v4646_v32, %v4599_v48  ;;  %v4600_v3 = vadd.f32 %v12669_v7, %v4529_v20  ;;  %v12671_v15 = vrot.slane %v10985_v1, 2  ;;  %v11164_v49 = vpop.f32.mrb[131].mxu0  ;;  %v11166_v48 = vpop.f32.mrb[131].mxu1 }
 0x548   : > { %v4437_v45 = vsel %vm4056_vm1, %v12665_v33, %v4436_v58  ;;  %v4651_v29 = vsel %vm4501_vm3, %v12666_v22, %v4650_v31  ;;  %v4865_v41 = vsel %vm4715_vm4, %v12667_v56, %v4864_v43  ;;  %v4309_v33 = vadd.f32 %v12670_v9, %v4232_v2  ;;  %12672 = vst [vmem:[#allocation50_spill] sm:$0xff] %v11164_v49  ;;  %v12674_v56 = vld [vmem:[#allocation68_spill] sm:$0xff] }
 0x549   : > { %v4458_v11 = vadd.f32 %v4437_v45, %v11011_v25  ;;  %v4439_v61 = vsel %vm4056_vm1, %v12671_v15, %v12193_v53  ;;  %v4652_v22 = vrot.slane %v11044_v5, 3  ;;  %v4866_v32 = vrot.slane %v11047_v21, 4  ;;  %v12673_v25 = vld [vmem:[#allocation81_spill] sm:$0xff] }
 0x54a   : > { %v4742_v20 = vadd.f32 %v12673_v25, %v4670_v40  ;;  %v4671_v45 = vadd.f32 %v4649_v63, %v4600_v3  ;;  %v4459_v2 = vadd.f32 %v4439_v61, %v11019_v27  ;;  %v12675_v7 = vrot.slane %v10988_v4, 3  ;;  %v12677_v53 = vld [vmem:[#allocation29_spill] sm:$0xff]  ;;  %v12678_v40 = vld [vmem:[#allocation84_spill] sm:$0xff]  ;;  %v12679_v3 = vld [vmem:[#allocation143_spill] sm:$0xff]  ;;  %v11183_v61 = vpop.f32.mrb[132].mxu0  ;;  %v11185_v4 = vpop.f32.mrb[132].mxu1 }
 0x54b   : > { %v4530_v13 = vadd.f32 %v12674_v56, %v4458_v11  ;;  %v12676_v9 = vrot.slane %v10991_v12, 4  ;;  %v12196_v21 = vrot.slane %v11053_v35, 2  ;;  %v12194_v15 = vrot.slane %v11059_v51, 3  ;;  %v12680_v25 = vld [vmem:[#allocation71_spill] sm:$0xff]  ;;  %12681 = vst [vmem:[#allocation128_spill] sm:$0xff] %v11183_v61 }
 0x54c   : > { %v4653_v1 = vsel %vm4501_vm3, %v12675_v7, %v4652_v22  ;;  %v4813_v49 = vadd.f32 %v12677_v53, %v4742_v20  ;;  %v4743_v63 = vadd.f32 %v12678_v40, %v4671_v45  ;;  %v4531_v27 = vadd.f32 %v12680_v25, %v4459_v2  ;;  %v12682_v20 = vld [vmem:[#allocation151_spill] sm:$0xff]  ;;  %v11198_v2 = vpop.f32.mrb[133].mxu1  ;;  %v12685_v25 = vld [vmem:[#allocation146_spill] sm:$0xff] }
 0x54d   : > { %v4867_v5 = vsel %vm4715_vm4, %v12676_v9, %v4866_v32  ;;  %v4601_v11 = vadd.f32 %v12679_v3, %v4530_v13  ;;  %v4441_v12 = vsel %vm4056_vm1, %v4436_v58, %v12196_v21  ;;  %v4655_v56 = vsel %vm4501_vm3, %v4650_v31, %v12194_v15  ;;  %v11196_v13 = vpop.f32.mrb[133].mxu0  ;;  %v12684_v9 = vld [vmem:[#allocation141_spill] sm:$0xff] }
 0x54e   : > { %v12195_v53 = vrot.slane %v11065_v16, 4  ;;  %v4384_v45 = vadd.f32 %v12682_v20, %v11016_v39  ;;  %12683 = vst [vmem:[#allocation130_spill] sm:$0xff] %v11196_v13  ;;  %v4884_v7 = vadd.f32 %v4860_v46, %v4813_v49  ;;  %v4814_v40 = vadd.f32 %v12684_v9, %v4743_v63  ;;  %v12686_v46 = vld [vmem:[#allocation92_spill] sm:$0xff] }
 0x54f   : > { %v4672_v3 = vadd.f32 %v4651_v29, %v4601_v11  ;;  %v4602_v61 = vadd.f32 %v12685_v25, %v4531_v27  ;;  %v4460_v58 = vadd.f32 %v4441_v12, %v11050_v60  ;;  %v11208_v15 = vmul.f32 %v12630_v28, %v11021_v26  ;;  %v12688_v29 = vld [vmem:[#allocation69_spill] sm:$0xff]  ;;  %v11218_v60 = vpop.f32.mrb[134].mxu0  ;;  %v11220_v12 = vpop.f32.mrb[134].mxu1 }
 0x550   : > { %v4869_v31 = vsel %vm4715_vm4, %v4864_v43, %v12195_v53  ;;  %v11212_v39 = vmul.f32 %v12631_v18, %v11021_v26  ;;  %v4961_v49 = vadd.f32 %v12686_v46, %v4884_v7  ;;  %v11215_v63 = vadd.f32 %v4863_v42, %v4814_v40  ;;  %12689 = vst [vmem:[#allocation46_spill] sm:$0xff] %v11218_v60  ;;  %v12691_v43 = vld [vmem:[#allocation74_spill] sm:$0xff]  ;;  %v11229_v7 = vpop.f32.mrb[135].mxu0  ;;  %v11231_v42 = vpop.f32.mrb[135].mxu1  ;;  %v12694_v40 = vld [vmem:[#allocation144_spill] sm:$0xff] }
 0x551   : > { %v4744_v11 = vadd.f32 %v12688_v29, %v4672_v3  ;;  %v4673_v27 = vadd.f32 %v4653_v1, %v4602_v61  ;;  %12690 = vst [vmem:[#allocation27_spill] sm:$0xff] %v11220_v12  ;;  %v4532_v20 = vadd.f32 %v12691_v43, %v4460_v58  ;;  %v12199_v9 = vrot.slane %v11208_v15, 2  ;;  %12692 = vst [vmem:[#allocation41_spill] sm:$0xff] %v11229_v7  ;;  %v12695_v61 = vld [vmem:[#allocation72_spill] sm:$0xff]  ;;  %v12696_v29 = vld [vmem:[#allocation149_spill] sm:$0xff] }
 0x552   : > { %12687 = vst [vmem:[#allocation45_spill] sm:$0xff] %v11215_v63  ;;  %v12198_v25 = vrot.slane %v11212_v39, 3  ;;  %v11227_v53 = vmul.f32 %v12632_v36, %v11021_v26  ;;  %12693 = vst [vmem:[#allocation127_spill] sm:$0xff] %v11231_v42  ;;  %v3643_v46 = vmax.f32 %v10949_v44, %v10951_v47  ;;  %v11238_v58 = vadd.f32 %v10664_v24, %v4308_v23 }
 0x553   : > { %v4815_v1 = vadd.f32 %v12694_v40, %v4744_v11  ;;  %v4745_v3 = vadd.f32 %v12695_v61, %v4673_v27  ;;  %v4603_v43 = vadd.f32 %v12696_v29, %v4532_v20  ;;  %v12697_v26 = vrot.slane %v11037_v57, 2  ;;  %v12698_v61 = vld [vmem:[#allocation147_spill] sm:$0xff] }
 0x554   : > { %v4657_v11 = vsel %vm4501_vm3, %v4652_v22, %v12198_v25  ;;  %v12197_v27 = vrot.slane %v11227_v53, 4  ;;  %3677 = vst [vmem:[#allocation2 + $0x1a0] sm:$0xff] %v3643_v46  ;;  %v3644_v24 = vmax.f32 %v10960_v10, %v10962_v59  ;;  %v11257_v20 = vadd.f32 %v10684_v6, %v4309_v33  ;;  %v12699_v29 = vld [vmem:[#allocation95_spill] sm:$0xff]  ;;  %v12704_v6 = vld [vmem:[#allocation136_spill] sm:$0xff] }
 0x555   : > { %v4443_v21 = vsel %vm4056_vm1, %v12697_v26, %v12199_v9  ;;  %v4886_v40 = vadd.f32 %v4865_v41, %v4815_v1  ;;  %v4816_v44 = vadd.f32 %v12698_v61, %v4745_v3  ;;  %v4674_v23 = vadd.f32 %v4655_v56, %v4603_v43  ;;  %v12702_v59 = vld [vmem:[#allocation75_spill] sm:$0xff]  ;;  %v12709_v43 = vld [vmem:[#allocation57_spill] sm:$0xff]  ;;  %v12710_v26 = vld [vmem:[#allocation56_spill] sm:$0xff] }
 0x556   : > { %v4461_v47 = vadd.f32 %v4443_v21, %v4384_v45  ;;  %v4871_v57 = vsel %vm4715_vm4, %v4866_v32, %v12197_v27  ;;  %v3645_v22 = vmax.f32 %v10993_v17, %v10995_v0  ;;  %v12701_v21 = vld [vmem:[#allocation77_spill] sm:$0xff]  ;;  %3678 = vst [vmem:[#allocation2 + $0x1a8] sm:$0xff] %v3644_v24  ;;  %v11266_v10 = vadd.f32 %v10692_v14, %v4961_v49  ;;  %v12703_v3 = vld [vmem:[#allocation135_spill] sm:$0xff]  ;;  %v12708_v0 = vld [vmem:[#allocation152_spill] sm:$0xff] }
 0x557   : > { %v4963_v41 = vadd.f32 %v12699_v29, %v4886_v40  ;;  %v11262_v1 = vadd.f32 %v4867_v5, %v4816_v44  ;;  %v4746_v56 = vadd.f32 %v12702_v59, %v4674_v23  ;;  %v12706_v46 = vld [vmem:[#allocation171_spill] sm:$0xff]  ;;  %v11281_v40 = vmax.f32 %v12710_v26, %v12709_v43  ;;  %v12712_v61 = vld [vmem:[#allocation24_spill] sm:$0xff]  ;;  %v12713_v14 = vld [vmem:[#allocation58_spill] sm:$0xff] }
 0x558   : > { %v4533_v45 = vadd.f32 %v12701_v21, %v4461_v47  ;;  %v11270_v32 = vmul.f32 %v12703_v3, %v3645_v22  ;;  %v11273_v33 = vmul.f32 %v12704_v6, %v3645_v22  ;;  %v11276_v17 = vmul.f32 %v12706_v46, %v3645_v22  ;;  %v12714_v44 = vld [vmem:[#allocation154_spill] sm:$0xff]  ;;  %v12716_v22 = vld [vmem:[#allocation123_spill] sm:$0xff]  ;;  %v12723_v25 = vld [vmem:[#allocation108_spill] sm:$0xff] }
 0x559   : > { %12700 = vst [vmem:[#allocation43_spill] sm:$0xff] %v11262_v1  ;;  %12711 = vst [vmem:[#allocation65_spill] sm:$0xff] %v11281_v40  ;;  %v3647_v49 = vmax.f32 %v12713_v14, %v12712_v61  ;;  %v11286_v47 = vadd.f32 %v12714_v44, %v4963_v41  ;;  %v12715_v24 = vld [vmem:[#allocation150_spill] sm:$0xff]  ;;  %v12724_v29 = vld [vmem:[#allocation109_spill] sm:$0xff] }
 0x55a   : > { %12705 = vst [vmem:[#allocation60_spill] sm:$0xff] %v11273_v33  ;;  %12707 = vst [vmem:[#allocation79_spill] sm:$0xff] %v11276_v17  ;;  %v4604_v5 = vadd.f32 %v12708_v0, %v4533_v45  ;;  %v4817_v23 = vadd.f32 %v12715_v24, %v4746_v56  ;;  %v12717_v59 = vld [vmem:[#allocation126_spill] sm:$0xff]  ;;  %v12718_v0 = vld [vmem:[#allocation173_spill] sm:$0xff] }
 0x55b   : > { %v11293_v27 = vmax.f32 %v12717_v59, %v12716_v22  ;;  %v11297_v43 = vmul.f32 %v12718_v0, %v11281_v40  ;;  %v12719_v26 = vld [vmem:[#allocation174_spill] sm:$0xff]  ;;  %v11304_v41 = vmul.f32 %v12703_v3, %v3647_v49  ;;  %v11307_v21 = vmul.f32 %v12704_v6, %v3647_v49  ;;  %v5266_v33 = vld [vmem:[#allocation2 + $0x1a0] sm:$0xe0]  ;;  %v12725_v1 = vld [vmem:[#allocation100_spill] sm:$0xff] }
 0x55c   : > { %v4675_v45 = vadd.f32 %v4657_v11, %v4604_v5  ;;  %v11301_v61 = vmul.f32 %v12719_v26, %v11281_v40  ;;  %v4888_v56 = vadd.f32 %v4869_v31, %v4817_v23  ;;  %v4395_v14 = vld [vmem:[#allocation2 + $0x1a0] sm:$0x3]  ;;  %v11310_v11 = vmul.f32 %v12706_v46, %v3647_v49  ;;  %v5046_v23 = vld [vmem:[#allocation2 + $0x1a0] sm:$0xf0] }
 0x55d   : > { %v4609_v44 = vld [vmem:[#allocation2 + $0x1a0] sm:$0x7]  ;;  %12720 = vst [vmem:[#allocation132_spill] sm:$0xff] %v11307_v21  ;;  %v11314_v5 = vmul.f32 %v12718_v0, %v11293_v27  ;;  %v4418_v9 = vmul.f32 %v12723_v25, %v4395_v14  ;;  %v5480_v40 = vld [vmem:[#allocation2 + $0x1a0] sm:$0xc0]  ;;  %v5069_v49 = vmul.f32 %v12703_v3, %v5046_v23  ;;  %v12726_v14 = vld [vmem:[#allocation153_spill] sm:$0xff] }
 0x55e   : > { %v4823_v24 = vld [vmem:[#allocation2 + $0x1a0] sm:$0xf]  ;;  %12721 = vst [vmem:[#allocation82_spill] sm:$0xff] %v11310_v11  ;;  %v4632_v17 = vmul.f32 %v12724_v29, %v4609_v44  ;;  %v4965_v63 = vadd.f32 %v12725_v1, %v4888_v56  ;;  %v11323_v11 = vmul.f32 %v12704_v6, %v5266_v33  ;;  %v11326_v7 = vmul.f32 %v12706_v46, %v5480_v40  ;;  %v4824_v25 = vld [vmem:[#allocation2 + $0x1a8] sm:$0xf] }
 0x55f   : > { %v12722_v22 = vld [vmem:[#allocation78_spill] sm:$0xff]  ;;  %v4846_v31 = vmul.f32 %v12628_v55, %v4823_v24  ;;  %v4444_v44 = vrot.slane %v4418_v9, 2  ;;  %v5047_v42 = vld [vmem:[#allocation2 + $0x1a8] sm:$0xf0]  ;;  %v5089_v60 = vrot.slane %v5069_v49, 4  ;;  %v12727_v40 = vrot.slane %v11053_v35, 2 }
 0x560   : > { %v4747_v59 = vadd.f32 %v12722_v22, %v4675_v45  ;;  %v4396_v45 = vld [vmem:[#allocation2 + $0x1a8] sm:$0x3]  ;;  %v4658_v55 = vrot.slane %v4632_v17, 3  ;;  %v5267_v23 = vld [vmem:[#allocation2 + $0x1a8] sm:$0xe0]  ;;  %v12729_v17 = vrot.slane %v11065_v16, 4 }
 0x561   : > { %v4610_v22 = vld [vmem:[#allocation2 + $0x1a8] sm:$0x7]  ;;  %v4872_v24 = vrot.slane %v4846_v31, 4  ;;  %v4419_v33 = vmul.f32 %v12630_v28, %v4396_v45  ;;  %v4445_v13 = vsel %vm4056_vm1, %v12727_v40, %v4444_v44  ;;  %v11347_v45 = vmul.f32 %v12718_v0, %v5047_v42  ;;  %v12731_v44 = vld [vmem:[#allocation89_spill] sm:$0xff] }
 0x562   : > { %v4818_v29 = vadd.f32 %v12726_v14, %v4747_v59  ;;  %v12728_v59 = vrot.slane %v11059_v51, 3  ;;  %v4462_v49 = vadd.f32 %v4445_v13, %v11238_v58  ;;  %v4633_v28 = vmul.f32 %v12631_v18, %v4610_v22 }
 0x563   : > { %v4873_v31 = vsel %vm4715_vm4, %v12729_v17, %v4872_v24  ;;  %v4446_v14 = vrot.slane %v4419_v33, 2  ;;  %v11350_v35 = vmul.f32 %v12719_v26, %v5267_v23  ;;  %v12730_v51 = vrot.slane %v11270_v32, 4 }
 0x564   : > { %v11332_v12 = vadd.f32 %v4871_v57, %v4818_v29  ;;  %v4659_v9 = vsel %vm4501_vm3, %v12728_v59, %v4658_v55  ;;  %v4847_v57 = vmul.f32 %v12632_v36, %v4824_v25  ;;  %v5093_v16 = vrot.slane %v11297_v43, 4  ;;  %v12770_v43 = vld [vmem:[#allocation166_spill] sm:$0xff] }
 0x565   : > { %v5091_v29 = vsel %vm4715_vm4, %v5089_v60, %v12730_v51  ;;  %v4534_v55 = vadd.f32 %v12731_v44, %v4462_v49  ;;  %v12732_v13 = vrot.slane %v11208_v15, 2  ;;  %v4660_v58 = vrot.slane %v4633_v28, 3  ;;  %v12733_v60 = vld [vmem:[#allocation160_spill] sm:$0xff] }
 0x566   : > { %v4874_v36 = vrot.slane %v4847_v57, 4  ;;  %v5092_v22 = vrot.slane %v11347_v45, 4  ;;  %v5306_v25 = vrot.slane %v11350_v35, 5  ;;  %v11364_v24 = vadd.f32 %v5091_v29, %v11266_v10  ;;  %v12737_v45 = vld [vmem:[#allocation40_spill] sm:$0xff]  ;;  %v12738_v35 = vld [vmem:[#allocation167_spill] sm:$0xff] }
 0x567   : > { %v4447_v18 = vsel %vm4056_vm1, %v12732_v13, %v4446_v14  ;;  %v4605_v33 = vadd.f32 %v12733_v60, %v4534_v55  ;;  %v12734_v23 = vrot.slane %v11212_v39, 3  ;;  %v12735_v15 = vrot.slane %v11227_v53, 4  ;;  %v12739_v29 = vld [vmem:[#allocation163_spill] sm:$0xff] }
 0x568   : > { %v4463_v42 = vadd.f32 %v4447_v18, %v11257_v20  ;;  %v5307_v17 = vrot.slane %v11301_v61, 5  ;;  %v12736_v20 = vld [vmem:[#allocation105_spill] sm:$0xff]  ;;  %v5095_v14 = vrot.slane %v11304_v41, 4  ;;  %v12206_v10 = vrot.slane %v11314_v5, 4  ;;  %v12741_v13 = vld [vmem:[#allocation59_spill] sm:$0xff] }
 0x569   : > { %v4661_v40 = vsel %vm4501_vm3, %v12734_v23, %v4660_v58  ;;  %v4875_v59 = vsel %vm4715_vm4, %v12735_v15, %v4874_v36  ;;  %v4676_v57 = vadd.f32 %v4659_v9, %v4605_v33  ;;  %v11380_v39 = vmul.f32 %v12719_v26, %v11293_v27  ;;  %v12742_v58 = vld [vmem:[#allocation90_spill] sm:$0xff] }
 0x56a   : > { %v4535_v49 = vadd.f32 %v12736_v20, %v4463_v42  ;;  %v3649_v53 = vmax.f32 %v12737_v45, %v11071_v62  ;;  %v5042_v51 = vadd.f32 %v12738_v35, %v4965_v63  ;;  %v12740_v55 = vrot.slane %v11270_v32, 4  ;;  %v12746_v15 = vld [vmem:[#allocation106_spill] sm:$0xff]  ;;  %v12747_v45 = vld [vmem:[#allocation61_spill] sm:$0xff] }
 0x56b   : > { %v11391_v18 = vmax.f32 %v12741_v13, %v11082_v19  ;;  %v3651_v9 = vmax.f32 %v11089_v54, %v11091_v8  ;;  %v4748_v36 = vadd.f32 %v12742_v58, %v4676_v57  ;;  %v12205_v62 = vrot.slane %v11380_v39, 5  ;;  %v12745_v54 = vld [vmem:[#allocation161_spill] sm:$0xff] }
 0x56c   : > { %v4606_v44 = vadd.f32 %v12739_v29, %v4535_v49  ;;  %v5096_v41 = vsel %vm4715_vm4, %v12740_v55, %v5095_v14  ;;  %v5075_v63 = vmul.f32 %v12703_v3, %v3649_v53  ;;  %v11402_v32 = vmul.f32 %v12704_v6, %v3649_v53  ;;  %v12748_v55 = vld [vmem:[#allocation47_spill] sm:$0xff]  ;;  %v5629_v49 = vld [vmem:[#allocation2 + $0x258] sm:$0xc0] }
 0x56d   : > { %v11397_v42 = vadd.f32 %v5096_v41, %v11286_v47  ;;  %v11405_v33 = vmul.f32 %v12706_v46, %v3649_v53  ;;  %v11409_v19 = vmul.f32 %v12718_v0, %v11391_v18  ;;  %3685 = vst [vmem:[#allocation2 + $0x260] sm:$0xff] %v3651_v9  ;;  %v4819_v8 = vadd.f32 %v12745_v54, %v4748_v36  ;;  %v12753_v36 = vld [vmem:[#allocation128_spill] sm:$0xff]  ;;  %v12757_v54 = vld [vmem:[#allocation46_spill] sm:$0xff] }
 0x56e   : > { %v4677_v60 = vadd.f32 %v4661_v40, %v4606_v44  ;;  %12743 = vst [vmem:[#allocation42_spill] sm:$0xff] %v11402_v32  ;;  %v5099_v47 = vrot.slane %v5075_v63, 4  ;;  %v11414_v23 = vmul.f32 %v12719_v26, %v11391_v18  ;;  %v3652_v40 = vmax.f32 %v11100_v52, %v11102_v37  ;;  %v12749_v52 = vld [vmem:[#allocation165_spill] sm:$0xff]  ;;  %v12791_v44 = vld [vmem:[#allocation111_spill] sm:$0xff] }
 0x56f   : > { %12744 = vst [vmem:[#allocation134_spill] sm:$0xff] %v11405_v33  ;;  %v12207_v57 = vrot.slane %v11409_v19, 4  ;;  %v11423_v53 = vmax.f32 %v12747_v45, %v11127_v38  ;;  %v4890_v35 = vadd.f32 %v4873_v31, %v4819_v8  ;;  %v11429_v41 = vmax.f32 %v12748_v55, %v11135_v34  ;;  %v12751_v38 = vld [vmem:[#allocation50_spill] sm:$0xff]  ;;  %v12766_v55 = vld [vmem:[#allocation172_spill] sm:$0xff] }
 0x570   : > { %v4749_v20 = vadd.f32 %v12746_v15, %v4677_v60  ;;  %v5100_v29 = vsel %vm4715_vm4, %v5095_v14, %v5099_v47  ;;  %3686 = vst [vmem:[#allocation2 + $0x268] sm:$0xff] %v3652_v40  ;;  %v11436_v9 = vmax.f32 %v11152_v50, %v11154_v30  ;;  %v11440_v31 = vmax.f32 %v12751_v38, %v11166_v48  ;;  %v12752_v14 = vld [vmem:[#allocation124_spill] sm:$0xff]  ;;  %v12755_v34 = vld [vmem:[#allocation130_spill] sm:$0xff]  ;;  %v12759_v30 = vld [vmem:[#allocation127_spill] sm:$0xff] }
 0x571   : > { %v11432_v13 = vadd.f32 %v5100_v29, %v5042_v51  ;;  %v4967_v58 = vadd.f32 %v12752_v14, %v4890_v35  ;;  %v11445_v63 = vmax.f32 %v12753_v36, %v11185_v4  ;;  %v11449_v60 = vmax.f32 %v12755_v34, %v11198_v2  ;;  %v12756_v51 = vld [vmem:[#allocation27_spill] sm:$0xff]  ;;  %v12760_v40 = vld [vmem:[#allocation41_spill] sm:$0xff]  ;;  %v12765_v29 = vld [vmem:[#allocation98_spill] sm:$0xff] }
 0x572   : > { %v4820_v37 = vadd.f32 %v12749_v52, %v4749_v20  ;;  %v11453_v8 = vmax.f32 %v12757_v54, %v12756_v51  ;;  %v11457_v15 = vmax.f32 %v12760_v40, %v12759_v30  ;;  %v12762_v48 = vld [vmem:[#allocation45_spill] sm:$0xff]  ;;  %v12763_v20 = vld [vmem:[#allocation107_spill] sm:$0xff]  ;;  %v5308_v36 = vsel %vm5160_vm5, %v5306_v25, %v5307_v17  ;;  %v5481_v51 = vld [vmem:[#allocation2 + $0x1a8] sm:$0xc0] }
 0x573   : > { %12750 = vst [vmem:[#allocation44_spill] sm:$0xff] %v11432_v13  ;;  %12754 = vst [vmem:[#allocation129_spill] sm:$0xff] %v11445_v63  ;;  %v4962_v45 = vadd.f32 %v12763_v20, %v12762_v48  ;;  %v12764_v35 = vld [vmem:[#allocation43_spill] sm:$0xff]  ;;  %v5044_v52 = vadd.f32 %v12766_v55, %v4967_v58  ;;  %v12771_v40 = vld [vmem:[#allocation164_spill] sm:$0xff]  ;;  %v5312_v25 = vsel %vm5160_vm5, %v5307_v17, %v12205_v62 }
 0x574   : > { %12758 = vst [vmem:[#allocation51_spill] sm:$0xff] %v11453_v8  ;;  %v4891_v50 = vadd.f32 %v4875_v59, %v4820_v37  ;;  %12761 = vst [vmem:[#allocation131_spill] sm:$0xff] %v11457_v15  ;;  %v4964_v4 = vadd.f32 %v12765_v29, %v12764_v35  ;;  %v5054_v38 = vld [vmem:[#allocation2 + $0x260] sm:$0xf]  ;;  %v5094_v59 = vsel %vm4715_vm4, %v5092_v22, %v5093_v16  ;;  %v12777_v17 = vld [vmem:[#allocation177_spill] sm:$0xff] }
 0x575   : > { %v5268_v2 = vld [vmem:[#allocation2 + $0x260] sm:$0x1f]  ;;  %3693 = vst [vmem:[#allocation2 + $0x320] sm:$0xff] %v11453_v8  ;;  %v5098_v37 = vsel %vm4715_vm4, %v5093_v16, %v12206_v10  ;;  %v5077_v54 = vmul.f32 %v12703_v3, %v5054_v38  ;;  %3694 = vst [vmem:[#allocation2 + $0x328] sm:$0xff] %v11457_v15  ;;  %v5039_v16 = vadd.f32 %v12770_v43, %v4962_v45  ;;  %v11538_v62 = vld [vmem:[#allocation2 + $0x2b8] sm:$0xff] }
 0x576   : > { %v5482_v14 = vld [vmem:[#allocation2 + $0x260] sm:$0x3f]  ;;  %v11481_v30 = vmul.f32 %v12704_v6, %v5268_v2  ;;  %v5041_v48 = vadd.f32 %v12771_v40, %v4964_v4  ;;  %v5498_v43 = vmul.f32 %v12777_v17, %v5481_v51 }
 0x577   : > { %v12767_v58 = vld [vmem:[#allocation23_spill] sm:$0xff]  ;;  %v11484_v22 = vmul.f32 %v12706_v46, %v5482_v14  ;;  %v12774_v20 = vld [vmem:[#allocation162_spill] sm:$0xff]  ;;  %v5103_v46 = vrot.slane %v5077_v54, 4  ;;  %v5116_v61 = vadd.f32 %v5094_v59, %v5039_v16  ;;  %v5706_v56 = vld [vmem:[#allocation2 + $0x268] sm:$0xc0] }
 0x578   : > { %v11477_v34 = vadd.f32 %v12767_v58, %v4891_v50  ;;  %12768 = vst [vmem:[#allocation52_spill] sm:$0xff] %v11481_v30  ;;  %v12772_v50 = vld [vmem:[#allocation176_spill] sm:$0xff]  ;;  %v12775_v6 = vrot.slane %v12774_v20, 6  ;;  %v12776_v38 = vld [vmem:[#allocation55_spill] sm:$0xff]  ;;  %v5118_v58 = vadd.f32 %v5098_v37, %v5041_v48  ;;  %v12782_v51 = vld [vmem:[#allocation110_spill] sm:$0xff] }
 0x579   : > { %12769 = vst [vmem:[#allocation62_spill] sm:$0xff] %v11484_v22  ;;  %v12773_v3 = vrot.slane %v12772_v50, 6  ;;  %v5055_v45 = vld [vmem:[#allocation2 + $0x268] sm:$0xf]  ;;  %v12204_v4 = vrot.slane %v12776_v38, 6  ;;  %v5104_v40 = vsel %vm4715_vm4, %v5099_v47, %v5103_v46  ;;  %v5520_v46 = vrot.slane %v5498_v43, 6 }
 0x57a   : > { %v5078_v2 = vmul.f32 %v12718_v0, %v5055_v45  ;;  %v5269_v14 = vld [vmem:[#allocation2 + $0x268] sm:$0x1f]  ;;  %v11515_v0 = vadd.f32 %v5104_v40, %v5044_v52  ;;  %v5190_v48 = vadd.f32 %v12782_v51, %v5118_v58  ;;  %v12783_v52 = vld [vmem:[#allocation54_spill] sm:$0xff] }
 0x57b   : > { %v5451_v35 = vsel %vm5374_vm6, %v12775_v6, %v12773_v3  ;;  %v11506_v20 = vmul.f32 %v12719_v26, %v5269_v14  ;;  %v12778_v54 = vmov %v12773_v3  ;;  %v12779_v6 = vld [vmem:[#allocation65_spill] sm:$0xff]  ;;  %v12781_v37 = vld [vmem:[#allocation116_spill] sm:$0xff]  ;;  %v11522_v26 = vmul.f32 %v12777_v17, %v11293_v27  ;;  %v12784_v40 = vld [vmem:[#allocation175_spill] sm:$0xff] }
 0x57c   : > { %v5455_v3 = vsel %vm5374_vm6, %v12778_v54, %v12204_v4  ;;  %v5500_v55 = vmul.f32 %v12777_v17, %v12779_v6  ;;  %12780 = vst [vmem:[#allocation64_spill] sm:$0xff] %v11515_v0  ;;  %v5105_v59 = vrot.slane %v5078_v2, 4  ;;  %v5188_v16 = vadd.f32 %v12781_v37, %v5116_v61  ;;  %v5639_v45 = vld [vmem:[#allocation8 + $0x34] ss:$8 sm:$0x3]  ;;  %v12785_v54 = vld [vmem:[#allocation178_spill] sm:$0xff] }
 0x57d   : > { %v5261_v61 = vadd.f32 %v12784_v40, %v5190_v48  ;;  %v5597_v58 = vrot.slane %v12785_v54, 6  ;;  %v5716_v6 = vld [vmem:[#allocation8 + $0x35] ss:$8 sm:$0x3]  ;;  %v12209_v27 = vrot.slane %v11522_v26, 6  ;;  %v7292_v22 = vld [vmem:[#allocation2 + $0x278] sm:$0xff] }
 0x57e   : > { %v5521_v50 = vrot.slane %v5500_v55, 6  ;;  %v11527_v14 = vsel %vm4715_vm4, %v12207_v57, %v5105_v59  ;;  %v5259_v2 = vadd.f32 %v12783_v52, %v5188_v16  ;;  %v12786_v51 = vld [vmem:[#allocation179_spill] sm:$0xff]  ;;  %v12787_v55 = vld [vmem:[#allocation180_spill] sm:$0xff]  ;;  %v12788_v16 = vld [vmem:[#allocation26_spill] sm:$0xff] }
 0x57f   : > { %v5598_v43 = vrot.slane %v12786_v51, 6  ;;  %v12208_v29 = vrot.slane %v12787_v55, 6  ;;  %v11536_v4 = vld [vmem:[#allocation2 + $0x288] sm:$0xff]  ;;  %v5332_v47 = vadd.f32 %v5312_v25, %v5261_v61  ;;  %v11541_v48 = vrot.slane %v5639_v45, %v12788_v16 }
 0x580   : > { %v5522_v37 = vsel %vm5374_vm6, %v5520_v46, %v5521_v50  ;;  %v5330_v59 = vadd.f32 %v5308_v36, %v5259_v2  ;;  %v12789_v52 = vld [vmem:[#allocation32_spill] sm:$0xff]  ;;  %v5526_v54 = vsel %vm5374_vm6, %v5521_v50, %v12209_v27  ;;  %v11554_v25 = vrot.slane %v5716_v6, %v12788_v16  ;;  %v12790_v2 = vld [vmem:[#allocation117_spill] sm:$0xff] }
 0x581   : > { %v11544_v40 = vrot.slane %v5639_v45, %v12789_v52  ;;  %v5787_v46 = vld [vmem:[#allocation8 + $0x36] ss:$8 sm:$0x3]  ;;  %v5599_v51 = vsel %vm5374_vm6, %v5597_v58, %v5598_v43  ;;  %v5603_v36 = vsel %vm5374_vm6, %v5598_v43, %v12208_v29  ;;  %v5404_v10 = vadd.f32 %v12791_v44, %v5332_v47  ;;  %v5783_v43 = vld [vmem:[#allocation2 + $0x248] sm:$0x80] }
 0x582   : > { %v5402_v61 = vadd.f32 %v12790_v2, %v5330_v59  ;;  %v11566_v58 = vrot.slane %v5716_v6, %v12789_v52  ;;  %v11569_v29 = vrot.slane %v5787_v46, %v12788_v16  ;;  %v11572_v59 = vrot.slane %v5787_v46, %v12789_v52  ;;  %v7293_v30 = vld [vmem:[#allocation2 + $0x2a8] sm:$0xff] }
 0x583   : > { %v5652_v45 = vmul.f32 %v11544_v40, %v5629_v49  ;;  %v5654_v57 = vmul.f32 %v11544_v40, %v11536_v4  ;;  %v11563_v50 = vmul.f32 %v11544_v40, %v11538_v62  ;;  %v5475_v49 = vadd.f32 %v5455_v3, %v5404_v10 }
 0x584   : > { %v5473_v44 = vadd.f32 %v5451_v35, %v5402_v61  ;;  %v5729_v28 = vmul.f32 %v11566_v58, %v5706_v56  ;;  %v5731_v1 = vmul.f32 %v11566_v58, %v11429_v41  ;;  %v11580_v6 = vmul.f32 %v11566_v58, %v11440_v31 }
 0x585   : > { %v5674_v47 = vrot.slane %v5652_v45, 6  ;;  %v5675_v2 = vrot.slane %v5654_v57, 6  ;;  %v12214_v27 = vrot.slane %v11563_v50, 6  ;;  %v5546_v63 = vadd.f32 %v5526_v54, %v5475_v49  ;;  %v5859_v54 = vld [vmem:[#allocation8 + $0x37] ss:$8 sm:$0x3] }
 0x586   : > { %v5544_v8 = vadd.f32 %v5522_v37, %v5473_v44  ;;  %v5800_v35 = vmul.f32 %v11572_v59, %v5783_v43  ;;  %v5751_v57 = vrot.slane %v5729_v28, 6  ;;  %v5752_v3 = vrot.slane %v5731_v1, 6  ;;  %v5930_v44 = vld [vmem:[#allocation8 + $0x40] ss:$8 sm:$0x3] }
 0x587   : > { %v5676_v46 = vsel %vm5374_vm6, %v5674_v47, %v5675_v2  ;;  %v5680_v10 = vsel %vm5374_vm6, %v5675_v2, %v12214_v27  ;;  %v12215_v56 = vrot.slane %v11580_v6, 6  ;;  %v5623_v45 = vadd.f32 %v5603_v36, %v5546_v63  ;;  %v5855_v36 = vld [vmem:[#allocation2 + $0x258] sm:$0x80]  ;;  %v5926_v47 = vld [vmem:[#allocation2 + $0x268] sm:$0x80] }
 0x588   : > { %v5621_v61 = vadd.f32 %v5599_v51, %v5544_v8  ;;  %v5802_v33 = vmul.f32 %v7292_v22, %v11572_v59  ;;  %v11590_v37 = vmul.f32 %v7293_v30, %v11572_v59  ;;  %v5753_v43 = vsel %vm5374_vm6, %v5751_v57, %v5752_v3 }
 0x589   : > { %v5757_v28 = vsel %vm5374_vm6, %v5752_v3, %v12215_v56  ;;  %v5823_v1 = vrot.slane %v5800_v35, 7  ;;  %v5700_v8 = vadd.f32 %v5680_v10, %v5623_v45  ;;  %v11598_v2 = vrot.slane %v5859_v54, %v12788_v16  ;;  %v5999_v56 = vld [vmem:[#allocation8 + $0x41] ss:$8 sm:$0x3] }
 0x58a   : > { %12792 = vst [vmem:[#allocation67_spill] sm:$0xff] %v11590_v37  ;;  %v5698_v49 = vadd.f32 %v5676_v46, %v5621_v61  ;;  %v5824_v63 = vrot.slane %v5802_v33, 7  ;;  %v12216_v51 = vrot.slane %v11590_v37, 7  ;;  %v11601_v27 = vrot.slane %v5859_v54, %v12789_v52 }
 0x58b   : > { %v11604_v57 = vrot.slane %v5930_v44, %v12788_v16  ;;  %v11607_v3 = vrot.slane %v5930_v44, %v12789_v52  ;;  %v5777_v46 = vadd.f32 %v5757_v28, %v5700_v8  ;;  %v6030_v8 = vld [vmem:[#allocation8 + $0x42] ss:$8 sm:$0x3] }
 0x58c   : > { %v5775_v35 = vadd.f32 %v5753_v43, %v5698_v49  ;;  %v5825_v33 = vsel %vm5819_vm7, %v5823_v1, %v5824_v63  ;;  %v5829_v10 = vsel %vm5819_vm7, %v5824_v63, %v12216_v51  ;;  %v5872_v61 = vmul.f32 %v11601_v27, %v5855_v36 }
 0x58d   : > { %12793 = vst [vmem:[#allocation33_spill] sm:$0xff] %v11607_v3  ;;  %v5874_v45 = vmul.f32 %v11601_v27, %v11536_v4  ;;  %v11618_v54 = vmul.f32 %v11601_v27, %v11538_v62  ;;  %v5943_v44 = vmul.f32 %v11607_v3, %v5926_v47  ;;  %v5849_v28 = vadd.f32 %v5829_v10, %v5777_v46 }
 0x58e   : > { %v5847_v43 = vadd.f32 %v5825_v33, %v5775_v35  ;;  %v5945_v1 = vmul.f32 %v11607_v3, %v11429_v41  ;;  %v11625_v49 = vmul.f32 %v11607_v3, %v11440_v31  ;;  %v5894_v63 = vrot.slane %v5872_v61, 7  ;;  %v12830_v3 = vld [vmem:[#allocation118_spill] sm:$0xff] }
 0x58f   : > { %12794 = vst [vmem:[#allocation70_spill] sm:$0xff] %v11618_v54  ;;  %v5895_v36 = vrot.slane %v5874_v45, 7  ;;  %v12221_v51 = vrot.slane %v11618_v54, 7  ;;  %v5965_v32 = vrot.slane %v5943_v44, 7  ;;  %v11630_v47 = vrot.slane %v5999_v56, %v12788_v16 }
 0x590   : > { %12795 = vst [vmem:[#allocation30_spill] sm:$0xff] %v11625_v49  ;;  %v5966_v0 = vrot.slane %v5945_v1, 7  ;;  %v11633_v35 = vrot.slane %v5999_v56, %v12789_v52  ;;  %v11640_v10 = vrot.slane %v6030_v8, %v12788_v16  ;;  %v11643_v61 = vrot.slane %v6030_v8, %v12789_v52  ;;  %v6061_v45 = vld [vmem:[#allocation8 + $0x43] ss:$8 sm:$0x3] }
 0x591   : > { %v5896_v46 = vsel %vm5819_vm7, %v5894_v63, %v5895_v36  ;;  %v5900_v33 = vsel %vm5819_vm7, %v5895_v36, %v12221_v51  ;;  %v12798_v56 = vrot.slane %v11625_v49, 7  ;;  %v6089_v63 = vld [vmem:[#allocation9] sm:$0x3] }
 0x592   : > { %12796 = vst [vmem:[#allocation48_spill] sm:$0xff] %v11633_v35  ;;  %12797 = vst [vmem:[#allocation53_spill] sm:$0xff] %v11643_v61  ;;  %v5918_v44 = vadd.f32 %v5896_v46, %v5847_v43  ;;  %v5920_v1 = vadd.f32 %v5900_v33, %v5849_v28  ;;  %v5967_v13 = vsel %vm5819_vm7, %v5965_v32, %v5966_v0  ;;  %v12801_v46 = vld [vmem:[#allocation96_spill] sm:$0xff] }
 0x593   : > { %v5971_v15 = vsel %vm5819_vm7, %v5966_v0, %v12798_v56  ;;  %v6012_v54 = vmul.f32 %v7292_v22, %v11633_v35  ;;  %v6014_v36 = vmul.f32 %v7293_v30, %v11633_v35  ;;  %v6043_v51 = vmul.f32 %v11643_v61, %v11536_v4  ;;  %v12800_v30 = vld [vmem:[#allocation93_spill] sm:$0xff] }
 0x594   : > { %v6045_v8 = vmul.f32 %v11643_v61, %v11538_v62  ;;  %v5989_v37 = vadd.f32 %v5967_v13, %v5918_v44  ;;  %v5991_v43 = vadd.f32 %v5971_v15, %v5920_v1  ;;  %v11656_v28 = vrot.slane %v6061_v45, %v12788_v16  ;;  %v12802_v44 = vld [vmem:[#allocation31_spill] sm:$0xff]  ;;  %v12804_v1 = vld [vmem:[#allocation158_spill] sm:$0xff] }
 0x595   : > { %v11659_v32 = vrot.slane %v6061_v45, %v12789_v52  ;;  %v11662_v0 = vrot.slane %v6089_v63, %v12788_v16  ;;  %v11665_v22 = vrot.slane %v6089_v63, %v12789_v52  ;;  %v5187_v4 = vadd.f32 %v12800_v30, %v11364_v24  ;;  %v12806_v63 = vld [vmem:[#allocation36_spill] sm:$0xff] }
 0x596   : > { %v5189_v62 = vadd.f32 %v12801_v46, %v11397_v42  ;;  %v6020_v13 = vadd.f32 %v6012_v54, %v5989_v37  ;;  %v6022_v15 = vadd.f32 %v6014_v36, %v5991_v43  ;;  %v12803_v16 = vrot.slane %v12802_v44, 5  ;;  %v12809_v37 = vld [vmem:[#allocation60_spill] sm:$0xff]  ;;  %v5551_v46 = vld [vmem:[#allocation2 + $0x240] sm:$0xc0] }
 0x597   : > { %12799 = vst [vmem:[#allocation28_spill] sm:$0xff] %v11659_v32  ;;  %v6074_v33 = vmul.f32 %v11659_v32, %v11429_v41  ;;  %v6076_v45 = vmul.f32 %v11659_v32, %v11440_v31  ;;  %v12805_v56 = vrot.slane %v12804_v1, 5  ;;  %v12807_v61 = vrot.slane %v12806_v63, 5  ;;  %v11695_v44 = vld [vmem:[#allocation2 + $0x270] sm:$0xff]  ;;  %v12816_v32 = vld [vmem:[#allocation86_spill] sm:$0xff] }
 0x598   : > { %v12808_v24 = vmov %v12803_v16  ;;  %v12810_v54 = vrot.slane %v12809_v37, 5  ;;  %v12811_v36 = vrot.slane %v11323_v11, 5  ;;  %v12812_v31 = vrot.slane %v11307_v21, 5 }
 0x599   : > { %v5234_v52 = vsel %vm5160_vm5, %v12805_v56, %v12803_v16  ;;  %v5239_v42 = vsel %vm5160_vm5, %v12808_v24, %v12807_v61  ;;  %v6051_v16 = vadd.f32 %v6043_v51, %v6020_v13  ;;  %v6053_v1 = vadd.f32 %v6045_v8, %v6022_v15  ;;  %v12814_v61 = vld [vmem:[#allocation85_spill] sm:$0xff]  ;;  %v12823_v51 = vld [vmem:[#allocation159_spill] sm:$0xff] }
 0x59a   : > { %v5305_v41 = vsel %vm5160_vm5, %v12811_v36, %v12810_v54  ;;  %v12813_v43 = vmov %v12810_v54  ;;  %v5258_v56 = vadd.f32 %v5234_v52, %v5187_v4  ;;  %v5260_v63 = vadd.f32 %v5239_v42, %v5189_v62  ;;  %v12818_v54 = vld [vmem:[#allocation88_spill] sm:$0xff]  ;;  %v12825_v62 = vld [vmem:[#allocation37_spill] sm:$0xff] }
 0x59b   : > { %v5310_v30 = vsel %vm5160_vm5, %v12813_v43, %v12812_v31  ;;  %v12815_v24 = vrot.slane %v12814_v61, 6  ;;  %v12817_v49 = vrot.slane %v12816_v32, 6  ;;  %v12819_v36 = vrot.slane %v12818_v54, 6  ;;  %v12821_v31 = vld [vmem:[#allocation35_spill] sm:$0xff] }
 0x59c   : > { %v12822_v43 = vrot.slane %v12821_v31, 6  ;;  %v12824_v8 = vrot.slane %v12823_v51, 6  ;;  %v12826_v13 = vrot.slane %v12825_v62, 6  ;;  %v6082_v52 = vadd.f32 %v6074_v33, %v6051_v16  ;;  %v11717_v54 = vld [vmem:[#allocation2 + $0x2a0] sm:$0xff] }
 0x59d   : > { %v5377_v11 = vsel %vm5374_vm6, %v12817_v49, %v12815_v24  ;;  %v12820_v21 = vmov %v12815_v24  ;;  %v6084_v49 = vadd.f32 %v6076_v45, %v6053_v1  ;;  %v5329_v42 = vadd.f32 %v5305_v41, %v5258_v56  ;;  %v12828_v61 = vld [vmem:[#allocation79_spill] sm:$0xff]  ;;  %v5628_v45 = vld [vmem:[#allocation2 + $0x250] sm:$0xc0] }
 0x59e   : > { %v5382_v37 = vsel %vm5374_vm6, %v12820_v21, %v12819_v36  ;;  %v5448_v4 = vsel %vm5374_vm6, %v12824_v8, %v12822_v43  ;;  %v12827_v15 = vmov %v12822_v43  ;;  %v5331_v24 = vadd.f32 %v5310_v30, %v5260_v63  ;;  %v12829_v36 = vld [vmem:[#allocation82_spill] sm:$0xff]  ;;  %v11738_v56 = vld [vmem:[#allocation2 + $0x2b0] sm:$0xff] }
 0x59f   : > { %v5453_v32 = vsel %vm5374_vm6, %v12827_v15, %v12826_v13  ;;  %v5518_v21 = vrot.slane %v12828_v61, 6  ;;  %v12233_v35 = vrot.slane %v12829_v36, 6  ;;  %v5574_v51 = vmul.f32 %v12830_v3, %v5551_v46  ;;  %v11726_v41 = vld [vmem:[#allocation2 + $0x280] sm:$0xff] }
 0x5a0   : > { %v5576_v43 = vmul.f32 %v12830_v3, %v11695_v44  ;;  %v6102_v8 = vadd.f32 %v11665_v22, %v6082_v52  ;;  %v6104_v31 = vadd.f32 %v11665_v22, %v6084_v49  ;;  %v5401_v13 = vadd.f32 %v5377_v11, %v5329_v42  ;;  %v5705_v61 = vld [vmem:[#allocation2 + $0x260] sm:$0xc0] }
 0x5a1   : > { %v5403_v33 = vadd.f32 %v5382_v37, %v5331_v24  ;;  %v12831_v63 = vrot.slane %v11326_v7, 6  ;;  %v5524_v46 = vsel %vm5374_vm6, %v5518_v21, %v12233_v35  ;;  %v11736_v16 = vmul.f32 %v12830_v3, %v11717_v54 }
 0x5a2   : > { %v5594_v1 = vrot.slane %v5574_v51, 6  ;;  %v6110_v11 = vmax.f32 %v6102_v8, 0.0  ;;  %v6112_v37 = vmax.f32 %v6104_v31, 0.0  ;;  %v5472_v15 = vadd.f32 %v5448_v4, %v5401_v13  ;;  %v5782_v8 = vld [vmem:[#allocation2 + $0x240] sm:$0x80] }
 0x5a3   : > { %v5519_v30 = vsel %vm5374_vm6, %v12831_v63, %v5518_v21  ;;  %v5474_v52 = vadd.f32 %v5453_v32, %v5403_v33  ;;  %v5595_v49 = vrot.slane %v5576_v43, 6  ;;  %v12236_v7 = vrot.slane %v11736_v16, 6 }
 0x5a4   : > { %v5651_v42 = vmul.f32 %v11541_v48, %v5628_v45  ;;  %v5653_v24 = vmul.f32 %v11541_v48, %v11726_v41  ;;  %v7088_v21 = vpack.c.bf16 %v6112_v37, %v6110_v11  ;;  %v5543_v63 = vadd.f32 %v5519_v30, %v5472_v15  ;;  %v5854_v15 = vld [vmem:[#allocation2 + $0x250] sm:$0x80] }
 0x5a5   : > { %v5545_v35 = vadd.f32 %v5524_v46, %v5474_v52  ;;  %v11746_v51 = vmul.f32 %v11541_v48, %v11738_v56  ;;  %v5596_v4 = vsel %vm5374_vm6, %v5594_v1, %v5595_v49  ;;  %v5601_v32 = vsel %vm5374_vm6, %v5595_v49, %v12236_v7 }
 0x5a6   : > { %v5671_v43 = vrot.slane %v5651_v42, 6  ;;  %v5672_v31 = vrot.slane %v5653_v24, 6  ;;  %7089 = vmatprep.subr.bf16.mxu0 %v7088_v21  ;;  %7097 = vmatprep.subr.bf16.mxu1 %v7088_v21  ;;  %v5620_v13 = vadd.f32 %v5596_v4, %v5543_v63  ;;  %v5728_v30 = vmul.f32 %v11554_v25, %v5705_v61 }
 0x5a7   : > { %v5622_v33 = vadd.f32 %v5601_v32, %v5545_v35  ;;  %v12234_v45 = vrot.slane %v11746_v51, 6  ;;  %v5730_v11 = vmul.f32 %v11554_v25, %v11423_v53  ;;  %v11759_v1 = vmul.f32 %v11554_v25, %v11436_v9 }
 0x5a8   : > { %v5673_v46 = vsel %vm5374_vm6, %v5671_v43, %v5672_v31  ;;  %v5799_v37 = vmul.f32 %v11569_v29, %v5782_v8  ;;  %v5748_v49 = vrot.slane %v5728_v30, 6  ;;  %v5801_v42 = vmul.f32 %v11569_v29, %v11695_v44 }
 0x5a9   : > { %12832 = vst [vmem:[#allocation139_spill] sm:$0xff] %v11759_v1  ;;  %v5678_v35 = vsel %vm5374_vm6, %v5672_v31, %v12234_v45  ;;  %v5697_v52 = vadd.f32 %v5673_v46, %v5620_v13  ;;  %v5749_v61 = vrot.slane %v5730_v11, 6  ;;  %v12235_v21 = vrot.slane %v11759_v1, 6  ;;  %v5925_v31 = vld [vmem:[#allocation2 + $0x260] sm:$0x80] }
 0x5aa   : > { %v5699_v24 = vadd.f32 %v5678_v35, %v5622_v33  ;;  %v11770_v63 = vmul.f32 %v11569_v29, %v11717_v54  ;;  %v5820_v4 = vrot.slane %v5799_v37, 7  ;;  %v5821_v8 = vrot.slane %v5801_v42, 7 }
 0x5ab   : > { %v5871_v32 = vmul.f32 %v11598_v2, %v5854_v15  ;;  %v5873_v43 = vmul.f32 %v11598_v2, %v11726_v41  ;;  %v5750_v13 = vsel %vm5374_vm6, %v5748_v49, %v5749_v61  ;;  %v5755_v33 = vsel %vm5374_vm6, %v5749_v61, %v12235_v21 }
 0x5ac   : > { %v12240_v30 = vrot.slane %v11770_v63, 7  ;;  %v11782_v46 = vmul.f32 %v11598_v2, %v11738_v56  ;;  %v5774_v11 = vadd.f32 %v5750_v13, %v5697_v52  ;;  %v5776_v37 = vadd.f32 %v5755_v33, %v5699_v24 }
 0x5ad   : > { %v5822_v15 = vsel %vm5819_vm7, %v5820_v4, %v5821_v8  ;;  %v5891_v35 = vrot.slane %v5871_v32, 7  ;;  %v5892_v49 = vrot.slane %v5873_v43, 7  ;;  %v5942_v61 = vmul.f32 %v11604_v57, %v5925_v31 }
 0x5ae   : > { %v5827_v42 = vsel %vm5819_vm7, %v5821_v8, %v12240_v30  ;;  %v12239_v45 = vrot.slane %v11782_v46, 7  ;;  %v5846_v21 = vadd.f32 %v5822_v15, %v5774_v11  ;;  %v5944_v1 = vmul.f32 %v11604_v57, %v11423_v53 }
 0x5af   : > { %v5848_v7 = vadd.f32 %v5827_v42, %v5776_v37  ;;  %v11794_v52 = vmul.f32 %v11604_v57, %v11436_v9  ;;  %v5893_v24 = vsel %vm5819_vm7, %v5891_v35, %v5892_v49  ;;  %v5962_v8 = vrot.slane %v5942_v61, 7 }
 0x5b0   : > { %v5898_v4 = vsel %vm5819_vm7, %v5892_v49, %v12239_v45  ;;  %v6011_v32 = vmul.f32 %v11630_v47, %v11695_v44  ;;  %v5917_v43 = vadd.f32 %v5893_v24, %v5846_v21  ;;  %v5963_v13 = vrot.slane %v5944_v1, 7  ;;  %v12834_v49 = vld [vmem:[#allocation49_spill] sm:$0xff]  ;;  %v12840_v45 = vld [vmem:[#allocation94_spill] sm:$0xff] }
 0x5b1   : > { %v5919_v31 = vadd.f32 %v5898_v4, %v5848_v7  ;;  %v12238_v33 = vrot.slane %v11794_v52, 7  ;;  %v6013_v11 = vmul.f32 %v11630_v47, %v11717_v54  ;;  %v6042_v37 = vmul.f32 %v11640_v10, %v11726_v41  ;;  %v12833_v54 = vld [vmem:[#allocation104_spill] sm:$0xff] }
 0x5b2   : > { %v6044_v15 = vmul.f32 %v11640_v10, %v11738_v56  ;;  %v6073_v35 = vmul.f32 %v11656_v28, %v11423_v53  ;;  %v5964_v42 = vsel %vm5819_vm7, %v5962_v8, %v5963_v13  ;;  %v6075_v7 = vmul.f32 %v11656_v28, %v11436_v9  ;;  %v12837_v4 = vld [vmem:[#allocation168_spill] sm:$0xff] }
 0x5b3   : > { %v5969_v44 = vsel %vm5819_vm7, %v5963_v13, %v12238_v33  ;;  %v4966_v1 = vadd.f32 %v12833_v54, %v11332_v12  ;;  %v5988_v21 = vadd.f32 %v5964_v42, %v5917_v43  ;;  %v5045_v56 = vadd.f32 %v12834_v49, %v11477_v34  ;;  %v12838_v13 = vld [vmem:[#allocation101_spill] sm:$0xff] }
 0x5b4   : > { %v5990_v41 = vadd.f32 %v5969_v44, %v5919_v31  ;;  %v12835_v61 = vrot.slane %v11409_v19, 4  ;;  %v12836_v53 = vrot.slane %v11314_v5, 4  ;;  %v12839_v33 = vrot.slane %v12838_v13, 5  ;;  %v12842_v12 = vld [vmem:[#allocation121_spill] sm:$0xff]  ;;  %v12847_v44 = vld [vmem:[#allocation38_spill] sm:$0xff] }
 0x5b5   : > { %v5043_v8 = vadd.f32 %v12837_v4, %v4966_v1  ;;  %v12841_v9 = vrot.slane %v12840_v45, 5  ;;  %v12843_v43 = vrot.slane %v12842_v12, 5  ;;  %v12845_v42 = vld [vmem:[#allocation157_spill] sm:$0xff]  ;;  %v12848_v5 = vrot.slane %v12847_v44, 5 }
 0x5b6   : > { %v5102_v24 = vsel %vm4715_vm4, %v12836_v53, %v12835_v61  ;;  %v12844_v31 = vmov %v12839_v33  ;;  %v12846_v19 = vrot.slane %v12845_v42, 5  ;;  %v6019_v49 = vadd.f32 %v6011_v32, %v5988_v21  ;;  %v12849_v53 = vld [vmem:[#allocation181_spill] sm:$0xff] }
 0x5b7   : > { %v5174_v30 = vsel %vm5160_vm5, %v12841_v9, %v12839_v33  ;;  %v5178_v34 = vsel %vm5160_vm5, %v12844_v31, %v12843_v43  ;;  %v6021_v1 = vadd.f32 %v6013_v11, %v5990_v41  ;;  %v5122_v61 = vadd.f32 %v11527_v14, %v5045_v56  ;;  %v5483_v9 = vld [vmem:[#allocation2 + $0x268] sm:$0x3f]  ;;  %v12858_v41 = vld [vmem:[#allocation97_spill] sm:$0xff] }
 0x5b8   : > { %v5245_v54 = vsel %vm5160_vm5, %v12848_v5, %v12846_v19  ;;  %v12850_v45 = vrot.slane %v12849_v53, 5  ;;  %v12851_v33 = vmov %v12846_v19  ;;  %v5120_v13 = vadd.f32 %v5102_v24, %v5043_v8  ;;  %v12856_v11 = vld [vmem:[#allocation103_spill] sm:$0xff]  ;;  %v12860_v5 = vld [vmem:[#allocation122_spill] sm:$0xff] }
 0x5b9   : > { %v12852_v12 = vrot.slane %v11414_v23, 5  ;;  %v12853_v43 = vrot.slane %v11380_v39, 5  ;;  %v12854_v19 = vrot.slane %v11506_v20, 5  ;;  %v12857_v21 = vrot.slane %v12856_v11, 6  ;;  %v11868_v20 = vld [vmem:[#allocation2 + $0x2d8] sm:$0xff] }
 0x5ba   : > { %v5249_v4 = vsel %vm5160_vm5, %v12851_v33, %v12850_v45  ;;  %v12859_v56 = vrot.slane %v12858_v41, 6  ;;  %v6050_v44 = vadd.f32 %v6042_v37, %v6019_v49  ;;  %v6052_v24 = vadd.f32 %v6044_v15, %v6021_v1  ;;  %v7294_v33 = vld [vmem:[#allocation2 + $0x228] sm:$0xff] }
 0x5bb   : > { %v5316_v31 = vsel %vm5160_vm5, %v12853_v43, %v12852_v12  ;;  %v12855_v32 = vmov %v12852_v12  ;;  %v5194_v8 = vadd.f32 %v5178_v34, %v5122_v61  ;;  %v12861_v53 = vrot.slane %v12860_v5, 6  ;;  %v12863_v12 = vld [vmem:[#allocation39_spill] sm:$0xff] }
 0x5bc   : > { %v5320_v14 = vsel %vm5160_vm5, %v12855_v32, %v12854_v19  ;;  %v5388_v42 = vsel %vm5374_vm6, %v12859_v56, %v12857_v21  ;;  %v12862_v39 = vmov %v12857_v21  ;;  %v5192_v23 = vadd.f32 %v5174_v30, %v5120_v13  ;;  %v12864_v19 = vld [vmem:[#allocation182_spill] sm:$0xff]  ;;  %v12865_v41 = vld [vmem:[#allocation119_spill] sm:$0xff] }
 0x5bd   : > { %v5392_v45 = vsel %vm5374_vm6, %v12862_v39, %v12861_v53  ;;  %v5433_v43 = vmul.f32 %v7294_v33, %v12863_v12  ;;  %v5462_v32 = vrot.slane %v12864_v19, 6  ;;  %v5504_v21 = vmul.f32 %v12777_v17, %v11391_v18  ;;  %v5560_v39 = vld [vmem:[#allocation2 + $0x308] sm:$0x3f] }
 0x5be   : > { %v6081_v37 = vadd.f32 %v6073_v35, %v6050_v44  ;;  %v6083_v15 = vadd.f32 %v6075_v7, %v6052_v24  ;;  %v5265_v34 = vadd.f32 %v5249_v4, %v5194_v8  ;;  %v5506_v49 = vmul.f32 %v12777_v17, %v5483_v9  ;;  %v11879_v33 = vld [vmem:[#allocation2 + $0x2e8] sm:$0xff]  ;;  %v5637_v9 = vld [vmem:[#allocation2 + $0x318] sm:$0x3f] }
 0x5bf   : > { %v5263_v1 = vadd.f32 %v5245_v54, %v5192_v23  ;;  %v5458_v61 = vrot.slane %v5433_v43, 6  ;;  %v5529_v11 = vrot.slane %v5504_v21, 6  ;;  %v5581_v56 = vmul.f32 %v12865_v41, %v11868_v20  ;;  %v5714_v43 = vld [vmem:[#allocation2 + $0x328] sm:$0x3f] }
 0x5c0   : > { %v6101_v30 = vadd.f32 %v11662_v0, %v6081_v37  ;;  %v6103_v13 = vadd.f32 %v11662_v0, %v6083_v15  ;;  %v5336_v5 = vadd.f32 %v5320_v14, %v5265_v34  ;;  %v5533_v53 = vrot.slane %v5506_v49, 6 }
 0x5c1   : > { %v5334_v18 = vadd.f32 %v5316_v31, %v5263_v1  ;;  %v12866_v35 = vrot.slane %v12776_v38, 6  ;;  %v5463_v7 = vsel %vm5374_vm6, %v5458_v61, %v5462_v32  ;;  %v12867_v54 = vrot.slane %v11522_v26, 6 }
 0x5c2   : > { %v6109_v44 = vmax.f32 %v6101_v30, 0.0  ;;  %v6111_v24 = vmax.f32 %v6103_v13, 0.0  ;;  %v5408_v8 = vadd.f32 %v5392_v45, %v5336_v5  ;;  %v5534_v14 = vsel %vm5374_vm6, %v5529_v11, %v5533_v53  ;;  %v5857_v5 = vld [vmem:[#allocation2 + $0x318] sm:$0x7f] }
 0x5c3   : > { %v5459_v17 = vsel %vm5374_vm6, %v12866_v35, %v5458_v61  ;;  %v5530_v4 = vsel %vm5374_vm6, %v12867_v54, %v5529_v11  ;;  %v5406_v23 = vadd.f32 %v5388_v42, %v5334_v18  ;;  %v5583_v12 = vmul.f32 %v12865_v41, %v5560_v39  ;;  %v5785_v41 = vld [vmem:[#allocation2 + $0x308] sm:$0x7f] }
 0x5c4   : > { %v5606_v31 = vrot.slane %v5581_v56, 6  ;;  %v5658_v38 = vmul.f32 %v11544_v40, %v11879_v33  ;;  %v7090_v19 = vpack.c.bf16 %v6111_v24, %v6109_v44  ;;  %v5479_v32 = vadd.f32 %v5463_v7, %v5408_v8  ;;  %v12871_v8 = vld [vmem:[#allocation33_spill] sm:$0xff] }
 0x5c5   : > { %v5660_v26 = vmul.f32 %v11544_v40, %v5637_v9  ;;  %v5735_v21 = vmul.f32 %v11566_v58, %v11449_v60  ;;  %v5477_v37 = vadd.f32 %v5459_v17, %v5406_v23  ;;  %v12868_v45 = vrot.slane %v12787_v55, 6  ;;  %v12872_v23 = vld [vmem:[#allocation67_spill] sm:$0xff] }
 0x5c6   : > { %v5610_v42 = vrot.slane %v5583_v12, 6  ;;  %v5683_v34 = vrot.slane %v5658_v38, 6  ;;  %7091 = vmatpush1.bf16.msra.mxu0 %v7090_v19  ;;  %7099 = vmatpush1.bf16.msra.mxu1 %v7090_v19  ;;  %v5550_v49 = vadd.f32 %v5534_v14, %v5479_v32  ;;  %v5737_v61 = vmul.f32 %v11566_v58, %v5714_v43 }
 0x5c7   : > { %v5607_v15 = vsel %vm5374_vm6, %v12868_v45, %v5606_v31  ;;  %v5687_v1 = vrot.slane %v5660_v26, 6  ;;  %v5760_v11 = vrot.slane %v5735_v21, 6  ;;  %v5548_v56 = vadd.f32 %v5530_v4, %v5477_v37  ;;  %v5928_v4 = vld [vmem:[#allocation2 + $0x328] sm:$0x7f]  ;;  %v6028_v37 = vld [vmem:[#allocation2 + $0x318] sm:$0xff] }
 0x5c8   : > { %v5611_v40 = vsel %vm5374_vm6, %v5606_v31, %v5610_v42  ;;  %v12869_v30 = vrot.slane %v11563_v50, 6  ;;  %v5806_v55 = vmul.f32 %v11572_v59, %v11868_v20  ;;  %v12870_v18 = vrot.slane %v11580_v6, 6  ;;  %v5997_v21 = vld [vmem:[#allocation2 + $0x308] sm:$0xff] }
 0x5c9   : > { %v5627_v53 = vadd.f32 %v5611_v40, %v5550_v49  ;;  %v5688_v39 = vsel %vm5374_vm6, %v5683_v34, %v5687_v1  ;;  %v5764_v35 = vrot.slane %v5737_v61, 6  ;;  %v5625_v17 = vadd.f32 %v5607_v15, %v5548_v56  ;;  %v12874_v15 = vld [vmem:[#allocation70_spill] sm:$0xff]  ;;  %v12876_v49 = vld [vmem:[#allocation48_spill] sm:$0xff] }
 0x5ca   : > { %v5684_v13 = vsel %vm5374_vm6, %v12869_v30, %v5683_v34  ;;  %v5761_v58 = vsel %vm5374_vm6, %v12870_v18, %v5760_v11  ;;  %v5808_v7 = vmul.f32 %v11572_v59, %v5785_v41  ;;  %v5832_v54 = vrot.slane %v5806_v55, 7  ;;  %v12877_v41 = vld [vmem:[#allocation30_spill] sm:$0xff] }
 0x5cb   : > { %v5878_v50 = vmul.f32 %v11601_v27, %v11879_v33  ;;  %v5704_v9 = vadd.f32 %v5688_v39, %v5627_v53  ;;  %v5765_v44 = vsel %vm5374_vm6, %v5760_v11, %v5764_v35  ;;  %v5880_v24 = vmul.f32 %v11601_v27, %v5857_v5  ;;  %v12879_v5 = vld [vmem:[#allocation53_spill] sm:$0xff] }
 0x5cc   : > { %v5949_v14 = vmul.f32 %v12871_v8, %v11449_v60  ;;  %v5702_v6 = vadd.f32 %v5684_v13, %v5625_v17  ;;  %v12873_v12 = vrot.slane %v12872_v23, 7  ;;  %v5836_v38 = vrot.slane %v5808_v7, 7  ;;  %v12881_v17 = vld [vmem:[#allocation131_spill] sm:$0xff] }
 0x5cd   : > { %v5903_v59 = vrot.slane %v5878_v50, 7  ;;  %v5781_v43 = vadd.f32 %v5765_v44, %v5704_v9  ;;  %v5907_v19 = vrot.slane %v5880_v24, 7  ;;  %v5951_v32 = vmul.f32 %v12871_v8, %v5928_v4  ;;  %v12882_v50 = vld [vmem:[#allocation44_spill] sm:$0xff]  ;;  %v12883_v4 = vld [vmem:[#allocation102_spill] sm:$0xff]  ;;  %v12885_v24 = vld [vmem:[#allocation125_spill] sm:$0xff] }
 0x5ce   : > { %v5833_v31 = vsel %vm5819_vm7, %v12873_v12, %v5832_v54  ;;  %v5974_v26 = vrot.slane %v5949_v14, 7  ;;  %v5779_v45 = vadd.f32 %v5761_v58, %v5702_v6  ;;  %v5837_v27 = vsel %vm5819_vm7, %v5832_v54, %v5836_v38  ;;  %v12884_v44 = vld [vmem:[#allocation64_spill] sm:$0xff]  ;;  %v12886_v14 = vld [vmem:[#allocation155_spill] sm:$0xff]  ;;  %v12890_v38 = vld [vmem:[#allocation169_spill] sm:$0xff] }
 0x5cf   : > { %v12875_v42 = vrot.slane %v12874_v15, 7  ;;  %v6016_v1 = vmul.f32 %v12876_v49, %v11868_v20  ;;  %v5853_v61 = vadd.f32 %v5837_v27, %v5781_v43  ;;  %v5908_v11 = vsel %vm5819_vm7, %v5903_v59, %v5907_v19  ;;  %v12880_v20 = vld [vmem:[#allocation28_spill] sm:$0xff]  ;;  %v12893_v19 = vld [vmem:[#allocation42_spill] sm:$0xff] }
 0x5d0   : > { %v12878_v56 = vrot.slane %v12877_v41, 7  ;;  %v5978_v30 = vrot.slane %v5951_v32, 7  ;;  %v5851_v13 = vadd.f32 %v5833_v31, %v5779_v45  ;;  %v6018_v55 = vmul.f32 %v12876_v49, %v5997_v21  ;;  %v12888_v6 = vld [vmem:[#allocation36_spill] sm:$0xff]  ;;  %v12900_v41 = vld [vmem:[#allocation99_spill] sm:$0xff] }
 0x5d1   : > { %v5904_v34 = vsel %vm5819_vm7, %v12875_v42, %v5903_v59  ;;  %v6047_v53 = vmul.f32 %v12879_v5, %v11879_v33  ;;  %v6049_v39 = vmul.f32 %v12879_v5, %v6028_v37  ;;  %v5924_v18 = vadd.f32 %v5908_v11, %v5853_v61  ;;  %v12897_v45 = vld [vmem:[#allocation52_spill] sm:$0xff] }
 0x5d2   : > { %v5975_v40 = vsel %vm5819_vm7, %v12878_v56, %v5974_v26  ;;  %v5979_v58 = vsel %vm5819_vm7, %v5974_v26, %v5978_v30  ;;  %v6078_v35 = vmul.f32 %v12880_v20, %v11449_v60  ;;  %v6080_v7 = vmul.f32 %v12880_v20, %v12881_v17  ;;  %v12895_v26 = vld [vmem:[#allocation132_spill] sm:$0xff] }
 0x5d3   : > { %v5922_v54 = vadd.f32 %v5904_v34, %v5851_v13  ;;  %v5191_v9 = vadd.f32 %v12883_v4, %v12882_v50  ;;  %v5193_v8 = vadd.f32 %v12885_v24, %v12884_v44  ;;  %v12887_v33 = vrot.slane %v12886_v14, 5  ;;  %v5559_v34 = vld [vmem:[#allocation2 + $0x300] sm:$0x3f]  ;;  %v12902_v30 = vld [vmem:[#allocation88_spill] sm:$0xff] }
 0x5d4   : > { %v12889_v23 = vrot.slane %v12888_v6, 5  ;;  %v5995_v31 = vadd.f32 %v5979_v58, %v5924_v18  ;;  %v12891_v59 = vrot.slane %v12890_v38, 5  ;;  %v12894_v32 = vrot.slane %v12893_v19, 5  ;;  %v11968_v18 = vld [vmem:[#allocation2 + $0x2d0] sm:$0xff]  ;;  %v11970_v58 = vld [vmem:[#allocation2 + $0x2e0] sm:$0xff] }
 0x5d5   : > { %v12892_v60 = vmov %v12887_v33  ;;  %v12896_v21 = vrot.slane %v12895_v26, 5  ;;  %v12898_v27 = vrot.slane %v12897_v45, 5  ;;  %v5993_v49 = vadd.f32 %v5975_v40, %v5922_v54  ;;  %v12904_v17 = vld [vmem:[#allocation120_spill] sm:$0xff] }
 0x5d6   : > { %v5243_v12 = vsel %vm5160_vm5, %v12889_v23, %v12887_v33  ;;  %v5247_v43 = vsel %vm5160_vm5, %v12892_v60, %v12891_v59  ;;  %v12899_v15 = vmov %v12894_v32  ;;  %v12901_v56 = vrot.slane %v12900_v41, 6  ;;  %v12907_v40 = vld [vmem:[#allocation156_spill] sm:$0xff]  ;;  %v5713_v41 = vld [vmem:[#allocation2 + $0x320] sm:$0x3f] }
 0x5d7   : > { %v5314_v37 = vsel %vm5160_vm5, %v12896_v21, %v12894_v32  ;;  %v5318_v42 = vsel %vm5160_vm5, %v12899_v15, %v12898_v27  ;;  %v5262_v61 = vadd.f32 %v5243_v12, %v5191_v9  ;;  %v5264_v11 = vadd.f32 %v5247_v43, %v5193_v8  ;;  %v12910_v8 = vld [vmem:[#allocation170_spill] sm:$0xff] }
 0x5d8   : > { %v12903_v13 = vrot.slane %v12902_v30, 6  ;;  %v6026_v20 = vadd.f32 %v6018_v55, %v5995_v31  ;;  %v12905_v50 = vrot.slane %v12904_v17, 6  ;;  %v12906_v4 = vmov %v12901_v56  ;;  %v12913_v31 = vld [vmem:[#allocation134_spill] sm:$0xff] }
 0x5d9   : > { %v12908_v54 = vrot.slane %v12907_v40, 6  ;;  %v12909_v9 = vrot.slane %v12825_v62, 6  ;;  %v12911_v14 = vrot.slane %v12910_v8, 6  ;;  %v6024_v23 = vadd.f32 %v6016_v1, %v5993_v49  ;;  %v5636_v62 = vld [vmem:[#allocation2 + $0x310] sm:$0x3f]  ;;  %v12915_v27 = vld [vmem:[#allocation62_spill] sm:$0xff] }
 0x5da   : > { %v5386_v5 = vsel %vm5374_vm6, %v12903_v13, %v12901_v56  ;;  %v5390_v44 = vsel %vm5374_vm6, %v12906_v4, %v12905_v50  ;;  %v5333_v55 = vadd.f32 %v5314_v37, %v5262_v61  ;;  %v5335_v12 = vadd.f32 %v5318_v42, %v5264_v11 }
 0x5db   : > { %v5457_v24 = vsel %vm5374_vm6, %v12909_v9, %v12908_v54  ;;  %v12912_v33 = vmov %v12908_v54  ;;  %v5527_v38 = vrot.slane %v12913_v31, 6  ;;  %v6057_v59 = vadd.f32 %v6049_v39, %v6026_v20 }
 0x5dc   : > { %v5461_v6 = vsel %vm5374_vm6, %v12912_v33, %v12911_v14  ;;  %v5580_v60 = vmul.f32 %v12830_v3, %v11968_v18  ;;  %v5582_v43 = vmul.f32 %v12830_v3, %v5559_v34  ;;  %v5657_v19 = vmul.f32 %v11541_v48, %v11970_v58 }
 0x5dd   : > { %v6055_v32 = vadd.f32 %v6047_v53, %v6024_v23  ;;  %v5405_v26 = vadd.f32 %v5386_v5, %v5333_v55  ;;  %v5407_v21 = vadd.f32 %v5390_v44, %v5335_v12  ;;  %v12914_v45 = vrot.slane %v12829_v36, 6  ;;  %v12919_v44 = vld [vmem:[#allocation129_spill] sm:$0xff] }
 0x5de   : > { %v6088_v37 = vadd.f32 %v6080_v7, %v6057_v59  ;;  %v12916_v15 = vrot.slane %v12915_v27, 6  ;;  %v5604_v42 = vrot.slane %v5580_v60, 6  ;;  %v5608_v49 = vrot.slane %v5582_v43, 6 }
 0x5df   : > { %v5528_v1 = vsel %vm5374_vm6, %v12914_v45, %v5527_v38  ;;  %v6086_v61 = vadd.f32 %v6078_v35, %v6055_v32  ;;  %v5476_v3 = vadd.f32 %v5457_v24, %v5405_v26  ;;  %v5478_v34 = vadd.f32 %v5461_v6, %v5407_v21  ;;  %v5784_v35 = vld [vmem:[#allocation2 + $0x300] sm:$0x7f] }
 0x5e0   : > { %v5532_v39 = vsel %vm5374_vm6, %v5527_v38, %v12916_v15  ;;  %v5659_v11 = vmul.f32 %v11541_v48, %v5636_v62  ;;  %v6108_v53 = vadd.f32 %v11665_v22, %v6088_v37  ;;  %v12917_v56 = vrot.slane %v11736_v16, 6  ;;  %v12920_v38 = vld [vmem:[#allocation139_spill] sm:$0xff] }
 0x5e1   : > { %v5609_v7 = vsel %vm5374_vm6, %v5604_v42, %v5608_v49  ;;  %v5681_v30 = vrot.slane %v5657_v19, 6  ;;  %v6106_v13 = vadd.f32 %v11665_v22, %v6086_v61  ;;  %v5547_v5 = vadd.f32 %v5528_v1, %v5476_v3 }
 0x5e2   : > { %v5605_v36 = vsel %vm5374_vm6, %v12917_v56, %v5604_v42  ;;  %v5549_v20 = vadd.f32 %v5532_v39, %v5478_v34  ;;  %v5685_v17 = vrot.slane %v5659_v11, 6  ;;  %v6116_v50 = vmax.f32 %v6108_v53, 0.0 }
 0x5e3   : > { %v12918_v4 = vrot.slane %v11746_v51, 6  ;;  %v5734_v40 = vmul.f32 %v11554_v25, %v12919_v44  ;;  %v5736_v16 = vmul.f32 %v11554_v25, %v5713_v41  ;;  %v6114_v54 = vmax.f32 %v6106_v13, 0.0  ;;  %v5856_v51 = vld [vmem:[#allocation2 + $0x310] sm:$0x7f]  ;;  %v5927_v25 = vld [vmem:[#allocation2 + $0x320] sm:$0x7f] }
 0x5e4   : > { %v5624_v9 = vadd.f32 %v5605_v36, %v5547_v5  ;;  %v5626_v24 = vadd.f32 %v5609_v7, %v5549_v20  ;;  %v5686_v8 = vsel %vm5374_vm6, %v5681_v30, %v5685_v17  ;;  %v5805_v33 = vmul.f32 %v11569_v29, %v11968_v18  ;;  %v5996_v41 = vld [vmem:[#allocation2 + $0x300] sm:$0xff] }
 0x5e5   : > { %v5682_v48 = vsel %vm5374_vm6, %v12918_v4, %v5681_v30  ;;  %v5758_v22 = vrot.slane %v5734_v40, 6  ;;  %v5762_v14 = vrot.slane %v5736_v16, 6  ;;  %v5807_v6 = vmul.f32 %v11569_v29, %v5784_v35  ;;  %v12925_v40 = vld [vmem:[#allocation51_spill] sm:$0xff] }
 0x5e6   : > { %v7092_v23 = vpack.c.bf16 %v6116_v50, %v6114_v54  ;;  %v5701_v55 = vadd.f32 %v5682_v48, %v5624_v9  ;;  %v5703_v12 = vadd.f32 %v5686_v8, %v5626_v24  ;;  %v5877_v31 = vmul.f32 %v11598_v2, %v11970_v58  ;;  %v6310_v8 = vld [vmem:[#allocation15 + $0x88] sm:$0xff] }
 0x5e7   : > { %v12921_v59 = vrot.slane %v12920_v38, 6  ;;  %v5763_v43 = vsel %vm5374_vm6, %v5758_v22, %v5762_v14  ;;  %v5830_v62 = vrot.slane %v5805_v33, 7  ;;  %v5834_v19 = vrot.slane %v5807_v6, 7  ;;  %v6420_v38 = vld [vmem:[#allocation15 + $0x198] sm:$0xff] }
 0x5e8   : > { %7093 = vmatprep.subr.bf16.mxu0 %v7092_v23  ;;  %7101 = vmatprep.subr.bf16.mxu1 %v7092_v23  ;;  %v5780_v29 = vadd.f32 %v5763_v43, %v5703_v12  ;;  %v5879_v26 = vmul.f32 %v11598_v2, %v5856_v51  ;;  %v5901_v21 = vrot.slane %v5877_v31, 7  ;;  %v12922_v45 = vrot.slane %v11770_v63, 7  ;;  %v6293_v51 = vld [vmem:[#allocation15] sm:$0xff]  ;;  %v6402_v12 = vld [vmem:[#allocation15 + $0x108] sm:$0xff]  ;;  %v6312_v31 = vld [vmem:[#allocation15 + $0x98] sm:$0xff] }
 0x5e9   : > { %v5759_v60 = vsel %vm5374_vm6, %v12921_v59, %v5758_v22  ;;  %v5835_v37 = vsel %vm5819_vm7, %v5830_v62, %v5834_v19  ;;  %v5948_v27 = vmul.f32 %v11604_v57, %v12919_v44  ;;  %v5950_v15 = vmul.f32 %v11604_v57, %v5927_v25  ;;  %v6418_v22 = vld [vmem:[#allocation15 + $0x188] sm:$0xff]  ;;  %v6419_v25 = vld [vmem:[#allocation15 + $0x190] sm:$0xff]  ;;  %v6117_v59 = vld [vmem:[#allocation14] sm:$0xff] }
 0x5ea   : > { %v5778_v32 = vadd.f32 %v5759_v60, %v5701_v55  ;;  %v5831_v1 = vsel %vm5819_vm7, %v12922_v45, %v5830_v62  ;;  %v5852_v42 = vadd.f32 %v5835_v37, %v5780_v29  ;;  %v5905_v49 = vrot.slane %v5879_v26, 7  ;;  %v6401_v55 = vld [vmem:[#allocation15 + $0x100] sm:$0xff]  ;;  %v6295_v62 = vld [vmem:[#allocation15 + $0x10] sm:$0xff]  ;;  %v6296_v19 = vld [vmem:[#allocation15 + $0x18] sm:$0xff] }
 0x5eb   : > { %v12923_v61 = vrot.slane %v11782_v46, 7  ;;  %v5972_v2 = vrot.slane %v5948_v27, 7  ;;  %v5976_v34 = vrot.slane %v5950_v15, 7  ;;  %v12924_v56 = vrot.slane %v11794_v52, 7  ;;  %v6027_v46 = vld [vmem:[#allocation2 + $0x310] sm:$0xff]  ;;  %v6313_v45 = vld [vmem:[#allocation15 + $0xa0] sm:$0xff] }
 0x5ec   : > { %v5850_v39 = vadd.f32 %v5831_v1, %v5778_v32  ;;  %v5906_v63 = vsel %vm5819_vm7, %v5901_v21, %v5905_v49  ;;  %v6015_v30 = vmul.f32 %v11630_v47, %v11968_v18  ;;  %v6017_v5 = vmul.f32 %v11630_v47, %v5996_v41  ;;  %v6309_v47 = vld [vmem:[#allocation15 + $0x80] sm:$0xff]  ;;  %v6403_v26 = vld [vmem:[#allocation15 + $0x110] sm:$0xff]  ;;  %v6314_v1 = vld [vmem:[#allocation15 + $0xa8] sm:$0xff] }
 0x5ed   : > { %v5902_v3 = vsel %vm5819_vm7, %v12923_v61, %v5901_v21  ;;  %v5923_v53 = vadd.f32 %v5906_v63, %v5852_v42  ;;  %v5973_v36 = vsel %vm5819_vm7, %v12924_v56, %v5972_v2  ;;  %v5977_v57 = vsel %vm5819_vm7, %v5972_v2, %v5976_v34  ;;  %v6404_v21 = vld [vmem:[#allocation15 + $0x118] sm:$0xff]  ;;  %v6421_v37 = vld [vmem:[#allocation15 + $0x1a0] sm:$0xff]  ;;  %v6422_v27 = vld [vmem:[#allocation15 + $0x1a8] sm:$0xff] }
 0x5ee   : > { %v5921_v11 = vadd.f32 %v5902_v3, %v5850_v39  ;;  %v6046_v17 = vmul.f32 %v11640_v10, %v11970_v58  ;;  %v6048_v50 = vmul.f32 %v11640_v10, %v6027_v46  ;;  %v6077_v4 = vmul.f32 %v11656_v28, %v12919_v44  ;;  %v6417_v58 = vld [vmem:[#allocation15 + $0x180] sm:$0xff]  ;;  %v6294_v44 = vld [vmem:[#allocation15 + $0x8] sm:$0xff]  ;;  %v6205_v42 = vld [vmem:[#allocation14 + $0x18] sm:$0xff] }
 0x5ef   : > { %v5994_v13 = vadd.f32 %v5977_v57, %v5923_v53  ;;  %v6079_v16 = vmul.f32 %v11656_v28, %v12925_v40  ;;  %v7104_v33 = vpack.c.bf16 %v6310_v8, %v6309_v47  ;;  %v7136_v6 = vpack.c.bf16 %v6418_v22, %v6417_v58  ;;  %v6311_v28 = vld [vmem:[#allocation15 + $0x90] sm:$0xff]  ;;  %v6118_v39 = vld [vmem:[#allocation14 + $0x8] sm:$0xff]  ;;  %v6297_v3 = vld [vmem:[#allocation15 + $0x20] sm:$0xff] }
 0x5f0   : > { %v5992_v7 = vadd.f32 %v5973_v36, %v5921_v11  ;;  %v7106_v60 = vpack.c.bf16 %v6294_v44, %v6293_v51  ;;  %v7138_v43 = vpack.c.bf16 %v6402_v12, %v6401_v55  ;;  %v7108_v32 = vpack.c.bf16 %v6312_v31, %v6311_v28  ;;  %v6298_v2 = vld [vmem:[#allocation15 + $0x28] sm:$0xff]  ;;  %v6405_v11 = vld [vmem:[#allocation15 + $0x120] sm:$0xff]  ;;  %v6315_v53 = vld [vmem:[#allocation15 + $0xb0] sm:$0xff] }
 0x5f1   : > { %v6025_v35 = vadd.f32 %v6017_v5, %v5994_v13  ;;  %v7140_v29 = vpack.c.bf16 %v6420_v38, %v6419_v25  ;;  %v12926_v15 = vmov 0.0   ;;  %v7110_v49 = vpack.c.bf16 %v6296_v19, %v6295_v62  ;;  %v6406_v41 = vld [vmem:[#allocation15 + $0x128] sm:$0xff]  ;;  %v6316_v56 = vld [vmem:[#allocation15 + $0xb8] sm:$0xff]  ;;  %v6423_v36 = vld [vmem:[#allocation15 + $0x1b0] sm:$0xff] }
 0x5f2   : > { %v6023_v20 = vadd.f32 %v6015_v30, %v5992_v7  ;;  %v7142_v61 = vpack.c.bf16 %v6404_v21, %v6403_v26  ;;  %v7112_v34 = vpack.c.bf16 %v6314_v1, %v6313_v45  ;;  %v7144_v63 = vpack.c.bf16 %v6422_v27, %v6421_v37  ;;  %v6424_v57 = vld [vmem:[#allocation15 + $0x1b8] sm:$0xff]  ;;  %v6299_v46 = vld [vmem:[#allocation15 + $0x30] sm:$0xff]  ;;  %v6410_v8 = vld [vmem:[#allocation15 + $0x148] sm:$0xff] }
 0x5f3   : > { %v6056_v48 = vadd.f32 %v6048_v50, %v6025_v35  ;;  %v7114_v7 = vpack.c.bf16 %v6298_v2, %v6297_v3  ;;  %v7146_v30 = vpack.c.bf16 %v6406_v41, %v6405_v11  ;;  %v6300_v13 = vld [vmem:[#allocation15 + $0x38] sm:$0xff]  ;;  %v7116_v5 = vpack.c.bf16 %v6316_v56, %v6315_v53  ;;  %v6317_v50 = vld [vmem:[#allocation15 + $0xc0] sm:$0xff]  ;;  %v6319_v58 = vld [vmem:[#allocation15 + $0xd0] sm:$0xff] }
 0x5f4   : > { %v6054_v52 = vadd.f32 %v6046_v17, %v6023_v20  ;;  %v7148_v20 = vpack.c.bf16 %v6424_v57, %v6423_v36  ;;  %v6407_v17 = vld [vmem:[#allocation15 + $0x130] sm:$0xff]  ;;  %v6408_v35 = vld [vmem:[#allocation15 + $0x138] sm:$0xff]  ;;  %v7118_v40 = vpack.c.bf16 %v6300_v13, %v6299_v46  ;;  %v6321_v31 = vld [vmem:[#allocation15 + $0xe0] sm:$0xff] }
 0x5f5   : > { %v6087_v54 = vadd.f32 %v6079_v16, %v6056_v48  ;;  %v6426_v48 = vld [vmem:[#allocation15 + $0x1c8] sm:$0xff]  ;;  %v7150_v16 = vpack.c.bf16 %v6408_v35, %v6407_v17  ;;  %v6320_v22 = vld [vmem:[#allocation15 + $0xd8] sm:$0xff]  ;;  %v6303_v51 = vld [vmem:[#allocation15 + $0x50] sm:$0xff] }
 0x5f6   : > { %v6085_v18 = vadd.f32 %v6077_v4, %v6054_v52  ;;  %v6318_v52 = vld [vmem:[#allocation15 + $0xc8] sm:$0xff]  ;;  %v6425_v4 = vld [vmem:[#allocation15 + $0x1c0] sm:$0xff]  ;;  %v6304_v44 = vld [vmem:[#allocation15 + $0x58] sm:$0xff] }
 0x5f7   : > { %v6107_v24 = vadd.f32 %v11662_v0, %v6087_v54  ;;  %v6302_v54 = vld [vmem:[#allocation15 + $0x48] sm:$0xff]  ;;  %v7152_v47 = vpack.c.bf16 %v6426_v48, %v6425_v4  ;;  %v6411_v12 = vld [vmem:[#allocation15 + $0x150] sm:$0xff]  ;;  %v6412_v28 = vld [vmem:[#allocation15 + $0x158] sm:$0xff] }
 0x5f8   : > { %v6105_v9 = vadd.f32 %v11662_v0, %v6085_v18  ;;  %v6204_v0 = vld [vmem:[#allocation14 + $0x10] sm:$0xff]  ;;  %v6301_v18 = vld [vmem:[#allocation15 + $0x40] sm:$0xff]  ;;  %v6322_v25 = vld [vmem:[#allocation15 + $0xe8] sm:$0xff] }
 0x5f9   : > { %v6115_v10 = vmax.f32 %v6107_v24, 0.0  ;;  %v6409_v24 = vld [vmem:[#allocation15 + $0x140] sm:$0xff]  ;;  %v7128_v62 = vpack.c.bf16 %v6322_v25, %v6321_v31  ;;  %v6414_v26 = vld [vmem:[#allocation15 + $0x168] sm:$0xff]  ;;  %v6323_v1 = vld [vmem:[#allocation15 + $0xf0] sm:$0xff] }
 0x5fa   : > { %v6113_v14 = vmax.f32 %v6105_v9, 0.0  ;;  %v7120_v9 = vpack.c.bf16 %v6318_v52, %v6317_v50  ;;  %v6429_v38 = vld [vmem:[#allocation15 + $0x1e0] sm:$0xff]  ;;  %v6324_v37 = vld [vmem:[#allocation15 + $0xf8] sm:$0xff]  ;;  %v6431_v27 = vld [vmem:[#allocation15 + $0x1f0] sm:$0xff] }
 0x5fb   : > { %v6415_v2 = vld [vmem:[#allocation15 + $0x170] sm:$0xff] }
 0x5fc   : > { %v7094_v23 = vpack.c.bf16 %v6115_v10, %v6113_v14  ;;  %v6427_v14 = vld [vmem:[#allocation15 + $0x1d0] sm:$0xff]  ;;  %v6428_v10 = vld [vmem:[#allocation15 + $0x1d8] sm:$0xff] }
 0x5fd   : > { %v7156_v55 = vpack.c.bf16 %v6428_v10, %v6427_v14 }
 0x5fe   : > { %7095 = vmatpush1.bf16.msra.mxu0 %v7094_v23  ;;  %7103 = vmatpush1.bf16.msra.mxu1 %v7094_v23  ;;  %v7124_v23 = vpack.c.bf16 %v6320_v22, %v6319_v58 }
 0x5ff   : > { %7105 = vmatprep.subr.bf16.mxu0 %v7104_v33  ;;  %7137 = vmatprep.subr.bf16.mxu1 %v7136_v6  ;;  %v7122_v33 = vpack.c.bf16 %v6302_v54, %v6301_v18  ;;  %v7154_v6 = vpack.c.bf16 %v6410_v8, %v6409_v24 }
 0x601   : > { %6813 = vmatmul.mubr.msk.f32.vlgmr.msra.gmra.mrb[136].mxu0 %vm6119_vm8, %v6117_v59  ;;  %6815 = vmatmul.mubr.msk.f32.vlgmr.msra.gmra.mrb[136].mxu1 %vm6119_vm8, %v6204_v0  ;;  %v6430_v59 = vld [vmem:[#allocation15 + $0x1e8] sm:$0xff]  ;;  %v7126_v0 = vpack.c.bf16 %v6304_v44, %v6303_v51 }
 0x602   : > { %6196 = vmatprep.mubr.f32.mxu0 %v12926_v15  ;;  %6282 = vmatprep.mubr.f32.mxu1 %v12926_v15  ;;  %v7160_v19 = vpack.c.bf16 %v6430_v59, %v6429_v38  ;;  %v7132_v15 = vpack.c.bf16 %v6324_v37, %v6323_v1 }
 0x603   : > { %7107 = vmatpush3.bf16.msra.mxu0 %v7106_v60  ;;  %7139 = vmatpush3.bf16.msra.mxu1 %v7138_v43  ;;  %v7158_v60 = vpack.c.bf16 %v6412_v28, %v6411_v12  ;;  %v6305_v43 = vld [vmem:[#allocation15 + $0x60] sm:$0xff] }
 0x604   : > { %7109 = vmatprep.subr.bf16.mxu0 %v7108_v32  ;;  %7141 = vmatprep.subr.bf16.mxu1 %v7140_v29  ;;  %v6306_v32 = vld [vmem:[#allocation15 + $0x68] sm:$0xff]  ;;  %v6413_v29 = vld [vmem:[#allocation15 + $0x160] sm:$0xff] }
 0x605   : > { %6814 = vmatmul.mubr.msk.f32.gmra.mrb[138].mxu0 %vm6119_vm8, %v6118_v39  ;;  %6816 = vmatmul.mubr.msk.f32.gmra.mrb[138].mxu1 %vm6119_vm8, %v6205_v42  ;;  %v7130_v21 = vpack.c.bf16 %v6306_v32, %v6305_v43  ;;  %v7162_v45 = vpack.c.bf16 %v6414_v26, %v6413_v29  ;;  %v6432_v39 = vld [vmem:[#allocation15 + $0x1f8] sm:$0xff]  ;;  %v6307_v42 = vld [vmem:[#allocation15 + $0x70] sm:$0xff] }
 0x607   : > { %7111 = vmatpush3.bf16.msra.mxu0 %v7110_v49  ;;  %7143 = vmatpush3.bf16.msra.mxu1 %v7142_v61  ;;  %v6308_v49 = vld [vmem:[#allocation15 + $0x78] sm:$0xff]  ;;  %v7164_v61 = vpack.c.bf16 %v6432_v39, %v6431_v27 }
 0x608   : > { %7113 = vmatprep.subr.bf16.mxu0 %v7112_v34  ;;  %7145 = vmatprep.subr.bf16.mxu1 %v7144_v63  ;;  %v7134_v3 = vpack.c.bf16 %v6308_v49, %v6307_v42  ;;  %v6416_v34 = vld [vmem:[#allocation15 + $0x178] sm:$0xff] }
 0x609   : > { %v7166_v63 = vpack.c.bf16 %v6416_v34, %v6415_v2 }
 0x60b   : > { %7115 = vmatpush3.bf16.msra.mxu0 %v7114_v7  ;;  %7147 = vmatpush3.bf16.msra.mxu1 %v7146_v30 }
 0x60c   : > { %7117 = vmatprep.subr.bf16.mxu0 %v7116_v5  ;;  %7149 = vmatprep.subr.bf16.mxu1 %v7148_v20 }
 0x60f   : > { %7119 = vmatpush3.bf16.msra.mxu0 %v7118_v40  ;;  %7151 = vmatpush3.bf16.msra.mxu1 %v7150_v16 }
 0x610   : > { %7121 = vmatprep.subr.bf16.mxu0 %v7120_v9  ;;  %7153 = vmatprep.subr.bf16.mxu1 %v7152_v47 }
 0x613   : > { %7123 = vmatpush3.bf16.msra.mxu0 %v7122_v33  ;;  %7155 = vmatpush3.bf16.msra.mxu1 %v7154_v6 }
 0x614   : > { %7125 = vmatprep.subr.bf16.mxu0 %v7124_v23  ;;  %7157 = vmatprep.subr.bf16.mxu1 %v7156_v55 }
 0x617   : > { %7127 = vmatpush3.bf16.msra.mxu0 %v7126_v0  ;;  %7159 = vmatpush3.bf16.msra.mxu1 %v7158_v60 }
 0x618   : > { %7129 = vmatprep.subr.bf16.mxu0 %v7128_v62  ;;  %7161 = vmatprep.subr.bf16.mxu1 %v7160_v19 }
 0x61b   : > { %7131 = vmatpush3.bf16.msra.mxu0 %v7130_v21  ;;  %7163 = vmatpush3.bf16.msra.mxu1 %v7162_v45 }
 0x61c   : > { %7133 = vmatprep.subr.bf16.mxu0 %v7132_v15  ;;  %7165 = vmatprep.subr.bf16.mxu1 %v7164_v61 }
 0x61f   : > { %7135 = vmatpush3.bf16.msra.mxu0 %v7134_v3  ;;  %7167 = vmatpush3.bf16.msra.mxu1 %v7166_v63 }
 0x6d4   : > { %v6192_v11 = vpop.f32.mrb[136].mxu0  ;;  %v6278_v41 = vpop.f32.mrb[136].mxu1 }
 0x6d5   : > { %v6289_v53 = vmax.f32 %v6192_v11, %v6278_v41  ;;  %v6194_v56 = vpop.f32.mrb[137].mxu0  ;;  %v6280_v36 = vpop.f32.mrb[137].mxu1 }
 0x6d6   : > { %v6290_v57 = vmax.f32 %v6194_v56, %v6280_v36 }
 0x6d8   : > { %v6198_v7 = vpop.f32.mrb[138].mxu0  ;;  %v6284_v30 = vpop.f32.mrb[138].mxu1  ;;  %6389 = vmatprep.mubr.f32.mxu0 %v6290_v57  ;;  %6497 = vmatprep.mubr.f32.mxu1 %v6290_v57 }
 0x6d9   : > { %v6291_v46 = vmax.f32 %v6198_v7, %v6284_v30  ;;  %v6200_v13 = vpop.f32.mrb[139].mxu0  ;;  %v6286_v5 = vpop.f32.mrb[139].mxu1  ;;  %6390 = vmatmul.mubr.f32.vlgmr.msra.gmra.mrb[140].mxu0 %v6289_v53  ;;  %6498 = vmatmul.mubr.f32.vlgmr.msra.gmra.mrb[140].mxu1 %v6289_v53 }
 0x6da   : > { %v6292_v20 = vmax.f32 %v6200_v13, %v6286_v5 }
 0x6dc   : > { %6394 = vmatprep.mubr.f32.mxu0 %v6292_v20  ;;  %6502 = vmatprep.mubr.f32.mxu1 %v6292_v20 }
 0x6dd   : > { %6395 = vmatmul.mubr.f32.gmra.mrb[142].mxu0 %v6291_v46  ;;  %6503 = vmatmul.mubr.f32.gmra.mrb[142].mxu1 %v6291_v46 }
 0x7ac   : > { %v6852_v17 = vpop.f32.mrb[140].mxu0  ;;  %v6890_v35 = vpop.f32.mrb[140].mxu1 }
 0x7ad   : > { %v6853_v50 = vpop.f32.mrb[141].mxu0  ;;  %v6891_v52 = vpop.f32.mrb[141].mxu1 }
 0x7ae   : > { %v6854_v4 = vadd.f32 %v6853_v50, %v6852_v17  ;;  %v6892_v48 = vadd.f32 %v6891_v52, %v6890_v35 }
 0x7b0   : > { %v6508_v40 = vmax.f32 %v6854_v4, %v6892_v48  ;;  %v6855_v16 = vpop.f32.mrb[142].mxu0  ;;  %v6893_v18 = vpop.f32.mrb[142].mxu1 }
 0x7b1   : > { %v6856_v54 = vpop.f32.mrb[143].mxu0  ;;  %v6894_v9 = vpop.f32.mrb[143].mxu1 }
 0x7b2   : > { %6510 = vst [vmem:[%s441_s15] sm:$0xff] %v6508_v40  ;;  %v6857_v47 = vadd.f32 %v6856_v54, %v6855_v16  ;;  %v6895_v24 = vadd.f32 %v6894_v9, %v6893_v18 }
 0x7b4   : > { %v6509_v8 = vmax.f32 %v6857_v47, %v6895_v24 }
 0x7b6   : > { %6511 = vst [vmem:[%s441_s15 + $0x8] sm:$0xff] %v6509_v8 }
 0x7b7 PF: > { %s25_s30 = sadd.s32 1, %s7519_s30  }
 0x7b8   : > { %p22_p1 = scmp.ge.s32.totalorder %s25_s30, 4  }
 0x7ba   :  { %24 = sbr.rel (!%p22_p1) target bundleno = 6 (0x6), region = 159 }
 0x7c1   :  { %6533 = vsyncpa [#allocation4], 1 }
 0x7c2   :  { %6535 = vsyncpa [#allocation4 + $0x1], 1 }
 0x7c3   :  { %6536 = vsyncpa [#allocation10], 1 }
 0x7c4   :  { %6537 = vsyncpa [#allocation13], 1 }
 0x7c5   :  { %6538 = vsyncpa [#allocation16], 1 }
 0x7c6   :  { %6539 = vsyncpa [#allocation5], 1 }
 0x7c7   :  { %6541 = vsyncpa [#allocation5 + $0x1], 1 }
 0x7c8   :  { %6542 = vsyncpa [#allocation7], 1 }

</bundles_post_ra>
